<compile_context>
chip_gen: v7x
topology: tpu7x:2x2x1
jax: 0.10.0
libtpu: 0.0.40
codegen_flags: <defaults>
</compile_context>

<pallas_src>
import functools

import numpy as np
import jax
import jax.numpy as jnp
from jax.experimental import pallas as pl
from jax.experimental.pallas import tpu as pltpu


# ------------------------------------------------------------------ fused block kernel

def _basic_block_kernel(*refs, bt, s, oh, ow, cin, cout, proj):
    """Fused BasicBlock for a batch tile of `bt` images.

    refs (proj=True):  xs, w1, b1, w2, b2, wsc, bsc, out, p1, y1p, p2
    refs (proj=False): xs, w1, b1, w2, b2,           out, p1, y1p, p2

      xs  : (bt, s*s, HPs, WPs, cin) bf16  zero-padded (+polyphase if s>1) block input
      w1  : (9*cin,  cout) bf16  conv1 weights, BN1 scale folded     b1: (1, cout) f32
      w2  : (9*cout, cout) bf16  conv2 weights, BN2 scale folded     b2: (1, cout) f32
      wsc : (cin,    cout) bf16  1x1 shortcut, BN folded             bsc:(1, cout) f32
      out : (bt, oh, ow, cout) bf16
      p1  : VMEM (bt*oh*ow, 9*cin)  bf16   im2col patches for conv1
      y1p : VMEM (bt, oh+2, ow+2, cout) bf16   zero-padded conv1 output (conv2 input)
      p2  : VMEM (bt*oh*ow, 9*cout) bf16   im2col patches for conv2
    """
    if proj:
        (xs_ref, w1_ref, b1_ref, w2_ref, b2_ref, wsc_ref, bsc_ref,
         o_ref, p1_ref, y1p_ref, p2_ref) = refs
    else:
        (xs_ref, w1_ref, b1_ref, w2_ref, b2_ref,
         o_ref, p1_ref, y1p_ref, p2_ref) = refs
        wsc_ref = bsc_ref = None

    # ---------- conv1 im2col: gather the 9 tap windows once into p1 ----------
    for b in range(bt):
        rows = slice(b * oh * ow, (b + 1) * oh * ow)
        for i in range(3):
            for j in range(3):
                t = i * 3 + j
                ph = (i % s) * s + (j % s)          # polyphase index
                r0, c0 = i // s, j // s
                win = xs_ref[b, ph, r0:r0 + oh, c0:c0 + ow, :]        # (oh, ow, cin)
                p1_ref[rows, t * cin:(t + 1) * cin] = win.reshape(oh * ow, cin)

    # conv1 + folded BN1 + ReLU : a single deep-K MXU matmul, f32 accumulation.
    y1 = jnp.dot(p1_ref[...], w1_ref[...], preferred_element_type=jnp.float32)
    y1 = jnp.maximum(y1 + b1_ref[...], 0.0)                            # (M, cout) f32

    # ---------- shortcut, kept in f32 registers (never leaves the core) ----------
    # The center tap (i=j=1) of the 3x3/pad-1/stride-s conv samples exactly the pixels
    # the 1x1/pad-0/stride-s shortcut conv needs, so reuse the im2col buffer.
    xc = p1_ref[:, 4 * cin:5 * cin]                                    # (M, cin) bf16
    if proj:
        res = jnp.dot(xc, wsc_ref[...],
                      preferred_element_type=jnp.float32) + bsc_ref[...]
    else:
        res = xc.astype(jnp.float32)                                   # identity path

    # ---------- conv1 output stays in VMEM: zero-padded scratch for conv2 ----------
    y1p_ref[...] = jnp.zeros_like(y1p_ref)
    y1p_ref[:, 1:oh + 1, 1:ow + 1, :] = (
        y1.astype(jnp.bfloat16).reshape(bt, oh, ow, cout))

    # ---------- conv2 im2col (stride 1, pad 1) ----------
    for b in range(bt):
        rows = slice(b * oh * ow, (b + 1) * oh * ow)
        for i in range(3):
            for j in range(3):
                t = i * 3 + j
                win = y1p_ref[b, i:i + oh, j:j + ow, :]                # (oh, ow, cout)
                p2_ref[rows, t * cout:(t + 1) * cout] = win.reshape(oh * ow, cout)

    # conv2 + folded BN2 + residual add (f32) + final ReLU.
    y2 = jnp.dot(p2_ref[...], w2_ref[...], preferred_element_type=jnp.float32)
    out = jnp.maximum(y2 + b2_ref[...] + res, 0.0)
    o_ref[...] = out.reshape(bt, oh, ow, cout).astype(o_ref.dtype)


# ----------------------------------------------------------------------- block wrapper

def _pick_batch_tile(n, m_per_image, target=256):
    """Largest divisor of n with bt*oh*ow <= target (fills MXU rows, bounds VMEM)."""
    bt = 1
    for d in range(1, n + 1):
        if n % d == 0 and d * m_per_image <= target:
            bt = d
    return bt


def basic_block_apply(x, fp):
    """One fused BasicBlock.  x: (N, H, W, Cin) NHWC bf16.  Returns NHWC bf16."""
    x = x.astype(jnp.bfloat16)
    n, h, wd, cin = x.shape
    s = fp["stride"]
    w1, b1 = fp["conv1"]
    w2, b2 = fp["conv2"]
    cout = w1.shape[-1]
    oh = (h + 2 - 3) // s + 1
    ow = (wd + 2 - 3) // s + 1

    # Single small host op per block: pad=1 (and polyphase split when s>1) so every
    # in-kernel tap window is a plain contiguous slice.
    hp, wp = h + 2, wd + 2
    hps, wps = -(-hp // s), -(-wp // s)
    xp = jnp.pad(x, ((0, 0), (1, hps * s - h - 1), (1, wps * s - wd - 1), (0, 0)))
    if s == 1:
        xs = xp[:, None]                                   # (n, 1, hp, wp, cin)
    else:
        # xs[n, ph*s+pw, a, b, c] == xp[n, a*s+ph, b*s+pw, c]
        xs = (xp.reshape(n, hps, s, wps, s, cin)
                .transpose(0, 2, 4, 1, 3, 5)
                .reshape(n, s * s, hps, wps, cin))

    proj = fp["shortcut"] is not None
    bt = _pick_batch_tile(n, oh * ow)

    kernel = functools.partial(_basic_block_kernel, bt=bt, s=s, oh=oh, ow=ow,
                               cin=cin, cout=cout, proj=proj)

    in_specs = [
        pl.BlockSpec((bt, s * s, hps, wps, cin), lambda b: (b, 0, 0, 0, 0)),
        pl.BlockSpec(w1.shape, lambda b: (0, 0)),
        pl.BlockSpec(b1.shape, lambda b: (0, 0)),
        pl.BlockSpec(w2.shape, lambda b: (0, 0)),
        pl.BlockSpec(b2.shape, lambda b: (0, 0)),
    ]
    args = [xs, w1, b1, w2, b2]
    if proj:
        wsc, bsc = fp["shortcut"]
        in_specs += [pl.BlockSpec(wsc.shape, lambda b: (0, 0)),
                     pl.BlockSpec(bsc.shape, lambda b: (0, 0))]
        args += [wsc, bsc]

    out = pl.pallas_call(
        kernel,
        out_shape=jax.ShapeDtypeStruct((n, oh, ow, cout), jnp.bfloat16),
        grid=(n // bt,),
        in_specs=in_specs,
        out_specs=pl.BlockSpec((bt, oh, ow, cout), lambda b: (b, 0, 0, 0)),
        scratch_shapes=[
            pltpu.VMEM((bt * oh * ow, 9 * cin), jnp.bfloat16),      # conv1 patches
            pltpu.VMEM((bt, oh + 2, ow + 2, cout), jnp.bfloat16),   # padded conv1 out
            pltpu.VMEM((bt * oh * ow, 9 * cout), jnp.bfloat16),     # conv2 patches
        ],
        compiler_params=pltpu.CompilerParams(
            dimension_semantics=("parallel",),
        ),
    )(*args)
    return out


def basic_block_forward(x_nchw, fp):
    """Single BasicBlock with the PyTorch interface: NCHW f32 in -> NCHW f32 out."""
    x = jnp.transpose(x_nchw, (0, 2, 3, 1)).astype(jnp.bfloat16)
    y = basic_block_apply(x, fp)
    return jnp.transpose(y, (0, 3, 1, 2)).astype(jnp.float32)


# ------------------------------------------------------------------ parameters & folding

def init_conv_bn(key, kh, kw, cin, cout):
    """Raw Conv2d(bias=True) + BatchNorm2d(eval) parameters, deterministic."""
    ks = jax.random.split(key, 6)
    return {
        "w": jax.random.normal(ks[0], (kh, kw, cin, cout), jnp.float32)
             / float(np.sqrt(kh * kw * cin)),
        "b": 0.05 * jax.random.normal(ks[1], (cout,), jnp.float32),
        "gamma": 1.0 + 0.1 * jax.random.normal(ks[2], (cout,), jnp.float32),
        "beta": 0.1 * jax.random.normal(ks[3], (cout,), jnp.float32),
        "mean": 0.1 * jax.random.normal(ks[4], (cout,), jnp.float32),
        "var": jnp.abs(1.0 + 0.1 * jax.random.normal(ks[5], (cout,), jnp.float32)),
    }


def fold_bn(p, eps=1e-5):
    """Fold eval-mode BN into the conv.  Weights are reshaped to (KH*KW*Cin, Cout)
    bf16 matching the kernel's im2col column order; bias stays f32."""
    scale = p["gamma"] / jnp.sqrt(p["var"] + eps)
    kh, kw, cin, cout = p["w"].shape
    w = (p["w"] * scale).astype(jnp.bfloat16).reshape(kh * kw * cin, cout)
    bias = (p["beta"] + (p["b"] - p["mean"]) * scale).astype(jnp.float32).reshape(1, -1)
    return w, bias


def init_basic_block(key, cin, cout, s):
    k1, k2, k3 = jax.random.split(key, 3)
    return {
        "stride": s,
        "conv1": init_conv_bn(k1, 3, 3, cin, cout),
        "conv2": init_conv_bn(k2, 3, 3, cout, cout),
        "shortcut": init_conv_bn(k3, 1, 1, cin, cout) if (s != 1 or cin != cout) else None,
    }


def fold_block(raw):
    return {
        "stride": raw["stride"],
        "conv1": fold_bn(raw["conv1"]),
        "conv2": fold_bn(raw["conv2"]),
        "shortcut": None if raw["shortcut"] is None else fold_bn(raw["shortcut"]),
    }


# ------------------------------------------------------------------- pure-JAX reference

def _ref_conv_bn(x, p, stride, pad, eps=1e-5):
    y = jax.lax.conv_general_dilated(
        x, p["w"], window_strides=(stride, stride),
        padding=[(pad, pad), (pad, pad)],
        dimension_numbers=("NHWC", "HWIO", "NHWC"))
    y = y + p["b"]
    return (y - p["mean"]) / jnp.sqrt(p["var"] + eps) * p["gamma"] + p["beta"]


def ref_basic_block(x_nchw, raw):
    x = jnp.transpose(x_nchw, (0, 2, 3, 1))
    s = raw["stride"]
    out = jax.nn.relu(_ref_conv_bn(x, raw["conv1"], s, 1))
    out = _ref_conv_bn(out, raw["conv2"], 1, 1)
    sc = x if raw["shortcut"] is None else _ref_conv_bn(x, raw["shortcut"], s, 0)
    return jnp.transpose(jax.nn.relu(out + sc), (0, 3, 1, 2))


# --------------------------------------------------------------------------------- main

if __name__ == "__main__":
    key = jax.random.PRNGKey(0)
    k_a, k_b, k_x = jax.random.split(key, 3)

    # Block A: projection shortcut (32 -> 64 channels, stride 2).
    # Block B: identity shortcut   (64 -> 64 channels, stride 1).
    raw_a = init_basic_block(k_a, 32, 64, 2)
    raw_b = init_basic_block(k_b, 64, 64, 1)
    params_a = fold_block(raw_a)
    params_b = fold_block(raw_b)

    x = jax.random.normal(k_x, (2, 32, 16, 16), jnp.float32)           # NCHW like PyTorch

    # Chained blocks stay in bf16 NHWC; transposes only at the network boundary.
    def two_blocks(x_nchw):
        h = jnp.transpose(x_nchw, (0, 2, 3, 1)).astype(jnp.bfloat16)
        h = basic_block_apply(h, params_a)
        h = basic_block_apply(h, params_b)
        return jnp.transpose(h, (0, 3, 1, 2)).astype(jnp.float32)

    fwd = jax.jit(two_blocks)
    out = jax.block_until_ready(fwd(x))
    assert out.shape == (2, 64, 8, 8) and out.dtype == jnp.float32

    # Also exercise the single-block PyTorch-style interface.
    single = jax.block_until_ready(jax.jit(
        lambda inp: basic_block_forward(inp, params_a))(x))
    assert single.shape == (2, 64, 8, 8)

    # Sanity check against a pure-JAX f32 reference (loose: bf16 MXU operands/activations).
    ref = ref_basic_block(ref_basic_block(x, raw_a), raw_b)
    err = float(jnp.max(jnp.abs(out - ref)))
    scale = float(jnp.max(jnp.abs(ref)))
    assert err <= 0.08 * scale + 0.08, f"numerical mismatch: err={err}, ref_scale={scale}"

    print("KERNEL_OK")
</pallas_src>

<mosaic_0001>
module attributes {stable_mosaic.version = 11 : i64} {
  func.func @_basic_block_kernel(%arg0: i32, %arg1: memref<2x4x9x9x32xbf16, #tpu.memory_space<vmem>>, %arg2: memref<288x64xbf16, #tpu.memory_space<vmem>>, %arg3: memref<1x64xf32, #tpu.memory_space<vmem>>, %arg4: memref<576x64xbf16, #tpu.memory_space<vmem>>, %arg5: memref<1x64xf32, #tpu.memory_space<vmem>>, %arg6: memref<32x64xbf16, #tpu.memory_space<vmem>>, %arg7: memref<1x64xf32, #tpu.memory_space<vmem>>, %arg8: memref<2x8x8x64xbf16, #tpu.memory_space<vmem>>, %arg9: memref<128x288xbf16, #tpu.memory_space<vmem>>, %arg10: memref<2x10x10x64xbf16, #tpu.memory_space<vmem>>, %arg11: memref<128x576xbf16, #tpu.memory_space<vmem>>) attributes {dimension_semantics = [#tpu.dimension_semantics<parallel>], iteration_bounds = array<i64: 1>, scalar_prefetch = 0 : i64, scratch_operands = 3 : i64, tpu.core_type = #tpu.core_type<tc>, window_params = [{transform_indices = @transform_0, window_bounds = array<i64: 2, 4, 9, 9, 32>}, {pipeline_mode = #tpu.pipeline_mode<synchronous>, transform_indices = @transform_1, window_bounds = array<i64: 288, 64>}, {pipeline_mode = #tpu.pipeline_mode<synchronous>, transform_indices = @transform_2, window_bounds = array<i64: 1, 64>}, {pipeline_mode = #tpu.pipeline_mode<synchronous>, transform_indices = @transform_3, window_bounds = array<i64: 576, 64>}, {pipeline_mode = #tpu.pipeline_mode<synchronous>, transform_indices = @transform_4, window_bounds = array<i64: 1, 64>}, {pipeline_mode = #tpu.pipeline_mode<synchronous>, transform_indices = @transform_5, window_bounds = array<i64: 32, 64>}, {pipeline_mode = #tpu.pipeline_mode<synchronous>, transform_indices = @transform_6, window_bounds = array<i64: 1, 64>}, {transform_indices = @transform_7, window_bounds = array<i64: 2, 8, 8, 64>}]} {
    %c0 = arith.constant 0 : index
    %c0_0 = arith.constant 0 : index
    %c0_1 = arith.constant 0 : index
    %c0_2 = arith.constant 0 : index
    %c0_3 = arith.constant 0 : index
    %0 = vector.load %arg1[%c0, %c0_0, %c0_1, %c0_2, %c0_3] : memref<2x4x9x9x32xbf16, #tpu.memory_space<vmem>>, vector<1x1x8x8x32xbf16>
    %1 = vector.shape_cast %0 : vector<1x1x8x8x32xbf16> to vector<8x8x32xbf16>
    %2 = vector.shape_cast %1 : vector<8x8x32xbf16> to vector<64x32xbf16>
    %c0_4 = arith.constant 0 : index
    %c0_5 = arith.constant 0 : index
    %3 = vector.load %arg9[%c0_4, %c0_5] : memref<128x288xbf16, #tpu.memory_space<vmem>>, vector<64x32xbf16>
    tpu.vector_store %arg9[%c0_4, %c0_5], %2 {strides = array<i32>} : memref<128x288xbf16, #tpu.memory_space<vmem>>, vector<64x32xbf16>,
    %c0_6 = arith.constant 0 : index
    %c1 = arith.constant 1 : index
    %c0_7 = arith.constant 0 : index
    %c0_8 = arith.constant 0 : index
    %c0_9 = arith.constant 0 : index
    %4 = vector.load %arg1[%c0_6, %c1, %c0_7, %c0_8, %c0_9] : memref<2x4x9x9x32xbf16, #tpu.memory_space<vmem>>, vector<1x1x8x8x32xbf16>
    %5 = vector.shape_cast %4 : vector<1x1x8x8x32xbf16> to vector<8x8x32xbf16>
    %6 = vector.shape_cast %5 : vector<8x8x32xbf16> to vector<64x32xbf16>
    %c0_10 = arith.constant 0 : index
    %c32 = arith.constant 32 : index
    %7 = vector.load %arg9[%c0_10, %c32] : memref<128x288xbf16, #tpu.memory_space<vmem>>, vector<64x32xbf16>
    tpu.vector_store %arg9[%c0_10, %c32], %6 {strides = array<i32>} : memref<128x288xbf16, #tpu.memory_space<vmem>>, vector<64x32xbf16>,
    %c0_11 = arith.constant 0 : index
    %c0_12 = arith.constant 0 : index
    %c0_13 = arith.constant 0 : index
    %c1_14 = arith.constant 1 : index
    %c0_15 = arith.constant 0 : index
    %8 = vector.load %arg1[%c0_11, %c0_12, %c0_13, %c1_14, %c0_15] : memref<2x4x9x9x32xbf16, #tpu.memory_space<vmem>>, vector<1x1x8x8x32xbf16>
    %9 = vector.shape_cast %8 : vector<1x1x8x8x32xbf16> to vector<8x8x32xbf16>
    %10 = vector.shape_cast %9 : vector<8x8x32xbf16> to vector<64x32xbf16>
    %c0_16 = arith.constant 0 : index
    %c64 = arith.constant 64 : index
    %11 = vector.load %arg9[%c0_16, %c64] : memref<128x288xbf16, #tpu.memory_space<vmem>>, vector<64x32xbf16>
    tpu.vector_store %arg9[%c0_16, %c64], %10 {strides = array<i32>} : memref<128x288xbf16, #tpu.memory_space<vmem>>, vector<64x32xbf16>,
    %c0_17 = arith.constant 0 : index
    %c2 = arith.constant 2 : index
    %c0_18 = arith.constant 0 : index
    %c0_19 = arith.constant 0 : index
    %c0_20 = arith.constant 0 : index
    %12 = vector.load %arg1[%c0_17, %c2, %c0_18, %c0_19, %c0_20] : memref<2x4x9x9x32xbf16, #tpu.memory_space<vmem>>, vector<1x1x8x8x32xbf16>
    %13 = vector.shape_cast %12 : vector<1x1x8x8x32xbf16> to vector<8x8x32xbf16>
    %14 = vector.shape_cast %13 : vector<8x8x32xbf16> to vector<64x32xbf16>
    %c0_21 = arith.constant 0 : index
    %c96 = arith.constant 96 : index
    %15 = vector.load %arg9[%c0_21, %c96] : memref<128x288xbf16, #tpu.memory_space<vmem>>, vector<64x32xbf16>
    tpu.vector_store %arg9[%c0_21, %c96], %14 {strides = array<i32>} : memref<128x288xbf16, #tpu.memory_space<vmem>>, vector<64x32xbf16>,
    %c0_22 = arith.constant 0 : index
    %c3 = arith.constant 3 : index
    %c0_23 = arith.constant 0 : index
    %c0_24 = arith.constant 0 : index
    %c0_25 = arith.constant 0 : index
    %16 = vector.load %arg1[%c0_22, %c3, %c0_23, %c0_24, %c0_25] : memref<2x4x9x9x32xbf16, #tpu.memory_space<vmem>>, vector<1x1x8x8x32xbf16>
    %17 = vector.shape_cast %16 : vector<1x1x8x8x32xbf16> to vector<8x8x32xbf16>
    %18 = vector.shape_cast %17 : vector<8x8x32xbf16> to vector<64x32xbf16>
    %c0_26 = arith.constant 0 : index
    %c128 = arith.constant 128 : index
    %19 = vector.load %arg9[%c0_26, %c128] : memref<128x288xbf16, #tpu.memory_space<vmem>>, vector<64x32xbf16>
    tpu.vector_store %arg9[%c0_26, %c128], %18 {strides = array<i32>} : memref<128x288xbf16, #tpu.memory_space<vmem>>, vector<64x32xbf16>,
    %c0_27 = arith.constant 0 : index
    %c2_28 = arith.constant 2 : index
    %c0_29 = arith.constant 0 : index
    %c1_30 = arith.constant 1 : index
    %c0_31 = arith.constant 0 : index
    %20 = vector.load %arg1[%c0_27, %c2_28, %c0_29, %c1_30, %c0_31] : memref<2x4x9x9x32xbf16, #tpu.memory_space<vmem>>, vector<1x1x8x8x32xbf16>
    %21 = vector.shape_cast %20 : vector<1x1x8x8x32xbf16> to vector<8x8x32xbf16>
    %22 = vector.shape_cast %21 : vector<8x8x32xbf16> to vector<64x32xbf16>
    %c0_32 = arith.constant 0 : index
    %c160 = arith.constant 160 : index
    %23 = vector.load %arg9[%c0_32, %c160] : memref<128x288xbf16, #tpu.memory_space<vmem>>, vector<64x32xbf16>
    tpu.vector_store %arg9[%c0_32, %c160], %22 {strides = array<i32>} : memref<128x288xbf16, #tpu.memory_space<vmem>>, vector<64x32xbf16>,
    %c0_33 = arith.constant 0 : index
    %c0_34 = arith.constant 0 : index
    %c1_35 = arith.constant 1 : index
    %c0_36 = arith.constant 0 : index
    %c0_37 = arith.constant 0 : index
    %24 = vector.load %arg1[%c0_33, %c0_34, %c1_35, %c0_36, %c0_37] : memref<2x4x9x9x32xbf16, #tpu.memory_space<vmem>>, vector<1x1x8x8x32xbf16>
    %25 = vector.shape_cast %24 : vector<1x1x8x8x32xbf16> to vector<8x8x32xbf16>
    %26 = vector.shape_cast %25 : vector<8x8x32xbf16> to vector<64x32xbf16>
    %c0_38 = arith.constant 0 : index
    %c192 = arith.constant 192 : index
    %27 = vector.load %arg9[%c0_38, %c192] : memref<128x288xbf16, #tpu.memory_space<vmem>>, vector<64x32xbf16>
    tpu.vector_store %arg9[%c0_38, %c192], %26 {strides = array<i32>} : memref<128x288xbf16, #tpu.memory_space<vmem>>, vector<64x32xbf16>,
    %c0_39 = arith.constant 0 : index
    %c1_40 = arith.constant 1 : index
    %c1_41 = arith.constant 1 : index
    %c0_42 = arith.constant 0 : index
    %c0_43 = arith.constant 0 : index
    %28 = vector.load %arg1[%c0_39, %c1_40, %c1_41, %c0_42, %c0_43] : memref<2x4x9x9x32xbf16, #tpu.memory_space<vmem>>, vector<1x1x8x8x32xbf16>
    %29 = vector.shape_cast %28 : vector<1x1x8x8x32xbf16> to vector<8x8x32xbf16>
    %30 = vector.shape_cast %29 : vector<8x8x32xbf16> to vector<64x32xbf16>
    %c0_44 = arith.constant 0 : index
    %c224 = arith.constant 224 : index
    %31 = vector.load %arg9[%c0_44, %c224] : memref<128x288xbf16, #tpu.memory_space<vmem>>, vector<64x32xbf16>
    tpu.vector_store %arg9[%c0_44, %c224], %30 {strides = array<i32>} : memref<128x288xbf16, #tpu.memory_space<vmem>>, vector<64x32xbf16>,
    %c0_45 = arith.constant 0 : index
    %c0_46 = arith.constant 0 : index
    %c1_47 = arith.constant 1 : index
    %c1_48 = arith.constant 1 : index
    %c0_49 = arith.constant 0 : index
    %32 = vector.load %arg1[%c0_45, %c0_46, %c1_47, %c1_48, %c0_49] : memref<2x4x9x9x32xbf16, #tpu.memory_space<vmem>>, vector<1x1x8x8x32xbf16>
    %33 = vector.shape_cast %32 : vector<1x1x8x8x32xbf16> to vector<8x8x32xbf16>
    %34 = vector.shape_cast %33 : vector<8x8x32xbf16> to vector<64x32xbf16>
    %c0_50 = arith.constant 0 : index
    %c256 = arith.constant 256 : index
    %35 = vector.load %arg9[%c0_50, %c256] : memref<128x288xbf16, #tpu.memory_space<vmem>>, vector<64x32xbf16>
    tpu.vector_store %arg9[%c0_50, %c256], %34 {strides = array<i32>} : memref<128x288xbf16, #tpu.memory_space<vmem>>, vector<64x32xbf16>,
    %c1_51 = arith.constant 1 : index
    %c0_52 = arith.constant 0 : index
    %c0_53 = arith.constant 0 : index
    %c0_54 = arith.constant 0 : index
    %c0_55 = arith.constant 0 : index
    %36 = vector.load %arg1[%c1_51, %c0_52, %c0_53, %c0_54, %c0_55] : memref<2x4x9x9x32xbf16, #tpu.memory_space<vmem>>, vector<1x1x8x8x32xbf16>
    %37 = vector.shape_cast %36 : vector<1x1x8x8x32xbf16> to vector<8x8x32xbf16>
    %38 = vector.shape_cast %37 : vector<8x8x32xbf16> to vector<64x32xbf16>
    %c64_56 = arith.constant 64 : index
    %c0_57 = arith.constant 0 : index
    %39 = vector.load %arg9[%c64_56, %c0_57] : memref<128x288xbf16, #tpu.memory_space<vmem>>, vector<64x32xbf16>
    tpu.vector_store %arg9[%c64_56, %c0_57], %38 {strides = array<i32>} : memref<128x288xbf16, #tpu.memory_space<vmem>>, vector<64x32xbf16>,
    %c1_58 = arith.constant 1 : index
    %c1_59 = arith.constant 1 : index
    %c0_60 = arith.constant 0 : index
    %c0_61 = arith.constant 0 : index
    %c0_62 = arith.constant 0 : index
    %40 = vector.load %arg1[%c1_58, %c1_59, %c0_60, %c0_61, %c0_62] : memref<2x4x9x9x32xbf16, #tpu.memory_space<vmem>>, vector<1x1x8x8x32xbf16>
    %41 = vector.shape_cast %40 : vector<1x1x8x8x32xbf16> to vector<8x8x32xbf16>
    %42 = vector.shape_cast %41 : vector<8x8x32xbf16> to vector<64x32xbf16>
    %c64_63 = arith.constant 64 : index
    %c32_64 = arith.constant 32 : index
    %43 = vector.load %arg9[%c64_63, %c32_64] : memref<128x288xbf16, #tpu.memory_space<vmem>>, vector<64x32xbf16>
    tpu.vector_store %arg9[%c64_63, %c32_64], %42 {strides = array<i32>} : memref<128x288xbf16, #tpu.memory_space<vmem>>, vector<64x32xbf16>,
    %c1_65 = arith.constant 1 : index
    %c0_66 = arith.constant 0 : index
    %c0_67 = arith.constant 0 : index
    %c1_68 = arith.constant 1 : index
    %c0_69 = arith.constant 0 : index
    %44 = vector.load %arg1[%c1_65, %c0_66, %c0_67, %c1_68, %c0_69] : memref<2x4x9x9x32xbf16, #tpu.memory_space<vmem>>, vector<1x1x8x8x32xbf16>
    %45 = vector.shape_cast %44 : vector<1x1x8x8x32xbf16> to vector<8x8x32xbf16>
    %46 = vector.shape_cast %45 : vector<8x8x32xbf16> to vector<64x32xbf16>
    %c64_70 = arith.constant 64 : index
    %c64_71 = arith.constant 64 : index
    %47 = vector.load %arg9[%c64_70, %c64_71] : memref<128x288xbf16, #tpu.memory_space<vmem>>, vector<64x32xbf16>
    tpu.vector_store %arg9[%c64_70, %c64_71], %46 {strides = array<i32>} : memref<128x288xbf16, #tpu.memory_space<vmem>>, vector<64x32xbf16>,
    %c1_72 = arith.constant 1 : index
    %c2_73 = arith.constant 2 : index
    %c0_74 = arith.constant 0 : index
    %c0_75 = arith.constant 0 : index
    %c0_76 = arith.constant 0 : index
    %48 = vector.load %arg1[%c1_72, %c2_73, %c0_74, %c0_75, %c0_76] : memref<2x4x9x9x32xbf16, #tpu.memory_space<vmem>>, vector<1x1x8x8x32xbf16>
    %49 = vector.shape_cast %48 : vector<1x1x8x8x32xbf16> to vector<8x8x32xbf16>
    %50 = vector.shape_cast %49 : vector<8x8x32xbf16> to vector<64x32xbf16>
    %c64_77 = arith.constant 64 : index
    %c96_78 = arith.constant 96 : index
    %51 = vector.load %arg9[%c64_77, %c96_78] : memref<128x288xbf16, #tpu.memory_space<vmem>>, vector<64x32xbf16>
    tpu.vector_store %arg9[%c64_77, %c96_78], %50 {strides = array<i32>} : memref<128x288xbf16, #tpu.memory_space<vmem>>, vector<64x32xbf16>,
    %c1_79 = arith.constant 1 : index
    %c3_80 = arith.constant 3 : index
    %c0_81 = arith.constant 0 : index
    %c0_82 = arith.constant 0 : index
    %c0_83 = arith.constant 0 : index
    %52 = vector.load %arg1[%c1_79, %c3_80, %c0_81, %c0_82, %c0_83] : memref<2x4x9x9x32xbf16, #tpu.memory_space<vmem>>, vector<1x1x8x8x32xbf16>
    %53 = vector.shape_cast %52 : vector<1x1x8x8x32xbf16> to vector<8x8x32xbf16>
    %54 = vector.shape_cast %53 : vector<8x8x32xbf16> to vector<64x32xbf16>
    %c64_84 = arith.constant 64 : index
    %c128_85 = arith.constant 128 : index
    %55 = vector.load %arg9[%c64_84, %c128_85] : memref<128x288xbf16, #tpu.memory_space<vmem>>, vector<64x32xbf16>
    tpu.vector_store %arg9[%c64_84, %c128_85], %54 {strides = array<i32>} : memref<128x288xbf16, #tpu.memory_space<vmem>>, vector<64x32xbf16>,
    %c1_86 = arith.constant 1 : index
    %c2_87 = arith.constant 2 : index
    %c0_88 = arith.constant 0 : index
    %c1_89 = arith.constant 1 : index
    %c0_90 = arith.constant 0 : index
    %56 = vector.load %arg1[%c1_86, %c2_87, %c0_88, %c1_89, %c0_90] : memref<2x4x9x9x32xbf16, #tpu.memory_space<vmem>>, vector<1x1x8x8x32xbf16>
    %57 = vector.shape_cast %56 : vector<1x1x8x8x32xbf16> to vector<8x8x32xbf16>
    %58 = vector.shape_cast %57 : vector<8x8x32xbf16> to vector<64x32xbf16>
    %c64_91 = arith.constant 64 : index
    %c160_92 = arith.constant 160 : index
    %59 = vector.load %arg9[%c64_91, %c160_92] : memref<128x288xbf16, #tpu.memory_space<vmem>>, vector<64x32xbf16>
    tpu.vector_store %arg9[%c64_91, %c160_92], %58 {strides = array<i32>} : memref<128x288xbf16, #tpu.memory_space<vmem>>, vector<64x32xbf16>,
    %c1_93 = arith.constant 1 : index
    %c0_94 = arith.constant 0 : index
    %c1_95 = arith.constant 1 : index
    %c0_96 = arith.constant 0 : index
    %c0_97 = arith.constant 0 : index
    %60 = vector.load %arg1[%c1_93, %c0_94, %c1_95, %c0_96, %c0_97] : memref<2x4x9x9x32xbf16, #tpu.memory_space<vmem>>, vector<1x1x8x8x32xbf16>
    %61 = vector.shape_cast %60 : vector<1x1x8x8x32xbf16> to vector<8x8x32xbf16>
    %62 = vector.shape_cast %61 : vector<8x8x32xbf16> to vector<64x32xbf16>
    %c64_98 = arith.constant 64 : index
    %c192_99 = arith.constant 192 : index
    %63 = vector.load %arg9[%c64_98, %c192_99] : memref<128x288xbf16, #tpu.memory_space<vmem>>, vector<64x32xbf16>
    tpu.vector_store %arg9[%c64_98, %c192_99], %62 {strides = array<i32>} : memref<128x288xbf16, #tpu.memory_space<vmem>>, vector<64x32xbf16>,
    %c1_100 = arith.constant 1 : index
    %c1_101 = arith.constant 1 : index
    %c1_102 = arith.constant 1 : index
    %c0_103 = arith.constant 0 : index
    %c0_104 = arith.constant 0 : index
    %64 = vector.load %arg1[%c1_100, %c1_101, %c1_102, %c0_103, %c0_104] : memref<2x4x9x9x32xbf16, #tpu.memory_space<vmem>>, vector<1x1x8x8x32xbf16>
    %65 = vector.shape_cast %64 : vector<1x1x8x8x32xbf16> to vector<8x8x32xbf16>
    %66 = vector.shape_cast %65 : vector<8x8x32xbf16> to vector<64x32xbf16>
    %c64_105 = arith.constant 64 : index
    %c224_106 = arith.constant 224 : index
    %67 = vector.load %arg9[%c64_105, %c224_106] : memref<128x288xbf16, #tpu.memory_space<vmem>>, vector<64x32xbf16>
    tpu.vector_store %arg9[%c64_105, %c224_106], %66 {strides = array<i32>} : memref<128x288xbf16, #tpu.memory_space<vmem>>, vector<64x32xbf16>,
    %c1_107 = arith.constant 1 : index
    %c0_108 = arith.constant 0 : index
    %c1_109 = arith.constant 1 : index
    %c1_110 = arith.constant 1 : index
    %c0_111 = arith.constant 0 : index
    %68 = vector.load %arg1[%c1_107, %c0_108, %c1_109, %c1_110, %c0_111] : memref<2x4x9x9x32xbf16, #tpu.memory_space<vmem>>, vector<1x1x8x8x32xbf16>
    %69 = vector.shape_cast %68 : vector<1x1x8x8x32xbf16> to vector<8x8x32xbf16>
    %70 = vector.shape_cast %69 : vector<8x8x32xbf16> to vector<64x32xbf16>
    %c64_112 = arith.constant 64 : index
    %c256_113 = arith.constant 256 : index
    %71 = vector.load %arg9[%c64_112, %c256_113] : memref<128x288xbf16, #tpu.memory_space<vmem>>, vector<64x32xbf16>
    tpu.vector_store %arg9[%c64_112, %c256_113], %70 {strides = array<i32>} : memref<128x288xbf16, #tpu.memory_space<vmem>>, vector<64x32xbf16>,
    %c0_114 = arith.constant 0 : index
    %c0_115 = arith.constant 0 : index
    %72 = vector.load %arg9[%c0_114, %c0_115] : memref<128x288xbf16, #tpu.memory_space<vmem>>, vector<128x288xbf16>
    %c0_116 = arith.constant 0 : index
    %c0_117 = arith.constant 0 : index
    %73 = vector.load %arg2[%c0_116, %c0_117] : memref<288x64xbf16, #tpu.memory_space<vmem>>, vector<288x64xbf16>
    %cst = arith.constant dense<0.000000e+00> : vector<128x64xf32>
    %74 = tpu.matmul %72, %73, %cst {dimension_numbers = #tpu.dot_dimension_numbers<[1], [0], [0], [1], [0, 0, 1, 1], [], []>} : vector<128x288xbf16>, vector<288x64xbf16>, vector<128x64xf32> -> vector<128x64xf32>
    %c0_118 = arith.constant 0 : index
    %c0_119 = arith.constant 0 : index
    %75 = vector.load %arg3[%c0_118, %c0_119] : memref<1x64xf32, #tpu.memory_space<vmem>>, vector<1x64xf32>
    %76 = vector.broadcast %75 : vector<1x64xf32> to vector<128x64xf32>
    %77 = arith.addf %74, %76 : vector<128x64xf32>
    %cst_120 = arith.constant 0.000000e+00 : f32
    %78 = vector.broadcast %cst_120 : f32 to vector<128x64xf32>
    %79 = arith.maximumf %77, %78 : vector<128x64xf32>
    %c0_121 = arith.constant 0 : index
    %c128_122 = arith.constant 128 : index
    %80 = vector.load %arg9[%c0_121, %c128_122] : memref<128x288xbf16, #tpu.memory_space<vmem>>, vector<128x32xbf16>
    %c0_123 = arith.constant 0 : index
    %c0_124 = arith.constant 0 : index
    %81 = vector.load %arg6[%c0_123, %c0_124] : memref<32x64xbf16, #tpu.memory_space<vmem>>, vector<32x64xbf16>
    %cst_125 = arith.constant dense<0.000000e+00> : vector<128x64xf32>
    %82 = tpu.matmul %80, %81, %cst_125 {dimension_numbers = #tpu.dot_dimension_numbers<[1], [0], [0], [1], [0, 0, 1, 1], [], []>} : vector<128x32xbf16>, vector<32x64xbf16>, vector<128x64xf32> -> vector<128x64xf32>
    %c0_126 = arith.constant 0 : index
    %c0_127 = arith.constant 0 : index
    %83 = vector.load %arg7[%c0_126, %c0_127] : memref<1x64xf32, #tpu.memory_space<vmem>>, vector<1x64xf32>
    %84 = vector.broadcast %83 : vector<1x64xf32> to vector<128x64xf32>
    %85 = arith.addf %82, %84 : vector<128x64xf32>
    %cst_128 = arith.constant 0.000000e+00 : bf16
    %86 = vector.broadcast %cst_128 : bf16 to vector<2x10x10x64xbf16>
    %c0_129 = arith.constant 0 : index
    %c0_130 = arith.constant 0 : index
    %c0_131 = arith.constant 0 : index
    %c0_132 = arith.constant 0 : index
    %87 = vector.load %arg10[%c0_129, %c0_130, %c0_131, %c0_132] : memref<2x10x10x64xbf16, #tpu.memory_space<vmem>>, vector<2x10x10x64xbf16>
    tpu.vector_store %arg10[%c0_129, %c0_130, %c0_131, %c0_132], %86 {strides = array<i32>} : memref<2x10x10x64xbf16, #tpu.memory_space<vmem>>, vector<2x10x10x64xbf16>,
    %88 = arith.truncf %79 : vector<128x64xf32> to vector<128x64xbf16>
    %89 = vector.shape_cast %88 : vector<128x64xbf16> to vector<2x8x8x64xbf16>
    %c0_133 = arith.constant 0 : index
    %c1_134 = arith.constant 1 : index
    %c1_135 = arith.constant 1 : index
    %c0_136 = arith.constant 0 : index
    %90 = vector.load %arg10[%c0_133, %c1_134, %c1_135, %c0_136] : memref<2x10x10x64xbf16, #tpu.memory_space<vmem>>, vector<2x8x8x64xbf16>
    tpu.vector_store %arg10[%c0_133, %c1_134, %c1_135, %c0_136], %89 {strides = array<i32>} : memref<2x10x10x64xbf16, #tpu.memory_space<vmem>>, vector<2x8x8x64xbf16>,
    %c0_137 = arith.constant 0 : index
    %c0_138 = arith.constant 0 : index
    %c0_139 = arith.constant 0 : index
    %c0_140 = arith.constant 0 : index
    %91 = vector.load %arg10[%c0_137, %c0_138, %c0_139, %c0_140] : memref<2x10x10x64xbf16, #tpu.memory_space<vmem>>, vector<1x8x8x64xbf16>
    %92 = vector.shape_cast %91 : vector<1x8x8x64xbf16> to vector<8x8x64xbf16>
    %93 = vector.shape_cast %92 : vector<8x8x64xbf16> to vector<64x64xbf16>
    %c0_141 = arith.constant 0 : index
    %c0_142 = arith.constant 0 : index
    %94 = vector.load %arg11[%c0_141, %c0_142] : memref<128x576xbf16, #tpu.memory_space<vmem>>, vector<64x64xbf16>
    tpu.vector_store %arg11[%c0_141, %c0_142], %93 {strides = array<i32>} : memref<128x576xbf16, #tpu.memory_space<vmem>>, vector<64x64xbf16>,
    %c0_143 = arith.constant 0 : index
    %c0_144 = arith.constant 0 : index
    %c1_145 = arith.constant 1 : index
    %c0_146 = arith.constant 0 : index
    %95 = vector.load %arg10[%c0_143, %c0_144, %c1_145, %c0_146] : memref<2x10x10x64xbf16, #tpu.memory_space<vmem>>, vector<1x8x8x64xbf16>
    %96 = vector.shape_cast %95 : vector<1x8x8x64xbf16> to vector<8x8x64xbf16>
    %97 = vector.shape_cast %96 : vector<8x8x64xbf16> to vector<64x64xbf16>
    %c0_147 = arith.constant 0 : index
    %c64_148 = arith.constant 64 : index
    %98 = vector.load %arg11[%c0_147, %c64_148] : memref<128x576xbf16, #tpu.memory_space<vmem>>, vector<64x64xbf16>
    tpu.vector_store %arg11[%c0_147, %c64_148], %97 {strides = array<i32>} : memref<128x576xbf16, #tpu.memory_space<vmem>>, vector<64x64xbf16>,
    %c0_149 = arith.constant 0 : index
    %c0_150 = arith.constant 0 : index
    %c2_151 = arith.constant 2 : index
    %c0_152 = arith.constant 0 : index
    %99 = vector.load %arg10[%c0_149, %c0_150, %c2_151, %c0_152] : memref<2x10x10x64xbf16, #tpu.memory_space<vmem>>, vector<1x8x8x64xbf16>
    %100 = vector.shape_cast %99 : vector<1x8x8x64xbf16> to vector<8x8x64xbf16>
    %101 = vector.shape_cast %100 : vector<8x8x64xbf16> to vector<64x64xbf16>
    %c0_153 = arith.constant 0 : index
    %c128_154 = arith.constant 128 : index
    %102 = vector.load %arg11[%c0_153, %c128_154] : memref<128x576xbf16, #tpu.memory_space<vmem>>, vector<64x64xbf16>
    tpu.vector_store %arg11[%c0_153, %c128_154], %101 {strides = array<i32>} : memref<128x576xbf16, #tpu.memory_space<vmem>>, vector<64x64xbf16>,
    %c0_155 = arith.constant 0 : index
    %c1_156 = arith.constant 1 : index
    %c0_157 = arith.constant 0 : index
    %c0_158 = arith.constant 0 : index
    %103 = vector.load %arg10[%c0_155, %c1_156, %c0_157, %c0_158] : memref<2x10x10x64xbf16, #tpu.memory_space<vmem>>, vector<1x8x8x64xbf16>
    %104 = vector.shape_cast %103 : vector<1x8x8x64xbf16> to vector<8x8x64xbf16>
    %105 = vector.shape_cast %104 : vector<8x8x64xbf16> to vector<64x64xbf16>
    %c0_159 = arith.constant 0 : index
    %c192_160 = arith.constant 192 : index
    %106 = vector.load %arg11[%c0_159, %c192_160] : memref<128x576xbf16, #tpu.memory_space<vmem>>, vector<64x64xbf16>
    tpu.vector_store %arg11[%c0_159, %c192_160], %105 {strides = array<i32>} : memref<128x576xbf16, #tpu.memory_space<vmem>>, vector<64x64xbf16>,
    %c0_161 = arith.constant 0 : index
    %c1_162 = arith.constant 1 : index
    %c1_163 = arith.constant 1 : index
    %c0_164 = arith.constant 0 : index
    %107 = vector.load %arg10[%c0_161, %c1_162, %c1_163, %c0_164] : memref<2x10x10x64xbf16, #tpu.memory_space<vmem>>, vector<1x8x8x64xbf16>
    %108 = vector.shape_cast %107 : vector<1x8x8x64xbf16> to vector<8x8x64xbf16>
    %109 = vector.shape_cast %108 : vector<8x8x64xbf16> to vector<64x64xbf16>
    %c0_165 = arith.constant 0 : index
    %c256_166 = arith.constant 256 : index
    %110 = vector.load %arg11[%c0_165, %c256_166] : memref<128x576xbf16, #tpu.memory_space<vmem>>, vector<64x64xbf16>
    tpu.vector_store %arg11[%c0_165, %c256_166], %109 {strides = array<i32>} : memref<128x576xbf16, #tpu.memory_space<vmem>>, vector<64x64xbf16>,
    %c0_167 = arith.constant 0 : index
    %c1_168 = arith.constant 1 : index
    %c2_169 = arith.constant 2 : index
    %c0_170 = arith.constant 0 : index
    %111 = vector.load %arg10[%c0_167, %c1_168, %c2_169, %c0_170] : memref<2x10x10x64xbf16, #tpu.memory_space<vmem>>, vector<1x8x8x64xbf16>
    %112 = vector.shape_cast %111 : vector<1x8x8x64xbf16> to vector<8x8x64xbf16>
    %113 = vector.shape_cast %112 : vector<8x8x64xbf16> to vector<64x64xbf16>
    %c0_171 = arith.constant 0 : index
    %c320 = arith.constant 320 : index
    %114 = vector.load %arg11[%c0_171, %c320] : memref<128x576xbf16, #tpu.memory_space<vmem>>, vector<64x64xbf16>
    tpu.vector_store %arg11[%c0_171, %c320], %113 {strides = array<i32>} : memref<128x576xbf16, #tpu.memory_space<vmem>>, vector<64x64xbf16>,
    %c0_172 = arith.constant 0 : index
    %c2_173 = arith.constant 2 : index
    %c0_174 = arith.constant 0 : index
    %c0_175 = arith.constant 0 : index
    %115 = vector.load %arg10[%c0_172, %c2_173, %c0_174, %c0_175] : memref<2x10x10x64xbf16, #tpu.memory_space<vmem>>, vector<1x8x8x64xbf16>
    %116 = vector.shape_cast %115 : vector<1x8x8x64xbf16> to vector<8x8x64xbf16>
    %117 = vector.shape_cast %116 : vector<8x8x64xbf16> to vector<64x64xbf16>
    %c0_176 = arith.constant 0 : index
    %c384 = arith.constant 384 : index
    %118 = vector.load %arg11[%c0_176, %c384] : memref<128x576xbf16, #tpu.memory_space<vmem>>, vector<64x64xbf16>
    tpu.vector_store %arg11[%c0_176, %c384], %117 {strides = array<i32>} : memref<128x576xbf16, #tpu.memory_space<vmem>>, vector<64x64xbf16>,
    %c0_177 = arith.constant 0 : index
    %c2_178 = arith.constant 2 : index
    %c1_179 = arith.constant 1 : index
    %c0_180 = arith.constant 0 : index
    %119 = vector.load %arg10[%c0_177, %c2_178, %c1_179, %c0_180] : memref<2x10x10x64xbf16, #tpu.memory_space<vmem>>, vector<1x8x8x64xbf16>
    %120 = vector.shape_cast %119 : vector<1x8x8x64xbf16> to vector<8x8x64xbf16>
    %121 = vector.shape_cast %120 : vector<8x8x64xbf16> to vector<64x64xbf16>
    %c0_181 = arith.constant 0 : index
    %c448 = arith.constant 448 : index
    %122 = vector.load %arg11[%c0_181, %c448] : memref<128x576xbf16, #tpu.memory_space<vmem>>, vector<64x64xbf16>
    tpu.vector_store %arg11[%c0_181, %c448], %121 {strides = array<i32>} : memref<128x576xbf16, #tpu.memory_space<vmem>>, vector<64x64xbf16>,
    %c0_182 = arith.constant 0 : index
    %c2_183 = arith.constant 2 : index
    %c2_184 = arith.constant 2 : index
    %c0_185 = arith.constant 0 : index
    %123 = vector.load %arg10[%c0_182, %c2_183, %c2_184, %c0_185] : memref<2x10x10x64xbf16, #tpu.memory_space<vmem>>, vector<1x8x8x64xbf16>
    %124 = vector.shape_cast %123 : vector<1x8x8x64xbf16> to vector<8x8x64xbf16>
    %125 = vector.shape_cast %124 : vector<8x8x64xbf16> to vector<64x64xbf16>
    %c0_186 = arith.constant 0 : index
    %c512 = arith.constant 512 : index
    %126 = vector.load %arg11[%c0_186, %c512] : memref<128x576xbf16, #tpu.memory_space<vmem>>, vector<64x64xbf16>
    tpu.vector_store %arg11[%c0_186, %c512], %125 {strides = array<i32>} : memref<128x576xbf16, #tpu.memory_space<vmem>>, vector<64x64xbf16>,
    %c1_187 = arith.constant 1 : index
    %c0_188 = arith.constant 0 : index
    %c0_189 = arith.constant 0 : index
    %c0_190 = arith.constant 0 : index
    %127 = vector.load %arg10[%c1_187, %c0_188, %c0_189, %c0_190] : memref<2x10x10x64xbf16, #tpu.memory_space<vmem>>, vector<1x8x8x64xbf16>
    %128 = vector.shape_cast %127 : vector<1x8x8x64xbf16> to vector<8x8x64xbf16>
    %129 = vector.shape_cast %128 : vector<8x8x64xbf16> to vector<64x64xbf16>
    %c64_191 = arith.constant 64 : index
    %c0_192 = arith.constant 0 : index
    %130 = vector.load %arg11[%c64_191, %c0_192] : memref<128x576xbf16, #tpu.memory_space<vmem>>, vector<64x64xbf16>
    tpu.vector_store %arg11[%c64_191, %c0_192], %129 {strides = array<i32>} : memref<128x576xbf16, #tpu.memory_space<vmem>>, vector<64x64xbf16>,
    %c1_193 = arith.constant 1 : index
    %c0_194 = arith.constant 0 : index
    %c1_195 = arith.constant 1 : index
    %c0_196 = arith.constant 0 : index
    %131 = vector.load %arg10[%c1_193, %c0_194, %c1_195, %c0_196] : memref<2x10x10x64xbf16, #tpu.memory_space<vmem>>, vector<1x8x8x64xbf16>
    %132 = vector.shape_cast %131 : vector<1x8x8x64xbf16> to vector<8x8x64xbf16>
    %133 = vector.shape_cast %132 : vector<8x8x64xbf16> to vector<64x64xbf16>
    %c64_197 = arith.constant 64 : index
    %c64_198 = arith.constant 64 : index
    %134 = vector.load %arg11[%c64_197, %c64_198] : memref<128x576xbf16, #tpu.memory_space<vmem>>, vector<64x64xbf16>
    tpu.vector_store %arg11[%c64_197, %c64_198], %133 {strides = array<i32>} : memref<128x576xbf16, #tpu.memory_space<vmem>>, vector<64x64xbf16>,
    %c1_199 = arith.constant 1 : index
    %c0_200 = arith.constant 0 : index
    %c2_201 = arith.constant 2 : index
    %c0_202 = arith.constant 0 : index
    %135 = vector.load %arg10[%c1_199, %c0_200, %c2_201, %c0_202] : memref<2x10x10x64xbf16, #tpu.memory_space<vmem>>, vector<1x8x8x64xbf16>
    %136 = vector.shape_cast %135 : vector<1x8x8x64xbf16> to vector<8x8x64xbf16>
    %137 = vector.shape_cast %136 : vector<8x8x64xbf16> to vector<64x64xbf16>
    %c64_203 = arith.constant 64 : index
    %c128_204 = arith.constant 128 : index
    %138 = vector.load %arg11[%c64_203, %c128_204] : memref<128x576xbf16, #tpu.memory_space<vmem>>, vector<64x64xbf16>
    tpu.vector_store %arg11[%c64_203, %c128_204], %137 {strides = array<i32>} : memref<128x576xbf16, #tpu.memory_space<vmem>>, vector<64x64xbf16>,
    %c1_205 = arith.constant 1 : index
    %c1_206 = arith.constant 1 : index
    %c0_207 = arith.constant 0 : index
    %c0_208 = arith.constant 0 : index
    %139 = vector.load %arg10[%c1_205, %c1_206, %c0_207, %c0_208] : memref<2x10x10x64xbf16, #tpu.memory_space<vmem>>, vector<1x8x8x64xbf16>
    %140 = vector.shape_cast %139 : vector<1x8x8x64xbf16> to vector<8x8x64xbf16>
    %141 = vector.shape_cast %140 : vector<8x8x64xbf16> to vector<64x64xbf16>
    %c64_209 = arith.constant 64 : index
    %c192_210 = arith.constant 192 : index
    %142 = vector.load %arg11[%c64_209, %c192_210] : memref<128x576xbf16, #tpu.memory_space<vmem>>, vector<64x64xbf16>
    tpu.vector_store %arg11[%c64_209, %c192_210], %141 {strides = array<i32>} : memref<128x576xbf16, #tpu.memory_space<vmem>>, vector<64x64xbf16>,
    %c1_211 = arith.constant 1 : index
    %c1_212 = arith.constant 1 : index
    %c1_213 = arith.constant 1 : index
    %c0_214 = arith.constant 0 : index
    %143 = vector.load %arg10[%c1_211, %c1_212, %c1_213, %c0_214] : memref<2x10x10x64xbf16, #tpu.memory_space<vmem>>, vector<1x8x8x64xbf16>
    %144 = vector.shape_cast %143 : vector<1x8x8x64xbf16> to vector<8x8x64xbf16>
    %145 = vector.shape_cast %144 : vector<8x8x64xbf16> to vector<64x64xbf16>
    %c64_215 = arith.constant 64 : index
    %c256_216 = arith.constant 256 : index
    %146 = vector.load %arg11[%c64_215, %c256_216] : memref<128x576xbf16, #tpu.memory_space<vmem>>, vector<64x64xbf16>
    tpu.vector_store %arg11[%c64_215, %c256_216], %145 {strides = array<i32>} : memref<128x576xbf16, #tpu.memory_space<vmem>>, vector<64x64xbf16>,
    %c1_217 = arith.constant 1 : index
    %c1_218 = arith.constant 1 : index
    %c2_219 = arith.constant 2 : index
    %c0_220 = arith.constant 0 : index
    %147 = vector.load %arg10[%c1_217, %c1_218, %c2_219, %c0_220] : memref<2x10x10x64xbf16, #tpu.memory_space<vmem>>, vector<1x8x8x64xbf16>
    %148 = vector.shape_cast %147 : vector<1x8x8x64xbf16> to vector<8x8x64xbf16>
    %149 = vector.shape_cast %148 : vector<8x8x64xbf16> to vector<64x64xbf16>
    %c64_221 = arith.constant 64 : index
    %c320_222 = arith.constant 320 : index
    %150 = vector.load %arg11[%c64_221, %c320_222] : memref<128x576xbf16, #tpu.memory_space<vmem>>, vector<64x64xbf16>
    tpu.vector_store %arg11[%c64_221, %c320_222], %149 {strides = array<i32>} : memref<128x576xbf16, #tpu.memory_space<vmem>>, vector<64x64xbf16>,
    %c1_223 = arith.constant 1 : index
    %c2_224 = arith.constant 2 : index
    %c0_225 = arith.constant 0 : index
    %c0_226 = arith.constant 0 : index
    %151 = vector.load %arg10[%c1_223, %c2_224, %c0_225, %c0_226] : memref<2x10x10x64xbf16, #tpu.memory_space<vmem>>, vector<1x8x8x64xbf16>
    %152 = vector.shape_cast %151 : vector<1x8x8x64xbf16> to vector<8x8x64xbf16>
    %153 = vector.shape_cast %152 : vector<8x8x64xbf16> to vector<64x64xbf16>
    %c64_227 = arith.constant 64 : index
    %c384_228 = arith.constant 384 : index
    %154 = vector.load %arg11[%c64_227, %c384_228] : memref<128x576xbf16, #tpu.memory_space<vmem>>, vector<64x64xbf16>
    tpu.vector_store %arg11[%c64_227, %c384_228], %153 {strides = array<i32>} : memref<128x576xbf16, #tpu.memory_space<vmem>>, vector<64x64xbf16>,
    %c1_229 = arith.constant 1 : index
    %c2_230 = arith.constant 2 : index
    %c1_231 = arith.constant 1 : index
    %c0_232 = arith.constant 0 : index
    %155 = vector.load %arg10[%c1_229, %c2_230, %c1_231, %c0_232] : memref<2x10x10x64xbf16, #tpu.memory_space<vmem>>, vector<1x8x8x64xbf16>
    %156 = vector.shape_cast %155 : vector<1x8x8x64xbf16> to vector<8x8x64xbf16>
    %157 = vector.shape_cast %156 : vector<8x8x64xbf16> to vector<64x64xbf16>
    %c64_233 = arith.constant 64 : index
    %c448_234 = arith.constant 448 : index
    %158 = vector.load %arg11[%c64_233, %c448_234] : memref<128x576xbf16, #tpu.memory_space<vmem>>, vector<64x64xbf16>
    tpu.vector_store %arg11[%c64_233, %c448_234], %157 {strides = array<i32>} : memref<128x576xbf16, #tpu.memory_space<vmem>>, vector<64x64xbf16>,
    %c1_235 = arith.constant 1 : index
    %c2_236 = arith.constant 2 : index
    %c2_237 = arith.constant 2 : index
    %c0_238 = arith.constant 0 : index
    %159 = vector.load %arg10[%c1_235, %c2_236, %c2_237, %c0_238] : memref<2x10x10x64xbf16, #tpu.memory_space<vmem>>, vector<1x8x8x64xbf16>
    %160 = vector.shape_cast %159 : vector<1x8x8x64xbf16> to vector<8x8x64xbf16>
    %161 = vector.shape_cast %160 : vector<8x8x64xbf16> to vector<64x64xbf16>
    %c64_239 = arith.constant 64 : index
    %c512_240 = arith.constant 512 : index
    %162 = vector.load %arg11[%c64_239, %c512_240] : memref<128x576xbf16, #tpu.memory_space<vmem>>, vector<64x64xbf16>
    tpu.vector_store %arg11[%c64_239, %c512_240], %161 {strides = array<i32>} : memref<128x576xbf16, #tpu.memory_space<vmem>>, vector<64x64xbf16>,
    %c0_241 = arith.constant 0 : index
    %c0_242 = arith.constant 0 : index
    %163 = vector.load %arg11[%c0_241, %c0_242] : memref<128x576xbf16, #tpu.memory_space<vmem>>, vector<128x576xbf16>
    %c0_243 = arith.constant 0 : index
    %c0_244 = arith.constant 0 : index
    %164 = vector.load %arg4[%c0_243, %c0_244] : memref<576x64xbf16, #tpu.memory_space<vmem>>, vector<576x64xbf16>
    %cst_245 = arith.constant dense<0.000000e+00> : vector<128x64xf32>
    %165 = tpu.matmul %163, %164, %cst_245 {dimension_numbers = #tpu.dot_dimension_numbers<[1], [0], [0], [1], [0, 0, 1, 1], [], []>} : vector<128x576xbf16>, vector<576x64xbf16>, vector<128x64xf32> -> vector<128x64xf32>
    %c0_246 = arith.constant 0 : index
    %c0_247 = arith.constant 0 : index
    %166 = vector.load %arg5[%c0_246, %c0_247] : memref<1x64xf32, #tpu.memory_space<vmem>>, vector<1x64xf32>
    %167 = vector.broadcast %166 : vector<1x64xf32> to vector<128x64xf32>
    %168 = arith.addf %165, %167 : vector<128x64xf32>
    %169 = arith.addf %168, %85 : vector<128x64xf32>
    %cst_248 = arith.constant 0.000000e+00 : f32
    %170 = vector.broadcast %cst_248 : f32 to vector<128x64xf32>
    %171 = arith.maximumf %169, %170 : vector<128x64xf32>
    %172 = vector.shape_cast %171 : vector<128x64xf32> to vector<2x8x8x64xf32>
    %173 = arith.truncf %172 : vector<2x8x8x64xf32> to vector<2x8x8x64xbf16>
    %c0_249 = arith.constant 0 : index
    %c0_250 = arith.constant 0 : index
    %c0_251 = arith.constant 0 : index
    %c0_252 = arith.constant 0 : index
    %174 = vector.load %arg8[%c0_249, %c0_250, %c0_251, %c0_252] : memref<2x8x8x64xbf16, #tpu.memory_space<vmem>>, vector<2x8x8x64xbf16>
    tpu.vector_store %arg8[%c0_249, %c0_250, %c0_251, %c0_252], %173 {strides = array<i32>} : memref<2x8x8x64xbf16, #tpu.memory_space<vmem>>, vector<2x8x8x64xbf16>,
    return
  }
  func.func @transform_0(%arg0: i32) -> (i32, i32, i32, i32, i32) {
    %c0_i32 = arith.constant 0 : i32
    %c0_i32_0 = arith.constant 0 : i32
    %c0_i32_1 = arith.constant 0 : i32
    %c0_i32_2 = arith.constant 0 : i32
    %c0_i32_3 = arith.constant 0 : i32
    return %arg0, %c0_i32, %c0_i32_0, %c0_i32_1, %c0_i32_2 : i32, i32, i32, i32, i32
  }
  func.func @transform_1(%arg0: i32) -> (i32, i32) {
    %c0_i32 = arith.constant 0 : i32
    %c0_i32_0 = arith.constant 0 : i32
    %c0_i32_1 = arith.constant 0 : i32
    return %c0_i32, %c0_i32_0 : i32, i32
  }
  func.func @transform_2(%arg0: i32) -> (i32, i32) {
    %c0_i32 = arith.constant 0 : i32
    %c0_i32_0 = arith.constant 0 : i32
    %c0_i32_1 = arith.constant 0 : i32
    return %c0_i32, %c0_i32_0 : i32, i32
  }
  func.func @transform_3(%arg0: i32) -> (i32, i32) {
    %c0_i32 = arith.constant 0 : i32
    %c0_i32_0 = arith.constant 0 : i32
    %c0_i32_1 = arith.constant 0 : i32
    return %c0_i32, %c0_i32_0 : i32, i32
  }
  func.func @transform_4(%arg0: i32) -> (i32, i32) {
    %c0_i32 = arith.constant 0 : i32
    %c0_i32_0 = arith.constant 0 : i32
    %c0_i32_1 = arith.constant 0 : i32
    return %c0_i32, %c0_i32_0 : i32, i32
  }
  func.func @transform_5(%arg0: i32) -> (i32, i32) {
    %c0_i32 = arith.constant 0 : i32
    %c0_i32_0 = arith.constant 0 : i32
    %c0_i32_1 = arith.constant 0 : i32
    return %c0_i32, %c0_i32_0 : i32, i32
  }
  func.func @transform_6(%arg0: i32) -> (i32, i32) {
    %c0_i32 = arith.constant 0 : i32
    %c0_i32_0 = arith.constant 0 : i32
    %c0_i32_1 = arith.constant 0 : i32
    return %c0_i32, %c0_i32_0 : i32, i32
  }
  func.func @transform_7(%arg0: i32) -> (i32, i32, i32, i32) {
    %c0_i32 = arith.constant 0 : i32
    %c0_i32_0 = arith.constant 0 : i32
    %c0_i32_1 = arith.constant 0 : i32
    %c0_i32_2 = arith.constant 0 : i32
    return %arg0, %c0_i32, %c0_i32_0, %c0_i32_1 : i32, i32, i32, i32
  }
}

module attributes {stable_mosaic.version = 11 : i64} {
  func.func @_basic_block_kernel(%arg0: i32, %arg1: memref<2x1x10x10x64xbf16, #tpu.memory_space<vmem>>, %arg2: memref<576x64xbf16, #tpu.memory_space<vmem>>, %arg3: memref<1x64xf32, #tpu.memory_space<vmem>>, %arg4: memref<576x64xbf16, #tpu.memory_space<vmem>>, %arg5: memref<1x64xf32, #tpu.memory_space<vmem>>, %arg6: memref<2x8x8x64xbf16, #tpu.memory_space<vmem>>, %arg7: memref<128x576xbf16, #tpu.memory_space<vmem>>, %arg8: memref<2x10x10x64xbf16, #tpu.memory_space<vmem>>, %arg9: memref<128x576xbf16, #tpu.memory_space<vmem>>) attributes {dimension_semantics = [#tpu.dimension_semantics<parallel>], iteration_bounds = array<i64: 1>, scalar_prefetch = 0 : i64, scratch_operands = 3 : i64, tpu.core_type = #tpu.core_type<tc>, window_params = [{transform_indices = @transform_0, window_bounds = array<i64: 2, 1, 10, 10, 64>}, {pipeline_mode = #tpu.pipeline_mode<synchronous>, transform_indices = @transform_1, window_bounds = array<i64: 576, 64>}, {pipeline_mode = #tpu.pipeline_mode<synchronous>, transform_indices = @transform_2, window_bounds = array<i64: 1, 64>}, {pipeline_mode = #tpu.pipeline_mode<synchronous>, transform_indices = @transform_3, window_bounds = array<i64: 576, 64>}, {pipeline_mode = #tpu.pipeline_mode<synchronous>, transform_indices = @transform_4, window_bounds = array<i64: 1, 64>}, {transform_indices = @transform_5, window_bounds = array<i64: 2, 8, 8, 64>}]} {
    %c0 = arith.constant 0 : index
    %c0_0 = arith.constant 0 : index
    %c0_1 = arith.constant 0 : index
    %c0_2 = arith.constant 0 : index
    %c0_3 = arith.constant 0 : index
    %0 = vector.load %arg1[%c0, %c0_0, %c0_1, %c0_2, %c0_3] : memref<2x1x10x10x64xbf16, #tpu.memory_space<vmem>>, vector<1x1x8x8x64xbf16>
    %1 = vector.shape_cast %0 : vector<1x1x8x8x64xbf16> to vector<8x8x64xbf16>
    %2 = vector.shape_cast %1 : vector<8x8x64xbf16> to vector<64x64xbf16>
    %c0_4 = arith.constant 0 : index
    %c0_5 = arith.constant 0 : index
    %3 = vector.load %arg7[%c0_4, %c0_5] : memref<128x576xbf16, #tpu.memory_space<vmem>>, vector<64x64xbf16>
    tpu.vector_store %arg7[%c0_4, %c0_5], %2 {strides = array<i32>} : memref<128x576xbf16, #tpu.memory_space<vmem>>, vector<64x64xbf16>,
    %c0_6 = arith.constant 0 : index
    %c0_7 = arith.constant 0 : index
    %c0_8 = arith.constant 0 : index
    %c1 = arith.constant 1 : index
    %c0_9 = arith.constant 0 : index
    %4 = vector.load %arg1[%c0_6, %c0_7, %c0_8, %c1, %c0_9] : memref<2x1x10x10x64xbf16, #tpu.memory_space<vmem>>, vector<1x1x8x8x64xbf16>
    %5 = vector.shape_cast %4 : vector<1x1x8x8x64xbf16> to vector<8x8x64xbf16>
    %6 = vector.shape_cast %5 : vector<8x8x64xbf16> to vector<64x64xbf16>
    %c0_10 = arith.constant 0 : index
    %c64 = arith.constant 64 : index
    %7 = vector.load %arg7[%c0_10, %c64] : memref<128x576xbf16, #tpu.memory_space<vmem>>, vector<64x64xbf16>
    tpu.vector_store %arg7[%c0_10, %c64], %6 {strides = array<i32>} : memref<128x576xbf16, #tpu.memory_space<vmem>>, vector<64x64xbf16>,
    %c0_11 = arith.constant 0 : index
    %c0_12 = arith.constant 0 : index
    %c0_13 = arith.constant 0 : index
    %c2 = arith.constant 2 : index
    %c0_14 = arith.constant 0 : index
    %8 = vector.load %arg1[%c0_11, %c0_12, %c0_13, %c2, %c0_14] : memref<2x1x10x10x64xbf16, #tpu.memory_space<vmem>>, vector<1x1x8x8x64xbf16>
    %9 = vector.shape_cast %8 : vector<1x1x8x8x64xbf16> to vector<8x8x64xbf16>
    %10 = vector.shape_cast %9 : vector<8x8x64xbf16> to vector<64x64xbf16>
    %c0_15 = arith.constant 0 : index
    %c128 = arith.constant 128 : index
    %11 = vector.load %arg7[%c0_15, %c128] : memref<128x576xbf16, #tpu.memory_space<vmem>>, vector<64x64xbf16>
    tpu.vector_store %arg7[%c0_15, %c128], %10 {strides = array<i32>} : memref<128x576xbf16, #tpu.memory_space<vmem>>, vector<64x64xbf16>,
    %c0_16 = arith.constant 0 : index
    %c0_17 = arith.constant 0 : index
    %c1_18 = arith.constant 1 : index
    %c0_19 = arith.constant 0 : index
    %c0_20 = arith.constant 0 : index
    %12 = vector.load %arg1[%c0_16, %c0_17, %c1_18, %c0_19, %c0_20] : memref<2x1x10x10x64xbf16, #tpu.memory_space<vmem>>, vector<1x1x8x8x64xbf16>
    %13 = vector.shape_cast %12 : vector<1x1x8x8x64xbf16> to vector<8x8x64xbf16>
    %14 = vector.shape_cast %13 : vector<8x8x64xbf16> to vector<64x64xbf16>
    %c0_21 = arith.constant 0 : index
    %c192 = arith.constant 192 : index
    %15 = vector.load %arg7[%c0_21, %c192] : memref<128x576xbf16, #tpu.memory_space<vmem>>, vector<64x64xbf16>
    tpu.vector_store %arg7[%c0_21, %c192], %14 {strides = array<i32>} : memref<128x576xbf16, #tpu.memory_space<vmem>>, vector<64x64xbf16>,
    %c0_22 = arith.constant 0 : index
    %c0_23 = arith.constant 0 : index
    %c1_24 = arith.constant 1 : index
    %c1_25 = arith.constant 1 : index
    %c0_26 = arith.constant 0 : index
    %16 = vector.load %arg1[%c0_22, %c0_23, %c1_24, %c1_25, %c0_26] : memref<2x1x10x10x64xbf16, #tpu.memory_space<vmem>>, vector<1x1x8x8x64xbf16>
    %17 = vector.shape_cast %16 : vector<1x1x8x8x64xbf16> to vector<8x8x64xbf16>
    %18 = vector.shape_cast %17 : vector<8x8x64xbf16> to vector<64x64xbf16>
    %c0_27 = arith.constant 0 : index
    %c256 = arith.constant 256 : index
    %19 = vector.load %arg7[%c0_27, %c256] : memref<128x576xbf16, #tpu.memory_space<vmem>>, vector<64x64xbf16>
    tpu.vector_store %arg7[%c0_27, %c256], %18 {strides = array<i32>} : memref<128x576xbf16, #tpu.memory_space<vmem>>, vector<64x64xbf16>,
    %c0_28 = arith.constant 0 : index
    %c0_29 = arith.constant 0 : index
    %c1_30 = arith.constant 1 : index
    %c2_31 = arith.constant 2 : index
    %c0_32 = arith.constant 0 : index
    %20 = vector.load %arg1[%c0_28, %c0_29, %c1_30, %c2_31, %c0_32] : memref<2x1x10x10x64xbf16, #tpu.memory_space<vmem>>, vector<1x1x8x8x64xbf16>
    %21 = vector.shape_cast %20 : vector<1x1x8x8x64xbf16> to vector<8x8x64xbf16>
    %22 = vector.shape_cast %21 : vector<8x8x64xbf16> to vector<64x64xbf16>
    %c0_33 = arith.constant 0 : index
    %c320 = arith.constant 320 : index
    %23 = vector.load %arg7[%c0_33, %c320] : memref<128x576xbf16, #tpu.memory_space<vmem>>, vector<64x64xbf16>
    tpu.vector_store %arg7[%c0_33, %c320], %22 {strides = array<i32>} : memref<128x576xbf16, #tpu.memory_space<vmem>>, vector<64x64xbf16>,
    %c0_34 = arith.constant 0 : index
    %c0_35 = arith.constant 0 : index
    %c2_36 = arith.constant 2 : index
    %c0_37 = arith.constant 0 : index
    %c0_38 = arith.constant 0 : index
    %24 = vector.load %arg1[%c0_34, %c0_35, %c2_36, %c0_37, %c0_38] : memref<2x1x10x10x64xbf16, #tpu.memory_space<vmem>>, vector<1x1x8x8x64xbf16>
    %25 = vector.shape_cast %24 : vector<1x1x8x8x64xbf16> to vector<8x8x64xbf16>
    %26 = vector.shape_cast %25 : vector<8x8x64xbf16> to vector<64x64xbf16>
    %c0_39 = arith.constant 0 : index
    %c384 = arith.constant 384 : index
    %27 = vector.load %arg7[%c0_39, %c384] : memref<128x576xbf16, #tpu.memory_space<vmem>>, vector<64x64xbf16>
    tpu.vector_store %arg7[%c0_39, %c384], %26 {strides = array<i32>} : memref<128x576xbf16, #tpu.memory_space<vmem>>, vector<64x64xbf16>,
    %c0_40 = arith.constant 0 : index
    %c0_41 = arith.constant 0 : index
    %c2_42 = arith.constant 2 : index
    %c1_43 = arith.constant 1 : index
    %c0_44 = arith.constant 0 : index
    %28 = vector.load %arg1[%c0_40, %c0_41, %c2_42, %c1_43, %c0_44] : memref<2x1x10x10x64xbf16, #tpu.memory_space<vmem>>, vector<1x1x8x8x64xbf16>
    %29 = vector.shape_cast %28 : vector<1x1x8x8x64xbf16> to vector<8x8x64xbf16>
    %30 = vector.shape_cast %29 : vector<8x8x64xbf16> to vector<64x64xbf16>
    %c0_45 = arith.constant 0 : index
    %c448 = arith.constant 448 : index
    %31 = vector.load %arg7[%c0_45, %c448] : memref<128x576xbf16, #tpu.memory_space<vmem>>, vector<64x64xbf16>
    tpu.vector_store %arg7[%c0_45, %c448], %30 {strides = array<i32>} : memref<128x576xbf16, #tpu.memory_space<vmem>>, vector<64x64xbf16>,
    %c0_46 = arith.constant 0 : index
    %c0_47 = arith.constant 0 : index
    %c2_48 = arith.constant 2 : index
    %c2_49 = arith.constant 2 : index
    %c0_50 = arith.constant 0 : index
    %32 = vector.load %arg1[%c0_46, %c0_47, %c2_48, %c2_49, %c0_50] : memref<2x1x10x10x64xbf16, #tpu.memory_space<vmem>>, vector<1x1x8x8x64xbf16>
    %33 = vector.shape_cast %32 : vector<1x1x8x8x64xbf16> to vector<8x8x64xbf16>
    %34 = vector.shape_cast %33 : vector<8x8x64xbf16> to vector<64x64xbf16>
    %c0_51 = arith.constant 0 : index
    %c512 = arith.constant 512 : index
    %35 = vector.load %arg7[%c0_51, %c512] : memref<128x576xbf16, #tpu.memory_space<vmem>>, vector<64x64xbf16>
    tpu.vector_store %arg7[%c0_51, %c512], %34 {strides = array<i32>} : memref<128x576xbf16, #tpu.memory_space<vmem>>, vector<64x64xbf16>,
    %c1_52 = arith.constant 1 : index
    %c0_53 = arith.constant 0 : index
    %c0_54 = arith.constant 0 : index
    %c0_55 = arith.constant 0 : index
    %c0_56 = arith.constant 0 : index
    %36 = vector.load %arg1[%c1_52, %c0_53, %c0_54, %c0_55, %c0_56] : memref<2x1x10x10x64xbf16, #tpu.memory_space<vmem>>, vector<1x1x8x8x64xbf16>
    %37 = vector.shape_cast %36 : vector<1x1x8x8x64xbf16> to vector<8x8x64xbf16>
    %38 = vector.shape_cast %37 : vector<8x8x64xbf16> to vector<64x64xbf16>
    %c64_57 = arith.constant 64 : index
    %c0_58 = arith.constant 0 : index
    %39 = vector.load %arg7[%c64_57, %c0_58] : memref<128x576xbf16, #tpu.memory_space<vmem>>, vector<64x64xbf16>
    tpu.vector_store %arg7[%c64_57, %c0_58], %38 {strides = array<i32>} : memref<128x576xbf16, #tpu.memory_space<vmem>>, vector<64x64xbf16>,
    %c1_59 = arith.constant 1 : index
    %c0_60 = arith.constant 0 : index
    %c0_61 = arith.constant 0 : index
    %c1_62 = arith.constant 1 : index
    %c0_63 = arith.constant 0 : index
    %40 = vector.load %arg1[%c1_59, %c0_60, %c0_61, %c1_62, %c0_63] : memref<2x1x10x10x64xbf16, #tpu.memory_space<vmem>>, vector<1x1x8x8x64xbf16>
    %41 = vector.shape_cast %40 : vector<1x1x8x8x64xbf16> to vector<8x8x64xbf16>
    %42 = vector.shape_cast %41 : vector<8x8x64xbf16> to vector<64x64xbf16>
    %c64_64 = arith.constant 64 : index
    %c64_65 = arith.constant 64 : index
    %43 = vector.load %arg7[%c64_64, %c64_65] : memref<128x576xbf16, #tpu.memory_space<vmem>>, vector<64x64xbf16>
    tpu.vector_store %arg7[%c64_64, %c64_65], %42 {strides = array<i32>} : memref<128x576xbf16, #tpu.memory_space<vmem>>, vector<64x64xbf16>,
    %c1_66 = arith.constant 1 : index
    %c0_67 = arith.constant 0 : index
    %c0_68 = arith.constant 0 : index
    %c2_69 = arith.constant 2 : index
    %c0_70 = arith.constant 0 : index
    %44 = vector.load %arg1[%c1_66, %c0_67, %c0_68, %c2_69, %c0_70] : memref<2x1x10x10x64xbf16, #tpu.memory_space<vmem>>, vector<1x1x8x8x64xbf16>
    %45 = vector.shape_cast %44 : vector<1x1x8x8x64xbf16> to vector<8x8x64xbf16>
    %46 = vector.shape_cast %45 : vector<8x8x64xbf16> to vector<64x64xbf16>
    %c64_71 = arith.constant 64 : index
    %c128_72 = arith.constant 128 : index
    %47 = vector.load %arg7[%c64_71, %c128_72] : memref<128x576xbf16, #tpu.memory_space<vmem>>, vector<64x64xbf16>
    tpu.vector_store %arg7[%c64_71, %c128_72], %46 {strides = array<i32>} : memref<128x576xbf16, #tpu.memory_space<vmem>>, vector<64x64xbf16>,
    %c1_73 = arith.constant 1 : index
    %c0_74 = arith.constant 0 : index
    %c1_75 = arith.constant 1 : index
    %c0_76 = arith.constant 0 : index
    %c0_77 = arith.constant 0 : index
    %48 = vector.load %arg1[%c1_73, %c0_74, %c1_75, %c0_76, %c0_77] : memref<2x1x10x10x64xbf16, #tpu.memory_space<vmem>>, vector<1x1x8x8x64xbf16>
    %49 = vector.shape_cast %48 : vector<1x1x8x8x64xbf16> to vector<8x8x64xbf16>
    %50 = vector.shape_cast %49 : vector<8x8x64xbf16> to vector<64x64xbf16>
    %c64_78 = arith.constant 64 : index
    %c192_79 = arith.constant 192 : index
    %51 = vector.load %arg7[%c64_78, %c192_79] : memref<128x576xbf16, #tpu.memory_space<vmem>>, vector<64x64xbf16>
    tpu.vector_store %arg7[%c64_78, %c192_79], %50 {strides = array<i32>} : memref<128x576xbf16, #tpu.memory_space<vmem>>, vector<64x64xbf16>,
    %c1_80 = arith.constant 1 : index
    %c0_81 = arith.constant 0 : index
    %c1_82 = arith.constant 1 : index
    %c1_83 = arith.constant 1 : index
    %c0_84 = arith.constant 0 : index
    %52 = vector.load %arg1[%c1_80, %c0_81, %c1_82, %c1_83, %c0_84] : memref<2x1x10x10x64xbf16, #tpu.memory_space<vmem>>, vector<1x1x8x8x64xbf16>
    %53 = vector.shape_cast %52 : vector<1x1x8x8x64xbf16> to vector<8x8x64xbf16>
    %54 = vector.shape_cast %53 : vector<8x8x64xbf16> to vector<64x64xbf16>
    %c64_85 = arith.constant 64 : index
    %c256_86 = arith.constant 256 : index
    %55 = vector.load %arg7[%c64_85, %c256_86] : memref<128x576xbf16, #tpu.memory_space<vmem>>, vector<64x64xbf16>
    tpu.vector_store %arg7[%c64_85, %c256_86], %54 {strides = array<i32>} : memref<128x576xbf16, #tpu.memory_space<vmem>>, vector<64x64xbf16>,
    %c1_87 = arith.constant 1 : index
    %c0_88 = arith.constant 0 : index
    %c1_89 = arith.constant 1 : index
    %c2_90 = arith.constant 2 : index
    %c0_91 = arith.constant 0 : index
    %56 = vector.load %arg1[%c1_87, %c0_88, %c1_89, %c2_90, %c0_91] : memref<2x1x10x10x64xbf16, #tpu.memory_space<vmem>>, vector<1x1x8x8x64xbf16>
    %57 = vector.shape_cast %56 : vector<1x1x8x8x64xbf16> to vector<8x8x64xbf16>
    %58 = vector.shape_cast %57 : vector<8x8x64xbf16> to vector<64x64xbf16>
    %c64_92 = arith.constant 64 : index
    %c320_93 = arith.constant 320 : index
    %59 = vector.load %arg7[%c64_92, %c320_93] : memref<128x576xbf16, #tpu.memory_space<vmem>>, vector<64x64xbf16>
    tpu.vector_store %arg7[%c64_92, %c320_93], %58 {strides = array<i32>} : memref<128x576xbf16, #tpu.memory_space<vmem>>, vector<64x64xbf16>,
    %c1_94 = arith.constant 1 : index
    %c0_95 = arith.constant 0 : index
    %c2_96 = arith.constant 2 : index
    %c0_97 = arith.constant 0 : index
    %c0_98 = arith.constant 0 : index
    %60 = vector.load %arg1[%c1_94, %c0_95, %c2_96, %c0_97, %c0_98] : memref<2x1x10x10x64xbf16, #tpu.memory_space<vmem>>, vector<1x1x8x8x64xbf16>
    %61 = vector.shape_cast %60 : vector<1x1x8x8x64xbf16> to vector<8x8x64xbf16>
    %62 = vector.shape_cast %61 : vector<8x8x64xbf16> to vector<64x64xbf16>
    %c64_99 = arith.constant 64 : index
    %c384_100 = arith.constant 384 : index
    %63 = vector.load %arg7[%c64_99, %c384_100] : memref<128x576xbf16, #tpu.memory_space<vmem>>, vector<64x64xbf16>
    tpu.vector_store %arg7[%c64_99, %c384_100], %62 {strides = array<i32>} : memref<128x576xbf16, #tpu.memory_space<vmem>>, vector<64x64xbf16>,
    %c1_101 = arith.constant 1 : index
    %c0_102 = arith.constant 0 : index
    %c2_103 = arith.constant 2 : index
    %c1_104 = arith.constant 1 : index
    %c0_105 = arith.constant 0 : index
    %64 = vector.load %arg1[%c1_101, %c0_102, %c2_103, %c1_104, %c0_105] : memref<2x1x10x10x64xbf16, #tpu.memory_space<vmem>>, vector<1x1x8x8x64xbf16>
    %65 = vector.shape_cast %64 : vector<1x1x8x8x64xbf16> to vector<8x8x64xbf16>
    %66 = vector.shape_cast %65 : vector<8x8x64xbf16> to vector<64x64xbf16>
    %c64_106 = arith.constant 64 : index
    %c448_107 = arith.constant 448 : index
    %67 = vector.load %arg7[%c64_106, %c448_107] : memref<128x576xbf16, #tpu.memory_space<vmem>>, vector<64x64xbf16>
    tpu.vector_store %arg7[%c64_106, %c448_107], %66 {strides = array<i32>} : memref<128x576xbf16, #tpu.memory_space<vmem>>, vector<64x64xbf16>,
    %c1_108 = arith.constant 1 : index
    %c0_109 = arith.constant 0 : index
    %c2_110 = arith.constant 2 : index
    %c2_111 = arith.constant 2 : index
    %c0_112 = arith.constant 0 : index
    %68 = vector.load %arg1[%c1_108, %c0_109, %c2_110, %c2_111, %c0_112] : memref<2x1x10x10x64xbf16, #tpu.memory_space<vmem>>, vector<1x1x8x8x64xbf16>
    %69 = vector.shape_cast %68 : vector<1x1x8x8x64xbf16> to vector<8x8x64xbf16>
    %70 = vector.shape_cast %69 : vector<8x8x64xbf16> to vector<64x64xbf16>
    %c64_113 = arith.constant 64 : index
    %c512_114 = arith.constant 512 : index
    %71 = vector.load %arg7[%c64_113, %c512_114] : memref<128x576xbf16, #tpu.memory_space<vmem>>, vector<64x64xbf16>
    tpu.vector_store %arg7[%c64_113, %c512_114], %70 {strides = array<i32>} : memref<128x576xbf16, #tpu.memory_space<vmem>>, vector<64x64xbf16>,
    %c0_115 = arith.constant 0 : index
    %c0_116 = arith.constant 0 : index
    %72 = vector.load %arg7[%c0_115, %c0_116] : memref<128x576xbf16, #tpu.memory_space<vmem>>, vector<128x576xbf16>
    %c0_117 = arith.constant 0 : index
    %c0_118 = arith.constant 0 : index
    %73 = vector.load %arg2[%c0_117, %c0_118] : memref<576x64xbf16, #tpu.memory_space<vmem>>, vector<576x64xbf16>
    %cst = arith.constant dense<0.000000e+00> : vector<128x64xf32>
    %74 = tpu.matmul %72, %73, %cst {dimension_numbers = #tpu.dot_dimension_numbers<[1], [0], [0], [1], [0, 0, 1, 1], [], []>} : vector<128x576xbf16>, vector<576x64xbf16>, vector<128x64xf32> -> vector<128x64xf32>
    %c0_119 = arith.constant 0 : index
    %c0_120 = arith.constant 0 : index
    %75 = vector.load %arg3[%c0_119, %c0_120] : memref<1x64xf32, #tpu.memory_space<vmem>>, vector<1x64xf32>
    %76 = vector.broadcast %75 : vector<1x64xf32> to vector<128x64xf32>
    %77 = arith.addf %74, %76 : vector<128x64xf32>
    %cst_121 = arith.constant 0.000000e+00 : f32
    %78 = vector.broadcast %cst_121 : f32 to vector<128x64xf32>
    %79 = arith.maximumf %77, %78 : vector<128x64xf32>
    %c0_122 = arith.constant 0 : index
    %c256_123 = arith.constant 256 : index
    %80 = vector.load %arg7[%c0_122, %c256_123] : memref<128x576xbf16, #tpu.memory_space<vmem>>, vector<128x64xbf16>
    %81 = arith.extf %80 : vector<128x64xbf16> to vector<128x64xf32>
    %cst_124 = arith.constant 0.000000e+00 : bf16
    %82 = vector.broadcast %cst_124 : bf16 to vector<2x10x10x64xbf16>
    %c0_125 = arith.constant 0 : index
    %c0_126 = arith.constant 0 : index
    %c0_127 = arith.constant 0 : index
    %c0_128 = arith.constant 0 : index
    %83 = vector.load %arg8[%c0_125, %c0_126, %c0_127, %c0_128] : memref<2x10x10x64xbf16, #tpu.memory_space<vmem>>, vector<2x10x10x64xbf16>
    tpu.vector_store %arg8[%c0_125, %c0_126, %c0_127, %c0_128], %82 {strides = array<i32>} : memref<2x10x10x64xbf16, #tpu.memory_space<vmem>>, vector<2x10x10x64xbf16>,
    %84 = arith.truncf %79 : vector<128x64xf32> to vector<128x64xbf16>
    %85 = vector.shape_cast %84 : vector<128x64xbf16> to vector<2x8x8x64xbf16>
    %c0_129 = arith.constant 0 : index
    %c1_130 = arith.constant 1 : index
    %c1_131 = arith.constant 1 : index
    %c0_132 = arith.constant 0 : index
    %86 = vector.load %arg8[%c0_129, %c1_130, %c1_131, %c0_132] : memref<2x10x10x64xbf16, #tpu.memory_space<vmem>>, vector<2x8x8x64xbf16>
    tpu.vector_store %arg8[%c0_129, %c1_130, %c1_131, %c0_132], %85 {strides = array<i32>} : memref<2x10x10x64xbf16, #tpu.memory_space<vmem>>, vector<2x8x8x64xbf16>,
    %c0_133 = arith.constant 0 : index
    %c0_134 = arith.constant 0 : index
    %c0_135 = arith.constant 0 : index
    %c0_136 = arith.constant 0 : index
    %87 = vector.load %arg8[%c0_133, %c0_134, %c0_135, %c0_136] : memref<2x10x10x64xbf16, #tpu.memory_space<vmem>>, vector<1x8x8x64xbf16>
    %88 = vector.shape_cast %87 : vector<1x8x8x64xbf16> to vector<8x8x64xbf16>
    %89 = vector.shape_cast %88 : vector<8x8x64xbf16> to vector<64x64xbf16>
    %c0_137 = arith.constant 0 : index
    %c0_138 = arith.constant 0 : index
    %90 = vector.load %arg9[%c0_137, %c0_138] : memref<128x576xbf16, #tpu.memory_space<vmem>>, vector<64x64xbf16>
    tpu.vector_store %arg9[%c0_137, %c0_138], %89 {strides = array<i32>} : memref<128x576xbf16, #tpu.memory_space<vmem>>, vector<64x64xbf16>,
    %c0_139 = arith.constant 0 : index
    %c0_140 = arith.constant 0 : index
    %c1_141 = arith.constant 1 : index
    %c0_142 = arith.constant 0 : index
    %91 = vector.load %arg8[%c0_139, %c0_140, %c1_141, %c0_142] : memref<2x10x10x64xbf16, #tpu.memory_space<vmem>>, vector<1x8x8x64xbf16>
    %92 = vector.shape_cast %91 : vector<1x8x8x64xbf16> to vector<8x8x64xbf16>
    %93 = vector.shape_cast %92 : vector<8x8x64xbf16> to vector<64x64xbf16>
    %c0_143 = arith.constant 0 : index
    %c64_144 = arith.constant 64 : index
    %94 = vector.load %arg9[%c0_143, %c64_144] : memref<128x576xbf16, #tpu.memory_space<vmem>>, vector<64x64xbf16>
    tpu.vector_store %arg9[%c0_143, %c64_144], %93 {strides = array<i32>} : memref<128x576xbf16, #tpu.memory_space<vmem>>, vector<64x64xbf16>,
    %c0_145 = arith.constant 0 : index
    %c0_146 = arith.constant 0 : index
    %c2_147 = arith.constant 2 : index
    %c0_148 = arith.constant 0 : index
    %95 = vector.load %arg8[%c0_145, %c0_146, %c2_147, %c0_148] : memref<2x10x10x64xbf16, #tpu.memory_space<vmem>>, vector<1x8x8x64xbf16>
    %96 = vector.shape_cast %95 : vector<1x8x8x64xbf16> to vector<8x8x64xbf16>
    %97 = vector.shape_cast %96 : vector<8x8x64xbf16> to vector<64x64xbf16>
    %c0_149 = arith.constant 0 : index
    %c128_150 = arith.constant 128 : index
    %98 = vector.load %arg9[%c0_149, %c128_150] : memref<128x576xbf16, #tpu.memory_space<vmem>>, vector<64x64xbf16>
    tpu.vector_store %arg9[%c0_149, %c128_150], %97 {strides = array<i32>} : memref<128x576xbf16, #tpu.memory_space<vmem>>, vector<64x64xbf16>,
    %c0_151 = arith.constant 0 : index
    %c1_152 = arith.constant 1 : index
    %c0_153 = arith.constant 0 : index
    %c0_154 = arith.constant 0 : index
    %99 = vector.load %arg8[%c0_151, %c1_152, %c0_153, %c0_154] : memref<2x10x10x64xbf16, #tpu.memory_space<vmem>>, vector<1x8x8x64xbf16>
    %100 = vector.shape_cast %99 : vector<1x8x8x64xbf16> to vector<8x8x64xbf16>
    %101 = vector.shape_cast %100 : vector<8x8x64xbf16> to vector<64x64xbf16>
    %c0_155 = arith.constant 0 : index
    %c192_156 = arith.constant 192 : index
    %102 = vector.load %arg9[%c0_155, %c192_156] : memref<128x576xbf16, #tpu.memory_space<vmem>>, vector<64x64xbf16>
    tpu.vector_store %arg9[%c0_155, %c192_156], %101 {strides = array<i32>} : memref<128x576xbf16, #tpu.memory_space<vmem>>, vector<64x64xbf16>,
    %c0_157 = arith.constant 0 : index
    %c1_158 = arith.constant 1 : index
    %c1_159 = arith.constant 1 : index
    %c0_160 = arith.constant 0 : index
    %103 = vector.load %arg8[%c0_157, %c1_158, %c1_159, %c0_160] : memref<2x10x10x64xbf16, #tpu.memory_space<vmem>>, vector<1x8x8x64xbf16>
    %104 = vector.shape_cast %103 : vector<1x8x8x64xbf16> to vector<8x8x64xbf16>
    %105 = vector.shape_cast %104 : vector<8x8x64xbf16> to vector<64x64xbf16>
    %c0_161 = arith.constant 0 : index
    %c256_162 = arith.constant 256 : index
    %106 = vector.load %arg9[%c0_161, %c256_162] : memref<128x576xbf16, #tpu.memory_space<vmem>>, vector<64x64xbf16>
    tpu.vector_store %arg9[%c0_161, %c256_162], %105 {strides = array<i32>} : memref<128x576xbf16, #tpu.memory_space<vmem>>, vector<64x64xbf16>,
    %c0_163 = arith.constant 0 : index
    %c1_164 = arith.constant 1 : index
    %c2_165 = arith.constant 2 : index
    %c0_166 = arith.constant 0 : index
    %107 = vector.load %arg8[%c0_163, %c1_164, %c2_165, %c0_166] : memref<2x10x10x64xbf16, #tpu.memory_space<vmem>>, vector<1x8x8x64xbf16>
    %108 = vector.shape_cast %107 : vector<1x8x8x64xbf16> to vector<8x8x64xbf16>
    %109 = vector.shape_cast %108 : vector<8x8x64xbf16> to vector<64x64xbf16>
    %c0_167 = arith.constant 0 : index
    %c320_168 = arith.constant 320 : index
    %110 = vector.load %arg9[%c0_167, %c320_168] : memref<128x576xbf16, #tpu.memory_space<vmem>>, vector<64x64xbf16>
    tpu.vector_store %arg9[%c0_167, %c320_168], %109 {strides = array<i32>} : memref<128x576xbf16, #tpu.memory_space<vmem>>, vector<64x64xbf16>,
    %c0_169 = arith.constant 0 : index
    %c2_170 = arith.constant 2 : index
    %c0_171 = arith.constant 0 : index
    %c0_172 = arith.constant 0 : index
    %111 = vector.load %arg8[%c0_169, %c2_170, %c0_171, %c0_172] : memref<2x10x10x64xbf16, #tpu.memory_space<vmem>>, vector<1x8x8x64xbf16>
    %112 = vector.shape_cast %111 : vector<1x8x8x64xbf16> to vector<8x8x64xbf16>
    %113 = vector.shape_cast %112 : vector<8x8x64xbf16> to vector<64x64xbf16>
    %c0_173 = arith.constant 0 : index
    %c384_174 = arith.constant 384 : index
    %114 = vector.load %arg9[%c0_173, %c384_174] : memref<128x576xbf16, #tpu.memory_space<vmem>>, vector<64x64xbf16>
    tpu.vector_store %arg9[%c0_173, %c384_174], %113 {strides = array<i32>} : memref<128x576xbf16, #tpu.memory_space<vmem>>, vector<64x64xbf16>,
    %c0_175 = arith.constant 0 : index
    %c2_176 = arith.constant 2 : index
    %c1_177 = arith.constant 1 : index
    %c0_178 = arith.constant 0 : index
    %115 = vector.load %arg8[%c0_175, %c2_176, %c1_177, %c0_178] : memref<2x10x10x64xbf16, #tpu.memory_space<vmem>>, vector<1x8x8x64xbf16>
    %116 = vector.shape_cast %115 : vector<1x8x8x64xbf16> to vector<8x8x64xbf16>
    %117 = vector.shape_cast %116 : vector<8x8x64xbf16> to vector<64x64xbf16>
    %c0_179 = arith.constant 0 : index
    %c448_180 = arith.constant 448 : index
    %118 = vector.load %arg9[%c0_179, %c448_180] : memref<128x576xbf16, #tpu.memory_space<vmem>>, vector<64x64xbf16>
    tpu.vector_store %arg9[%c0_179, %c448_180], %117 {strides = array<i32>} : memref<128x576xbf16, #tpu.memory_space<vmem>>, vector<64x64xbf16>,
    %c0_181 = arith.constant 0 : index
    %c2_182 = arith.constant 2 : index
    %c2_183 = arith.constant 2 : index
    %c0_184 = arith.constant 0 : index
    %119 = vector.load %arg8[%c0_181, %c2_182, %c2_183, %c0_184] : memref<2x10x10x64xbf16, #tpu.memory_space<vmem>>, vector<1x8x8x64xbf16>
    %120 = vector.shape_cast %119 : vector<1x8x8x64xbf16> to vector<8x8x64xbf16>
    %121 = vector.shape_cast %120 : vector<8x8x64xbf16> to vector<64x64xbf16>
    %c0_185 = arith.constant 0 : index
    %c512_186 = arith.constant 512 : index
    %122 = vector.load %arg9[%c0_185, %c512_186] : memref<128x576xbf16, #tpu.memory_space<vmem>>, vector<64x64xbf16>
    tpu.vector_store %arg9[%c0_185, %c512_186], %121 {strides = array<i32>} : memref<128x576xbf16, #tpu.memory_space<vmem>>, vector<64x64xbf16>,
    %c1_187 = arith.constant 1 : index
    %c0_188 = arith.constant 0 : index
    %c0_189 = arith.constant 0 : index
    %c0_190 = arith.constant 0 : index
    %123 = vector.load %arg8[%c1_187, %c0_188, %c0_189, %c0_190] : memref<2x10x10x64xbf16, #tpu.memory_space<vmem>>, vector<1x8x8x64xbf16>
    %124 = vector.shape_cast %123 : vector<1x8x8x64xbf16> to vector<8x8x64xbf16>
    %125 = vector.shape_cast %124 : vector<8x8x64xbf16> to vector<64x64xbf16>
    %c64_191 = arith.constant 64 : index
    %c0_192 = arith.constant 0 : index
    %126 = vector.load %arg9[%c64_191, %c0_192] : memref<128x576xbf16, #tpu.memory_space<vmem>>, vector<64x64xbf16>
    tpu.vector_store %arg9[%c64_191, %c0_192], %125 {strides = array<i32>} : memref<128x576xbf16, #tpu.memory_space<vmem>>, vector<64x64xbf16>,
    %c1_193 = arith.constant 1 : index
    %c0_194 = arith.constant 0 : index
    %c1_195 = arith.constant 1 : index
    %c0_196 = arith.constant 0 : index
    %127 = vector.load %arg8[%c1_193, %c0_194, %c1_195, %c0_196] : memref<2x10x10x64xbf16, #tpu.memory_space<vmem>>, vector<1x8x8x64xbf16>
    %128 = vector.shape_cast %127 : vector<1x8x8x64xbf16> to vector<8x8x64xbf16>
    %129 = vector.shape_cast %128 : vector<8x8x64xbf16> to vector<64x64xbf16>
    %c64_197 = arith.constant 64 : index
    %c64_198 = arith.constant 64 : index
    %130 = vector.load %arg9[%c64_197, %c64_198] : memref<128x576xbf16, #tpu.memory_space<vmem>>, vector<64x64xbf16>
    tpu.vector_store %arg9[%c64_197, %c64_198], %129 {strides = array<i32>} : memref<128x576xbf16, #tpu.memory_space<vmem>>, vector<64x64xbf16>,
    %c1_199 = arith.constant 1 : index
    %c0_200 = arith.constant 0 : index
    %c2_201 = arith.constant 2 : index
    %c0_202 = arith.constant 0 : index
    %131 = vector.load %arg8[%c1_199, %c0_200, %c2_201, %c0_202] : memref<2x10x10x64xbf16, #tpu.memory_space<vmem>>, vector<1x8x8x64xbf16>
    %132 = vector.shape_cast %131 : vector<1x8x8x64xbf16> to vector<8x8x64xbf16>
    %133 = vector.shape_cast %132 : vector<8x8x64xbf16> to vector<64x64xbf16>
    %c64_203 = arith.constant 64 : index
    %c128_204 = arith.constant 128 : index
    %134 = vector.load %arg9[%c64_203, %c128_204] : memref<128x576xbf16, #tpu.memory_space<vmem>>, vector<64x64xbf16>
    tpu.vector_store %arg9[%c64_203, %c128_204], %133 {strides = array<i32>} : memref<128x576xbf16, #tpu.memory_space<vmem>>, vector<64x64xbf16>,
    %c1_205 = arith.constant 1 : index
    %c1_206 = arith.constant 1 : index
    %c0_207 = arith.constant 0 : index
    %c0_208 = arith.constant 0 : index
    %135 = vector.load %arg8[%c1_205, %c1_206, %c0_207, %c0_208] : memref<2x10x10x64xbf16, #tpu.memory_space<vmem>>, vector<1x8x8x64xbf16>
    %136 = vector.shape_cast %135 : vector<1x8x8x64xbf16> to vector<8x8x64xbf16>
    %137 = vector.shape_cast %136 : vector<8x8x64xbf16> to vector<64x64xbf16>
    %c64_209 = arith.constant 64 : index
    %c192_210 = arith.constant 192 : index
    %138 = vector.load %arg9[%c64_209, %c192_210] : memref<128x576xbf16, #tpu.memory_space<vmem>>, vector<64x64xbf16>
    tpu.vector_store %arg9[%c64_209, %c192_210], %137 {strides = array<i32>} : memref<128x576xbf16, #tpu.memory_space<vmem>>, vector<64x64xbf16>,
    %c1_211 = arith.constant 1 : index
    %c1_212 = arith.constant 1 : index
    %c1_213 = arith.constant 1 : index
    %c0_214 = arith.constant 0 : index
    %139 = vector.load %arg8[%c1_211, %c1_212, %c1_213, %c0_214] : memref<2x10x10x64xbf16, #tpu.memory_space<vmem>>, vector<1x8x8x64xbf16>
    %140 = vector.shape_cast %139 : vector<1x8x8x64xbf16> to vector<8x8x64xbf16>
    %141 = vector.shape_cast %140 : vector<8x8x64xbf16> to vector<64x64xbf16>
    %c64_215 = arith.constant 64 : index
    %c256_216 = arith.constant 256 : index
    %142 = vector.load %arg9[%c64_215, %c256_216] : memref<128x576xbf16, #tpu.memory_space<vmem>>, vector<64x64xbf16>
    tpu.vector_store %arg9[%c64_215, %c256_216], %141 {strides = array<i32>} : memref<128x576xbf16, #tpu.memory_space<vmem>>, vector<64x64xbf16>,
    %c1_217 = arith.constant 1 : index
    %c1_218 = arith.constant 1 : index
    %c2_219 = arith.constant 2 : index
    %c0_220 = arith.constant 0 : index
    %143 = vector.load %arg8[%c1_217, %c1_218, %c2_219, %c0_220] : memref<2x10x10x64xbf16, #tpu.memory_space<vmem>>, vector<1x8x8x64xbf16>
    %144 = vector.shape_cast %143 : vector<1x8x8x64xbf16> to vector<8x8x64xbf16>
    %145 = vector.shape_cast %144 : vector<8x8x64xbf16> to vector<64x64xbf16>
    %c64_221 = arith.constant 64 : index
    %c320_222 = arith.constant 320 : index
    %146 = vector.load %arg9[%c64_221, %c320_222] : memref<128x576xbf16, #tpu.memory_space<vmem>>, vector<64x64xbf16>
    tpu.vector_store %arg9[%c64_221, %c320_222], %145 {strides = array<i32>} : memref<128x576xbf16, #tpu.memory_space<vmem>>, vector<64x64xbf16>,
    %c1_223 = arith.constant 1 : index
    %c2_224 = arith.constant 2 : index
    %c0_225 = arith.constant 0 : index
    %c0_226 = arith.constant 0 : index
    %147 = vector.load %arg8[%c1_223, %c2_224, %c0_225, %c0_226] : memref<2x10x10x64xbf16, #tpu.memory_space<vmem>>, vector<1x8x8x64xbf16>
    %148 = vector.shape_cast %147 : vector<1x8x8x64xbf16> to vector<8x8x64xbf16>
    %149 = vector.shape_cast %148 : vector<8x8x64xbf16> to vector<64x64xbf16>
    %c64_227 = arith.constant 64 : index
    %c384_228 = arith.constant 384 : index
    %150 = vector.load %arg9[%c64_227, %c384_228] : memref<128x576xbf16, #tpu.memory_space<vmem>>, vector<64x64xbf16>
    tpu.vector_store %arg9[%c64_227, %c384_228], %149 {strides = array<i32>} : memref<128x576xbf16, #tpu.memory_space<vmem>>, vector<64x64xbf16>,
    %c1_229 = arith.constant 1 : index
    %c2_230 = arith.constant 2 : index
    %c1_231 = arith.constant 1 : index
    %c0_232 = arith.constant 0 : index
    %151 = vector.load %arg8[%c1_229, %c2_230, %c1_231, %c0_232] : memref<2x10x10x64xbf16, #tpu.memory_space<vmem>>, vector<1x8x8x64xbf16>
    %152 = vector.shape_cast %151 : vector<1x8x8x64xbf16> to vector<8x8x64xbf16>
    %153 = vector.shape_cast %152 : vector<8x8x64xbf16> to vector<64x64xbf16>
    %c64_233 = arith.constant 64 : index
    %c448_234 = arith.constant 448 : index
    %154 = vector.load %arg9[%c64_233, %c448_234] : memref<128x576xbf16, #tpu.memory_space<vmem>>, vector<64x64xbf16>
    tpu.vector_store %arg9[%c64_233, %c448_234], %153 {strides = array<i32>} : memref<128x576xbf16, #tpu.memory_space<vmem>>, vector<64x64xbf16>,
    %c1_235 = arith.constant 1 : index
    %c2_236 = arith.constant 2 : index
    %c2_237 = arith.constant 2 : index
    %c0_238 = arith.constant 0 : index
    %155 = vector.load %arg8[%c1_235, %c2_236, %c2_237, %c0_238] : memref<2x10x10x64xbf16, #tpu.memory_space<vmem>>, vector<1x8x8x64xbf16>
    %156 = vector.shape_cast %155 : vector<1x8x8x64xbf16> to vector<8x8x64xbf16>
    %157 = vector.shape_cast %156 : vector<8x8x64xbf16> to vector<64x64xbf16>
    %c64_239 = arith.constant 64 : index
    %c512_240 = arith.constant 512 : index
    %158 = vector.load %arg9[%c64_239, %c512_240] : memref<128x576xbf16, #tpu.memory_space<vmem>>, vector<64x64xbf16>
    tpu.vector_store %arg9[%c64_239, %c512_240], %157 {strides = array<i32>} : memref<128x576xbf16, #tpu.memory_space<vmem>>, vector<64x64xbf16>,
    %c0_241 = arith.constant 0 : index
    %c0_242 = arith.constant 0 : index
    %159 = vector.load %arg9[%c0_241, %c0_242] : memref<128x576xbf16, #tpu.memory_space<vmem>>, vector<128x576xbf16>
    %c0_243 = arith.constant 0 : index
    %c0_244 = arith.constant 0 : index
    %160 = vector.load %arg4[%c0_243, %c0_244] : memref<576x64xbf16, #tpu.memory_space<vmem>>, vector<576x64xbf16>
    %cst_245 = arith.constant dense<0.000000e+00> : vector<128x64xf32>
    %161 = tpu.matmul %159, %160, %cst_245 {dimension_numbers = #tpu.dot_dimension_numbers<[1], [0], [0], [1], [0, 0, 1, 1], [], []>} : vector<128x576xbf16>, vector<576x64xbf16>, vector<128x64xf32> -> vector<128x64xf32>
    %c0_246 = arith.constant 0 : index
    %c0_247 = arith.constant 0 : index
    %162 = vector.load %arg5[%c0_246, %c0_247] : memref<1x64xf32, #tpu.memory_space<vmem>>, vector<1x64xf32>
    %163 = vector.broadcast %162 : vector<1x64xf32> to vector<128x64xf32>
    %164 = arith.addf %161, %163 : vector<128x64xf32>
    %165 = arith.addf %164, %81 : vector<128x64xf32>
    %cst_248 = arith.constant 0.000000e+00 : f32
    %166 = vector.broadcast %cst_248 : f32 to vector<128x64xf32>
    %167 = arith.maximumf %165, %166 : vector<128x64xf32>
    %168 = vector.shape_cast %167 : vector<128x64xf32> to vector<2x8x8x64xf32>
    %169 = arith.truncf %168 : vector<2x8x8x64xf32> to vector<2x8x8x64xbf16>
    %c0_249 = arith.constant 0 : index
    %c0_250 = arith.constant 0 : index
    %c0_251 = arith.constant 0 : index
    %c0_252 = arith.constant 0 : index
    %170 = vector.load %arg6[%c0_249, %c0_250, %c0_251, %c0_252] : memref<2x8x8x64xbf16, #tpu.memory_space<vmem>>, vector<2x8x8x64xbf16>
    tpu.vector_store %arg6[%c0_249, %c0_250, %c0_251, %c0_252], %169 {strides = array<i32>} : memref<2x8x8x64xbf16, #tpu.memory_space<vmem>>, vector<2x8x8x64xbf16>,
    return
  }
  func.func @transform_0(%arg0: i32) -> (i32, i32, i32, i32, i32) {
    %c0_i32 = arith.constant 0 : i32
    %c0_i32_0 = arith.constant 0 : i32
    %c0_i32_1 = arith.constant 0 : i32
    %c0_i32_2 = arith.constant 0 : i32
    %c0_i32_3 = arith.constant 0 : i32
    return %arg0, %c0_i32, %c0_i32_0, %c0_i32_1, %c0_i32_2 : i32, i32, i32, i32, i32
  }
  func.func @transform_1(%arg0: i32) -> (i32, i32) {
    %c0_i32 = arith.constant 0 : i32
    %c0_i32_0 = arith.constant 0 : i32
    %c0_i32_1 = arith.constant 0 : i32
    return %c0_i32, %c0_i32_0 : i32, i32
  }
  func.func @transform_2(%arg0: i32) -> (i32, i32) {
    %c0_i32 = arith.constant 0 : i32
    %c0_i32_0 = arith.constant 0 : i32
    %c0_i32_1 = arith.constant 0 : i32
    return %c0_i32, %c0_i32_0 : i32, i32
  }
  func.func @transform_3(%arg0: i32) -> (i32, i32) {
    %c0_i32 = arith.constant 0 : i32
    %c0_i32_0 = arith.constant 0 : i32
    %c0_i32_1 = arith.constant 0 : i32
    return %c0_i32, %c0_i32_0 : i32, i32
  }
  func.func @transform_4(%arg0: i32) -> (i32, i32) {
    %c0_i32 = arith.constant 0 : i32
    %c0_i32_0 = arith.constant 0 : i32
    %c0_i32_1 = arith.constant 0 : i32
    return %c0_i32, %c0_i32_0 : i32, i32
  }
  func.func @transform_5(%arg0: i32) -> (i32, i32, i32, i32) {
    %c0_i32 = arith.constant 0 : i32
    %c0_i32_0 = arith.constant 0 : i32
    %c0_i32_1 = arith.constant 0 : i32
    %c0_i32_2 = arith.constant 0 : i32
    return %arg0, %c0_i32, %c0_i32_0, %c0_i32_1 : i32, i32, i32, i32
  }
}

</mosaic_0001>

<bundles_post_ra>
// kernel: two_blocks.2
= control target key start
LH: loop header
LB: loop body
LE: loop exit
PB: predicated region body
PF: predicated region fallthrough
CT: control target
= control target key end

     0   :  { %vm126_vm0 = vsmask.f32 3328  ;;  %vm127_vm1 = vsmask.f32 7440  ;;  %s5718_s28 = smov 64   ;;  %s5719_s8 = smov 32   ;;  %s7384_s0 = inlined_call_operand.vmem [shape: bf16[2,4,9,9,32], index: 0, kind: input, shape index: {}]   ;;  %s7385_s1 = inlined_call_operand.vmem [shape: bf16[288,64], index: 1, kind: input, shape index: {}]   ;;  %s7386_s5 = inlined_call_operand.vmem [shape: bf16[32,64], index: 5, kind: input, shape index: {}]   ;;  %s7387_s2 = inlined_call_operand.vmem [shape: f32[1,64], index: 2, kind: input, shape index: {}]   ;;  %s7388_s3 = inlined_call_operand.vmem [shape: bf16[576,64], index: 3, kind: input, shape index: {}]   ;;  %s7389_s4 = inlined_call_operand.vmem [shape: f32[1,64], index: 4, kind: input, shape index: {}]   ;;  %s7390_s6 = inlined_call_operand.vmem [shape: f32[1,64], index: 6, kind: input, shape index: {}]   ;;  %s7391_s7 = inlined_call_operand.vmem [shape: bf16[2,8,8,64], index: 7, kind: output, shape index: {}]  }
   0x1   :  { %v5589_v0 = vld [vmem:[%s7384_s0 + $0x8] ss:$8 sps:$4 sm:$0xff]   ;;  %v5593_v4 = vld [vmem:[%s7384_s0 + $0x58] ss:$8 sps:$4 sm:$0xff]   ;;  %v4819_v6 = vld [vmem:[%s7384_s0 + $0x94] sm:$0x1] }
   0x2   :  { %v5590_v1 = vld [vmem:[%s7384_s0 + $0x48] ss:$8 sps:$4 sm:$0xff]   ;;  %538 = vrot.lane.b32.xlu1 %v5589_v0, %s5718_s28  ;;  %s5720_s17 = smov 96   ;;  %v4820_v7 = vld [vmem:[%s7384_s0 + $0x98] sm:$0xf]  ;;  %v379_v11 = vshll.u32 %v4819_v6, 16  ;;  %vm5814_vm2 = vmor %vm126_vm0, %vm127_vm1 }
   0x3   :  { %v5591_v2 = vld [vmem:[%s7384_s0 + $0x90] ss:$8 sps:$4 sm:$0xff]   ;;  %93 = vrot.lane.b32.xlu0 %v5590_v1, %s5719_s8  ;;  %v4821_v8 = vld [vmem:[%s7384_s0 + $0x9c] sm:$0x1]  ;;  %v384_v12 = vshrl.u32 %v4820_v7, 16  ;;  %v387_v13 = vshll.u32 %v4820_v7, 16 }
   0x4   :  { %v5592_v3 = vld [vmem:[%s7384_s0 + $0x50] ss:$8 sps:$4 sm:$0xff]   ;;  %v393_v14 = vshll.u32 %v4821_v8, 16  ;;  %v110_v15 = vld [vmem:[%s7384_s0] sm:$0xf]  ;;  %v381_v20 = vrot.slane %v379_v11, 5 }
   0x5   :  { %v4818_v5 = vld [vmem:[%s7384_s0 + $0x90] sm:$0xf]  ;;  %v111_v18 = vld [vmem:[%s7384_s0 + $0x4] sm:$0x1]  ;;  %v112_v19 = vld [vmem:[%s7384_s0 + $0x8] sm:$0xf] }
   0x6   :  { %299 = vrot.lane.b32.xlu1 %v5591_v2, %s5720_s17  ;;  %v370_v9 = vshrl.u32 %v4818_v5, 16  ;;  %v373_v10 = vshll.u32 %v4818_v5, 16  ;;  %v386_v21 = vrot.slane %v384_v12, 4  ;;  %v389_v22 = vrot.slane %v387_v13, 5  ;;  %v113_v24 = vld [vmem:[%s7384_s0 + $0xc] sm:$0x1] }
   0x7   :  { %583 = vrot.lane.b32.xlu0 %v5592_v3, %s5720_s17  ;;  %v395_v23 = vrot.slane %v393_v14, 5  ;;  %v130_v26 = vshrl.u32 %v110_v15, 16  ;;  %v133_v27 = vshll.u32 %v110_v15, 16  ;;  %v139_v28 = vshll.u32 %v111_v18, 16  ;;  %v4822_v29 = vld [vmem:[%s7384_s0 + $0xa0] sm:$0xf] }
   0x8   :  { %v372_v16 = vrot.slane %v370_v9, 4  ;;  %v375_v17 = vrot.slane %v373_v10, 5  ;;  %v5621_v30 = vld [vmem:[%s7385_s1 + $0x80] sm:$0xff]   ;;  %v390_v32 = vor.u32 %v389_v22, %v386_v21  ;;  %v144_v33 = vshrl.u32 %v112_v19, 16  ;;  %v4824_v42 = vld [vmem:[%s7384_s0 + $0xa8] sm:$0xf] }
   0x9   :  { %v147_v34 = vshll.u32 %v112_v19, 16  ;;  %v153_v35 = vshll.u32 %v113_v24, 16  ;;  %v4823_v36 = vld [vmem:[%s7384_s0 + $0xa4] sm:$0x1]  ;;  %v132_v39 = vrot.slane %v130_v26, 4  ;;  %v135_v40 = vrot.slane %v133_v27, 5  ;;  %5473 = vmatprep.subr.bf16.mxu1 %v5621_v30 }
   0xa   :  { %95 = vrot.lane.b32.xlu1 %v5593_v4, %s5719_s8  ;;  %v376_v25 = vor.u32 %v375_v17, %v372_v16  ;;  %v5622_v37 = vld [vmem:[%s7385_s1 + $0x40] sm:$0xff]   ;;  %v141_v41 = vrot.slane %v139_v28, 5  ;;  %v391_v43 = vrot.slane %v390_v32, 4  ;;  %v146_v44 = vrot.slane %v144_v33, 4  ;;  %5474 = vmatpush3.bf16.msra.mxu1 %v5621_v30  ;;  %v4825_v53 = vld [vmem:[%s7384_s0 + $0xac] sm:$0x1] }
   0xb   :  { %v149_v45 = vrot.slane %v147_v34, 5  ;;  %v155_v46 = vrot.slane %v153_v35, 5  ;;  %5249 = vmatprep.subr.bf16.mxu0 %v5622_v37  ;;  %v136_v48 = vor.u32 %v135_v40, %v132_v39  ;;  %v398_v49 = vshrl.u32 %v4822_v29, 16  ;;  %v114_v56 = vld [vmem:[%s7384_s0 + $0x10] sm:$0xf]  ;;  %v5623_v62 = vld [vmem:[%s7385_s1] sm:$0xff]  }
   0xc   :  { %v377_v38 = vrot.slane %v376_v25, 4  ;;  %v401_v50 = vshll.u32 %v4822_v29, 16  ;;  %v396_v51 = vsel %vm5814_vm2, %v391_v43, %v395_v23  ;;  %v407_v54 = vshll.u32 %v4823_v36, 16  ;;  %v115_v61 = vld [vmem:[%s7384_s0 + $0x14] sm:$0x1]  ;;  %5250 = vmatpush3.bf16.msra.mxu0 %v5623_v62  ;;  %v5624_v13 = vld [vmem:[%s7385_s1 + $0x88] sm:$0xff]  }
   0xd   :  { %v150_v52 = vor.u32 %v149_v45, %v146_v44  ;;  %v412_v55 = vshrl.u32 %v4824_v42, 16  ;;  %v137_v58 = vrot.slane %v136_v48, 4  ;;  %v400_v59 = vrot.slane %v398_v49, 4  ;;  %v116_v3 = vld [vmem:[%s7384_s0 + $0x18] sm:$0xf]  ;;  %v5625_v17 = vld [vmem:[%s7385_s1 + $0x48] sm:$0xff]   ;;  %5475 = vmatprep.subr.bf16.mxu1 %v5624_v13 }
   0xe   :  { %v382_v47 = vsel %vm5814_vm2, %v377_v38, %v381_v20  ;;  %v403_v60 = vrot.slane %v401_v50, 5  ;;  %v409_v0 = vrot.slane %v407_v54, 5  ;;  %v415_v2 = vshll.u32 %v4824_v42, 16  ;;  %v117_v7 = vld [vmem:[%s7384_s0 + $0x1c] sm:$0x1]  ;;  %v5626_v22 = vld [vmem:[%s7385_s1 + $0x8] sm:$0xff]   ;;  %5476 = vmatpush3.bf16.msra.mxu1 %v5624_v13  ;;  %5251 = vmatprep.subr.bf16.mxu0 %v5625_v17 }
   0xf   :  { %v4834_v57 = vcombine.low %v382_v47, %v396_v51  ;;  %v151_v63 = vrot.slane %v150_v52, 4  ;;  %v414_v1 = vrot.slane %v412_v55, 4  ;;  %v142_v4 = vsel %vm5814_vm2, %v137_v58, %v141_v41  ;;  %v4826_v30 = vld [vmem:[%s7384_s0 + $0xb0] sm:$0xf]  ;;  %v4827_v32 = vld [vmem:[%s7384_s0 + $0xb4] sm:$0x1] }
  0x10   :  { %v404_v5 = vor.u32 %v403_v60, %v400_v59  ;;  %v421_v6 = vshll.u32 %v4825_v53, 16  ;;  %v158_v8 = vshrl.u32 %v114_v56, 16  ;;  %v417_v10 = vrot.slane %v415_v2, 5  ;;  %v4828_v35 = vld [vmem:[%s7384_s0 + $0xb8] sm:$0xf]  ;;  %5252 = vmatpush3.bf16.msra.mxu0 %v5626_v22  ;;  %v5627_v41 = vld [vmem:[%s7385_s1 + $0x50] sm:$0xff]  }
  0x11   :  { %493 = vrot.lane.b32.xlu0 %v4834_v57, %s5719_s8  ;;  %v156_v9 = vsel %vm5814_vm2, %v151_v63, %v155_v46  ;;  %v161_v11 = vshll.u32 %v114_v56, 16  ;;  %v167_v12 = vshll.u32 %v115_v61, 16  ;;  %v172_v21 = vshrl.u32 %v116_v3, 16  ;;  %v4829_v36 = vld [vmem:[%s7384_s0 + $0xbc] sm:$0x1]  ;;  %5253 = vmatprep.subr.bf16.mxu0 %v5627_v41  ;;  %v5628_v50 = vld [vmem:[%s7385_s1 + $0x10] sm:$0xff]  }
  0x12   :  { %v4790_v14 = vcombine.low %v142_v4, %v156_v9  ;;  %v405_v15 = vrot.slane %v404_v5, 4  ;;  %v160_v16 = vrot.slane %v158_v8, 4  ;;  %v418_v18 = vor.u32 %v417_v10, %v414_v1  ;;  %v5594_v43 = vld [vmem:[%s7384_s0 + $0x18] ss:$8 sps:$4 sm:$0xff]   ;;  %v119_v62 = vld [vmem:[%s7384_s0 + $0x24] sm:$0x1] }
  0x13   :  { %v423_v19 = vrot.slane %v421_v6, 5  ;;  %v163_v20 = vrot.slane %v161_v11, 5  ;;  %v169_v23 = vrot.slane %v167_v12, 5  ;;  %v175_v24 = vshll.u32 %v116_v3, 16  ;;  %v118_v58 = vld [vmem:[%s7384_s0 + $0x20] sm:$0xf] }
  0x14   :  { %253 = vrot.lane.b32.xlu1 %v4790_v14, %s5718_s28  ;;  %v181_v25 = vshll.u32 %v117_v7, 16  ;;  %v410_v26 = vsel %vm5814_vm2, %v405_v15, %v409_v0  ;;  %v419_v27 = vrot.slane %v418_v18, 4  ;;  %v174_v29 = vrot.slane %v172_v21, 4  ;;  %5254 = vmatpush3.bf16.msra.mxu0 %v5628_v50  ;;  %v5595_v60 = vld [vmem:[%s7384_s0 + $0x60] ss:$8 sps:$4 sm:$0xff]   ;;  %v5630_v15 = vld [vmem:[%s7385_s1 + $0x58] sm:$0xff]  }
  0x15   :  { %v164_v28 = vor.u32 %v163_v20, %v160_v16  ;;  %v177_v33 = vrot.slane %v175_v24, 5  ;;  %v426_v39 = vshrl.u32 %v4826_v30, 16  ;;  %v429_v40 = vshll.u32 %v4826_v30, 16  ;;  %v120_v63 = vld [vmem:[%s7384_s0 + $0x28] sm:$0xf]  ;;  %v5631_v18 = vld [vmem:[%s7385_s1 + $0x18] sm:$0xff]   ;;  %5255 = vmatprep.subr.bf16.mxu0 %v5630_v15 }
  0x16   :  { %v183_v34 = vrot.slane %v181_v25, 5  ;;  %v424_v37 = vsel %vm5814_vm2, %v419_v27, %v423_v19  ;;  %v435_v45 = vshll.u32 %v4827_v32, 16  ;;  %v440_v46 = vshrl.u32 %v4828_v35, 16  ;;  %v121_v4 = vld [vmem:[%s7384_s0 + $0x2c] sm:$0x1]  ;;  %v5632_v24 = vld [vmem:[%s7385_s1 + $0x60] sm:$0xff]  }
  0x17   :  { %v165_v38 = vrot.slane %v164_v28, 4  ;;  %v4835_v42 = vcombine.low %v410_v26, %v424_v37  ;;  %v178_v44 = vor.u32 %v177_v33, %v174_v29  ;;  %v428_v47 = vrot.slane %v426_v39, 4  ;;  %v5596_v10 = vld [vmem:[%s7384_s0 + $0xa0] ss:$8 sps:$4 sm:$0xff]   ;;  %v4831_v28 = vld [vmem:[%s7384_s0 + $0xc4] sm:$0x1] }
  0x18   :  { %v431_v48 = vrot.slane %v429_v40, 5  ;;  %v443_v49 = vshll.u32 %v4828_v35, 16  ;;  %v442_v53 = vrot.slane %v440_v46, 4  ;;  %v449_v54 = vshll.u32 %v4829_v36, 16  ;;  %v5597_v20 = vld [vmem:[%s7384_s0 + $0x68] ss:$8 sps:$4 sm:$0xff]   ;;  %5256 = vmatpush3.bf16.msra.mxu0 %v5631_v18 }
  0x19   :  { %495 = vrot.lane.b32.xlu0 %v4835_v42, %s5719_s8  ;;  %v170_v51 = vsel %vm5814_vm2, %v165_v38, %v169_v23  ;;  %v179_v52 = vrot.slane %v178_v44, 4  ;;  %v437_v56 = vrot.slane %v435_v45, 5  ;;  %v186_v0 = vshrl.u32 %v118_v58, 16  ;;  %v4830_v27 = vld [vmem:[%s7384_s0 + $0xc0] sm:$0xf]  ;;  %5257 = vmatprep.subr.bf16.mxu0 %v5632_v24 }
  0x1a   :  { %v432_v55 = vor.u32 %v431_v48, %v428_v47  ;;  %v445_v57 = vrot.slane %v443_v49, 5  ;;  %v451_v61 = vrot.slane %v449_v54, 5  ;;  %v189_v5 = vshll.u32 %v118_v58, 16  ;;  %v4832_v29 = vld [vmem:[%s7384_s0 + $0xc8] sm:$0xf] }
  0x1b   :  { %v184_v59 = vsel %vm5814_vm2, %v179_v52, %v183_v34  ;;  %v188_v6 = vrot.slane %v186_v0, 4  ;;  %v195_v7 = vshll.u32 %v119_v62, 16  ;;  %v200_v8 = vshrl.u32 %v120_v63, 16  ;;  %v4833_v32 = vld [vmem:[%s7384_s0 + $0xcc] sm:$0x1] }
  0x1c   :  { %v4791_v1 = vcombine.low %v170_v51, %v184_v59  ;;  %v433_v2 = vrot.slane %v432_v55, 4  ;;  %v446_v3 = vor.u32 %v445_v57, %v442_v53  ;;  %v203_v9 = vshll.u32 %v120_v63, 16  ;;  %v5598_v44 = vld [vmem:[%s7384_s0 + $0x28] ss:$8 sps:$4 sm:$0xff]   ;;  %v124_v57 = vld [vmem:[%s7384_s0 + $0x38] sm:$0xf] }
  0x1d   :  { %540 = vrot.lane.b32.xlu0 %v5594_v43, %s5718_s28  ;;  %v191_v13 = vrot.slane %v189_v5, 5  ;;  %v209_v14 = vshll.u32 %v121_v4, 16  ;;  %v202_v16 = vrot.slane %v200_v8, 4  ;;  %v197_v22 = vrot.slane %v195_v7, 5  ;;  %v5633_v43 = vld [vmem:[%s7385_s1 + $0x20] sm:$0xff]   ;;  %v5636_v48 = vld [vmem:[%s7385_s1 + $0x68] sm:$0xff]  }
  0x1e   :  { %255 = vrot.lane.b32.xlu1 %v4791_v1, %s5718_s28  ;;  %v438_v11 = vsel %vm5814_vm2, %v433_v2, %v437_v56  ;;  %v447_v12 = vrot.slane %v446_v3, 4  ;;  %v205_v17 = vrot.slane %v203_v9, 5  ;;  %v454_v33 = vshrl.u32 %v4830_v27, 16  ;;  %5258 = vmatpush3.bf16.msra.mxu0 %v5633_v43  ;;  %v5599_v53 = vld [vmem:[%s7384_s0 + $0x70] ss:$8 sps:$4 sm:$0xff]   ;;  %v5637_v7 = vld [vmem:[%s7385_s1 + $0x28] sm:$0xff]  }
  0x1f   :  { %v192_v21 = vor.u32 %v191_v13, %v188_v6  ;;  %v211_v23 = vrot.slane %v209_v14, 5  ;;  %v457_v34 = vshll.u32 %v4830_v27, 16  ;;  %v463_v35 = vshll.u32 %v4831_v28, 16  ;;  %v122_v55 = vld [vmem:[%s7384_s0 + $0x30] sm:$0xf]  ;;  %5259 = vmatprep.subr.bf16.mxu0 %v5636_v48 }
  0x20   :  { %v452_v19 = vsel %vm5814_vm2, %v447_v12, %v451_v61  ;;  %v206_v26 = vor.u32 %v205_v17, %v202_v16  ;;  %v468_v37 = vshrl.u32 %v4832_v29, 16  ;;  %v471_v38 = vshll.u32 %v4832_v29, 16  ;;  %v123_v56 = vld [vmem:[%s7384_s0 + $0x34] sm:$0x1]  ;;  %v5600_v58 = vld [vmem:[%s7384_s0 + $0xb0] ss:$8 sps:$4 sm:$0xff]  }
  0x21   :  { %585 = vrot.lane.b32.xlu0 %v5595_v60, %s5720_s17  ;;  %v4836_v25 = vcombine.low %v438_v11, %v452_v19  ;;  %v193_v30 = vrot.slane %v192_v21, 4  ;;  %v477_v39 = vshll.u32 %v4833_v32, 16  ;;  %v456_v41 = vrot.slane %v454_v33, 4  ;;  %v125_v60 = vld [vmem:[%s7384_s0 + $0x3c] sm:$0x1]  ;;  %v5639_v11 = vld [vmem:[%s7385_s1 + $0x70] sm:$0xff]  }
  0x22   :  { %301 = vrot.lane.b32.xlu1 %v5596_v10, %s5720_s17  ;;  %v207_v36 = vrot.slane %v206_v26, 4  ;;  %v459_v42 = vrot.slane %v457_v34, 5  ;;  %v470_v46 = vrot.slane %v468_v37, 4  ;;  %v473_v47 = vrot.slane %v471_v38, 5  ;;  %v5601_v12 = vld [vmem:[%s7384_s0 + $0x78] ss:$8 sps:$4 sm:$0xff]   ;;  %5260 = vmatpush3.bf16.msra.mxu0 %v5637_v7 }
  0x23   :  { %v198_v40 = vsel %vm5814_vm2, %v193_v30, %v197_v22  ;;  %v465_v51 = vrot.slane %v463_v35, 5  ;;  %v479_v52 = vrot.slane %v477_v39, 5  ;;  %v214_v61 = vshrl.u32 %v122_v55, 16  ;;  %v4950_v18 = vld [vmem:[%s7384_s0 + $0x1b0] sm:$0xf]  ;;  %5261 = vmatprep.subr.bf16.mxu0 %v5639_v11  ;;  %v5641_v39 = vld [vmem:[%s7385_s1 + $0x78] sm:$0xff]  }
  0x24   :  { %v212_v45 = vsel %vm5814_vm2, %v207_v36, %v211_v23  ;;  %v460_v50 = vor.u32 %v459_v42, %v456_v41  ;;  %v474_v54 = vor.u32 %v473_v47, %v470_v46  ;;  %v217_v62 = vshll.u32 %v122_v55, 16  ;;  %v4951_v19 = vld [vmem:[%s7384_s0 + $0x1b4] sm:$0x1]  ;;  %v4953_v22 = vld [vmem:[%s7384_s0 + $0x1bc] sm:$0x1] }
  0x25   :  { %497 = vrot.lane.b32.xlu0 %v4836_v25, %s5719_s8  ;;  %v4792_v49 = vcombine.low %v198_v40, %v212_v45  ;;  %v223_v63 = vshll.u32 %v123_v56, 16  ;;  %v228_v1 = vshrl.u32 %v124_v57, 16  ;;  %v231_v2 = vshll.u32 %v124_v57, 16  ;;  %v5640_v34 = vld [vmem:[%s7385_s1 + $0x30] sm:$0xff]   ;;  %v5602_v35 = vld [vmem:[%s7384_s0 + $0x38] ss:$8 sps:$4 sm:$0xff]  }
  0x26   :  { %97 = vrot.lane.b32.xlu1 %v5597_v20, %s5719_s8  ;;  %v461_v59 = vrot.slane %v460_v50, 4  ;;  %v475_v0 = vrot.slane %v474_v54, 4  ;;  %v237_v3 = vshll.u32 %v125_v60, 16  ;;  %v216_v5 = vrot.slane %v214_v61, 4  ;;  %v4952_v20 = vld [vmem:[%s7384_s0 + $0x1b8] sm:$0xf]  ;;  %5262 = vmatpush3.bf16.msra.mxu0 %v5640_v34 }
  0x27   :  { %v219_v6 = vrot.slane %v217_v62, 5  ;;  %v230_v9 = vrot.slane %v228_v1, 4  ;;  %v233_v10 = vrot.slane %v231_v2, 5  ;;  %v225_v14 = vrot.slane %v223_v63, 5  ;;  %v4906_v46 = vld [vmem:[%s7384_s0 + $0x120] sm:$0xf]  ;;  %5263 = vmatprep.subr.bf16.mxu0 %v5641_v39 }
  0x28   :  { %v466_v4 = vsel %vm5814_vm2, %v461_v59, %v465_v51  ;;  %v480_v8 = vsel %vm5814_vm2, %v475_v0, %v479_v52  ;;  %v239_v15 = vrot.slane %v237_v3, 5  ;;  %v1084_v23 = vshrl.u32 %v4950_v18, 16  ;;  %v4907_v47 = vld [vmem:[%s7384_s0 + $0x124] sm:$0x1]  ;;  %v4908_v48 = vld [vmem:[%s7384_s0 + $0x128] sm:$0xf] }
  0x29   :  { %542 = vrot.lane.b32.xlu0 %v5598_v44, %s5718_s28  ;;  %v220_v13 = vor.u32 %v219_v6, %v216_v5  ;;  %v4837_v16 = vcombine.low %v466_v4, %v480_v8  ;;  %v234_v17 = vor.u32 %v233_v10, %v230_v9  ;;  %v1087_v24 = vshll.u32 %v4950_v18, 16  ;;  %v5603_v44 = vld [vmem:[%s7384_s0 + $0x80] ss:$8 sps:$4 sm:$0xff]   ;;  %v4909_v51 = vld [vmem:[%s7384_s0 + $0x12c] sm:$0x1]  ;;  %v5642_v62 = vld [vmem:[%s7385_s1 + $0x38] sm:$0xff]  }
  0x2a   :  { %257 = vrot.lane.b32.xlu1 %v4792_v49, %s5718_s28  ;;  %v1093_v25 = vshll.u32 %v4951_v19, 16  ;;  %v1098_v27 = vshrl.u32 %v4952_v20, 16  ;;  %v1101_v28 = vshll.u32 %v4952_v20, 16  ;;  %v1107_v29 = vshll.u32 %v4953_v22, 16  ;;  %v5604_v49 = vld [vmem:[%s7384_s0 + $0xc0] ss:$8 sps:$4 sm:$0xff]   ;;  %5264 = vmatpush3.bf16.msra.mxu0 %v5642_v62 }
  0x2b   :  { %v221_v21 = vrot.slane %v220_v13, 4  ;;  %v235_v26 = vrot.slane %v234_v17, 4  ;;  %v1086_v32 = vrot.slane %v1084_v23, 4  ;;  %v1089_v33 = vrot.slane %v1087_v24, 5  ;;  %v6051_v2 = vld [vmem:[%s7386_s5] sm:$0xff]  }
  0x2c   :  { %v1100_v37 = vrot.slane %v1098_v27, 4  ;;  %v1103_v38 = vrot.slane %v1101_v28, 5  ;;  %v1095_v42 = vrot.slane %v1093_v25, 5  ;;  %v1109_v43 = vrot.slane %v1107_v29, 5  ;;  %v5605_v3 = vld [vmem:[%s7384_s0 + $0x168] ss:$8 sps:$4 sm:$0xff]   ;;  %5493 = vmatprep.subr.bf16.mxu1 %v6051_v2 }
  0x2d   :  { %587 = vrot.lane.b32.xlu0 %v5599_v53, %s5720_s17  ;;  %v226_v30 = vsel %vm5814_vm2, %v221_v21, %v225_v14  ;;  %v240_v36 = vsel %vm5814_vm2, %v235_v26, %v239_v15  ;;  %v1090_v41 = vor.u32 %v1089_v33, %v1086_v32  ;;  %v846_v52 = vshrl.u32 %v4906_v46, 16  ;;  %v4954_v9 = vld [vmem:[%s7384_s0 + $0x1c0] sm:$0xf]  ;;  %v4955_v10 = vld [vmem:[%s7384_s0 + $0x1c4] sm:$0x1] }
  0x2e   :  { %303 = vrot.lane.b32.xlu1 %v5600_v58, %s5720_s17  ;;  %v4793_v40 = vcombine.low %v226_v30, %v240_v36  ;;  %v1104_v45 = vor.u32 %v1103_v38, %v1100_v37  ;;  %v849_v53 = vshll.u32 %v4906_v46, 16  ;;  %v855_v54 = vshll.u32 %v4907_v47, 16  ;;  %v4956_v11 = vld [vmem:[%s7384_s0 + $0x1c8] sm:$0xf]  ;;  %v4957_v13 = vld [vmem:[%s7384_s0 + $0x1cc] sm:$0x1] }
  0x2f   :  { %v1091_v50 = vrot.slane %v1090_v41, 4  ;;  %v860_v56 = vshrl.u32 %v4908_v48, 16  ;;  %v863_v57 = vshll.u32 %v4908_v48, 16  ;;  %v869_v58 = vshll.u32 %v4909_v51, 16  ;;  %v5606_v24 = vld [vmem:[%s7384_s0 + $0x128] ss:$8 sps:$4 sm:$0xff]  }
  0x30   :  { %v1105_v55 = vrot.slane %v1104_v45, 4  ;;  %v848_v60 = vrot.slane %v846_v52, 4  ;;  %v851_v61 = vrot.slane %v849_v53, 5  ;;  %v857_v5 = vrot.slane %v855_v54, 5  ;;  %v5607_v33 = vld [vmem:[%s7384_s0 + $0x170] ss:$8 sps:$4 sm:$0xff]  }
  0x31   :  { %499 = vrot.lane.b32.xlu0 %v4837_v16, %s5719_s8  ;;  %v1096_v59 = vsel %vm5814_vm2, %v1091_v50, %v1095_v42  ;;  %v862_v0 = vrot.slane %v860_v56, 4  ;;  %v865_v1 = vrot.slane %v863_v57, 5  ;;  %v871_v6 = vrot.slane %v869_v58, 5  ;;  %v4911_v36 = vld [vmem:[%s7384_s0 + $0x134] sm:$0x1] }
  0x32   :  { %99 = vrot.lane.b32.xlu1 %v5601_v12, %s5719_s8  ;;  %v1110_v63 = vsel %vm5814_vm2, %v1105_v55, %v1109_v43  ;;  %v852_v4 = vor.u32 %v851_v61, %v848_v60  ;;  %v1112_v14 = vshrl.u32 %v4954_v9, 16  ;;  %v1115_v15 = vshll.u32 %v4954_v9, 16  ;;  %v4912_v37 = vld [vmem:[%s7384_s0 + $0x138] sm:$0xf]  ;;  %v4913_v39 = vld [vmem:[%s7384_s0 + $0x13c] sm:$0x1] }
  0x33   :  { %v4966_v7 = vcombine.low %v1096_v59, %v1110_v63  ;;  %v866_v8 = vor.u32 %v865_v1, %v862_v0  ;;  %v1121_v16 = vshll.u32 %v4955_v10, 16  ;;  %v1126_v18 = vshrl.u32 %v4956_v11, 16  ;;  %v5608_v47 = vld [vmem:[%s7384_s0 + $0x1b0] ss:$8 sps:$4 sm:$0xff]   ;;  %v4959_v61 = vld [vmem:[%s7384_s0 + $0x1d4] sm:$0x1] }
  0x34   :  { %v853_v12 = vrot.slane %v852_v4, 4  ;;  %v1129_v19 = vshll.u32 %v4956_v11, 16  ;;  %v1135_v20 = vshll.u32 %v4957_v13, 16  ;;  %v1114_v22 = vrot.slane %v1112_v14, 4  ;;  %v5609_v54 = vld [vmem:[%s7384_s0 + $0x178] ss:$8 sps:$4 sm:$0xff]  }
  0x35   :  { %544 = vrot.lane.b32.xlu0 %v5602_v35, %s5718_s28  ;;  %v867_v17 = vrot.slane %v866_v8, 4  ;;  %v1117_v23 = vrot.slane %v1115_v15, 5  ;;  %v1128_v26 = vrot.slane %v1126_v18, 4  ;;  %v1123_v30 = vrot.slane %v1121_v16, 5  ;;  %v4910_v35 = vld [vmem:[%s7384_s0 + $0x130] sm:$0xf] }
  0x36   :  { %259 = vrot.lane.b32.xlu1 %v4793_v40, %s5718_s28  ;;  %v858_v21 = vsel %vm5814_vm2, %v853_v12, %v857_v5  ;;  %v1131_v27 = vrot.slane %v1129_v19, 5  ;;  %v1137_v32 = vrot.slane %v1135_v20, 5  ;;  %v874_v40 = vshrl.u32 %v4910_v35, 16  ;;  %v4958_v60 = vld [vmem:[%s7384_s0 + $0x1d0] sm:$0xf] }
  0x37   :  { %v872_v25 = vsel %vm5814_vm2, %v867_v17, %v871_v6  ;;  %v1118_v29 = vor.u32 %v1117_v23, %v1114_v22  ;;  %v877_v41 = vshll.u32 %v4910_v35, 16  ;;  %v883_v42 = vshll.u32 %v4911_v36, 16  ;;  %v4960_v62 = vld [vmem:[%s7384_s0 + $0x1d8] sm:$0xf]  ;;  %v4961_v0 = vld [vmem:[%s7384_s0 + $0x1dc] sm:$0x1] }
  0x38   :  { %v4922_v28 = vcombine.low %v858_v21, %v872_v25  ;;  %v1132_v34 = vor.u32 %v1131_v27, %v1128_v26  ;;  %v891_v45 = vshll.u32 %v4912_v37, 16  ;;  %v897_v46 = vshll.u32 %v4913_v39, 16  ;;  %v5610_v12 = vld [vmem:[%s7384_s0 + $0x138] ss:$8 sps:$4 sm:$0xff]   ;;  %v4915_v23 = vld [vmem:[%s7384_s0 + $0x144] sm:$0x1] }
  0x39   :  { %589 = vrot.lane.b32.xlu0 %v5603_v44, %s5720_s17  ;;  %v1119_v38 = vrot.slane %v1118_v29, 4  ;;  %v888_v44 = vshrl.u32 %v4912_v37, 16  ;;  %v879_v50 = vrot.slane %v877_v41, 5  ;;  %v885_v56 = vrot.slane %v883_v42, 5  ;;  %v5611_v20 = vld [vmem:[%s7384_s0 + $0x180] ss:$8 sps:$4 sm:$0xff]  }
  0x3a   :  { %305 = vrot.lane.b32.xlu1 %v5604_v49, %s5720_s17  ;;  %v1133_v43 = vrot.slane %v1132_v34, 4  ;;  %v876_v49 = vrot.slane %v874_v40, 4  ;;  %v893_v53 = vrot.slane %v891_v45, 5  ;;  %v899_v57 = vrot.slane %v897_v46, 5  ;;  %v4914_v22 = vld [vmem:[%s7384_s0 + $0x140] sm:$0xf] }
  0x3b   :  { %v1124_v48 = vsel %vm5814_vm2, %v1119_v38, %v1123_v30  ;;  %v890_v52 = vrot.slane %v888_v44, 4  ;;  %v1140_v1 = vshrl.u32 %v4958_v60, 16  ;;  %v1149_v4 = vshll.u32 %v4959_v61, 16  ;;  %v4917_v26 = vld [vmem:[%s7384_s0 + $0x14c] sm:$0x1] }
  0x3c   :  { %v1138_v51 = vsel %vm5814_vm2, %v1133_v43, %v1137_v32  ;;  %v880_v55 = vor.u32 %v879_v50, %v876_v49  ;;  %v1154_v6 = vshrl.u32 %v4960_v62, 16  ;;  %v1163_v8 = vshll.u32 %v4961_v0, 16  ;;  %v5612_v35 = vld [vmem:[%s7384_s0 + $0x1c0] ss:$8 sps:$4 sm:$0xff]   ;;  %v4963_v49 = vld [vmem:[%s7384_s0 + $0x1e4] sm:$0x1] }
  0x3d   :  { %1207 = vrot.lane.b32.xlu0 %v4966_v7, %s5719_s8  ;;  %v4967_v58 = vcombine.low %v1124_v48, %v1138_v51  ;;  %v894_v59 = vor.u32 %v893_v53, %v890_v52  ;;  %v1157_v7 = vshll.u32 %v4960_v62, 16  ;;  %v1142_v10 = vrot.slane %v1140_v1, 4  ;;  %v5613_v42 = vld [vmem:[%s7384_s0 + $0x188] ss:$8 sps:$4 sm:$0xff]   ;;  %v4962_v48 = vld [vmem:[%s7384_s0 + $0x1e0] sm:$0xf] }
  0x3e   :  { %813 = vrot.lane.b32.xlu1 %v5605_v3, %s5719_s8  ;;  %v881_v63 = vrot.slane %v880_v55, 4  ;;  %v1143_v3 = vshll.u32 %v4958_v60, 16  ;;  %v1156_v14 = vrot.slane %v1154_v6, 4  ;;  %v1151_v18 = vrot.slane %v1149_v4, 5  ;;  %v4964_v50 = vld [vmem:[%s7384_s0 + $0x1e8] sm:$0xf] }
  0x3f   :  { %v895_v5 = vrot.slane %v894_v59, 4  ;;  %v1159_v15 = vrot.slane %v1157_v7, 5  ;;  %v1165_v19 = vrot.slane %v1163_v8, 5  ;;  %v902_v27 = vshrl.u32 %v4914_v22, 16  ;;  %v4965_v52 = vld [vmem:[%s7384_s0 + $0x1ec] sm:$0x1] }
  0x40   :  { %v886_v9 = vsel %vm5814_vm2, %v881_v63, %v885_v56  ;;  %v1145_v11 = vrot.slane %v1143_v3, 5  ;;  %v911_v29 = vshll.u32 %v4915_v23, 16  ;;  %v925_v34 = vshll.u32 %v4917_v26, 16  ;;  %v5614_v63 = vld [vmem:[%s7384_s0 + $0x148] ss:$8 sps:$4 sm:$0xff]  }
  0x41   :  { %1252 = vrot.lane.b32.xlu0 %v5606_v24, %s5718_s28  ;;  %v900_v13 = vsel %vm5814_vm2, %v895_v5, %v899_v57  ;;  %v1160_v21 = vor.u32 %v1159_v15, %v1156_v14  ;;  %v4916_v24 = vld [vmem:[%s7384_s0 + $0x148] sm:$0xf]  ;;  %v904_v37 = vrot.slane %v902_v27, 4  ;;  %v1168_v53 = vshrl.u32 %v4962_v48, 16  ;;  %v5615_v8 = vld [vmem:[%s7384_s0 + $0x190] ss:$8 sps:$4 sm:$0xff]  }
  0x42   :  { %969 = vrot.lane.b32.xlu1 %v4922_v28, %s5718_s28  ;;  %v4923_v16 = vcombine.low %v886_v9, %v900_v13  ;;  %v1146_v17 = vor.u32 %v1145_v11, %v1142_v10  ;;  %v905_v28 = vshll.u32 %v4914_v22, 16  ;;  %v916_v32 = vshrl.u32 %v4916_v24, 16  ;;  %v4918_v10 = vld [vmem:[%s7384_s0 + $0x150] sm:$0xf]  ;;  %v4919_v11 = vld [vmem:[%s7384_s0 + $0x154] sm:$0x1] }
  0x43   :  { %v1161_v30 = vrot.slane %v1160_v21, 4  ;;  %v913_v44 = vrot.slane %v911_v29, 5  ;;  %v927_v45 = vrot.slane %v925_v34, 5  ;;  %v1177_v55 = vshll.u32 %v4963_v49, 16  ;;  %v4921_v14 = vld [vmem:[%s7384_s0 + $0x15c] sm:$0x1] }
  0x44   :  { %v1147_v25 = vrot.slane %v1146_v17, 4  ;;  %v907_v38 = vrot.slane %v905_v28, 5  ;;  %v918_v40 = vrot.slane %v916_v32, 4  ;;  %v1182_v57 = vshrl.u32 %v4964_v50, 16  ;;  %v5616_v22 = vld [vmem:[%s7384_s0 + $0x1d0] ss:$8 sps:$4 sm:$0xff]  }
  0x45   :  { %1297 = vrot.lane.b32.xlu0 %v5607_v33, %s5720_s17  ;;  %v919_v33 = vshll.u32 %v4916_v24, 16  ;;  %v1166_v39 = vsel %vm5814_vm2, %v1161_v30, %v1165_v19  ;;  %v1191_v59 = vshll.u32 %v4965_v52, 16  ;;  %v1170_v61 = vrot.slane %v1168_v53, 4  ;;  %v5617_v29 = vld [vmem:[%s7384_s0 + $0x198] ss:$8 sps:$4 sm:$0xff]  }
  0x46   :  { %1014 = vrot.lane.b32.xlu1 %v5608_v47, %s5720_s17  ;;  %v1152_v36 = vsel %vm5814_vm2, %v1147_v25, %v1151_v18  ;;  %v908_v43 = vor.u32 %v907_v38, %v904_v37  ;;  %v1184_v1 = vrot.slane %v1182_v57, 4  ;;  %v1179_v6 = vrot.slane %v1177_v55, 5  ;;  %v5618_v37 = vld [vmem:[%s7384_s0 + $0x158] ss:$8 sps:$4 sm:$0xff]  }
  0x47   :  { %v921_v41 = vrot.slane %v919_v33, 5  ;;  %v4968_v46 = vcombine.low %v1152_v36, %v1166_v39  ;;  %v1193_v7 = vrot.slane %v1191_v59, 5  ;;  %v930_v15 = vshrl.u32 %v4918_v10, 16  ;;  %v5619_v49 = vld [vmem:[%s7384_s0 + $0x1a0] ss:$8 sps:$4 sm:$0xff]  }
  0x48   :  { %v909_v51 = vrot.slane %v908_v43, 4  ;;  %v939_v17 = vshll.u32 %v4919_v11, 16  ;;  %v953_v21 = vshll.u32 %v4921_v14, 16  ;;  %v4864_v43 = vld [vmem:[%s7384_s0 + $0x10] sm:$0xf]  ;;  %vm59_vm3 = vcmask 261120  }
  0x49   :  { %1209 = vrot.lane.b32.xlu0 %v4967_v58, %s5719_s8  ;;  %v922_v47 = vor.u32 %v921_v41, %v918_v40  ;;  %v1185_v58 = vshll.u32 %v4964_v50, 16  ;;  %v932_v24 = vrot.slane %v930_v15, 4  ;;  %v4862_v41 = vld [vmem:[%s7384_s0 + $0x8] sm:$0xf]  ;;  %v630_v50 = vshrl.u32 %v4864_v43, 16 }
  0x4a   :  { %815 = vrot.lane.b32.xlu1 %v5609_v54, %s5719_s8  ;;  %v1171_v54 = vshll.u32 %v4962_v48, 16  ;;  %v914_v60 = vsel %vm5814_vm2, %v909_v51, %v913_v44  ;;  %v941_v32 = vrot.slane %v939_v17, 5  ;;  %v955_v33 = vrot.slane %v953_v21, 5  ;;  %v5620_v53 = vld [vmem:[%s7384_s0 + $0x1e0] ss:$8 sps:$4 sm:$0xff]  }
  0x4b   :  { %v923_v56 = vrot.slane %v922_v47, 4  ;;  %v1187_v3 = vrot.slane %v1185_v58, 5  ;;  %v619_v47 = vshll.u32 %v4862_v41, 16  ;;  %v633_v51 = vshll.u32 %v4864_v43, 16 }
  0x4c   :  { %v1173_v62 = vrot.slane %v1171_v54, 5  ;;  %v632_v57 = vrot.slane %v630_v50, 4  ;;  %vm105_vm4 = vcmask 523520   ;;  %v4876_v50 = vld [vmem:[%s7384_s0 + $0x40] sm:$0xf]  ;;  %vm265_vm5 = vcmask 785920  }
  0x4d   :  { %1254 = vrot.lane.b32.xlu0 %v5610_v12, %s5718_s28  ;;  %v928_v0 = vsel %vm5814_vm2, %v923_v56, %v927_v45  ;;  %v1188_v9 = vor.u32 %v1187_v3, %v1184_v1  ;;  %v4920_v12 = vld [vmem:[%s7384_s0 + $0x158] sm:$0xf]  ;;  %v4865_v45 = vld [vmem:[%s7384_s0 + $0x14] sm:$0x1]  ;;  %v621_v55 = vrot.slane %v619_v47, 5  ;;  %v635_v58 = vrot.slane %v633_v51, 5 }
  0x4e   :  { %971 = vrot.lane.b32.xlu1 %v4923_v16, %s5718_s28  ;;  %v4924_v4 = vcombine.low %v914_v60, %v928_v0  ;;  %v1174_v5 = vor.u32 %v1173_v62, %v1170_v61  ;;  %v933_v16 = vshll.u32 %v4918_v10, 16  ;;  %v944_v19 = vshrl.u32 %v4920_v12, 16  ;;  %v4866_v60 = vld [vmem:[%s7384_s0 + $0x18] sm:$0xf]  ;;  %v4867_v62 = vld [vmem:[%s7384_s0 + $0x1c] sm:$0x1] }
  0x4f   :  { %v1189_v18 = vrot.slane %v1188_v9, 4  ;;  %v639_v52 = vshll.u32 %v4865_v45, 16  ;;  %v4869_v0 = vld [vmem:[%s7384_s0 + $0x24] sm:$0x1]  ;;  %v636_v1 = vor.u32 %v635_v58, %v632_v57  ;;  %v644_v3 = vshrl.u32 %v4866_v60, 16 }
  0x50   :  { %v1175_v13 = vrot.slane %v1174_v5, 4  ;;  %v935_v25 = vrot.slane %v933_v16, 5  ;;  %v946_v27 = vrot.slane %v944_v19, 4  ;;  %v653_v5 = vshll.u32 %v4867_v62, 16  ;;  %v4875_v47 = vld [vmem:[%s7384_s0 + $0x3c] sm:$0x1] }
  0x51   :  { %1299 = vrot.lane.b32.xlu0 %v5611_v20, %s5720_s17  ;;  %v947_v20 = vshll.u32 %v4920_v12, 16  ;;  %v1194_v26 = vsel %vm5814_vm2, %v1189_v18, %v1193_v7  ;;  %v641_v59 = vrot.slane %v639_v52, 5  ;;  %v667_v9 = vshll.u32 %v4869_v0, 16  ;;  %v4877_v51 = vld [vmem:[%s7384_s0 + $0x44] sm:$0x1] }
  0x52   :  { %1016 = vrot.lane.b32.xlu1 %v5612_v35, %s5720_s17  ;;  %v1180_v23 = vsel %vm5814_vm2, %v1175_v13, %v1179_v6  ;;  %v936_v30 = vor.u32 %v935_v25, %v932_v24  ;;  %v637_v10 = vrot.slane %v636_v1, 4  ;;  %v646_v11 = vrot.slane %v644_v3, 4  ;;  %v4871_v25 = vld [vmem:[%s7384_s0 + $0x2c] sm:$0x1] }
  0x53   :  { %v949_v28 = vrot.slane %v947_v20, 5  ;;  %v4969_v34 = vcombine.low %v1180_v23, %v1194_v26  ;;  %v655_v13 = vrot.slane %v653_v5, 5  ;;  %v669_v17 = vrot.slane %v667_v9, 5  ;;  %v5629_v20 = vld [vmem:[%s7384_s0] ss:$8 sps:$4 sm:$0xff]  }
  0x54   :  { %v937_v36 = vrot.slane %v936_v30, 4  ;;  %v642_v18 = vsel %vm5814_vm2, %v637_v10, %v641_v59  ;;  %v4870_v23 = vld [vmem:[%s7384_s0 + $0x28] sm:$0xf]  ;;  %60 = vst.msk [vmem:[#allocation2] sm:$0xff] %vm59_vm3, %v5629_v20  ;;  %v4872_v26 = vld [vmem:[%s7384_s0 + $0x30] sm:$0xf] }
  0x55   :  { %1211 = vrot.lane.b32.xlu0 %v4968_v46, %s5719_s8  ;;  %v950_v35 = vor.u32 %v949_v28, %v946_v27  ;;  %v616_v46 = vshrl.u32 %v4862_v41, 16  ;;  %v672_v27 = vshrl.u32 %v4870_v23, 16  ;;  %v675_v30 = vshll.u32 %v4870_v23, 16  ;;  %v5634_v10 = vld [vmem:[%s7384_s0 + $0x10] ss:$8 sps:$4 sm:$0xff]  }
  0x56   :  { %817 = vrot.lane.b32.xlu1 %v5613_v42, %s5719_s8  ;;  %v942_v39 = vsel %vm5814_vm2, %v937_v36, %v941_v32  ;;  %v4863_v42 = vld [vmem:[%s7384_s0 + $0xc] sm:$0x1]  ;;  %v681_v32 = vshll.u32 %v4871_v25, 16  ;;  %v689_v36 = vshll.u32 %v4872_v26, 16  ;;  %v717_v57 = vshll.u32 %v4876_v50, 16  ;;  %61 = vst.msk [vmem:[#allocation2 + $0x18] sm:$0xff] %vm59_vm3, %v5634_v10 }
  0x57   :  { %v951_v38 = vrot.slane %v950_v35, 4  ;;  %v625_v48 = vshll.u32 %v4863_v42, 16  ;;  %v618_v54 = vrot.slane %v616_v46, 4  ;;  %v674_v35 = vrot.slane %v672_v27, 4  ;;  %v4874_v46 = vld [vmem:[%s7384_s0 + $0x38] sm:$0xf] }
  0x58   :  { %v700_v52 = vshrl.u32 %v4874_v46, 16  ;;  %v719_v1 = vrot.slane %v717_v57, 5  ;;  %v4996_v23 = vld [vmem:[%s7384_s0 + $0x130] sm:$0xf]  ;;  %vm311_vm6 = vcmask 1048320   ;;  %vm2022_vm7 = vcmask 519168  }
  0x59   :  { %1256 = vrot.lane.b32.xlu0 %v5614_v63, %s5718_s28  ;;  %v956_v40 = vsel %vm5814_vm2, %v951_v38, %v955_v33  ;;  %v627_v56 = vrot.slane %v625_v48, 5  ;;  %v622_v61 = vor.u32 %v621_v55, %v618_v54  ;;  %v4868_v63 = vld [vmem:[%s7384_s0 + $0x20] sm:$0xf]  ;;  %v686_v33 = vshrl.u32 %v4872_v26, 16 }
  0x5a   :  { %973 = vrot.lane.b32.xlu1 %v4924_v4, %s5718_s28  ;;  %v4925_v44 = vcombine.low %v942_v39, %v956_v40  ;;  %v647_v4 = vshll.u32 %v4866_v60, 16  ;;  %v658_v7 = vshrl.u32 %v4868_v63, 16  ;;  %v677_v39 = vrot.slane %v675_v30, 5 }
  0x5b   :  { %v623_v6 = vrot.slane %v622_v61, 4  ;;  %v683_v40 = vrot.slane %v681_v32, 5  ;;  %v688_v41 = vrot.slane %v686_v33, 4  ;;  %v709_v55 = vshll.u32 %v4875_v47, 16 }
  0x5c   :  { %v649_v12 = vrot.slane %v647_v4, 5  ;;  %v660_v15 = vrot.slane %v658_v7, 4  ;;  %v702_v59 = vrot.slane %v700_v52, 4  ;;  %v723_v61 = vshll.u32 %v4877_v51, 16 }
  0x5d   :  { %1301 = vrot.lane.b32.xlu0 %v5615_v8, %s5720_s17  ;;  %v661_v8 = vshll.u32 %v4868_v63, 16  ;;  %v628_v14 = vsel %vm5814_vm2, %v623_v6, %v627_v56  ;;  %v714_v56 = vshrl.u32 %v4876_v50, 16  ;;  %v711_v6 = vrot.slane %v709_v55, 5 }
  0x5e   :  { %1018 = vrot.lane.b32.xlu1 %v5616_v22, %s5720_s17  ;;  %v650_v19 = vor.u32 %v649_v12, %v646_v11  ;;  %v4878_v21 = vcombine.low %v628_v14, %v642_v18  ;;  %v725_v7 = vrot.slane %v723_v61, 5  ;;  %v1347_v30 = vshll.u32 %v4996_v23, 16 }
  0x5f   :  { %v663_v16 = vrot.slane %v661_v8, 5  ;;  %v716_v0 = vrot.slane %v714_v56, 4  ;;  %vm2024_vm8 = vcmask 516096   ;;  %vm2274_vm9 = vsmask.f32 7938 }
  0x60   :  { %v651_v24 = vrot.slane %v650_v19, 4  ;;  %743 = vst.msk [vmem:[#allocation2 + $0x10] sm:$0xff] %vm59_vm3, %v4878_v21  ;;  %v4994_v19 = vld [vmem:[%s7384_s0 + $0x128] sm:$0xf]  ;;  %vm2280_vm10 = vsmask.f32 256  ;;  %vm6581_vm11 = vmand %vm2022_vm7, %vm2274_vm9 }
  0x61   :  { %1213 = vrot.lane.b32.xlu0 %v4969_v34, %s5719_s8  ;;  %v664_v22 = vor.u32 %v663_v16, %v660_v15  ;;  %v720_v9 = vor.u32 %v719_v1, %v716_v0  ;;  %v5635_v15 = vld [vmem:[%s7384_s0 + $0xd8] ss:$8 sps:$4 sm:$0xff]   ;;  %v5645_v16 = vld [vmem:[%s7386_s5 + $0x8] sm:$0xff]   ;;  %v1330_v26 = vshrl.u32 %v4994_v19, 16  ;;  %v1333_v27 = vshll.u32 %v4994_v19, 16  ;;  %vm6586_vm12 = vmand %vm2024_vm8, %vm2280_vm10 }
  0x62   :  { %819 = vrot.lane.b32.xlu1 %v5617_v29, %s5719_s8  ;;  %v4873_v29 = vld [vmem:[%s7384_s0 + $0x34] sm:$0x1]  ;;  %v656_v34 = vsel %vm5814_vm2, %v651_v24, %v655_v13  ;;  %349 = vst.msk [vmem:[#allocation2 + $0x8] sm:$0xff] %vm59_vm3, %v5635_v15  ;;  %vm2601_vm13 = vcmask 1042432   ;;  %vm2602_vm14 = vcmask 1046532   ;;  %vm2407_vm0 = vcmask 523264  }
  0x63   :  { %v665_v28 = vrot.slane %v664_v22, 4  ;;  %v721_v13 = vrot.slane %v720_v9, 4  ;;  %v4995_v22 = vld [vmem:[%s7384_s0 + $0x12c] sm:$0x1]  ;;  %v4997_v24 = vld [vmem:[%s7384_s0 + $0x134] sm:$0x1]  ;;  %vm6668_vm15 = vmor %vm2601_vm13, %vm2602_vm14 }
  0x64   :  { %v1353_v32 = vshll.u32 %v4997_v24, 16  ;;  %v1332_v33 = vrot.slane %v1330_v26, 4  ;;  %v5003_v9 = vld [vmem:[%s7384_s0 + $0x14c] sm:$0x1]  ;;  %v5006_v26 = vld [vmem:[%s7384_s0 + $0x158] sm:$0xf] }
  0x65   :  { %1258 = vrot.lane.b32.xlu0 %v5618_v37, %s5718_s28  ;;  %v695_v37 = vshll.u32 %v4873_v29, 16  ;;  %v670_v38 = vsel %vm5814_vm2, %v665_v28, %v669_v17  ;;  %v726_v20 = vsel %vm5814_vm2, %v721_v13, %v725_v7  ;;  %v1339_v28 = vshll.u32 %v4995_v22, 16 }
  0x66   :  { %975 = vrot.lane.b32.xlu1 %v4925_v44, %s5718_s28  ;;  %v4879_v42 = vcombine.low %v656_v34, %v670_v38  ;;  %v691_v44 = vrot.slane %v689_v36, 5  ;;  %v1344_v29 = vshrl.u32 %v4996_v23, 16  ;;  %v1335_v34 = vrot.slane %v1333_v27, 5  ;;  %v4998_v36 = vld [vmem:[%s7384_s0 + $0x138] sm:$0xf] }
  0x67   :  { %v697_v45 = vrot.slane %v695_v37, 5  ;;  %v1463_v62 = vld [vmem:[#allocation2 + $0x10] sm:$0xff]  ;;  %v1349_v38 = vrot.slane %v1347_v30, 5  ;;  %v1395_v15 = vshll.u32 %v5003_v9, 16  ;;  %v5007_v30 = vld [vmem:[%s7384_s0 + $0x15c] sm:$0x1] }
  0x68   :  { %744 = vst.msk [vmem:[#allocation2 + $0x28] sm:$0xff] %vm59_vm3, %v4879_v42  ;;  %v692_v54 = vor.u32 %v691_v44, %v688_v41  ;;  %5477 = vmatprep.mubr.msk.bf16.mxu1 %vm59_vm3, %v1463_v62  ;;  %v1346_v37 = vrot.slane %v1344_v29, 4  ;;  %v1336_v41 = vor.u32 %v1335_v34, %v1332_v33  ;;  %v5000_v42 = vld [vmem:[%s7384_s0 + $0x140] sm:$0xf]  ;;  %v5001_v44 = vld [vmem:[%s7384_s0 + $0x144] sm:$0x1] }
  0x69   :  { %1303 = vrot.lane.b32.xlu0 %v5619_v49, %s5720_s17  ;;  %v678_v49 = vor.u32 %v677_v39, %v674_v35  ;;  %v1341_v35 = vrot.slane %v1339_v28, 5  ;;  %v1355_v39 = vrot.slane %v1353_v32, 5  ;;  %v1372_v51 = vshrl.u32 %v5000_v42, 16  ;;  %v5008_v32 = vld [vmem:[%s7384_s0 + $0x160] sm:$0xf] }
  0x6a   :  { %1020 = vrot.lane.b32.xlu1 %v5620_v53, %s5720_s17  ;;  %v703_v53 = vshll.u32 %v4874_v46, 16  ;;  %v693_v63 = vrot.slane %v692_v54, 4  ;;  %v1375_v52 = vshll.u32 %v5000_v42, 16  ;;  %v1381_v55 = vshll.u32 %v5001_v44, 16  ;;  %v5650_v9 = vld [vmem:[%s7384_s0 + $0x120] ss:$8 sps:$4 sm:$0xff]  }
  0x6b   :  { %v679_v58 = vrot.slane %v678_v49, 4  ;;  %v1350_v49 = vor.u32 %v1349_v38, %v1346_v37  ;;  %v1374_v57 = vrot.slane %v1372_v51, 4  ;;  %v1397_v23 = vrot.slane %v1395_v15, 5  ;;  %780 = vst.msk [vmem:[#allocation2 + $0x60] sm:$0xff] %vm59_vm3, %v5650_v9 }
  0x6c   :  { %v705_v60 = vrot.slane %v703_v53, 5  ;;  %v698_v8 = vsel %vm5814_vm2, %v693_v63, %v697_v45  ;;  %v1361_v45 = vshll.u32 %v4998_v36, 16  ;;  %v1337_v53 = vrot.slane %v1336_v41, 4 }
  0x6d   :  { %v684_v4 = vsel %vm5814_vm2, %v679_v58, %v683_v40  ;;  %v1358_v40 = vshrl.u32 %v4998_v36, 16  ;;  %v1351_v56 = vrot.slane %v1350_v49, 4  ;;  %v1377_v58 = vrot.slane %v1375_v52, 5 }
  0x6e   :  { %v706_v5 = vor.u32 %v705_v60, %v702_v59  ;;  %v4880_v11 = vcombine.low %v684_v4, %v698_v8  ;;  %v1363_v54 = vrot.slane %v1361_v45, 5  ;;  %v5638_v59 = vld [vmem:[%s7384_s0 + $0xe8] ss:$8 sps:$4 sm:$0xff]   ;;  %v1342_v60 = vsel %vm5814_vm2, %v1337_v53, %v1341_v35  ;;  %v5009_v35 = vld [vmem:[%s7384_s0 + $0x164] sm:$0x1] }
  0x6f   :  { %v1466_v17 = vld [vmem:[#allocation2 + $0x28] sm:$0xff]  ;;  %v1360_v50 = vrot.slane %v1358_v40, 4  ;;  %v1356_v0 = vsel %vm5814_vm2, %v1351_v56, %v1355_v39  ;;  %v1378_v1 = vor.u32 %v1377_v58, %v1374_v57  ;;  %350 = vst.msk [vmem:[#allocation2 + $0x20] sm:$0xff] %vm59_vm3, %v5638_v59  ;;  %v1414_v33 = vshrl.u32 %v5006_v26, 16  ;;  %v5644_v56 = vld [vmem:[%s7384_s0 + $0xf8] ss:$8 sps:$4 sm:$0xff]  }
  0x70   :  { %v707_v12 = vrot.slane %v706_v5, 4  ;;  %745 = vst.msk [vmem:[#allocation2 + $0x40] sm:$0xff] %vm59_vm3, %v4880_v11  ;;  %5478 = vmatmul.mubr.msk.bf16.vlgmr.msra.gmra.mrb[0].mxu1 %vm59_vm3, %v1466_v17  ;;  %v5010_v5 = vcombine.low %v1342_v60, %v1356_v0  ;;  %v5002_v8 = vld [vmem:[%s7384_s0 + $0x148] sm:$0xf]  ;;  %v5004_v11 = vld [vmem:[%s7384_s0 + $0x150] sm:$0xf] }
  0x71   :  { %5494 = vmatpush3.bf16.msra.mxu1 %v6051_v2  ;;  %v4999_v2 = vld [vmem:[%s7384_s0 + $0x13c] sm:$0x1]  ;;  %v1364_v61 = vor.u32 %v1363_v54, %v1360_v50  ;;  %v1379_v7 = vrot.slane %v1378_v1, 4  ;;  %v1389_v13 = vshll.u32 %v5002_v8, 16  ;;  %v1403_v17 = vshll.u32 %v5004_v11, 16  ;;  %351 = vst.msk [vmem:[#allocation2 + $0x38] sm:$0xff] %vm59_vm3, %v5644_v56 }
  0x72   :  { %v712_v18 = vsel %vm5814_vm2, %v707_v12, %v711_v6  ;;  %5495 = vmatprep.subr.bf16.mxu1 %v5645_v16  ;;  %v1367_v46 = vshll.u32 %v4999_v2, 16  ;;  %1457 = vst.msk [vmem:[#allocation2 + $0x70] sm:$0xff] %vm59_vm3, %v5010_v5  ;;  %v1386_v12 = vshrl.u32 %v5002_v8, 16  ;;  %v1417_v36 = vshll.u32 %v5006_v26, 16  ;;  %v5647_v1 = vld [vmem:[%s7384_s0 + $0x108] ss:$8 sps:$4 sm:$0xff]  }
  0x73   :  { %v4881_v25 = vcombine.low %v712_v18, %v726_v20  ;;  %v1365_v6 = vrot.slane %v1364_v61, 4  ;;  %v1391_v20 = vrot.slane %v1389_v13, 5  ;;  %v1423_v37 = vshll.u32 %v5007_v30, 16  ;;  %352 = vst.msk [vmem:[#allocation2 + $0x50] sm:$0xff] %vm59_vm3, %v5647_v1 }
  0x74   :  { %v6277_v43 = vpop.permute.xlu1 %538  ;;  %v1369_v62 = vrot.slane %v1367_v46, 5  ;;  %v1388_v19 = vrot.slane %v1386_v12, 4  ;;  %v1428_v38 = vshrl.u32 %v5008_v32, 16  ;;  %v1416_v2 = vrot.slane %v1414_v33, 4  ;;  %v5653_v12 = vld [vmem:[%s7384_s0 + $0x218] ss:$8 sps:$4 sm:$0xff]  }
  0x75   :  { %v94_v48 = vpop.permute.xlu0 %93  ;;  %746 = vst.msk [vmem:[#allocation2 + $0x58] sm:$0xff] %vm59_vm3, %v4881_v25  ;;  %5496 = vmatpush3.bf16.msra.mxu1 %v5645_v16  ;;  %v1400_v16 = vshrl.u32 %v5004_v11, 16  ;;  %v1405_v25 = vrot.slane %v1403_v17, 5  ;;  %v1431_v40 = vshll.u32 %v5008_v32, 16  ;;  %v1437_v41 = vshll.u32 %v5009_v35, 16  ;;  %1065 = vst.msk [vmem:[#allocation2 + $0x98] sm:$0xff] %vm59_vm3, %v5653_v12 }
  0x76   :  { %106 = vst.msk [vmem:[#allocation2] sm:$0xff] %vm105_vm4, %v94_v48  ;;  %v1370_v10 = vsel %vm5814_vm2, %v1365_v6, %v1369_v62  ;;  %v1392_v28 = vor.u32 %v1391_v20, %v1388_v19  ;;  %v1419_v46 = vrot.slane %v1417_v36, 5  ;;  %v5646_v62 = vld [vmem:[%s7384_s0 + $0x20] ss:$8 sps:$4 sm:$0xff]   ;;  %v5656_v20 = vld [vmem:[%s7384_s0 + $0x150] ss:$8 sps:$4 sm:$0xff]  }
  0x77   :  { %v1469_v47 = vld [vmem:[#allocation2 + $0x40] sm:$0xff]  ;;  %v1402_v24 = vrot.slane %v1400_v16, 4  ;;  %v1433_v52 = vrot.slane %v1431_v40, 5  ;;  %v1439_v53 = vrot.slane %v1437_v41, 5  ;;  %62 = vst.msk [vmem:[#allocation2 + $0x30] sm:$0xff] %vm59_vm3, %v5646_v62  ;;  %783 = vst.msk [vmem:[#allocation2 + $0xa8] sm:$0xff] %vm59_vm3, %v5656_v20 }
  0x78   :  { %v6293_v3 = vpop.permute.xlu1 %299  ;;  %5481 = vmatprep.mubr.msk.bf16.mxu1 %vm59_vm3, %v1469_v47  ;;  %v1393_v39 = vrot.slane %v1392_v28, 4  ;;  %v1425_v47 = vrot.slane %v1423_v37, 5  ;;  %v5649_v6 = vld [vmem:[%s7384_s0 + $0x1f8] ss:$8 sps:$4 sm:$0xff]   ;;  %v5651_v11 = vld [vmem:[%s7384_s0 + $0x208] ss:$8 sps:$4 sm:$0xff]  }
  0x79   :  { %v584_v21 = vpop.permute.xlu0 %583  ;;  %v1406_v34 = vor.u32 %v1405_v25, %v1402_v24  ;;  %v1475_v42 = vld [vmem:[#allocation2 + $0x70] sm:$0xff]  ;;  %1063 = vst.msk [vmem:[#allocation2 + $0x68] sm:$0xff] %vm59_vm3, %v5649_v6  ;;  %1064 = vst.msk [vmem:[#allocation2 + $0x80] sm:$0xff] %vm59_vm3, %v5651_v11  ;;  %vm2564_vm1 = vcmask 1048064  }
  0x7a   :  { %v1398_v50 = vsel %vm5814_vm2, %v1393_v39, %v1397_v23  ;;  %v5655_v19 = vld [vmem:[%s7384_s0 + $0x228] ss:$8 sps:$4 sm:$0xff]  }
  0x7b   :  { %v1407_v45 = vrot.slane %v1406_v34, 4  ;;  %1066 = vst.msk [vmem:[#allocation2 + $0xb0] sm:$0xff] %vm59_vm3, %v5655_v19 }
  0x7c   :  { %v96_v14 = vpop.permute.xlu1 %95  ;;  %v1472_v63 = vld [vmem:[#allocation2 + $0x58] sm:$0xff] }
  0x7d   :  { %107 = vst.msk [vmem:[#allocation2 + $0x18] sm:$0xff] %vm105_vm4, %v96_v14  ;;  %5482 = vmatmul.mubr.msk.bf16.gmra.mrb[4].mxu1 %vm59_vm3, %v1472_v63 }
  0x7e   :  { %5485 = vmatprep.mubr.msk.bf16.mxu1 %vm59_vm3, %v1475_v42 }
  0x83   :  { %v494_v48 = vpop.permute.xlu0 %493 }
  0x84   :  { %505 = vst.msk [vmem:[#allocation2 + $0x8] sm:$0xff] %vm105_vm4, %v494_v48  ;;  %v1430_v48 = vrot.slane %v1428_v38, 4 }
  0x85   :  { %550 = vst.msk [vmem:[#allocation2 + $0x8] sm:$0xff] %vm265_vm5, %v6277_v43  ;;  %v1383_v43 = vrot.slane %v1381_v55, 5  ;;  %v1420_v55 = vor.u32 %v1419_v46, %v1416_v2 }
  0x86   :  { %595 = vst.msk [vmem:[#allocation2 + $0x8] sm:$0xff] %vm311_vm6, %v584_v21  ;;  %v254_v4 = vpop.permute.xlu1 %253  ;;  %v1434_v58 = vor.u32 %v1433_v52, %v1430_v48 }
  0x87   :  { %266 = vst.msk [vmem:[#allocation2] sm:$0xff] %vm265_vm5, %v254_v4  ;;  %v1384_v14 = vsel %vm5814_vm2, %v1379_v7, %v1383_v43  ;;  %v1421_v60 = vrot.slane %v1420_v55, 4  ;;  %v5648_v4 = vld [vmem:[%s7384_s0 + $0x30] ss:$8 sps:$4 sm:$0xff]  }
  0x88   :  { %312 = vst.msk [vmem:[#allocation2] sm:$0xff] %vm311_vm6, %v6293_v3  ;;  %v5005_v3 = vld [vmem:[%s7384_s0 + $0x154] sm:$0x1]  ;;  %v5011_v18 = vcombine.low %v1370_v10, %v1384_v14  ;;  %v1435_v63 = vrot.slane %v1434_v58, 4 }
  0x89   :  { %v1409_v21 = vshll.u32 %v5005_v3, 16  ;;  %v1426_v43 = vsel %vm5814_vm2, %v1421_v60, %v1425_v47  ;;  %63 = vst.msk [vmem:[#allocation2 + $0x48] sm:$0xff] %vm59_vm3, %v5648_v4  ;;  %v5652_v3 = vld [vmem:[%s7384_s0 + $0x130] ss:$8 sps:$4 sm:$0xff]   ;;  %v5721_v4 = vmov 0  }
  0x8a   :  { %1458 = vst.msk [vmem:[#allocation2 + $0x88] sm:$0xff] %vm59_vm3, %v5011_v18  ;;  %v1440_v5 = vsel %vm5814_vm2, %v1435_v63, %v1439_v53  ;;  %781 = vst.msk [vmem:[#allocation2 + $0x78] sm:$0xff] %vm59_vm3, %v5652_v3  ;;  %v5654_v18 = vld [vmem:[%s7384_s0 + $0x140] ss:$8 sps:$4 sm:$0xff]  }
  0x8b   :  { %v496_v22 = vpop.permute.xlu0 %495  ;;  %v1411_v29 = vrot.slane %v1409_v21, 5  ;;  %v5013_v7 = vcombine.low %v1426_v43, %v1440_v5  ;;  %782 = vst.msk [vmem:[#allocation2 + $0x90] sm:$0xff] %vm59_vm3, %v5654_v18 }
  0x8c   :  { %506 = vst.msk [vmem:[#allocation2 + $0x20] sm:$0xff] %vm105_vm4, %v496_v22 }
  0x8d   :  { %v6381_v27 = vld [vmem:[#allocation2 + $0x8] sm:$0xff]  ;;  %v1412_v54 = vsel %vm5814_vm2, %v1407_v45, %v1411_v29  ;;  %1460 = vst.msk [vmem:[#allocation2 + $0xb8] sm:$0xff] %vm59_vm3, %v5013_v7 }
  0x8e   :  { %1692 = vmatprep.mubr.bf16.mxu0 %v6381_v27  ;;  %v5012_v57 = vcombine.low %v1398_v50, %v1412_v54  ;;  %2026 = vst.msk [vmem:[#allocation3 + $0x8] sm:$0xf] %vm2022_vm7, %v5721_v4  ;;  %2023 = vst.msk [vmem:[#allocation3] sm:$0xf] %vm2022_vm7, %v5721_v4 }
  0x8f   :  { %v541_v44 = vpop.permute.xlu0 %540  ;;  %v1461_v49 = vld [vmem:[#allocation2] sm:$0xff]  ;;  %2027 = vst.msk [vmem:[#allocation3 + $0xc] sm:$0x1] %vm2024_vm8, %v5721_v4  ;;  %2025 = vst.msk [vmem:[#allocation3 + $0x4] sm:$0x1] %vm2024_vm8, %v5721_v4 }
  0x90   :  { %551 = vst.msk [vmem:[#allocation2 + $0x20] sm:$0xff] %vm265_vm5, %v541_v44  ;;  %v256_v51 = vpop.permute.xlu1 %255  ;;  %1693 = vmatmul.mubr.bf16.vlgmr.msra.gmra.mrb[0].mxu0 %v1461_v49 }
  0x91   :  { %267 = vst.msk [vmem:[#allocation2 + $0x18] sm:$0xff] %vm265_vm5, %v256_v51  ;;  %v1478_v59 = vld [vmem:[#allocation2 + $0x88] sm:$0xff] }
  0x92   :  { %5486 = vmatmul.mubr.msk.bf16.gmra.mrb[8].mxu1 %vm59_vm3, %v1478_v59  ;;  %1459 = vst.msk [vmem:[#allocation2 + $0xa0] sm:$0xff] %vm59_vm3, %v5012_v57 }
  0x93   :  { %v586_v61 = vpop.permute.xlu0 %585  ;;  %2028 = vst.msk [vmem:[#allocation3 + $0x10] sm:$0xf] %vm2022_vm7, %v5721_v4  ;;  %2030 = vst.msk [vmem:[#allocation3 + $0x18] sm:$0xf] %vm2022_vm7, %v5721_v4 }
  0x94   :  { %596 = vst.msk [vmem:[#allocation2 + $0x20] sm:$0xff] %vm311_vm6, %v586_v61  ;;  %v302_v0 = vpop.permute.xlu1 %301  ;;  %v1484_v22 = vld [vmem:[#allocation2 + $0xb8] sm:$0xff] }
  0x95   :  { %313 = vst.msk [vmem:[#allocation2 + $0x18] sm:$0xff] %vm311_vm6, %v302_v0 }
  0x96   :  { %2029 = vst.msk [vmem:[#allocation3 + $0x14] sm:$0x1] %vm2024_vm8, %v5721_v4  ;;  %2031 = vst.msk [vmem:[#allocation3 + $0x1c] sm:$0x1] %vm2024_vm8, %v5721_v4 }
  0x97   :  { %v498_v8 = vpop.permute.xlu0 %497  ;;  %2032 = vst.msk [vmem:[#allocation3 + $0x20] sm:$0xf] %vm2022_vm7, %v5721_v4  ;;  %2034 = vst.msk [vmem:[#allocation3 + $0x28] sm:$0xf] %vm2022_vm7, %v5721_v4 }
  0x98   :  { %507 = vst.msk [vmem:[#allocation2 + $0x38] sm:$0xff] %vm105_vm4, %v498_v8  ;;  %v98_v10 = vpop.permute.xlu1 %97 }
  0x99   :  { %108 = vst.msk [vmem:[#allocation2 + $0x30] sm:$0xff] %vm105_vm4, %v98_v10  ;;  %v1481_v13 = vld [vmem:[#allocation2 + $0xa0] sm:$0xff] }
  0x9a   :  { %5489 = vmatprep.mubr.msk.bf16.mxu1 %vm59_vm3, %v1481_v13  ;;  %2033 = vst.msk [vmem:[#allocation3 + $0x24] sm:$0x1] %vm2024_vm8, %v5721_v4  ;;  %2035 = vst.msk [vmem:[#allocation3 + $0x2c] sm:$0x1] %vm2024_vm8, %v5721_v4 }
  0x9b   :  { %v543_v14 = vpop.permute.xlu0 %542  ;;  %v1465_v15 = vld [vmem:[#allocation2 + $0x20] sm:$0xff]  ;;  %5490 = vmatmul.mubr.msk.bf16.gmra.mrb[12].mxu1 %vm59_vm3, %v1484_v22  ;;  %2036 = vst.msk [vmem:[#allocation3 + $0x30] sm:$0xf] %vm2022_vm7, %v5721_v4  ;;  %2038 = vst.msk [vmem:[#allocation3 + $0x38] sm:$0xf] %vm2022_vm7, %v5721_v4 }
  0x9c   :  { %552 = vst.msk [vmem:[#allocation2 + $0x38] sm:$0xff] %vm265_vm5, %v543_v14  ;;  %v258_v16 = vpop.permute.xlu1 %257  ;;  %1700 = vmatprep.mubr.bf16.mxu0 %v1465_v15  ;;  %v1464_v17 = vld [vmem:[#allocation2 + $0x18] sm:$0xff]  ;;  %5497 = vmatprep.mubr.msk.bf16.mxu1 %vm59_vm3, %v6381_v27  ;;  %v6561_v14 = vld [vmem:[%s7387_s2] ss:$0 sm:$0xff] }
  0x9d   :  { %268 = vst.msk [vmem:[#allocation2 + $0x30] sm:$0xff] %vm265_vm5, %v258_v16  ;;  %1701 = vmatmul.mubr.bf16.gmra.mrb[4].mxu0 %v1464_v17  ;;  %v2412_v17 = vld [vmem:[#allocation3] sm:$0xf] }
  0x9e   :  { %2037 = vst.msk [vmem:[#allocation3 + $0x34] sm:$0x1] %vm2024_vm8, %v5721_v4  ;;  %2039 = vst.msk [vmem:[#allocation3 + $0x3c] sm:$0x1] %vm2024_vm8, %v5721_v4  ;;  %v2429_v22 = vshrl.u32 %v2412_v17, 16 }
  0x9f   :  { %v588_v21 = vpop.permute.xlu0 %587  ;;  %2040 = vst.msk [vmem:[#allocation3 + $0x40] sm:$0xf] %vm2022_vm7, %v5721_v4  ;;  %2042 = vst.msk [vmem:[#allocation3 + $0x48] sm:$0xf] %vm2022_vm7, %v5721_v4 }
  0xa0   :  { %597 = vst.msk [vmem:[#allocation2 + $0x38] sm:$0xff] %vm311_vm6, %v588_v21  ;;  %v304_v23 = vpop.permute.xlu1 %303 }
  0xa1   :  { %314 = vst.msk [vmem:[#allocation2 + $0x30] sm:$0xff] %vm311_vm6, %v304_v23  ;;  %v2432_v23 = vshll.u32 %v2412_v17, 16 }
  0xa2   :  { %2041 = vst.msk [vmem:[#allocation3 + $0x44] sm:$0x1] %vm2024_vm8, %v5721_v4  ;;  %2043 = vst.msk [vmem:[#allocation3 + $0x4c] sm:$0x1] %vm2024_vm8, %v5721_v4 }
  0xa3   :  { %v500_v24 = vpop.permute.xlu0 %499  ;;  %5498 = vmatmul.mubr.msk.bf16.vlgmr.msra.gmra.mrb[16].mxu1 %vm59_vm3, %v1465_v15  ;;  %2044 = vst.msk [vmem:[#allocation3 + $0x50] sm:$0xf] %vm2022_vm7, %v5721_v4  ;;  %2046 = vst.msk [vmem:[#allocation3 + $0x58] sm:$0xf] %vm2022_vm7, %v5721_v4 }
  0xa4   :  { %508 = vst.msk [vmem:[#allocation2 + $0x50] sm:$0xff] %vm105_vm4, %v500_v24  ;;  %v100_v25 = vpop.permute.xlu1 %99 }
  0xa5   :  { %109 = vst.msk [vmem:[#allocation2 + $0x48] sm:$0xff] %vm105_vm4, %v100_v25 }
  0xa6   :  { %2045 = vst.msk [vmem:[#allocation3 + $0x54] sm:$0x1] %vm2024_vm8, %v5721_v4  ;;  %2047 = vst.msk [vmem:[#allocation3 + $0x5c] sm:$0x1] %vm2024_vm8, %v5721_v4 }
  0xa7   :  { %v545_v26 = vpop.permute.xlu0 %544  ;;  %v1468_v28 = vld [vmem:[#allocation2 + $0x38] sm:$0xff]  ;;  %2048 = vst.msk [vmem:[#allocation3 + $0x60] sm:$0xf] %vm2022_vm7, %v5721_v4  ;;  %2050 = vst.msk [vmem:[#allocation3 + $0x68] sm:$0xf] %vm2022_vm7, %v5721_v4 }
  0xa8   :  { %553 = vst.msk [vmem:[#allocation2 + $0x50] sm:$0xff] %vm265_vm5, %v545_v26  ;;  %v260_v29 = vpop.permute.xlu1 %259  ;;  %1708 = vmatprep.mubr.bf16.mxu0 %v1468_v28  ;;  %v1467_v30 = vld [vmem:[#allocation2 + $0x30] sm:$0xff]  ;;  %5501 = vmatprep.mubr.msk.bf16.mxu1 %vm59_vm3, %v1468_v28 }
  0xa9   :  { %269 = vst.msk [vmem:[#allocation2 + $0x48] sm:$0xff] %vm265_vm5, %v260_v29  ;;  %1709 = vmatmul.mubr.bf16.gmra.mrb[8].mxu0 %v1467_v30 }
  0xaa   :  { %2049 = vst.msk [vmem:[#allocation3 + $0x64] sm:$0x1] %vm2024_vm8, %v5721_v4  ;;  %2051 = vst.msk [vmem:[#allocation3 + $0x6c] sm:$0x1] %vm2024_vm8, %v5721_v4  ;;  %v3254_v30 = vld [vmem:[#allocation3 + $0x50] sm:$0xf] }
  0xab   :  { %v590_v27 = vpop.permute.xlu0 %589  ;;  %2052 = vst.msk [vmem:[#allocation3 + $0x70] sm:$0xf] %vm2022_vm7, %v5721_v4  ;;  %2054 = vst.msk [vmem:[#allocation3 + $0x78] sm:$0xf] %vm2022_vm7, %v5721_v4 }
  0xac   :  { %598 = vst.msk [vmem:[#allocation2 + $0x50] sm:$0xff] %vm311_vm6, %v590_v27  ;;  %v306_v32 = vpop.permute.xlu1 %305 }
  0xad   :  { %315 = vst.msk [vmem:[#allocation2 + $0x48] sm:$0xff] %vm311_vm6, %v306_v32 }
  0xae   :  { %2053 = vst.msk [vmem:[#allocation3 + $0x74] sm:$0x1] %vm2024_vm8, %v5721_v4  ;;  %2055 = vst.msk [vmem:[#allocation3 + $0x7c] sm:$0x1] %vm2024_vm8, %v5721_v4 }
  0xaf   :  { %v1208_v33 = vpop.permute.xlu0 %1207  ;;  %2056 = vst.msk [vmem:[#allocation3 + $0x80] sm:$0xf] %vm2022_vm7, %v5721_v4  ;;  %2058 = vst.msk [vmem:[#allocation3 + $0x88] sm:$0xf] %vm2022_vm7, %v5721_v4 }
  0xb0   :  { %1219 = vst.msk [vmem:[#allocation2 + $0x68] sm:$0xff] %vm105_vm4, %v1208_v33  ;;  %v814_v34 = vpop.permute.xlu1 %813  ;;  %v2991_v33 = vld [vmem:[#allocation3 + $0x48] sm:$0xf] }
  0xb1   :  { %825 = vst.msk [vmem:[#allocation2 + $0x60] sm:$0xff] %vm105_vm4, %v814_v34  ;;  %v6573_v34 = vrot.slane %v2429_v22, 4 }
  0xb2   :  { %2057 = vst.msk [vmem:[#allocation3 + $0x84] sm:$0x1] %vm2024_vm8, %v5721_v4  ;;  %2059 = vst.msk [vmem:[#allocation3 + $0x8c] sm:$0x1] %vm2024_vm8, %v5721_v4 }
  0xb3   :  { %v1253_v35 = vpop.permute.xlu0 %1252  ;;  %v1471_v36 = vld [vmem:[#allocation2 + $0x50] sm:$0xff]  ;;  %2060 = vst.msk [vmem:[#allocation3 + $0x90] sm:$0xf] %vm2022_vm7, %v5721_v4  ;;  %2062 = vst.msk [vmem:[#allocation3 + $0x98] sm:$0xf] %vm2022_vm7, %v5721_v4 }
  0xb4   :  { %1264 = vst.msk [vmem:[#allocation2 + $0x68] sm:$0xff] %vm265_vm5, %v1253_v35  ;;  %v970_v37 = vpop.permute.xlu1 %969  ;;  %1716 = vmatprep.mubr.bf16.mxu0 %v1471_v36  ;;  %5502 = vmatmul.mubr.msk.bf16.gmra.mrb[20].mxu1 %vm59_vm3, %v1471_v36  ;;  %v1470_v38 = vld [vmem:[#allocation2 + $0x48] sm:$0xff]  ;;  %v6575_v35 = vrot.slane %v2432_v23, 5 }
  0xb5   :  { %981 = vst.msk [vmem:[#allocation2 + $0x60] sm:$0xff] %vm265_vm5, %v970_v37  ;;  %1717 = vmatmul.mubr.bf16.gmra.mrb[12].mxu0 %v1470_v38  ;;  %v3271_v38 = vshrl.u32 %v3254_v30, 16 }
  0xb6   :  { %2061 = vst.msk [vmem:[#allocation3 + $0x94] sm:$0x1] %vm2024_vm8, %v5721_v4  ;;  %2063 = vst.msk [vmem:[#allocation3 + $0x9c] sm:$0x1] %vm2024_vm8, %v5721_v4 }
  0xb7   :  { %v1298_v39 = vpop.permute.xlu0 %1297 }
  0xb8   :  { %1309 = vst.msk [vmem:[#allocation2 + $0x68] sm:$0xff] %vm311_vm6, %v1298_v39  ;;  %v1015_v2 = vpop.permute.xlu1 %1014  ;;  %v3274_v39 = vshll.u32 %v3254_v30, 16 }
  0xb9   :  { %1026 = vst.msk [vmem:[#allocation2 + $0x60] sm:$0xff] %vm311_vm6, %v1015_v2  ;;  %v3092_v2 = vshrl.u32 %v2991_v33, 16 }
  0xbb   :  { %v1210_v40 = vpop.permute.xlu0 %1209 }
  0xbc   :  { %1220 = vst.msk [vmem:[#allocation2 + $0x80] sm:$0xff] %vm105_vm4, %v1210_v40  ;;  %v816_v41 = vpop.permute.xlu1 %815  ;;  %v3095_v40 = vshll.u32 %v2991_v33, 16  ;;  %v6603_v33 = vld [vmem:[#allocation3] sm:$0xe] }
  0xbd   :  { %826 = vst.msk [vmem:[#allocation2 + $0x78] sm:$0xff] %vm105_vm4, %v816_v41 }
  0xbf   :  { %v1255_v42 = vpop.permute.xlu0 %1254  ;;  %v1474_v44 = vld [vmem:[#allocation2 + $0x68] sm:$0xff] }
  0xc0   :  { %1265 = vst.msk [vmem:[#allocation2 + $0x80] sm:$0xff] %vm265_vm5, %v1255_v42  ;;  %v972_v45 = vpop.permute.xlu1 %971  ;;  %1724 = vmatprep.mubr.bf16.mxu0 %v1474_v44  ;;  %5505 = vmatprep.mubr.msk.bf16.mxu1 %vm59_vm3, %v1474_v44  ;;  %v1473_v46 = vld [vmem:[#allocation2 + $0x60] sm:$0xff]  ;;  %v2276_v44 = vld [vmem:[#allocation3 + $0x8] sm:$0xf] }
  0xc1   :  { %982 = vst.msk [vmem:[#allocation2 + $0x78] sm:$0xff] %vm265_vm5, %v972_v45  ;;  %1725 = vmatmul.mubr.bf16.gmra.mrb[16].mxu0 %v1473_v46  ;;  %v2282_v45 = vld [vmem:[#allocation3 + $0xc] sm:$0x1] }
  0xc3   :  { %v1300_v47 = vpop.permute.xlu0 %1299 }
  0xc4   :  { %1310 = vst.msk [vmem:[#allocation2 + $0x80] sm:$0xff] %vm311_vm6, %v1300_v47  ;;  %v1017_v48 = vpop.permute.xlu1 %1016  ;;  %v2413_v47 = vld [vmem:[#allocation3 + $0x4] sm:$0x1] }
  0xc5   :  { %1027 = vst.msk [vmem:[#allocation2 + $0x78] sm:$0xff] %vm311_vm6, %v1017_v48  ;;  %v2435_v48 = vor.u32 %v6575_v35, %v6573_v34  ;;  %v6605_v34 = vld [vmem:[#allocation3 + $0x4] sm:$0x1] }
  0xc7   :  { %v1212_v49 = vpop.permute.xlu0 %1211 }
  0xc8   :  { %1221 = vst.msk [vmem:[#allocation2 + $0x98] sm:$0xff] %vm105_vm4, %v1212_v49  ;;  %v818_v50 = vpop.permute.xlu1 %817  ;;  %v3255_v49 = vld [vmem:[#allocation3 + $0x54] sm:$0x1] }
  0xc9   :  { %827 = vst.msk [vmem:[#allocation2 + $0x90] sm:$0xff] %vm105_vm4, %v818_v50  ;;  %v3280_v17 = vshll.u32 %v3255_v49, 16 }
  0xcb   :  { %v1257_v51 = vpop.permute.xlu0 %1256  ;;  %v1477_v52 = vld [vmem:[#allocation2 + $0x80] sm:$0xff] }
  0xcc   :  { %1266 = vst.msk [vmem:[#allocation2 + $0x98] sm:$0xff] %vm265_vm5, %v1257_v51  ;;  %v974_v53 = vpop.permute.xlu1 %973  ;;  %1732 = vmatprep.mubr.bf16.mxu0 %v1477_v52  ;;  %5506 = vmatmul.mubr.msk.bf16.gmra.mrb[24].mxu1 %vm59_vm3, %v1477_v52  ;;  %v1476_v54 = vld [vmem:[#allocation2 + $0x78] sm:$0xff] }
  0xcd   :  { %983 = vst.msk [vmem:[#allocation2 + $0x90] sm:$0xff] %vm265_vm5, %v974_v53  ;;  %1733 = vmatmul.mubr.bf16.gmra.mrb[20].mxu0 %v1476_v54 }
  0xcf   :  { %v1302_v55 = vpop.permute.xlu0 %1301 }
  0xd0   :  { %1311 = vst.msk [vmem:[#allocation2 + $0x98] sm:$0xff] %vm311_vm6, %v1302_v55  ;;  %v1019_v56 = vpop.permute.xlu1 %1018  ;;  %v3273_v55 = vrot.slane %v3271_v38, 4 }
  0xd1   :  { %1028 = vst.msk [vmem:[#allocation2 + $0x90] sm:$0xff] %vm311_vm6, %v1019_v56 }
  0xd3   :  { %v1214_v57 = vpop.permute.xlu0 %1213 }
  0xd4   :  { %1222 = vst.msk [vmem:[#allocation2 + $0xb0] sm:$0xff] %vm105_vm4, %v1214_v57  ;;  %v820_v58 = vpop.permute.xlu1 %819  ;;  %v2285_v57 = vld [vmem:[#allocation3 + $0x10] sm:$0xf] }
  0xd5   :  { %828 = vst.msk [vmem:[#allocation2 + $0xa8] sm:$0xff] %vm105_vm4, %v820_v58 }
  0xd7   :  { %v1259_v59 = vpop.permute.xlu0 %1258  ;;  %v1480_v60 = vld [vmem:[#allocation2 + $0x98] sm:$0xff] }
  0xd8   :  { %1267 = vst.msk [vmem:[#allocation2 + $0xb0] sm:$0xff] %vm265_vm5, %v1259_v59  ;;  %v976_v61 = vpop.permute.xlu1 %975  ;;  %1740 = vmatprep.mubr.bf16.mxu0 %v1480_v60  ;;  %5509 = vmatprep.mubr.msk.bf16.mxu1 %vm59_vm3, %v1480_v60  ;;  %v1479_v62 = vld [vmem:[#allocation2 + $0x90] sm:$0xff]  ;;  %v3276_v60 = vrot.slane %v3274_v39, 5 }
  0xd9   :  { %984 = vst.msk [vmem:[#allocation2 + $0xa8] sm:$0xff] %vm265_vm5, %v976_v61  ;;  %1741 = vmatmul.mubr.bf16.gmra.mrb[24].mxu0 %v1479_v62  ;;  %v3094_v61 = vrot.slane %v3092_v2, 4  ;;  %v3097_v62 = vrot.slane %v3095_v40, 5  ;;  %v6614_v2 = vrot.slane %v2435_v48, 4  ;;  %v6616_v40 = vld [vmem:[#allocation3 + $0x98] sm:$0xf] }
  0xdb   :  { %v1304_v63 = vpop.permute.xlu0 %1303  ;;  %v3098_v38 = vor.u32 %v3097_v62, %v3094_v61  ;;  %v2291_v61 = vld [vmem:[#allocation3 + $0x18] sm:$0xf] }
  0xdc   :  { %1312 = vst.msk [vmem:[#allocation2 + $0xb0] sm:$0xff] %vm311_vm6, %v1304_v63  ;;  %v1021_v0 = vpop.permute.xlu1 %1020 }
  0xdd   :  { %1029 = vst.msk [vmem:[#allocation2 + $0xa8] sm:$0xff] %vm311_vm6, %v1021_v0  ;;  %v6630_v48 = vrot.slane %v3098_v38, 4 }
  0xe3   :  { %v1483_v1 = vld [vmem:[#allocation2 + $0xb0] sm:$0xff] }
  0xe4   :  { %1748 = vmatprep.mubr.bf16.mxu0 %v1483_v1  ;;  %5510 = vmatmul.mubr.msk.bf16.gmra.mrb[28].mxu1 %vm59_vm3, %v1483_v1  ;;  %v1482_v43 = vld [vmem:[#allocation2 + $0xa8] sm:$0xff] }
  0xe5   :  { %1749 = vmatmul.mubr.bf16.gmra.mrb[28].mxu0 %v1482_v43 }
 0x143   :  { %v6546_v5 = vpop.f32.mrb[0].mxu1 }
 0x144   :  { %v1791_v6 = vpop.f32.mrb[1].mxu1 }
 0x145   :  { %v6548_v7 = vpop.f32.mrb[2].mxu1 }
 0x146   :  { %v1794_v8 = vpop.f32.mrb[3].mxu1 }
 0x150   :  { %v6550_v9 = vpop.f32.mrb[4].mxu1 }
 0x151   :  { %v6552_v10 = vpop.f32.mrb[5].mxu1 }
 0x152   :  { %v6554_v11 = vpop.f32.mrb[6].mxu1 }
 0x153   :  { %v6556_v3 = vpop.f32.mrb[7].mxu1 }
 0x163   :  { %v5265_v12 = vpop.f32.mrb[0].mxu0 }
 0x164   :  { %v5266_v13 = vpop.f32.mrb[1].mxu0 }
 0x165   :  { %v5267_v15 = vadd.f32 %v5266_v13, %v5265_v12  ;;  %v5268_v16 = vpop.f32.mrb[2].mxu0  ;;  %v6564_v21 = vpop.f32.mrb[8].mxu1 }
 0x166   :  { %v5269_v18 = vpop.f32.mrb[3].mxu0  ;;  %v6566_v24 = vpop.f32.mrb[9].mxu1 }
 0x167   :  { %v5270_v19 = vadd.f32 %v5269_v18, %v5268_v16  ;;  %v1695_v20 = vadd.f32 %v5267_v15, %v6561_v14  ;;  %v6569_v28 = vpop.f32.mrb[10].mxu1  ;;  %v2438_v15 = vshll.u32 %v2413_v47, 16 }
 0x168   :  { %v6571_v29 = vpop.f32.mrb[11].mxu1 }
 0x169   :  { %v1792_v25 = vadd.f32 %v1791_v6, %v1695_v20  ;;  %v1698_v26 = vadd.f32 %v5270_v19, %v6561_v14  ;;  %v2992_v6 = vld [vmem:[#allocation3 + $0x4c] sm:$0x1] }
 0x16b   :  { %v1854_v27 = vmax.f32 %v1792_v25, 0.0  ;;  %v1795_v32 = vadd.f32 %v1794_v8, %v1698_v26  ;;  %v2288_v8 = vld [vmem:[#allocation3 + $0x14] sm:$0x1] }
 0x16d   :  { %v5233_v36 = vpack.c.bf16 %v1854_v27, %v1854_v27  ;;  %v1855_v37 = vmax.f32 %v1795_v32, 0.0  ;;  %v3277_v27 = vor.u32 %v3276_v60, %v3273_v55  ;;  %v3101_v32 = vshll.u32 %v2992_v6, 16  ;;  %v5665_v60 = vld [vmem:[%s7388_s3 + $0x40] sm:$0xff]  }
 0x16e   :  { %v6591_v16 = vpop.f32.mrb[12].mxu1  ;;  %5333 = vmatprep.subr.bf16.mxu1 %v5665_v60  ;;  %v5668_v60 = vld [vmem:[%s7388_s3 + $0x8] sm:$0xff]  }
 0x16f   :  { %v2113_v41 = vshrl.u32 %v5233_v36, 16  ;;  %v5234_v42 = vpack.c.bf16 %v1855_v37, %v1855_v37  ;;  %v2116_v51 = vshll.u32 %v5233_v36, 16  ;;  %v6597_v23 = vpop.f32.mrb[13].mxu1 }
 0x170   :  { %v5271_v46 = vpop.f32.mrb[4].mxu0  ;;  %v6601_v30 = vpop.f32.mrb[14].mxu1 }
 0x171   :  { %v2115_v50 = vrot.slane %v2113_v41, 7  ;;  %v2121_v53 = vshrl.u32 %v5234_v42, 16  ;;  %v5272_v54 = vpop.f32.mrb[5].mxu0  ;;  %v2124_v43 = vshll.u32 %v5234_v42, 16  ;;  %v6611_v37 = vpop.f32.mrb[15].mxu1  ;;  %v6620_v42 = vrot.slane %v2438_v15, 5 }
 0x172   :  { %v5273_v58 = vadd.f32 %v5272_v54, %v5271_v46  ;;  %v5274_v59 = vpop.f32.mrb[6].mxu0  ;;  %v6618_v41 = vld [vmem:[#allocation3 + $0x9c] sm:$0x1]  ;;  %v2606_v46 = vrot.slane %v6605_v34, 5  ;;  %v2303_v34 = vld [vmem:[#allocation3 + $0x28] sm:$0xf] }
 0x173   :  { %v2118_v63 = vor.u32 %v2116_v51, %v2115_v50  ;;  %v2119_v0 = vrot.slane %v2115_v50, 4  ;;  %v2123_v1 = vrot.slane %v2121_v53, 7  ;;  %v5275_v4 = vpop.f32.mrb[7].mxu0  ;;  %v6626_v50 = vrot.slane %v3277_v27, 4 }
 0x174   :  { %v1703_v12 = vadd.f32 %v5273_v58, %v6561_v14  ;;  %v5276_v13 = vadd.f32 %v5275_v4, %v5274_v59  ;;  %v3931_v51 = vshrl.u32 %v6616_v40, 16  ;;  %v3934_v53 = vshll.u32 %v6616_v40, 16 }
 0x175   :  { %v2277_v18 = vsel %vm6581_vm11, %v2118_v63, %v2276_v44  ;;  %v2283_v19 = vsel %vm6586_vm12, %v2119_v0, %v2282_v45  ;;  %v2126_v20 = vor.u32 %v2124_v43, %v2123_v1  ;;  %v2127_v22 = vrot.slane %v2123_v1, 4  ;;  %v5666_v0 = vld [vmem:[%s7388_s3] sm:$0xff]   ;;  %v2294_v43 = vld [vmem:[#allocation3 + $0x1c] sm:$0x1] }
 0x176   :  { %2278 = vst [vmem:[#allocation3 + $0x8] sm:$0xf] %v2277_v18  ;;  %2284 = vst [vmem:[#allocation3 + $0xc] sm:$0x1] %v2283_v19  ;;  %v1800_v25 = vadd.f32 %v6546_v5, %v1703_v12  ;;  %v1706_v26 = vadd.f32 %v5276_v13, %v6561_v14  ;;  %v6622_v44 = vrot.slane %v3280_v17, 5  ;;  %v5076_v45 = vrot.slane %v6603_v33, 9  ;;  %5334 = vmatpush3.bf16.msra.mxu1 %v5666_v0 }
 0x177   :  { %v2286_v35 = vsel %vm6581_vm11, %v2126_v20, %v2285_v57  ;;  %v2289_v36 = vsel %vm6586_vm12, %v2127_v22, %v2288_v8  ;;  %v3940_v54 = vshll.u32 %v6618_v41, 16  ;;  %v2297_v13 = vld [vmem:[#allocation3 + $0x20] sm:$0xf]  ;;  %v2441_v18 = vsel %vm5814_vm2, %v6614_v2, %v6620_v42 }
 0x178   :  { %2287 = vst [vmem:[#allocation3 + $0x10] sm:$0xf] %v2286_v35  ;;  %2290 = vst [vmem:[#allocation3 + $0x14] sm:$0x1] %v2289_v36  ;;  %v1856_v5 = vmax.f32 %v1800_v25, 0.0  ;;  %v1803_v39 = vadd.f32 %v6548_v7, %v1706_v26  ;;  %v6628_v7 = vrot.slane %v3101_v32, 5  ;;  %v6695_v41 = vsel %vm6668_vm15, %v5076_v45, %v2606_v46 }
 0x179   :  { %v2300_v26 = vld [vmem:[#allocation3 + $0x24] sm:$0x1] }
 0x17a   :  { %v5235_v47 = vpack.c.bf16 %v1856_v5, %v1856_v5  ;;  %v1857_v49 = vmax.f32 %v1803_v39, 0.0  ;;  %v6647_v39 = vrot.slane %v3931_v51, 4 }
 0x17c   :  { %v2129_v55 = vshrl.u32 %v5235_v47, 16  ;;  %v2132_v57 = vshll.u32 %v5235_v47, 16  ;;  %v5236_v58 = vpack.c.bf16 %v1857_v49, %v1857_v49  ;;  %v5277_v59 = vpop.f32.mrb[8].mxu0  ;;  %v5667_v47 = vld [vmem:[%s7388_s3 + $0x48] sm:$0xff]  }
 0x17d   :  { %v5278_v62 = vpop.f32.mrb[9].mxu0  ;;  %v2414_v63 = vld [vmem:[#allocation3 + $0x8] sm:$0xf]  ;;  %v2415_v32 = vld [vmem:[#allocation3 + $0xc] sm:$0x1]  ;;  %5335 = vmatprep.subr.bf16.mxu1 %v5667_v47 }
 0x17e   :  { %v2131_v1 = vrot.slane %v2129_v55, 7  ;;  %v2137_v4 = vshrl.u32 %v5236_v58, 16  ;;  %v2140_v6 = vshll.u32 %v5236_v58, 16  ;;  %v5279_v8 = vadd.f32 %v5278_v62, %v5277_v59  ;;  %v5280_v12 = vpop.f32.mrb[10].mxu0  ;;  %5336 = vmatpush3.bf16.msra.mxu1 %v5668_v60 }
 0x17f   :  { %v5281_v15 = vpop.f32.mrb[11].mxu0  ;;  %v5657_v17 = vld [vmem:[#allocation3 + $0x8] ss:$8 sps:$4 sm:$0xff]   ;;  %v2443_v19 = vshrl.u32 %v2414_v63, 16  ;;  %v2446_v38 = vshll.u32 %v2414_v63, 16  ;;  %v2452_v0 = vshll.u32 %v2415_v32, 16  ;;  %v3283_v60 = vsel %vm5814_vm2, %v6626_v50, %v6622_v44 }
 0x180   :  { %v2134_v20 = vor.u32 %v2132_v57, %v2131_v1  ;;  %v2135_v22 = vrot.slane %v2131_v1, 4  ;;  %v2139_v25 = vrot.slane %v2137_v4, 7  ;;  %v5282_v27 = vadd.f32 %v5281_v15, %v5280_v12  ;;  %2684 = vrot.lane.b32.xlu0 %v5657_v17, %s5718_s28  ;;  %v2416_v5 = vld [vmem:[#allocation3 + $0x10] sm:$0xf]  ;;  %v2417_v59 = vld [vmem:[#allocation3 + $0x14] sm:$0x1] }
 0x181   :  { %v1711_v35 = vadd.f32 %v5279_v8, %v6561_v14  ;;  %v2445_v36 = vrot.slane %v2443_v19, 4  ;;  %v2448_v63 = vrot.slane %v2446_v38, 5  ;;  %v2977_v1 = vld [vmem:[#allocation3 + $0x10] sm:$0xf]  ;;  %v2457_v4 = vshrl.u32 %v2416_v5, 16 }
 0x182   :  { %v2292_v49 = vsel %vm6581_vm11, %v2134_v20, %v2291_v61  ;;  %v2295_v55 = vsel %vm6586_vm12, %v2135_v22, %v2294_v43  ;;  %v2142_v57 = vor.u32 %v2140_v6, %v2139_v25  ;;  %v2143_v58 = vrot.slane %v2139_v25, 4  ;;  %v5669_v32 = vld [vmem:[%s7388_s3 + $0x50] sm:$0xff]  }
 0x183   :  { %2293 = vst [vmem:[#allocation3 + $0x18] sm:$0xf] %v2292_v49  ;;  %2296 = vst [vmem:[#allocation3 + $0x1c] sm:$0x1] %v2295_v55  ;;  %v1808_v51 = vadd.f32 %v6552_v10, %v1711_v35  ;;  %v1714_v62 = vadd.f32 %v5282_v27, %v6561_v14  ;;  %v2460_v6 = vshll.u32 %v2416_v5, 16  ;;  %v2449_v12 = vor.u32 %v2448_v63, %v2445_v36  ;;  %v5670_v55 = vld [vmem:[%s7388_s3 + $0x10] sm:$0xff]  }
 0x184   :  { %v2298_v61 = vsel %vm6581_vm11, %v2142_v57, %v2297_v13  ;;  %v2301_v43 = vsel %vm6586_vm12, %v2143_v58, %v2300_v26  ;;  %v2466_v15 = vshll.u32 %v2417_v59, 16  ;;  %v2994_v13 = vshrl.u32 %v2977_v1, 16  ;;  %5337 = vmatprep.subr.bf16.mxu1 %v5669_v32  ;;  %v2306_v57 = vld [vmem:[#allocation3 + $0x2c] sm:$0x1] }
 0x185   :  { %2299 = vst [vmem:[#allocation3 + $0x20] sm:$0xf] %v2298_v61  ;;  %2302 = vst [vmem:[#allocation3 + $0x24] sm:$0x1] %v2301_v43  ;;  %v1858_v8 = vmax.f32 %v1808_v51, 0.0  ;;  %v1811_v10 = vadd.f32 %v6556_v3, %v1714_v62  ;;  %v2997_v19 = vshll.u32 %v2977_v1, 16  ;;  %5338 = vmatpush3.bf16.msra.mxu1 %v5670_v55 }
 0x186   :  { %v6674_v20 = vrot.slane %v3934_v53, 5  ;;  %v6678_v22 = vrot.slane %v3940_v54, 5  ;;  %v2450_v26 = vrot.slane %v2449_v12, 4  ;;  %v2454_v27 = vrot.slane %v2452_v0, 5  ;;  %v2309_v61 = vld [vmem:[#allocation3 + $0x30] sm:$0xf] }
 0x187   :  { %v5237_v25 = vpack.c.bf16 %v1858_v8, %v1858_v8  ;;  %v1859_v3 = vmax.f32 %v1811_v10, 0.0  ;;  %v6683_v36 = vrot.slane %v2457_v4, 4  ;;  %v6685_v38 = vrot.slane %v2460_v6, 5  ;;  %v5671_v6 = vld [vmem:[%s7388_s3 + $0x58] sm:$0xff]  }
 0x188   :  { %v5283_v35 = vpop.f32.mrb[12].mxu0  ;;  %v6687_v40 = vrot.slane %v2466_v15, 5  ;;  %v2455_v47 = vsel %vm5814_vm2, %v2450_v26, %v2454_v27  ;;  %v6699_v49 = vrot.slane %v2994_v13, 4  ;;  %v6709_v59 = vrot.slane %v2997_v19, 5  ;;  %v5672_v19 = vld [vmem:[%s7388_s3 + $0x18] sm:$0xff]   ;;  %5339 = vmatprep.subr.bf16.mxu1 %v5671_v6 }
 0x189   :  { %v2145_v53 = vshrl.u32 %v5237_v25, 16  ;;  %v5238_v54 = vpack.c.bf16 %v1859_v3, %v1859_v3  ;;  %v5284_v5 = vpop.f32.mrb[13].mxu0  ;;  %v5072_v45 = vcombine.low %v2441_v18, %v2455_v47  ;;  %v2148_v62 = vshll.u32 %v5237_v25, 16  ;;  %v2312_v25 = vld [vmem:[#allocation3 + $0x34] sm:$0x1]  ;;  %5340 = vmatpush3.bf16.msra.mxu1 %v5672_v19 }
 0x18a   :  { %v5285_v33 = vadd.f32 %v5284_v5, %v5283_v35  ;;  %v5286_v58 = vpop.f32.mrb[14].mxu0  ;;  %v2418_v46 = vld [vmem:[#allocation3 + $0x18] sm:$0xf]  ;;  %v2463_v42 = vor.u32 %v6685_v38, %v6683_v36  ;;  %v2419_v15 = vld [vmem:[#allocation3 + $0x1c] sm:$0x1]  ;;  %v3000_v35 = vor.u32 %v6709_v59, %v6699_v49 }
 0x18b   :  { %v2147_v51 = vrot.slane %v2145_v53, 7  ;;  %v2153_v63 = vshrl.u32 %v5238_v54, 16  ;;  %v2156_v0 = vshll.u32 %v5238_v54, 16  ;;  %v5287_v1 = vpop.f32.mrb[15].mxu0  ;;  %2552 = vrot.lane.b32.xlu1 %v5072_v45, %s5718_s28  ;;  %v2471_v18 = vshrl.u32 %v2418_v46, 16 }
 0x18c   :  { %v1719_v43 = vadd.f32 %v5285_v33, %v6561_v14  ;;  %v5288_v4 = vadd.f32 %v5287_v1, %v5286_v58  ;;  %v5658_v2 = vld [vmem:[#allocation3 + $0x18] ss:$8 sps:$4 sm:$0xff]   ;;  %v2474_v13 = vshll.u32 %v2418_v46, 16  ;;  %v2978_v5 = vld [vmem:[#allocation3 + $0x14] sm:$0x1]  ;;  %v2480_v33 = vshll.u32 %v2419_v15, 16 }
 0x18d   :  { %v2150_v8 = vor.u32 %v2148_v62, %v2147_v51  ;;  %v2151_v10 = vrot.slane %v2147_v51, 4  ;;  %v2155_v12 = vrot.slane %v2153_v63, 7  ;;  %2686 = vrot.lane.b32.xlu0 %v5658_v2, %s5718_s28  ;;  %v2473_v27 = vrot.slane %v2471_v18, 4  ;;  %v2420_v32 = vld [vmem:[#allocation3 + $0x20] sm:$0xf] }
 0x18e   :  { %v1816_v3 = vadd.f32 %v6550_v9, %v1719_v43  ;;  %v1722_v26 = vadd.f32 %v5288_v4, %v6561_v14  ;;  %v5673_v9 = vld [vmem:[%s7388_s3 + $0x60] sm:$0xff]   ;;  %v2476_v55 = vrot.slane %v2474_v13, 5  ;;  %v2485_v46 = vshrl.u32 %v2420_v32, 16  ;;  %v6745_v63 = vld [vmem:[#allocation3 + $0x18] sm:$0xf] }
 0x18f   :  { %v2304_v36 = vsel %vm6581_vm11, %v2150_v8, %v2303_v34  ;;  %v2307_v38 = vsel %vm6586_vm12, %v2151_v10, %v2306_v57  ;;  %v2158_v53 = vor.u32 %v2156_v0, %v2155_v12  ;;  %v2159_v54 = vrot.slane %v2155_v12, 4  ;;  %v2421_v58 = vld [vmem:[#allocation3 + $0x24] sm:$0x1]  ;;  %5341 = vmatprep.subr.bf16.mxu1 %v5673_v9  ;;  %v2315_v15 = vld [vmem:[#allocation3 + $0x38] sm:$0xf] }
 0x190   :  { %2305 = vst [vmem:[#allocation3 + $0x28] sm:$0xf] %v2304_v36  ;;  %2308 = vst [vmem:[#allocation3 + $0x2c] sm:$0x1] %v2307_v38  ;;  %v1860_v47 = vmax.f32 %v1816_v3, 0.0  ;;  %v1819_v49 = vadd.f32 %v6554_v11, %v1722_v26  ;;  %v5674_v34 = vld [vmem:[%s7388_s3 + $0x20] sm:$0xff]   ;;  %v2477_v62 = vor.u32 %v2476_v55, %v2473_v27 }
 0x191   :  { %v2310_v57 = vsel %vm6581_vm11, %v2158_v53, %v2309_v61  ;;  %v2313_v45 = vsel %vm6586_vm12, %v2159_v54, %v2312_v25  ;;  %v2488_v59 = vshll.u32 %v2420_v32, 16  ;;  %v3003_v0 = vshll.u32 %v2978_v5, 16  ;;  %5342 = vmatpush3.bf16.msra.mxu1 %v5674_v34  ;;  %v5675_v3 = vld [vmem:[%s7388_s3 + $0x68] sm:$0xff]   ;;  %v2318_v53 = vld [vmem:[#allocation3 + $0x3c] sm:$0x1] }
 0x192   :  { %2311 = vst [vmem:[#allocation3 + $0x30] sm:$0xf] %v2310_v57  ;;  %2314 = vst [vmem:[#allocation3 + $0x34] sm:$0x1] %v2313_v45  ;;  %v5239_v51 = vpack.c.bf16 %v1860_v47, %v1860_v47  ;;  %v1861_v11 = vmax.f32 %v1819_v49, 0.0  ;;  %v2464_v1 = vrot.slane %v2463_v42, 4  ;;  %v3104_v42 = vsel %vm5814_vm2, %v6630_v48, %v6628_v7  ;;  %5343 = vmatprep.subr.bf16.mxu1 %v5675_v3 }
 0x193   :  { %v2487_v43 = vrot.slane %v2485_v46, 4  ;;  %v2490_v4 = vrot.slane %v2488_v59, 5  ;;  %v2494_v2 = vshll.u32 %v2421_v58, 16  ;;  %v2478_v8 = vrot.slane %v2477_v62, 4  ;;  %v2321_v58 = vld [vmem:[#allocation3 + $0x40] sm:$0xf] }
 0x194   :  { %v2161_v61 = vshrl.u32 %v5239_v51, 16  ;;  %v5240_v18 = vpack.c.bf16 %v1861_v11, %v1861_v11  ;;  %v5289_v6 = vpop.f32.mrb[16].mxu0  ;;  %v2482_v10 = vrot.slane %v2480_v33, 5  ;;  %v2164_v12 = vshll.u32 %v5239_v51, 16  ;;  %v2324_v34 = vld [vmem:[#allocation3 + $0x44] sm:$0x1] }
 0x195   :  { %v5290_v13 = vpop.f32.mrb[17].mxu0  ;;  %v2491_v19 = vor.u32 %v2490_v4, %v2487_v43  ;;  %v6747_v25 = vrot.slane %v3000_v35, 4  ;;  %v3008_v38 = vshrl.u32 %v6745_v63, 16  ;;  %v2469_v35 = vsel %vm5814_vm2, %v2464_v1, %v6687_v40  ;;  %v5676_v40 = vld [vmem:[%s7388_s3 + $0xc0] sm:$0xff]   ;;  %v5677_v62 = vld [vmem:[%s7388_s3 + $0x28] sm:$0xff]  }
 0x196   :  { %v2163_v26 = vrot.slane %v2161_v61, 7  ;;  %v2169_v27 = vshrl.u32 %v5240_v18, 16  ;;  %v5291_v32 = vadd.f32 %v5290_v13, %v5289_v6  ;;  %v5292_v36 = vpop.f32.mrb[18].mxu0  ;;  %v2483_v54 = vsel %vm5814_vm2, %v2478_v8, %v2482_v10  ;;  %5397 = vmatprep.subr.bf16.mxu0 %v5676_v40  ;;  %v5680_v13 = vld [vmem:[%s7388_s3 + $0x70] sm:$0xff]   ;;  %5344 = vmatpush3.bf16.msra.mxu1 %v5677_v62  ;;  %v5682_v40 = vld [vmem:[%s7388_s3 + $0x78] sm:$0xff]  }
 0x197   :  { %v5293_v5 = vpop.f32.mrb[19].mxu0  ;;  %v6762_v9 = vrot.slane %v2494_v2, 5  ;;  %v6764_v47 = vrot.slane %v3003_v0, 5  ;;  %v2172_v33 = vshll.u32 %v5240_v18, 16  ;;  %v6766_v57 = vrot.slane %v2491_v19, 4  ;;  %v5678_v18 = vld [vmem:[%s7388_s3 + $0x80] sm:$0xff]   ;;  %5345 = vmatprep.subr.bf16.mxu1 %v5680_v13 }
 0x198   :  { %v2166_v49 = vor.u32 %v2164_v12, %v2163_v26  ;;  %v2167_v55 = vrot.slane %v2163_v26, 4  ;;  %v2171_v45 = vrot.slane %v2169_v27, 7  ;;  %v5073_v46 = vcombine.low %v2469_v35, %v2483_v54  ;;  %v2422_v43 = vld [vmem:[#allocation3 + $0x28] sm:$0xf]  ;;  %v2423_v4 = vld [vmem:[#allocation3 + $0x2c] sm:$0x1]  ;;  %5398 = vmatpush3.bf16.msra.mxu0 %v5678_v18 }
 0x199   :  { %v5294_v59 = vadd.f32 %v5293_v5, %v5292_v36  ;;  %v1727_v51 = vadd.f32 %v5291_v32, %v6561_v14  ;;  %v5659_v11 = vld [vmem:[#allocation3 + $0x28] ss:$8 sps:$4 sm:$0xff]   ;;  %v3006_v2 = vsel %vm5814_vm2, %v6747_v25, %v6764_v47  ;;  %v3010_v61 = vrot.slane %v3008_v38, 4 }
 0x19a   :  { %v2316_v0 = vsel %vm6581_vm11, %v2166_v49, %v2315_v15  ;;  %v2319_v1 = vsel %vm6586_vm12, %v2167_v55, %v2318_v53  ;;  %v2174_v6 = vor.u32 %v2172_v33, %v2171_v45  ;;  %v2175_v8 = vrot.slane %v2171_v45, 4  ;;  %2554 = vrot.lane.b32.xlu1 %v5073_v46, %s5718_s28  ;;  %2688 = vrot.lane.b32.xlu0 %v5659_v11, %s5718_s28  ;;  %v2980_v15 = vld [vmem:[#allocation3 + $0x1c] sm:$0x1]  ;;  %v2424_v32 = vld [vmem:[#allocation3 + $0x30] sm:$0xf]  ;;  %v5685_v47 = vld [vmem:[%s7388_s3 + $0x88] sm:$0xff]  }
 0x19b   :  { %2317 = vst [vmem:[#allocation3 + $0x38] sm:$0xf] %v2316_v0  ;;  %2320 = vst [vmem:[#allocation3 + $0x3c] sm:$0x1] %v2319_v1  ;;  %v1824_v10 = vadd.f32 %v6566_v24, %v1727_v51  ;;  %v1730_v12 = vadd.f32 %v5294_v59, %v6561_v14  ;;  %v2499_v19 = vshrl.u32 %v2422_v43, 16  ;;  %v2502_v3 = vshll.u32 %v2422_v43, 16 }
 0x19c   :  { %v2508_v26 = vshll.u32 %v2423_v4, 16  ;;  %v3011_v27 = vshll.u32 %v6745_v63, 16  ;;  %v2322_v24 = vsel %vm6581_vm11, %v2174_v6, %v2321_v58  ;;  %v2325_v36 = vsel %vm6586_vm12, %v2175_v8, %v2324_v34  ;;  %v5681_v35 = vld [vmem:[%s7388_s3 + $0x30] sm:$0xff]  }
 0x19d   :  { %v1862_v38 = vmax.f32 %v1824_v10, 0.0  ;;  %v1827_v53 = vadd.f32 %v6571_v29, %v1730_v12  ;;  %2323 = vst [vmem:[#allocation3 + $0x40] sm:$0xf] %v2322_v24  ;;  %2326 = vst [vmem:[#allocation3 + $0x44] sm:$0x1] %v2325_v36  ;;  %v2497_v63 = vsel %vm5814_vm2, %v6766_v57, %v6762_v9  ;;  %v2501_v54 = vrot.slane %v2499_v19, 4  ;;  %5346 = vmatpush3.bf16.msra.mxu1 %v5681_v35 }
 0x19e   :  { %v2504_v5 = vrot.slane %v2502_v3, 5  ;;  %v3013_v49 = vrot.slane %v3011_v27, 5  ;;  %v2425_v55 = vld [vmem:[#allocation3 + $0x34] sm:$0x1]  ;;  %v3017_v34 = vshll.u32 %v2980_v15, 16  ;;  %v2513_v29 = vshrl.u32 %v2424_v32, 16  ;;  %5347 = vmatprep.subr.bf16.mxu1 %v5682_v40 }
 0x19f   :  { %v5241_v33 = vpack.c.bf16 %v1862_v38, %v1862_v38  ;;  %v1863_v58 = vmax.f32 %v1827_v53, 0.0  ;;  %v2510_v59 = vrot.slane %v2508_v26, 5  ;;  %v2516_v11 = vshll.u32 %v2424_v32, 16  ;;  %v5683_v9 = vld [vmem:[%s7388_s3 + $0xc8] sm:$0xff]   ;;  %v2327_v3 = vld [vmem:[#allocation3 + $0x58] sm:$0xf] }
 0x1a0   :  { %v5295_v45 = vpop.f32.mrb[20].mxu0  ;;  %v2505_v46 = vor.u32 %v2504_v5, %v2501_v54  ;;  %v3014_v51 = vor.u32 %v3013_v49, %v3010_v61  ;;  %v2522_v43 = vshll.u32 %v2425_v55, 16  ;;  %v3019_v10 = vrot.slane %v3017_v34, 5  ;;  %5399 = vmatprep.subr.bf16.mxu0 %v5683_v9  ;;  %v2330_v26 = vld [vmem:[#allocation3 + $0x5c] sm:$0x1] }
 0x1a1   :  { %v2177_v57 = vshrl.u32 %v5241_v33, 16  ;;  %v2180_v62 = vshll.u32 %v5241_v33, 16  ;;  %v5242_v0 = vpack.c.bf16 %v1863_v58, %v1863_v58  ;;  %v5296_v1 = vpop.f32.mrb[21].mxu0  ;;  %v2515_v19 = vrot.slane %v2513_v29, 4  ;;  %v2333_v27 = vld [vmem:[#allocation3 + $0x60] sm:$0xf]  ;;  %5400 = vmatpush3.bf16.msra.mxu0 %v5685_v47 }
 0x1a2   :  { %v5297_v4 = vadd.f32 %v5296_v1, %v5295_v45  ;;  %v5298_v18 = vpop.f32.mrb[22].mxu0  ;;  %v2506_v6 = vrot.slane %v2505_v46, 4  ;;  %v3015_v8 = vrot.slane %v3014_v51, 4  ;;  %v2336_v55 = vld [vmem:[#allocation3 + $0x64] sm:$0x1]  ;;  %v2518_v40 = vrot.slane %v2516_v11, 5 }
 0x1a3   :  { %v2179_v12 = vrot.slane %v2177_v57, 7  ;;  %v2185_v61 = vshrl.u32 %v5242_v0, 16  ;;  %v2188_v15 = vshll.u32 %v5242_v0, 16  ;;  %v5299_v13 = vpop.f32.mrb[23].mxu0  ;;  %v2426_v29 = vld [vmem:[#allocation3 + $0x38] sm:$0xf] }
 0x1a4   :  { %v1735_v32 = vadd.f32 %v5297_v4, %v6561_v14  ;;  %v2511_v24 = vsel %vm5814_vm2, %v2506_v6, %v2510_v59  ;;  %v5300_v36 = vadd.f32 %v5299_v13, %v5298_v18  ;;  %v3020_v38 = vsel %vm5814_vm2, %v3015_v8, %v3019_v10  ;;  %v5660_v49 = vld [vmem:[#allocation3 + $0x38] ss:$8 sps:$4 sm:$0xff]   ;;  %v2427_v25 = vld [vmem:[#allocation3 + $0x3c] sm:$0x1]  ;;  %v2848_v57 = vld [vmem:[#allocation3 + $0x8] sm:$0xe] }
 0x1a5   :  { %v2182_v53 = vor.u32 %v2180_v62, %v2179_v12  ;;  %v2183_v35 = vrot.slane %v2179_v12, 4  ;;  %v2187_v54 = vrot.slane %v2185_v61, 7  ;;  %v5074_v5 = vcombine.low %v2497_v63, %v2511_v24  ;;  %v5684_v45 = vld [vmem:[%s7388_s3 + $0x38] sm:$0xff]   ;;  %2690 = vrot.lane.b32.xlu0 %v5660_v49, %s5718_s28  ;;  %v2849_v62 = vld [vmem:[#allocation3 + $0xc] sm:$0x1] }
 0x1a6   :  { %v1832_v33 = vadd.f32 %v6564_v21, %v1735_v32  ;;  %v1738_v58 = vadd.f32 %v5300_v36, %v6561_v14  ;;  %v5112_v34 = vcombine.low %v3006_v2, %v3020_v38  ;;  %v2519_v11 = vor.u32 %v2518_v40, %v2515_v19  ;;  %5348 = vmatpush3.bf16.msra.mxu1 %v5684_v45  ;;  %v2850_v6 = vld [vmem:[#allocation3 + $0x10] sm:$0xe]  ;;  %v2851_v12 = vld [vmem:[#allocation3 + $0x14] sm:$0x1]  ;;  %v6843_v61 = vld [vmem:[#allocation3 + $0x20] sm:$0xf] }
 0x1a7   :  { %v2328_v63 = vsel %vm6581_vm11, %v2182_v53, %v2327_v3  ;;  %v2331_v21 = vsel %vm6586_vm12, %v2183_v35, %v2330_v26  ;;  %v2190_v46 = vor.u32 %v2188_v15, %v2187_v54  ;;  %v2191_v59 = vrot.slane %v2187_v54, 4  ;;  %2556 = vrot.lane.b32.xlu1 %v5074_v5, %s5718_s28  ;;  %v5687_v15 = vld [vmem:[%s7388_s3 + $0xd0] sm:$0xff]   ;;  %v2339_v35 = vld [vmem:[#allocation3 + $0x68] sm:$0xf]  ;;  %v2342_v54 = vld [vmem:[#allocation3 + $0x6c] sm:$0x1] }
 0x1a8   :  { %2329 = vst [vmem:[#allocation3 + $0x58] sm:$0xf] %v2328_v63  ;;  %2332 = vst [vmem:[#allocation3 + $0x5c] sm:$0x1] %v2331_v21  ;;  %v1864_v2 = vmax.f32 %v1832_v33, 0.0  ;;  %v1835_v51 = vadd.f32 %v6569_v28, %v1738_v58  ;;  %v6837_v9 = vrot.slane %v2522_v43, 5  ;;  %v3937_v38 = vor.u32 %v6674_v20, %v6647_v39  ;;  %5401 = vmatprep.subr.bf16.mxu0 %v5687_v15 }
 0x1a9   :  { %v2334_v0 = vsel %vm6581_vm11, %v2190_v46, %v2333_v27  ;;  %v2337_v1 = vsel %vm6586_vm12, %v2191_v59, %v2336_v55  ;;  %v2527_v4 = vshrl.u32 %v2426_v29, 16  ;;  %v2530_v18 = vshll.u32 %v2426_v29, 16  ;;  %3117 = vrot.lane.b32.xlu0 %v5112_v34, %s5718_s28  ;;  %v5688_v53 = vld [vmem:[%s7388_s3 + $0x90] sm:$0xff]   ;;  %v5689_v34 = vld [vmem:[%s7388_s3 + $0xd8] sm:$0xff]   ;;  %v2571_v20 = vld [vmem:[#allocation3 + $0x8] sm:$0xe] }
 0x1aa   :  { %2335 = vst [vmem:[#allocation3 + $0x60] sm:$0xf] %v2334_v0  ;;  %2338 = vst [vmem:[#allocation3 + $0x64] sm:$0x1] %v2337_v1  ;;  %v5243_v8 = vpack.c.bf16 %v1864_v2, %v1864_v2  ;;  %v1865_v28 = vmax.f32 %v1835_v51, 0.0  ;;  %v2520_v10 = vrot.slane %v2519_v11, 4  ;;  %5402 = vmatpush3.bf16.msra.mxu0 %v5688_v53 }
 0x1ab   :  { %v2536_v43 = vshll.u32 %v2427_v25, 16  ;;  %v2529_v13 = vrot.slane %v2527_v4, 4  ;;  %v2532_v19 = vrot.slane %v2530_v18, 5  ;;  %v5096_v3 = vrot.slane %v2848_v57, 9  ;;  %v2345_v46 = vld [vmem:[#allocation3 + $0x70] sm:$0xf]  ;;  %5403 = vmatprep.subr.bf16.mxu0 %v5689_v34 }
 0x1ac   :  { %v2882_v26 = vrot.slane %v2849_v62, 5  ;;  %v2193_v27 = vshrl.u32 %v5243_v8, 16  ;;  %v2196_v32 = vshll.u32 %v5243_v8, 16  ;;  %v5244_v24 = vpack.c.bf16 %v1865_v28, %v1865_v28  ;;  %v5301_v36 = vpop.f32.mrb[24].mxu0  ;;  %v2348_v62 = vld [vmem:[#allocation3 + $0x74] sm:$0x1] }
 0x1ad   :  { %v5302_v5 = vpop.f32.mrb[25].mxu0  ;;  %v2525_v49 = vsel %vm5814_vm2, %v2520_v10, %v6837_v9  ;;  %v2533_v55 = vor.u32 %v2532_v19, %v2529_v13  ;;  %v2538_v33 = vrot.slane %v2536_v43, 5  ;;  %v5097_v58 = vrot.slane %v2850_v6, 9  ;;  %v2982_v1 = vld [vmem:[#allocation3 + $0x24] sm:$0x1]  ;;  %v5691_v10 = vld [vmem:[%s7388_s3 + $0x98] sm:$0xff]  }
 0x1ae   :  { %v2195_v29 = vrot.slane %v2193_v27, 7  ;;  %v2201_v40 = vshrl.u32 %v5244_v24, 16  ;;  %v2204_v45 = vshll.u32 %v5244_v24, 16  ;;  %v5303_v63 = vadd.f32 %v5302_v5, %v5301_v36  ;;  %v5304_v21 = vpop.f32.mrb[26].mxu0  ;;  %v2983_v19 = vld [vmem:[#allocation3 + $0x28] sm:$0xf]  ;;  %5404 = vmatpush3.bf16.msra.mxu0 %v5691_v10 }
 0x1af   :  { %v2534_v59 = vrot.slane %v2533_v55, 4  ;;  %v5305_v25 = vpop.f32.mrb[27].mxu0  ;;  %v6862_v47 = vsel %vm6668_vm15, %v5096_v3, %v2882_v26  ;;  %v2886_v2 = vrot.slane %v2851_v12, 5  ;;  %v3022_v51 = vshrl.u32 %v6843_v61, 16  ;;  %v5692_v3 = vld [vmem:[%s7388_s3 + $0xe0] sm:$0xff]  }
 0x1b0   :  { %v2198_v11 = vor.u32 %v2196_v32, %v2195_v29  ;;  %v2199_v9 = vrot.slane %v2195_v29, 4  ;;  %v2203_v57 = vrot.slane %v2201_v40, 7  ;;  %v5306_v0 = vadd.f32 %v5305_v25, %v5304_v21  ;;  %v2984_v36 = vld [vmem:[#allocation3 + $0x2c] sm:$0x1]  ;;  %v3256_v53 = vld [vmem:[#allocation3 + $0x58] sm:$0xf]  ;;  %5405 = vmatprep.subr.bf16.mxu0 %v5692_v3 }
 0x1b1   :  { %v2539_v4 = vsel %vm5814_vm2, %v2534_v59, %v2538_v33  ;;  %v1743_v18 = vadd.f32 %v5303_v63, %v6561_v14  ;;  %v2887_v6 = vsel %vm6668_vm15, %v5097_v58, %v2886_v2  ;;  %v5661_v8 = vld [vmem:[#allocation3 + $0x58] ss:$8 sps:$4 sm:$0xff]   ;;  %v3024_v28 = vrot.slane %v3022_v51, 4  ;;  %v3257_v59 = vld [vmem:[#allocation3 + $0x5c] sm:$0x1] }
 0x1b2   :  { %v2340_v43 = vsel %vm6581_vm11, %v2198_v11, %v2339_v35  ;;  %v2343_v12 = vsel %vm6586_vm12, %v2199_v9, %v2342_v54  ;;  %v2206_v15 = vor.u32 %v2204_v45, %v2203_v57  ;;  %v2207_v13 = vrot.slane %v2203_v57, 4  ;;  %3523 = vrot.lane.b32.xlu0 %v5661_v8, %s5718_s28  ;;  %v5693_v58 = vld [vmem:[%s7388_s3 + $0xa0] sm:$0xff]  }
 0x1b3   :  { %2341 = vst [vmem:[#allocation3 + $0x68] sm:$0xf] %v2340_v43  ;;  %2344 = vst [vmem:[#allocation3 + $0x6c] sm:$0x1] %v2343_v12  ;;  %v5075_v26 = vcombine.low %v2525_v49, %v2539_v4  ;;  %v1840_v27 = vadd.f32 %v6597_v23, %v1743_v18  ;;  %v5104_v32 = vcombine.low %v6862_v47, %v2887_v6  ;;  %v3025_v5 = vshll.u32 %v6843_v61, 16  ;;  %v5697_v4 = vld [vmem:[%s7388_s3 + $0xa8] sm:$0xff]  }
 0x1b4   :  { %v1746_v24 = vadd.f32 %v5306_v0, %v6561_v14  ;;  %v2346_v35 = vsel %vm6581_vm11, %v2206_v15, %v2345_v46  ;;  %v2349_v54 = vsel %vm6586_vm12, %v2207_v13, %v2348_v62  ;;  %v3031_v55 = vshll.u32 %v2982_v1, 16  ;;  %5406 = vmatpush3.bf16.msra.mxu0 %v5693_v58  ;;  %v2351_v18 = vld [vmem:[#allocation3 + $0x78] sm:$0xf]  ;;  %v2354_v6 = vld [vmem:[#allocation3 + $0x7c] sm:$0x1] }
 0x1b5   :  { %2347 = vst [vmem:[#allocation3 + $0x70] sm:$0xf] %v2346_v35  ;;  %2350 = vst [vmem:[#allocation3 + $0x74] sm:$0x1] %v2349_v54  ;;  %2558 = vrot.lane.b32.xlu1 %v5075_v26, %s5718_s28  ;;  %v1866_v23 = vmax.f32 %v1840_v27, 0.0  ;;  %v3036_v49 = vshrl.u32 %v2983_v19, 16 }
 0x1b6   :  { %v1843_v14 = vadd.f32 %v6611_v37, %v1746_v24  ;;  %v3039_v33 = vshll.u32 %v2983_v19, 16  ;;  %v3027_v34 = vrot.slane %v3025_v5, 5  ;;  %v3033_v29 = vrot.slane %v3031_v55, 5  ;;  %v5696_v37 = vld [vmem:[%s7388_s3 + $0xe8] sm:$0xff]   ;;  %v6904_v27 = vld [vmem:[%s7388_s3 + $0x100] sm:$0xff]   ;;  %v5699_v5 = vld [vmem:[%s7388_s3 + $0xf0] sm:$0xff]  }
 0x1b7   :  { %v3045_v40 = vshll.u32 %v2984_v36, 16  ;;  %v3285_v61 = vshrl.u32 %v3256_v53, 16  ;;  %v5245_v45 = vpack.c.bf16 %v1866_v23, %v1866_v23  ;;  %v3038_v21 = vrot.slane %v3036_v49, 4  ;;  %5407 = vmatprep.subr.bf16.mxu0 %v5696_v37  ;;  %v5717_v36 = vld [vmem:[%s7387_s2] ss:$0 sm:$0xff]  ;;  %5513 = vmatprep.subr.bf16.mxu1 %v6904_v27 }
 0x1b8   :  { %v1867_v63 = vmax.f32 %v1843_v14, 0.0  ;;  %v3041_v46 = vrot.slane %v3039_v33, 5  ;;  %v3028_v25 = vor.u32 %v3027_v34, %v3024_v28  ;;  %v5307_v2 = vpop.f32.mrb[28].mxu0  ;;  %v3288_v11 = vshll.u32 %v3256_v53, 16  ;;  %5408 = vmatpush3.bf16.msra.mxu0 %v5697_v4  ;;  %v2360_v49 = vld [vmem:[#allocation3 + $0x84] sm:$0x1] }
 0x1b9   :  { %v3047_v47 = vrot.slane %v3045_v40, 5  ;;  %v3287_v51 = vrot.slane %v3285_v61, 4  ;;  %v2209_v9 = vshrl.u32 %v5245_v45, 16  ;;  %v2212_v57 = vshll.u32 %v5245_v45, 16  ;;  %2924 = vrot.lane.b32.xlu1 %v5104_v32, %s5718_s28  ;;  %v5308_v1 = vpop.f32.mrb[29].mxu0  ;;  %5409 = vmatprep.subr.bf16.mxu0 %v5699_v5 }
 0x1ba   :  { %v5246_v62 = vpack.c.bf16 %v1867_v63, %v1867_v63  ;;  %v3042_v0 = vor.u32 %v3041_v46, %v3038_v21  ;;  %v3029_v8 = vrot.slane %v3028_v25, 4  ;;  %v5309_v28 = vadd.f32 %v5308_v1, %v5307_v2  ;;  %v5310_v10 = vpop.f32.mrb[30].mxu0  ;;  %v2357_v32 = vld [vmem:[#allocation3 + $0x80] sm:$0xf]  ;;  %v2852_v58 = vld [vmem:[#allocation3 + $0x18] sm:$0xe] }
 0x1bb   :  { %v3290_v43 = vrot.slane %v3288_v11, 5  ;;  %v3294_v12 = vshll.u32 %v3257_v59, 16  ;;  %v2211_v15 = vrot.slane %v2209_v9, 7  ;;  %v5311_v26 = vpop.f32.mrb[31].mxu0  ;;  %v2853_v45 = vld [vmem:[#allocation3 + $0x1c] sm:$0x1] }
 0x1bc   :  { %v2217_v13 = vshrl.u32 %v5246_v62, 16  ;;  %v2220_v19 = vshll.u32 %v5246_v62, 16  ;;  %v3043_v3 = vrot.slane %v3042_v0, 4  ;;  %v3034_v24 = vsel %vm5814_vm2, %v3029_v8, %v3033_v29  ;;  %v2854_v63 = vld [vmem:[#allocation3 + $0x20] sm:$0xe]  ;;  %v5700_v21 = vld [vmem:[%s7388_s3 + $0xb0] sm:$0xff]  }
 0x1bd   :  { %v1751_v53 = vadd.f32 %v5717_v36, %v5309_v28  ;;  %v3291_v35 = vor.u32 %v3290_v43, %v3287_v51  ;;  %v3296_v54 = vrot.slane %v3294_v12, 5  ;;  %v2214_v55 = vor.u32 %v2212_v57, %v2211_v15  ;;  %v2985_v2 = vld [vmem:[#allocation3 + $0x30] sm:$0xf]  ;;  %v2986_v0 = vld [vmem:[#allocation3 + $0x34] sm:$0x1]  ;;  %5410 = vmatpush3.bf16.msra.mxu0 %v5700_v21  ;;  %v5703_v28 = vld [vmem:[%s7388_s3 + $0xb8] sm:$0xff]  }
 0x1be   :  { %v2215_v23 = vrot.slane %v2211_v15, 4  ;;  %v2219_v14 = vrot.slane %v2217_v13, 7  ;;  %v3048_v33 = vsel %vm5814_vm2, %v3043_v3, %v3047_v47  ;;  %v5312_v61 = vadd.f32 %v5311_v26, %v5310_v10  ;;  %v2855_v47 = vld [vmem:[#allocation3 + $0x24] sm:$0x1]  ;;  %v5662_v62 = vld [vmem:[#allocation3 + $0x68] ss:$8 sps:$4 sm:$0xff]  }
 0x1bf   :  { %v5113_v34 = vcombine.low %v3034_v24, %v3048_v33  ;;  %v1848_v29 = vadd.f32 %v6591_v16, %v1751_v53  ;;  %v3292_v40 = vrot.slane %v3291_v35, 4  ;;  %v2352_v46 = vsel %vm6581_vm11, %v2214_v55, %v2351_v18  ;;  %v5701_v16 = vld [vmem:[%s7388_s3 + $0xf8] sm:$0xff]   ;;  %v2366_v53 = vld [vmem:[#allocation3 + $0x8c] sm:$0x1]  ;;  %v3976_v31 = vld [vmem:[#allocation3 + $0x70] sm:$0xe] }
 0x1c0   :  { %v2355_v59 = vsel %vm6586_vm12, %v2215_v23, %v2354_v6  ;;  %v2222_v37 = vor.u32 %v2220_v19, %v2219_v14  ;;  %v2223_v25 = vrot.slane %v2219_v14, 4  ;;  %2353 = vst [vmem:[#allocation3 + $0x78] sm:$0xf] %v2352_v46  ;;  %v1754_v9 = vadd.f32 %v5717_v36, %v5312_v61  ;;  %v2987_v8 = vld [vmem:[#allocation3 + $0x38] sm:$0xf]  ;;  %5411 = vmatprep.subr.bf16.mxu0 %v5701_v16 }
 0x1c1   :  { %2356 = vst [vmem:[#allocation3 + $0x7c] sm:$0x1] %v2355_v59  ;;  %3119 = vrot.lane.b32.xlu0 %v5113_v34, %s5718_s28  ;;  %v1868_v51 = vmax.f32 %v1848_v29, 0.0  ;;  %v3297_v11 = vsel %vm5814_vm2, %v3292_v40, %v3296_v54  ;;  %v5098_v57 = vrot.slane %v2852_v58, 9  ;;  %v2890_v6 = vrot.slane %v2853_v45, 5  ;;  %5412 = vmatpush3.bf16.msra.mxu0 %v5703_v28 }
 0x1c2   :  { %v2358_v1 = vsel %vm6581_vm11, %v2222_v37, %v2357_v32  ;;  %v2361_v4 = vsel %vm6586_vm12, %v2223_v25, %v2360_v49  ;;  %v5132_v18 = vcombine.low %v3283_v60, %v3297_v11  ;;  %v1851_v43 = vadd.f32 %v6601_v30, %v1754_v9  ;;  %v2988_v13 = vld [vmem:[#allocation3 + $0x3c] sm:$0x1]  ;;  %v3258_v19 = vld [vmem:[#allocation3 + $0x60] sm:$0xf]  ;;  %v2363_v30 = vld [vmem:[#allocation3 + $0x88] sm:$0xf] }
 0x1c3   :  { %2359 = vst [vmem:[#allocation3 + $0x80] sm:$0xf] %v2358_v1  ;;  %2362 = vst [vmem:[#allocation3 + $0x84] sm:$0x1] %v2361_v4  ;;  %v5247_v10 = vpack.c.bf16 %v1868_v51, %v1868_v51  ;;  %v5099_v12 = vrot.slane %v2854_v63, 9  ;;  %v2894_v15 = vrot.slane %v2855_v47, 5  ;;  %v2891_v44 = vsel %vm6668_vm15, %v5098_v57, %v2890_v6 }
 0x1c4   :  { %3394 = vrot.lane.b32.xlu1 %v5132_v18, %s5718_s28  ;;  %v3050_v50 = vshrl.u32 %v2985_v2, 16  ;;  %v3053_v60 = vshll.u32 %v2985_v2, 16  ;;  %v3059_v3 = vshll.u32 %v2986_v0, 16  ;;  %v1869_v24 = vmax.f32 %v1851_v43, 0.0  ;;  %v3259_v58 = vld [vmem:[#allocation3 + $0x64] sm:$0x1] }
 0x1c5   :  { %v2225_v26 = vshrl.u32 %v5247_v10, 16  ;;  %v2228_v32 = vshll.u32 %v5247_v10, 16  ;;  %v2895_v36 = vsel %vm6668_vm15, %v5099_v12, %v2894_v15  ;;  %3525 = vrot.lane.b32.xlu0 %v5662_v62, %s5718_s28  ;;  %v3064_v49 = vshrl.u32 %v2987_v8, 16  ;;  %v3260_v59 = vld [vmem:[#allocation3 + $0x68] sm:$0xf] }
 0x1c6   :  { %v5105_v35 = vcombine.low %v2891_v44, %v2895_v36  ;;  %v3052_v54 = vrot.slane %v3050_v50, 4  ;;  %v3055_v5 = vrot.slane %v3053_v60, 5  ;;  %v3061_v55 = vrot.slane %v3059_v3, 5  ;;  %v2369_v37 = vld [vmem:[#allocation3 + $0x90] sm:$0xf] }
 0x1c7   :  { %v2227_v23 = vrot.slane %v2225_v26, 7  ;;  %v5248_v14 = vpack.c.bf16 %v1869_v24, %v1869_v24  ;;  %v3067_v33 = vshll.u32 %v2987_v8, 16  ;;  %v3073_v29 = vshll.u32 %v2988_v13, 16  ;;  %v2372_v57 = vld [vmem:[#allocation3 + $0x94] sm:$0x1] }
 0x1c8   :  { %2926 = vrot.lane.b32.xlu1 %v5105_v35, %s5718_s28  ;;  %v3056_v34 = vor.u32 %v3055_v5, %v3052_v54  ;;  %v3299_v40 = vshrl.u32 %v3258_v19, 16  ;;  %v3302_v61 = vshll.u32 %v3258_v19, 16  ;;  %v3066_v47 = vrot.slane %v3064_v49, 4  ;;  %v3261_v62 = vld [vmem:[#allocation3 + $0x6c] sm:$0x1] }
 0x1c9   :  { %v2230_v45 = vor.u32 %v2228_v32, %v2227_v23  ;;  %v2231_v63 = vrot.slane %v2227_v23, 4  ;;  %v2233_v21 = vshrl.u32 %v5248_v14, 16  ;;  %v2236_v46 = vshll.u32 %v5248_v14, 16  ;;  %v2856_v8 = vld [vmem:[#allocation3 + $0x28] sm:$0xe] }
 0x1ca   :  { %v3057_v25 = vrot.slane %v3056_v34, 4  ;;  %v3069_v2 = vrot.slane %v3067_v33, 5  ;;  %v3075_v16 = vrot.slane %v3073_v29, 5  ;;  %v3301_v0 = vrot.slane %v3299_v40, 4  ;;  %v2857_v28 = vld [vmem:[#allocation3 + $0x2c] sm:$0x1] }
 0x1cb   :  { %v2364_v51 = vsel %vm6581_vm11, %v2230_v45, %v2363_v30  ;;  %v2367_v11 = vsel %vm6586_vm12, %v2231_v63, %v2366_v53  ;;  %v2235_v9 = vrot.slane %v2233_v21, 7  ;;  %v3304_v18 = vrot.slane %v3302_v61, 5  ;;  %v2858_v13 = vld [vmem:[#allocation3 + $0x30] sm:$0xe]  ;;  %v2859_v3 = vld [vmem:[#allocation3 + $0x34] sm:$0x1] }
 0x1cc   :  { %2365 = vst [vmem:[#allocation3 + $0x88] sm:$0xf] %v2364_v51  ;;  %2368 = vst [vmem:[#allocation3 + $0x8c] sm:$0x1] %v2367_v11  ;;  %v3062_v1 = vsel %vm5814_vm2, %v3057_v25, %v3061_v55  ;;  %v3070_v4 = vor.u32 %v3069_v2, %v3066_v47  ;;  %v3308_v6 = vshll.u32 %v3259_v58, 16  ;;  %v3313_v12 = vshrl.u32 %v3260_v59, 16 }
 0x1cd   :  { %v2238_v10 = vor.u32 %v2236_v46, %v2235_v9  ;;  %v2239_v43 = vrot.slane %v2235_v9, 4  ;;  %v3316_v15 = vshll.u32 %v3260_v59, 16  ;;  %v3305_v44 = vor.u32 %v3304_v18, %v3301_v0  ;;  %v2989_v30 = vld [vmem:[#allocation3 + $0x40] sm:$0xf]  ;;  %v2990_v53 = vld [vmem:[#allocation3 + $0x44] sm:$0x1] }
 0x1ce   :  { %v3071_v19 = vrot.slane %v3070_v4, 4  ;;  %v3310_v50 = vrot.slane %v3308_v6, 5  ;;  %v3322_v60 = vshll.u32 %v3261_v62, 16  ;;  %v3315_v24 = vrot.slane %v3313_v12, 4  ;;  %v3262_v23 = vld [vmem:[#allocation3 + $0x70] sm:$0xf] }
 0x1cf   :  { %v2370_v26 = vsel %vm6581_vm11, %v2238_v10, %v2369_v37  ;;  %v2373_v32 = vsel %vm6586_vm12, %v2239_v43, %v2372_v57  ;;  %v3318_v36 = vrot.slane %v3316_v15, 5  ;;  %v3306_v54 = vrot.slane %v3305_v44, 4  ;;  %v3263_v58 = vld [vmem:[#allocation3 + $0x74] sm:$0x1]  ;;  %v5663_v29 = vld [vmem:[#allocation3 + $0x78] ss:$8 sps:$4 sm:$0xff]  }
 0x1d0   :  { %2371 = vst [vmem:[#allocation3 + $0x90] sm:$0xf] %v2370_v26  ;;  %2374 = vst [vmem:[#allocation3 + $0x94] sm:$0x1] %v2373_v32  ;;  %v3076_v35 = vsel %vm5814_vm2, %v3071_v19, %v3075_v16  ;;  %v3324_v5 = vrot.slane %v3322_v60, 5  ;;  %v5100_v55 = vrot.slane %v2856_v8, 9 }
 0x1d1   :  { %v5114_v14 = vcombine.low %v3062_v1, %v3076_v35  ;;  %v3319_v49 = vor.u32 %v3318_v36, %v3315_v24  ;;  %v2898_v52 = vrot.slane %v2857_v28, 5  ;;  %v5101_v33 = vrot.slane %v2858_v13, 9  ;;  %v3264_v45 = vld [vmem:[#allocation3 + $0x78] sm:$0xf]  ;;  %v3265_v16 = vld [vmem:[#allocation3 + $0x7c] sm:$0x1] }
 0x1d2   :  { %v3311_v56 = vsel %vm5814_vm2, %v3306_v54, %v3310_v50  ;;  %v2902_v34 = vrot.slane %v2859_v3, 5  ;;  %v3078_v40 = vshrl.u32 %v2989_v30, 16  ;;  %v3081_v61 = vshll.u32 %v2989_v30, 16  ;;  %v2860_v63 = vld [vmem:[#allocation3 + $0x38] sm:$0xe] }
 0x1d3   :  { %3121 = vrot.lane.b32.xlu0 %v5114_v14, %s5718_s28  ;;  %v3320_v21 = vrot.slane %v3319_v49, 4  ;;  %v2899_v46 = vsel %vm6668_vm15, %v5100_v55, %v2898_v52  ;;  %v3087_v59 = vshll.u32 %v2990_v53, 16  ;;  %v3327_v37 = vshrl.u32 %v3262_v23, 16  ;;  %v2861_v0 = vld [vmem:[#allocation3 + $0x3c] sm:$0x1] }
 0x1d4   :  { %v2903_v25 = vsel %vm6668_vm15, %v5101_v33, %v2902_v34  ;;  %v3080_v47 = vrot.slane %v3078_v40, 4  ;;  %v3083_v2 = vrot.slane %v3081_v61, 5  ;;  %v3330_v51 = vshll.u32 %v3262_v23, 16  ;;  %v2862_v1 = vld [vmem:[#allocation3 + $0x40] sm:$0xe] }
 0x1d5   :  { %v3325_v11 = vsel %vm5814_vm2, %v3320_v21, %v3324_v5  ;;  %v5106_v9 = vcombine.low %v2899_v46, %v2903_v25  ;;  %v3089_v57 = vrot.slane %v3087_v59, 5  ;;  %v3329_v62 = vrot.slane %v3327_v37, 4  ;;  %v2863_v28 = vld [vmem:[#allocation3 + $0x44] sm:$0x1]  ;;  %v3816_v10 = vld [vmem:[#allocation3 + $0x60] sm:$0xf] }
 0x1d6   :  { %v5133_v4 = vcombine.low %v3311_v56, %v3325_v11  ;;  %v3084_v18 = vor.u32 %v3083_v2, %v3080_v47  ;;  %v3332_v6 = vrot.slane %v3330_v51, 5  ;;  %v3336_v8 = vshll.u32 %v3263_v58, 16  ;;  %v3817_v3 = vld [vmem:[#allocation3 + $0x64] sm:$0x1]  ;;  %v3818_v30 = vld [vmem:[#allocation3 + $0x68] sm:$0xf] }
 0x1d7   :  { %3527 = vrot.lane.b32.xlu0 %v5663_v29, %s5718_s28  ;;  %v3341_v43 = vshrl.u32 %v3264_v45, 16  ;;  %v3344_v12 = vshll.u32 %v3264_v45, 16  ;;  %v3350_v15 = vshll.u32 %v3265_v16, 16  ;;  %v5102_v13 = vrot.slane %v2860_v63, 9  ;;  %v3819_v55 = vld [vmem:[#allocation3 + $0x6c] sm:$0x1] }
 0x1d8   :  { %3396 = vrot.lane.b32.xlu1 %v5133_v4, %s5718_s28  ;;  %v3085_v19 = vrot.slane %v3084_v18, 4  ;;  %v3333_v44 = vor.u32 %v3332_v6, %v3329_v62  ;;  %v3338_v50 = vrot.slane %v3336_v8, 5  ;;  %v2906_v60 = vrot.slane %v2861_v0, 5  ;;  %v3266_v23 = vld [vmem:[#allocation3 + $0x80] sm:$0xf] }
 0x1d9   :  { %v3343_v26 = vrot.slane %v3341_v43, 4  ;;  %v3346_v32 = vrot.slane %v3344_v12, 5  ;;  %v3352_v24 = vrot.slane %v3350_v15, 5  ;;  %v5103_v36 = vrot.slane %v2862_v1, 9  ;;  %v5664_v52 = vld [vmem:[#allocation3 + $0x88] ss:$8 sps:$4 sm:$0xff]  }
 0x1da   :  { %v3090_v53 = vsel %vm5814_vm2, %v3085_v19, %v3089_v57  ;;  %v3334_v35 = vrot.slane %v3333_v44, 4  ;;  %v6978_v54 = vsel %vm6668_vm15, %v5102_v13, %v2906_v60  ;;  %v2910_v5 = vrot.slane %v2863_v28, 5  ;;  %v3267_v56 = vld [vmem:[#allocation3 + $0x84] sm:$0x1]  ;;  %v3268_v45 = vld [vmem:[#allocation3 + $0x88] sm:$0xf] }
 0x1db   :  { %v5115_v14 = vcombine.low %v3090_v53, %v3104_v42  ;;  %v3347_v49 = vor.u32 %v3346_v32, %v3343_v26  ;;  %v3833_v33 = vshrl.u32 %v3816_v10, 16  ;;  %v3836_v58 = vshll.u32 %v3816_v10, 16  ;;  %v3269_v21 = vld [vmem:[#allocation3 + $0x8c] sm:$0x1]  ;;  %v3820_v47 = vld [vmem:[#allocation3 + $0x70] sm:$0xf] }
 0x1dc   :  { %2928 = vrot.lane.b32.xlu1 %v5106_v9, %s5718_s28  ;;  %v3339_v34 = vsel %vm5814_vm2, %v3334_v35, %v3338_v50  ;;  %v2911_v29 = vsel %vm6668_vm15, %v5103_v36, %v2910_v5  ;;  %v3842_v40 = vshll.u32 %v3817_v3, 16  ;;  %v3847_v61 = vshrl.u32 %v3818_v30, 16  ;;  %v5679_v9 = vld [vmem:[#allocation3] ss:$8 sps:$4 sm:$0xff]   ;;  %v3821_v4 = vld [vmem:[#allocation3 + $0x74] sm:$0x1] }
 0x1dd   :  { %3123 = vrot.lane.b32.xlu0 %v5115_v14, %s5718_s28  ;;  %v3348_v7 = vrot.slane %v3347_v49, 4  ;;  %v5107_v48 = vcombine.low %v6978_v54, %v2911_v29  ;;  %v3835_v42 = vrot.slane %v3833_v33, 4  ;;  %v3838_v63 = vrot.slane %v3836_v58, 5  ;;  %v3822_v18 = vld [vmem:[#allocation3 + $0x78] sm:$0xf]  ;;  %2408 = vst.msk [vmem:[#allocation4] sm:$0xff] %vm2407_vm0, %v5679_v9 }
 0x1de   :  { %v3844_v46 = vrot.slane %v3842_v40, 5  ;;  %v3849_v59 = vrot.slane %v3847_v61, 4  ;;  %v3850_v37 = vshll.u32 %v3818_v30, 16  ;;  %v3856_v25 = vshll.u32 %v3819_v55, 16  ;;  %v3687_v36 = vld [vmem:[#allocation3 + $0x58] sm:$0xe] }
 0x1df   :  { %v3353_v2 = vsel %vm5814_vm2, %v3348_v7, %v3352_v24  ;;  %v3839_v16 = vor.u32 %v3838_v63, %v3835_v42  ;;  %v3355_v51 = vshrl.u32 %v3266_v23, 16  ;;  %v3358_v11 = vshll.u32 %v3266_v23, 16  ;;  %v3688_v30 = vld [vmem:[#allocation3 + $0x5c] sm:$0x1]  ;;  %v3689_v53 = vld [vmem:[#allocation3 + $0x60] sm:$0xe] }
 0x1e0   :  { %v5134_v57 = vcombine.low %v3339_v34, %v3353_v2  ;;  %v3852_v62 = vrot.slane %v3850_v37, 5  ;;  %v3858_v0 = vrot.slane %v3856_v25, 5  ;;  %v3364_v1 = vshll.u32 %v3267_v56, 16  ;;  %v3690_v35 = vld [vmem:[#allocation3 + $0x64] sm:$0x1] }
 0x1e1   :  { %3529 = vrot.lane.b32.xlu0 %v5664_v52, %s5718_s28  ;;  %v3840_v6 = vrot.slane %v3839_v16, 4  ;;  %v3357_v8 = vrot.slane %v3355_v51, 4  ;;  %v3360_v28 = vrot.slane %v3358_v11, 5  ;;  %v3369_v10 = vshrl.u32 %v3268_v45, 16  ;;  %v3823_v5 = vld [vmem:[#allocation3 + $0x7c] sm:$0x1] }
 0x1e2   :  { %3398 = vrot.lane.b32.xlu1 %v5134_v57, %s5718_s28  ;;  %v3853_v43 = vor.u32 %v3852_v62, %v3849_v59  ;;  %v3366_v12 = vrot.slane %v3364_v1, 5  ;;  %v3372_v15 = vshll.u32 %v3268_v45, 16  ;;  %v3378_v13 = vshll.u32 %v3269_v21, 16  ;;  %v3824_v56 = vld [vmem:[#allocation3 + $0x80] sm:$0xf] }
 0x1e3   :  { %v3845_v19 = vsel %vm5814_vm2, %v3840_v6, %v3844_v46  ;;  %v3361_v44 = vor.u32 %v3360_v28, %v3357_v8  ;;  %v3371_v50 = vrot.slane %v3369_v10, 4  ;;  %v3861_v60 = vshrl.u32 %v3820_v47, 16  ;;  %v3825_v21 = vld [vmem:[#allocation3 + $0x84] sm:$0x1]  ;;  %v3826_v46 = vld [vmem:[#allocation3 + $0x88] sm:$0xf] }
 0x1e4   :  { %v3854_v3 = vrot.slane %v3853_v43, 4  ;;  %v3374_v26 = vrot.slane %v3372_v15, 5  ;;  %v3380_v32 = vrot.slane %v3378_v13, 5  ;;  %v3864_v24 = vshll.u32 %v3820_v47, 16  ;;  %v3827_v47 = vld [vmem:[#allocation3 + $0x8c] sm:$0x1] }
 0x1e5   :  { %v3362_v54 = vrot.slane %v3361_v44, 4  ;;  %v3863_v55 = vrot.slane %v3861_v60, 4  ;;  %v3870_v23 = vshll.u32 %v3821_v4, 16  ;;  %v3875_v14 = vshrl.u32 %v3822_v18, 16  ;;  %v3691_v2 = vld [vmem:[#allocation3 + $0x68] sm:$0xe] }
 0x1e6   :  { %2930 = vrot.lane.b32.xlu1 %v5107_v48, %s5718_s28  ;;  %v3859_v49 = vsel %vm5814_vm2, %v3854_v3, %v3858_v0  ;;  %v3375_v52 = vor.u32 %v3374_v26, %v3371_v50  ;;  %v3866_v33 = vrot.slane %v3864_v24, 5  ;;  %v3878_v58 = vshll.u32 %v3822_v18, 16  ;;  %v3692_v4 = vld [vmem:[#allocation3 + $0x6c] sm:$0x1]  ;;  %v3693_v18 = vld [vmem:[#allocation3 + $0x70] sm:$0xe] }
 0x1e7   :  { %v5172_v34 = vcombine.low %v3845_v19, %v3859_v49  ;;  %v3367_v29 = vsel %vm5814_vm2, %v3362_v54, %v3366_v12  ;;  %v3872_v40 = vrot.slane %v3870_v23, 5  ;;  %v3877_v61 = vrot.slane %v3875_v14, 4  ;;  %v3694_v43 = vld [vmem:[#allocation3 + $0x74] sm:$0x1]  ;;  %v3828_v12 = vld [vmem:[#allocation3 + $0x90] sm:$0xf] }
 0x1e8   :  { %v3376_v45 = vrot.slane %v3375_v52, 4  ;;  %v3867_v7 = vor.u32 %v3866_v33, %v3863_v55  ;;  %v3880_v42 = vrot.slane %v3878_v58, 5  ;;  %v3884_v63 = vshll.u32 %v3823_v5, 16  ;;  %v5686_v15 = vld [vmem:[#allocation3 + $0x10] ss:$8 sps:$4 sm:$0xff]  }
 0x1e9   :  { %3956 = vrot.lane.b32.xlu0 %v5172_v34, %s5718_s28  ;;  %v5156_v48 = vrot.slane %v3687_v36, 9  ;;  %v3721_v59 = vrot.slane %v3688_v30, 5  ;;  %v5157_v37 = vrot.slane %v3689_v53, 9  ;;  %v3725_v25 = vrot.slane %v3690_v35, 5  ;;  %v3829_v60 = vld [vmem:[#allocation3 + $0x94] sm:$0x1] }
 0x1ea   :  { %v3381_v16 = vsel %vm5814_vm2, %v3376_v45, %v3380_v32  ;;  %v3868_v51 = vrot.slane %v3867_v7, 4  ;;  %v3881_v11 = vor.u32 %v3880_v42, %v3877_v61  ;;  %v3886_v9 = vrot.slane %v3884_v63, 5  ;;  %2409 = vst.msk [vmem:[#allocation4 + $0x28] sm:$0xff] %vm2407_vm0, %v5686_v15  ;;  %v3695_v14 = vld [vmem:[#allocation3 + $0x78] sm:$0xe] }
 0x1eb   :  { %v5135_v57 = vcombine.low %v3367_v29, %v3381_v16  ;;  %v3722_v62 = vsel %vm6668_vm15, %v5156_v48, %v3721_v59  ;;  %v3726_v0 = vsel %vm6668_vm15, %v5157_v37, %v3725_v25  ;;  %v3889_v1 = vshrl.u32 %v3824_v56, 16  ;;  %v3696_v49 = vld [vmem:[#allocation3 + $0x7c] sm:$0x1]  ;;  %v3697_v34 = vld [vmem:[#allocation3 + $0x80] sm:$0xe] }
 0x1ec   :  { %v3873_v6 = vsel %vm5814_vm2, %v3868_v51, %v3872_v40  ;;  %v3882_v8 = vrot.slane %v3881_v11, 4  ;;  %v5164_v28 = vcombine.low %v3722_v62, %v3726_v0  ;;  %v3892_v10 = vshll.u32 %v3824_v56, 16  ;;  %v3698_v29 = vld [vmem:[#allocation3 + $0x84] sm:$0x1]  ;;  %v3699_v40 = vld [vmem:[#allocation3 + $0x88] sm:$0xe] }
 0x1ed   :  { %3400 = vrot.lane.b32.xlu1 %v5135_v57, %s5718_s28  ;;  %v3891_v13 = vrot.slane %v3889_v1, 4  ;;  %v3898_v19 = vshll.u32 %v3825_v21, 16  ;;  %v3903_v44 = vshrl.u32 %v3826_v46, 16  ;;  %v3906_v50 = vshll.u32 %v3826_v46, 16  ;;  %v3700_v63 = vld [vmem:[#allocation3 + $0x8c] sm:$0x1] }
 0x1ee   :  { %v3887_v3 = vsel %vm5814_vm2, %v3882_v8, %v3886_v9  ;;  %v3894_v26 = vrot.slane %v3892_v10, 5  ;;  %v3912_v32 = vshll.u32 %v3827_v47, 16  ;;  %v5158_v24 = vrot.slane %v3691_v2, 9  ;;  %v3701_v37 = vld [vmem:[#allocation3 + $0x90] sm:$0xe] }
 0x1ef   :  { %v5173_v36 = vcombine.low %v3873_v6, %v3887_v3  ;;  %v3900_v30 = vrot.slane %v3898_v19, 5  ;;  %v3905_v53 = vrot.slane %v3903_v44, 4  ;;  %v3908_v35 = vrot.slane %v3906_v50, 5  ;;  %v2572_v25 = vld [vmem:[#allocation3 + $0xc] sm:$0x1] }
 0x1f0   :  { %v3895_v54 = vor.u32 %v3894_v26, %v3891_v13  ;;  %v3914_v5 = vrot.slane %v3912_v32, 5  ;;  %v3729_v55 = vrot.slane %v3692_v4, 5  ;;  %v5159_v23 = vrot.slane %v3693_v18, 9  ;;  %v3702_v39 = vld [vmem:[#allocation3 + $0x94] sm:$0x1] }
 0x1f1   :  { %3958 = vrot.lane.b32.xlu0 %v5173_v36, %s5718_s28  ;;  %3763 = vrot.lane.b32.xlu1 %v5164_v28, %s5718_s28  ;;  %v3909_v52 = vor.u32 %v3908_v35, %v3905_v53  ;;  %v3733_v33 = vrot.slane %v3694_v43, 5  ;;  %v3917_v58 = vshrl.u32 %v3828_v12, 16  ;;  %v3920_v56 = vshll.u32 %v3828_v12, 16  ;;  %v2573_v62 = vld [vmem:[#allocation3 + $0x10] sm:$0xe] }
 0x1f2   :  { %v3896_v61 = vrot.slane %v3895_v54, 4  ;;  %v3730_v45 = vsel %vm6668_vm15, %v5158_v24, %v3729_v55  ;;  %v3926_v7 = vshll.u32 %v3829_v60, 16  ;;  %v3938_v42 = vrot.slane %v3937_v38, 4  ;;  %v2574_v0 = vld [vmem:[#allocation3 + $0x14] sm:$0x1] }
 0x1f3   :  { %v3910_v21 = vrot.slane %v3909_v52, 4  ;;  %v3734_v46 = vsel %vm6668_vm15, %v5159_v23, %v3733_v33  ;;  %v3919_v48 = vrot.slane %v3917_v58, 4  ;;  %v3922_v59 = vrot.slane %v3920_v56, 5  ;;  %v2575_v8 = vld [vmem:[#allocation3 + $0x18] sm:$0xe] }
 0x1f4   :  { %v3901_v47 = vsel %vm5814_vm2, %v3896_v61, %v3900_v30  ;;  %v5165_v2 = vcombine.low %v3730_v45, %v3734_v46  ;;  %v3928_v16 = vrot.slane %v3926_v7, 5  ;;  %v3943_v51 = vsel %vm5814_vm2, %v3938_v42, %v6678_v22  ;;  %v2576_v28 = vld [vmem:[#allocation3 + $0x1c] sm:$0x1]  ;;  %v2577_v15 = vld [vmem:[#allocation3 + $0x20] sm:$0xe] }
 0x1f5   :  { %v3915_v38 = vsel %vm5814_vm2, %v3910_v21, %v3914_v5  ;;  %v3923_v11 = vor.u32 %v3922_v59, %v3919_v48  ;;  %v5160_v9 = vrot.slane %v3695_v14, 9  ;;  %v3737_v57 = vrot.slane %v3696_v49, 5  ;;  %v2578_v13 = vld [vmem:[#allocation3 + $0x24] sm:$0x1]  ;;  %v5690_v19 = vld [vmem:[#allocation3 + $0x20] ss:$8 sps:$4 sm:$0xff]  }
 0x1f6   :  { %v5174_v1 = vcombine.low %v3901_v47, %v3915_v38  ;;  %3765 = vrot.lane.b32.xlu1 %v5165_v2, %s5718_s28  ;;  %v5161_v4 = vrot.slane %v3697_v34, 9  ;;  %v3741_v18 = vrot.slane %v3698_v29, 5  ;;  %v5162_v6 = vrot.slane %v3699_v40, 9  ;;  %v2579_v3 = vld [vmem:[#allocation3 + $0x28] sm:$0xe]  ;;  %2410 = vst.msk [vmem:[#allocation4 + $0x50] sm:$0xff] %vm2407_vm0, %v5690_v19  ;;  %v2685_v34 = vpop.permute.xlu0 %2684 }
 0x1f7   :  { %v3924_v10 = vrot.slane %v3923_v11, 4  ;;  %v3738_v22 = vsel %vm6668_vm15, %v5160_v9, %v3737_v57  ;;  %v3745_v43 = vrot.slane %v3700_v63, 5  ;;  %v5163_v12 = vrot.slane %v3701_v37, 9  ;;  %v2580_v26 = vld [vmem:[#allocation3 + $0x2c] sm:$0x1] }
 0x1f8   :  { %3960 = vrot.lane.b32.xlu0 %v5174_v1, %s5718_s28  ;;  %v3742_v44 = vsel %vm6668_vm15, %v5161_v4, %v3741_v18  ;;  %v3749_v50 = vrot.slane %v3702_v39, 5  ;;  %v2610_v60 = vrot.slane %v2572_v25, 5  ;;  %v5077_v30 = vrot.slane %v2571_v20, 9  ;;  %v2581_v53 = vld [vmem:[#allocation3 + $0x30] sm:$0xe] }
 0x1f9   :  { %v3929_v32 = vsel %vm5814_vm2, %v3924_v10, %v3928_v16  ;;  %v5166_v24 = vcombine.low %v3738_v22, %v3742_v44  ;;  %v3746_v36 = vsel %vm6668_vm15, %v5162_v6, %v3745_v43  ;;  %v5078_v5 = vrot.slane %v2573_v62, 9  ;;  %v2582_v23 = vld [vmem:[#allocation3 + $0x34] sm:$0x1]  ;;  %v2583_v14 = vld [vmem:[#allocation3 + $0x38] sm:$0xe] }
 0x1fa   :  { %v5175_v35 = vcombine.low %v3929_v32, %v3943_v51  ;;  %v3750_v54 = vsel %vm6668_vm15, %v5163_v12, %v3749_v50  ;;  %v2614_v55 = vrot.slane %v2574_v0, 5  ;;  %v2611_v52 = vsel %vm6668_vm15, %v5077_v30, %v2610_v60  ;;  %v2584_v56 = vld [vmem:[#allocation3 + $0x3c] sm:$0x1]  ;;  %v5694_v2 = vld [vmem:[#allocation3 + $0x10] ss:$8 sps:$4 sm:$0xff]  }
 0x1fb   :  { %3767 = vrot.lane.b32.xlu1 %v5166_v24, %s5718_s28  ;;  %v5167_v49 = vcombine.low %v3746_v36, %v3750_v54  ;;  %v5079_v33 = vrot.slane %v2575_v8, 9  ;;  %v2618_v58 = vrot.slane %v2576_v28, 5  ;;  %v5084_v29 = vcombine.low %v6695_v41, %v2611_v52  ;;  %v5695_v51 = vld [vmem:[#allocation3 + $0x30] ss:$8 sps:$4 sm:$0xff]   ;;  %2973 = vst.msk [vmem:[#allocation4 + $0x18] sm:$0xff] %vm2407_vm0, %v5694_v2 }
 0x1fc   :  { %3962 = vrot.lane.b32.xlu0 %v5175_v35, %s5718_s28  ;;  %v2615_v40 = vsel %vm6668_vm15, %v5078_v5, %v2614_v55  ;;  %v5080_v61 = vrot.slane %v2577_v15, 9  ;;  %v2622_v45 = vrot.slane %v2578_v13, 5  ;;  %v5081_v42 = vrot.slane %v2579_v3, 9  ;;  %2411 = vst.msk [vmem:[#allocation4 + $0x78] sm:$0xff] %vm2407_vm0, %v5695_v51  ;;  %v2700_v9 = vld [vmem:[#allocation3 + $0x8] sm:$0xf] }
 0x1fd   :  { %v2619_v7 = vsel %vm6668_vm15, %v5079_v33, %v2618_v58  ;;  %v2626_v63 = vrot.slane %v2580_v26, 5  ;;  %v5082_v21 = vrot.slane %v2581_v53, 9  ;;  %2652 = vst.msk [vmem:[#allocation4 + $0x8] sm:$0xff] %vm2407_vm0, %v5084_v29  ;;  %v2630_v48 = vrot.slane %v2582_v23, 5  ;;  %v2553_v41 = vpop.permute.xlu1 %2552  ;;  %v2701_v57 = vld [vmem:[#allocation3 + $0xc] sm:$0x1] }
 0x1fe   :  { %v5085_v46 = vcombine.low %v2615_v40, %v2619_v7  ;;  %v5083_v59 = vrot.slane %v2583_v14, 9  ;;  %2696 = vst.msk [vmem:[#allocation4 + $0x8] sm:$0xff] %vm2564_vm1, %v2685_v34  ;;  %v2623_v37 = vsel %vm6668_vm15, %v5080_v61, %v2622_v45  ;;  %v2634_v47 = vrot.slane %v2584_v56, 5  ;;  %2565 = vst.msk [vmem:[#allocation4] sm:$0xff] %vm2564_vm1, %v2553_v41  ;;  %v2702_v62 = vld [vmem:[#allocation3 + $0x10] sm:$0xf] }
 0x1ff   :  { %3769 = vrot.lane.b32.xlu1 %v5167_v49, %s5718_s28  ;;  %v2627_v25 = vsel %vm6668_vm15, %v5081_v42, %v2626_v63  ;;  %v2687_v39 = vpop.permute.xlu0 %2686  ;;  %v2631_v20 = vsel %vm6668_vm15, %v5082_v21, %v2630_v48  ;;  %v2703_v0 = vld [vmem:[#allocation3 + $0x14] sm:$0x1]  ;;  %v2717_v1 = vshrl.u32 %v2700_v9, 16  ;;  %v2720_v4 = vshll.u32 %v2700_v9, 16  ;;  %v3410_v8 = vld [vmem:[#allocation3 + $0x50] sm:$0xe] }
 0x200   :  { %2653 = vst.msk [vmem:[#allocation4 + $0x30] sm:$0xff] %vm2407_vm0, %v5085_v46  ;;  %v5086_v16 = vcombine.low %v2623_v37, %v2627_v25  ;;  %v2635_v38 = vsel %vm6668_vm15, %v5083_v59, %v2634_v47  ;;  %v2731_v18 = vshrl.u32 %v2702_v62, 16  ;;  %v2734_v6 = vshll.u32 %v2702_v62, 16  ;;  %v5705_v15 = vld [vmem:[%s7388_s3 + $0x108] sm:$0xff]   ;;  %v3411_v50 = vld [vmem:[#allocation3 + $0x54] sm:$0x1] }
 0x201   :  { %2697 = vst.msk [vmem:[#allocation4 + $0x30] sm:$0xff] %vm2564_vm1, %v2687_v39  ;;  %v5087_v11 = vcombine.low %v2631_v20, %v2635_v38  ;;  %v2719_v10 = vrot.slane %v2717_v1, 4  ;;  %v2722_v22 = vrot.slane %v2720_v4, 5  ;;  %v2726_v43 = vshll.u32 %v2701_v57, 16  ;;  %v3412_v26 = vld [vmem:[#allocation3 + $0x58] sm:$0xe] }
 0x202   :  { %2654 = vst.msk [vmem:[#allocation4 + $0x58] sm:$0xff] %vm2407_vm0, %v5086_v16  ;;  %v2733_v12 = vrot.slane %v2731_v18, 4  ;;  %v2736_v19 = vrot.slane %v2734_v6, 5  ;;  %v2740_v44 = vshll.u32 %v2703_v0, 16  ;;  %v5136_v60 = vrot.slane %v3410_v8, 9  ;;  %v5709_v54 = vld [vmem:[%s7388_s3 + $0x110] sm:$0xff]  }
 0x203   :  { %2655 = vst.msk [vmem:[#allocation4 + $0x80] sm:$0xff] %vm2407_vm0, %v5087_v11  ;;  %v2723_v3 = vor.u32 %v2722_v22, %v2719_v10  ;;  %v3413_v32 = vld [vmem:[#allocation3 + $0x5c] sm:$0x1]  ;;  %v3444_v24 = vrot.slane %v3411_v50, 5  ;;  %v5137_v53 = vrot.slane %v3412_v26, 9  ;;  %v2728_v55 = vrot.slane %v2726_v43, 5 }
 0x204   :  { %v2737_v30 = vor.u32 %v2736_v19, %v2733_v12  ;;  %v3448_v35 = vrot.slane %v3413_v32, 5  ;;  %v2742_v49 = vrot.slane %v2740_v44, 5  ;;  %v5702_v33 = vld [vmem:[#allocation3 + $0x20] ss:$8 sps:$4 sm:$0xff]   ;;  %v5714_v58 = vld [vmem:[%s7388_s3 + $0x118] sm:$0xff]  }
 0x205   :  { %v4057_v28 = vld [vmem:[#allocation4 + $0x8] sm:$0xff]  ;;  %v4056_v13 = vld [vmem:[#allocation4] sm:$0xff]  ;;  %v2724_v5 = vrot.slane %v2723_v3, 4  ;;  %v3445_v23 = vsel %vm6668_vm15, %v5136_v60, %v3444_v24  ;;  %v5704_v29 = vld [vmem:[#allocation3 + $0x50] ss:$8 sps:$4 sm:$0xff]   ;;  %2974 = vst.msk [vmem:[#allocation4 + $0x40] sm:$0xff] %vm2407_vm0, %v5702_v33 }
 0x206   :  { %4447 = vmatprep.mubr.bf16.mxu1 %v4057_v28  ;;  %v2738_v14 = vrot.slane %v2737_v30, 4  ;;  %v3449_v52 = vsel %vm6668_vm15, %v5137_v53, %v3448_v35  ;;  %v2704_v7 = vld [vmem:[#allocation3 + $0x18] sm:$0xf]  ;;  %v2705_v42 = vld [vmem:[#allocation3 + $0x1c] sm:$0x1]  ;;  %3250 = vst.msk [vmem:[#allocation4 + $0xa0] sm:$0xff] %vm2407_vm0, %v5704_v29 }
 0x207   :  { %4448 = vmatmul.mubr.bf16.vlgmr.msra.gmra.mrb[32].mxu1 %v4056_v13  ;;  %v2729_v56 = vsel %vm5814_vm2, %v2724_v5, %v2728_v55  ;;  %v2706_v63 = vld [vmem:[#allocation3 + $0x20] sm:$0xf]  ;;  %v2707_v21 = vld [vmem:[#allocation3 + $0x24] sm:$0x1]  ;;  %v2745_v46 = vshrl.u32 %v2704_v7, 16  ;;  %v2748_v48 = vshll.u32 %v2704_v7, 16 }
 0x208   :  { %v4062_v36 = vld [vmem:[#allocation4 + $0x30] sm:$0xff]  ;;  %5514 = vmatpush3.bf16.msra.mxu1 %v6904_v27  ;;  %v5144_v27 = vcombine.low %v3445_v23, %v3449_v52  ;;  %v2743_v34 = vsel %vm5814_vm2, %v2738_v14, %v2742_v49  ;;  %v2759_v59 = vshrl.u32 %v2706_v63, 16  ;;  %v2762_v41 = vshll.u32 %v2706_v63, 16  ;;  %v3414_v37 = vld [vmem:[#allocation3 + $0x60] sm:$0xe] }
 0x209   :  { %4455 = vmatprep.mubr.bf16.mxu1 %v4062_v36  ;;  %5515 = vmatprep.subr.bf16.mxu1 %v5705_v15  ;;  %v5092_v45 = vcombine.low %v2729_v56, %v2743_v34  ;;  %v3415_v25 = vld [vmem:[#allocation3 + $0x64] sm:$0x1]  ;;  %v2747_v47 = vrot.slane %v2745_v46, 4  ;;  %v2750_v2 = vrot.slane %v2748_v48, 5  ;;  %v2754_v16 = vshll.u32 %v2705_v42, 16 }
 0x20a   :  { %3490 = vst.msk [vmem:[#allocation4 + $0xa8] sm:$0xff] %vm2407_vm0, %v5144_v27  ;;  %v2761_v51 = vrot.slane %v2759_v59, 4  ;;  %v3416_v39 = vld [vmem:[#allocation3 + $0x68] sm:$0xe]  ;;  %v2764_v20 = vrot.slane %v2762_v41, 5  ;;  %v2768_v38 = vshll.u32 %v2707_v21, 16 }
 0x20b   :  { %2844 = vst.msk [vmem:[#allocation4 + $0x10] sm:$0xff] %vm2407_vm0, %v5092_v45  ;;  %v3417_v11 = vld [vmem:[#allocation3 + $0x6c] sm:$0x1]  ;;  %v5138_v9 = vrot.slane %v3414_v37, 9  ;;  %v3452_v57 = vrot.slane %v3415_v25, 5  ;;  %v2751_v62 = vor.u32 %v2750_v2, %v2747_v47  ;;  %v5139_v0 = vrot.slane %v3416_v39, 9 }
 0x20c   :  { %5516 = vmatpush3.bf16.msra.mxu1 %v5705_v15  ;;  %v2555_v40 = vpop.permute.xlu1 %2554  ;;  %v2689_v61 = vpop.permute.xlu0 %2688  ;;  %v3456_v1 = vrot.slane %v3417_v11, 5  ;;  %v2765_v4 = vor.u32 %v2764_v20, %v2761_v51  ;;  %v5706_v18 = vld [vmem:[#allocation3 + $0x30] ss:$8 sps:$4 sm:$0xff]   ;;  %v2756_v8 = vrot.slane %v2754_v16, 5  ;;  %v2770_v15 = vrot.slane %v2768_v38, 5 }
 0x20d   :  { %5517 = vmatprep.subr.bf16.mxu1 %v5709_v54  ;;  %2566 = vst.msk [vmem:[#allocation4 + $0x28] sm:$0xff] %vm2564_vm1, %v2555_v40  ;;  %2698 = vst.msk [vmem:[#allocation4 + $0x58] sm:$0xff] %vm2564_vm1, %v2689_v61  ;;  %v2752_v6 = vrot.slane %v2751_v62, 4  ;;  %v3453_v28 = vsel %vm6668_vm15, %v5138_v9, %v3452_v57  ;;  %v5707_v19 = vld [vmem:[#allocation3 + $0x60] ss:$8 sps:$4 sm:$0xff]  }
 0x20e   :  { %v3457_v10 = vsel %vm6668_vm15, %v5139_v0, %v3456_v1  ;;  %v2766_v12 = vrot.slane %v2765_v4, 4  ;;  %2975 = vst.msk [vmem:[#allocation4 + $0x68] sm:$0xff] %vm2407_vm0, %v5706_v18  ;;  %v2708_v44 = vld [vmem:[#allocation3 + $0x28] sm:$0xf]  ;;  %v2709_v50 = vld [vmem:[#allocation3 + $0x2c] sm:$0x1] }
 0x20f   :  { %v5145_v13 = vcombine.low %v3453_v28, %v3457_v10  ;;  %v2710_v60 = vld [vmem:[#allocation3 + $0x30] sm:$0xf]  ;;  %v2757_v3 = vsel %vm5814_vm2, %v2752_v6, %v2756_v8  ;;  %3251 = vst.msk [vmem:[#allocation4 + $0xc8] sm:$0xff] %vm2407_vm0, %v5707_v19  ;;  %v2711_v32 = vld [vmem:[#allocation3 + $0x34] sm:$0x1]  ;;  %v2773_v24 = vshrl.u32 %v2708_v44, 16 }
 0x210   :  { %5518 = vmatpush3.bf16.msra.mxu1 %v5709_v54  ;;  %v2771_v26 = vsel %vm5814_vm2, %v2766_v12, %v2770_v15  ;;  %v2776_v36 = vshll.u32 %v2708_v44, 16  ;;  %v2787_v53 = vshrl.u32 %v2710_v60, 16  ;;  %v2790_v35 = vshll.u32 %v2710_v60, 16  ;;  %v3418_v54 = vld [vmem:[#allocation3 + $0x70] sm:$0xe] }
 0x211   :  { %5519 = vmatprep.subr.bf16.mxu1 %v5714_v58  ;;  %3491 = vst.msk [vmem:[#allocation4 + $0xd0] sm:$0xff] %vm2407_vm0, %v5145_v13  ;;  %v5093_v30 = vcombine.low %v2757_v3, %v2771_v26  ;;  %v2775_v23 = vrot.slane %v2773_v24, 4  ;;  %v2782_v49 = vshll.u32 %v2709_v50, 16  ;;  %v2796_v52 = vshll.u32 %v2711_v32, 16  ;;  %v3419_v27 = vld [vmem:[#allocation3 + $0x74] sm:$0x1] }
 0x212   :  { %v2778_v14 = vrot.slane %v2776_v36, 5  ;;  %v2789_v33 = vrot.slane %v2787_v53, 4  ;;  %v3420_v56 = vld [vmem:[#allocation3 + $0x78] sm:$0xe]  ;;  %v5140_v34 = vrot.slane %v3418_v54, 9  ;;  %v3460_v29 = vrot.slane %v3419_v27, 5 }
 0x213   :  { %2845 = vst.msk [vmem:[#allocation4 + $0x38] sm:$0xff] %vm2407_vm0, %v5093_v30  ;;  %v3421_v61 = vld [vmem:[#allocation3 + $0x7c] sm:$0x1]  ;;  %v5141_v45 = vrot.slane %v3420_v56, 9  ;;  %v5708_v63 = vld [vmem:[#allocation3 + $0x40] ss:$8 sps:$4 sm:$0xff]  }
 0x214   :  { %5520 = vmatpush3.bf16.msra.mxu1 %v5714_v58  ;;  %v4061_v22 = vld [vmem:[#allocation4 + $0x28] sm:$0xff]  ;;  %v4067_v43 = vld [vmem:[#allocation4 + $0x58] sm:$0xff]  ;;  %v2792_v58 = vrot.slane %v2790_v35, 5  ;;  %v2779_v40 = vor.u32 %v2778_v14, %v2775_v23  ;;  %v3464_v42 = vrot.slane %v3421_v61, 5  ;;  %v2784_v48 = vrot.slane %v2782_v49, 5  ;;  %2976 = vst.msk [vmem:[#allocation4 + $0x90] sm:$0xff] %vm2407_vm0, %v5708_v63 }
 0x215   :  { %4456 = vmatmul.mubr.bf16.gmra.mrb[36].mxu1 %v4061_v22  ;;  %v2798_v41 = vrot.slane %v2796_v52, 5  ;;  %v3461_v37 = vsel %vm6668_vm15, %v5140_v34, %v3460_v29  ;;  %v5710_v47 = vld [vmem:[#allocation3 + $0x70] ss:$8 sps:$4 sm:$0xff]   ;;  %v2713_v51 = vld [vmem:[#allocation3 + $0x3c] sm:$0x1] }
 0x216   :  { %4463 = vmatprep.mubr.bf16.mxu1 %v4067_v43  ;;  %v2793_v7 = vor.u32 %v2792_v58, %v2789_v33  ;;  %v2780_v46 = vrot.slane %v2779_v40, 4  ;;  %v3465_v25 = vsel %vm6668_vm15, %v5141_v45, %v3464_v42  ;;  %v2712_v16 = vld [vmem:[#allocation3 + $0x38] sm:$0xf]  ;;  %v2714_v39 = vld [vmem:[#allocation3 + $0x40] sm:$0xf]  ;;  %3252 = vst.msk [vmem:[#allocation4 + $0xf0] sm:$0xff] %vm2407_vm0, %v5710_v47 }
 0x217   :  { %v2691_v55 = vpop.permute.xlu0 %2690  ;;  %v5146_v2 = vcombine.low %v3461_v37, %v3465_v25  ;;  %v2715_v11 = vld [vmem:[#allocation3 + $0x44] sm:$0x1]  ;;  %v2801_v9 = vshrl.u32 %v2712_v16, 16  ;;  %v2804_v57 = vshll.u32 %v2712_v16, 16  ;;  %v7122_v62 = vld [vmem:[#allocation3 + $0x28] sm:$0xe] }
 0x218   :  { %2699 = vst.msk [vmem:[#allocation4 + $0x80] sm:$0xff] %vm2564_vm1, %v2691_v55  ;;  %v2794_v59 = vrot.slane %v2793_v7, 4  ;;  %v2785_v20 = vsel %vm5814_vm2, %v2780_v46, %v2784_v48  ;;  %v2815_v18 = vshrl.u32 %v2714_v39, 16  ;;  %v2818_v6 = vshll.u32 %v2714_v39, 16  ;;  %v3422_v22 = vld [vmem:[#allocation3 + $0x80] sm:$0xe] }
 0x219   :  { %v2557_v5 = vpop.permute.xlu1 %2556  ;;  %3492 = vst.msk [vmem:[#allocation4 + $0xf8] sm:$0xff] %vm2407_vm0, %v5146_v2  ;;  %v2803_v8 = vrot.slane %v2801_v9, 4  ;;  %v2806_v28 = vrot.slane %v2804_v57, 5  ;;  %v2810_v10 = vshll.u32 %v2713_v51, 16  ;;  %v2824_v15 = vshll.u32 %v2715_v11, 16 }
 0x21a   :  { %2567 = vst.msk [vmem:[#allocation4 + $0x50] sm:$0xff] %vm2564_vm1, %v2557_v5  ;;  %v2799_v38 = vsel %vm5814_vm2, %v2794_v59, %v2798_v41  ;;  %v2817_v43 = vrot.slane %v2815_v18, 4  ;;  %v2820_v12 = vrot.slane %v2818_v6, 5  ;;  %v3423_v13 = vld [vmem:[#allocation3 + $0x84] sm:$0x1]  ;;  %v5142_v19 = vrot.slane %v3422_v22, 9 }
 0x21b   :  { %v3118_v21 = vpop.permute.xlu0 %3117  ;;  %v5094_v4 = vcombine.low %v2785_v20, %v2799_v38  ;;  %v2807_v44 = vor.u32 %v2806_v28, %v2803_v8  ;;  %v3424_v50 = vld [vmem:[#allocation3 + $0x88] sm:$0xe]  ;;  %v3425_v60 = vld [vmem:[#allocation3 + $0x8c] sm:$0x1]  ;;  %v3468_v3 = vrot.slane %v3423_v13, 5  ;;  %v5119_v26 = vrot.slane %v7122_v62, 9 }
 0x21c   :  { %3129 = vst.msk [vmem:[#allocation4 + $0x18] sm:$0xff] %vm2564_vm1, %v3118_v21  ;;  %v2821_v36 = vor.u32 %v2820_v12, %v2817_v43  ;;  %v5143_v30 = vrot.slane %v3424_v50, 9  ;;  %v3472_v53 = vrot.slane %v3425_v60, 5  ;;  %v2812_v54 = vrot.slane %v2810_v10, 5  ;;  %v5711_v5 = vld [vmem:[#allocation3 + $0x60] ss:$8 sps:$4 sm:$0xff]  }
 0x21d   :  { %2846 = vst.msk [vmem:[#allocation4 + $0x60] sm:$0xff] %vm2407_vm0, %v5094_v4  ;;  %v2808_v35 = vrot.slane %v2807_v44, 4  ;;  %v7128_v55 = vld [vmem:[#allocation3 + $0x2c] sm:$0x1]  ;;  %v2826_v49 = vrot.slane %v2824_v15, 5  ;;  %v3469_v52 = vsel %vm6668_vm15, %v5142_v19, %v3468_v3  ;;  %3812 = vst.msk [vmem:[#allocation4 + $0xb8] sm:$0xff] %vm2407_vm0, %v5711_v5 }
 0x21e   :  { %v2822_v14 = vrot.slane %v2821_v36, 4  ;;  %v3473_v27 = vsel %vm6668_vm15, %v5143_v30, %v3472_v53  ;;  %v5712_v58 = vld [vmem:[#allocation3 + $0x80] ss:$8 sps:$4 sm:$0xff]   ;;  %v5713_v29 = vld [vmem:[#allocation3 + $0x70] ss:$8 sps:$4 sm:$0xff]   ;;  %v3179_v41 = vrot.slane %v7128_v55, 5 }
 0x21f   :  { %v4072_v1 = vld [vmem:[#allocation4 + $0x80] sm:$0xff]  ;;  %v5147_v33 = vcombine.low %v3469_v52, %v3473_v27  ;;  %v2813_v56 = vsel %vm5814_vm2, %v2808_v35, %v2812_v54  ;;  %3253 = vst.msk [vmem:[#allocation4 + $0x118] sm:$0xff] %vm2407_vm0, %v5712_v58  ;;  %v3539_v61 = vld [vmem:[#allocation3 + $0x58] sm:$0xf]  ;;  %v3540_v45 = vld [vmem:[#allocation3 + $0x5c] sm:$0x1] }
 0x220   :  { %v2827_v34 = vsel %vm5814_vm2, %v2822_v14, %v2826_v49  ;;  %v3541_v7 = vld [vmem:[#allocation3 + $0x60] sm:$0xf]  ;;  %3813 = vst.msk [vmem:[#allocation4 + $0xe0] sm:$0xff] %vm2407_vm0, %v5713_v29  ;;  %v3542_v63 = vld [vmem:[#allocation3 + $0x64] sm:$0x1]  ;;  %v3556_v21 = vshrl.u32 %v3539_v61, 16  ;;  %v7157_v49 = vsel %vm6668_vm15, %v5119_v26, %v3179_v41 }
 0x221   :  { %v4066_v0 = vld [vmem:[#allocation4 + $0x50] sm:$0xff]  ;;  %v5095_v40 = vcombine.low %v2813_v56, %v2827_v34  ;;  %3493 = vst.msk [vmem:[#allocation4 + $0x120] sm:$0xff] %vm2407_vm0, %v5147_v33  ;;  %v3559_v46 = vshll.u32 %v3539_v61, 16  ;;  %v3565_v48 = vshll.u32 %v3540_v45, 16  ;;  %v3570_v59 = vshrl.u32 %v3541_v7, 16 }
 0x222   :  { %4464 = vmatmul.mubr.bf16.gmra.mrb[40].mxu1 %v4066_v0  ;;  %v3573_v37 = vshll.u32 %v3541_v7, 16  ;;  %v3558_v47 = vrot.slane %v3556_v21, 4  ;;  %v3579_v51 = vshll.u32 %v3542_v63, 16  ;;  %v5715_v38 = vld [vmem:[#allocation3 + $0x80] ss:$8 sps:$4 sm:$0xff]  }
 0x223   :  { %4471 = vmatprep.mubr.bf16.mxu1 %v4072_v1  ;;  %v4059_v24 = vld [vmem:[#allocation4 + $0x18] sm:$0xff]  ;;  %2847 = vst.msk [vmem:[#allocation4 + $0x88] sm:$0xff] %vm2407_vm0, %v5095_v40  ;;  %v3561_v2 = vrot.slane %v3559_v46, 5  ;;  %v3572_v16 = vrot.slane %v3570_v59, 4  ;;  %v3567_v39 = vrot.slane %v3565_v48, 5  ;;  %3814 = vst.msk [vmem:[#allocation4 + $0x108] sm:$0xff] %vm2407_vm0, %v5715_v38 }
 0x224   :  { %v3524_v32 = vpop.permute.xlu0 %3523  ;;  %4544 = vmatprep.mubr.bf16.mxu0 %v4059_v24  ;;  %v3575_v20 = vrot.slane %v3573_v37, 5  ;;  %v3543_v11 = vld [vmem:[#allocation3 + $0x68] sm:$0xf]  ;;  %v3544_v0 = vld [vmem:[#allocation3 + $0x6c] sm:$0x1]  ;;  %v3581_v44 = vrot.slane %v3579_v51, 5 }
 0x225   :  { %3535 = vst.msk [vmem:[#allocation4 + $0xa8] sm:$0xff] %vm2564_vm1, %v3524_v32  ;;  %v3562_v57 = vor.u32 %v3561_v2, %v3558_v47  ;;  %v3545_v1 = vld [vmem:[#allocation3 + $0x70] sm:$0xf]  ;;  %v3584_v4 = vshrl.u32 %v3543_v11, 16  ;;  %v3546_v6 = vld [vmem:[#allocation3 + $0x74] sm:$0x1] }
 0x226   :  { %v3576_v18 = vor.u32 %v3575_v20, %v3572_v16  ;;  %v3587_v8 = vshll.u32 %v3543_v11, 16  ;;  %v3593_v28 = vshll.u32 %v3544_v0, 16  ;;  %v3598_v10 = vshrl.u32 %v3545_v1, 16  ;;  %v5716_v3 = vld [vmem:[#allocation3 + $0x90] ss:$8 sps:$4 sm:$0xff]  }
 0x227   :  { %v2559_v23 = vpop.permute.xlu1 %2558  ;;  %v3563_v22 = vrot.slane %v3562_v57, 4  ;;  %v3586_v43 = vrot.slane %v3584_v4, 4  ;;  %v3601_v12 = vshll.u32 %v3545_v1, 16  ;;  %v3607_v15 = vshll.u32 %v3546_v6, 16  ;;  %v3133_v53 = vld [vmem:[#allocation3 + $0x10] sm:$0xe] }
 0x228   :  { %2568 = vst.msk [vmem:[#allocation4 + $0x78] sm:$0xff] %vm2564_vm1, %v2559_v23  ;;  %v3577_v19 = vrot.slane %v3576_v18, 4  ;;  %v3589_v50 = vrot.slane %v3587_v8, 5  ;;  %v3600_v60 = vrot.slane %v3598_v10, 4  ;;  %v3595_v24 = vrot.slane %v3593_v28, 5 }
 0x229   :  { %v3603_v36 = vrot.slane %v3601_v12, 5  ;;  %v3609_v30 = vrot.slane %v3607_v15, 5  ;;  %v3568_v35 = vsel %vm5814_vm2, %v3563_v22, %v3567_v39  ;;  %3815 = vst.msk [vmem:[#allocation4 + $0x130] sm:$0xff] %vm2407_vm0, %v5716_v3  ;;  %v3134_v55 = vld [vmem:[#allocation3 + $0x14] sm:$0x1]  ;;  %v5116_v58 = vrot.slane %v3133_v53, 9 }
 0x22a   :  { %v3582_v54 = vsel %vm5814_vm2, %v3577_v19, %v3581_v44  ;;  %v3590_v5 = vor.u32 %v3589_v50, %v3586_v43  ;;  %v3135_v23 = vld [vmem:[#allocation3 + $0x18] sm:$0xe]  ;;  %v3136_v14 = vld [vmem:[#allocation3 + $0x1c] sm:$0x1]  ;;  %v3167_v56 = vrot.slane %v3134_v55, 5 }
 0x22b   :  { %v2925_v42 = vpop.permute.xlu1 %2924  ;;  %v5152_v27 = vcombine.low %v3568_v35, %v3582_v54  ;;  %v3604_v33 = vor.u32 %v3603_v36, %v3600_v60  ;;  %v3547_v34 = vld [vmem:[#allocation3 + $0x78] sm:$0xf]  ;;  %v3548_v29 = vld [vmem:[#allocation3 + $0x7c] sm:$0x1]  ;;  %v5117_v45 = vrot.slane %v3135_v23, 9  ;;  %v3171_v7 = vrot.slane %v3136_v14, 5 }
 0x22c   :  { %2936 = vst.msk [vmem:[#allocation4 + $0x10] sm:$0xff] %vm2564_vm1, %v2925_v42  ;;  %v4077_v25 = vld [vmem:[#allocation4 + $0xa8] sm:$0xff]  ;;  %v3591_v61 = vrot.slane %v3590_v5, 4  ;;  %v3549_v42 = vld [vmem:[#allocation3 + $0x80] sm:$0xf]  ;;  %v3612_v63 = vshrl.u32 %v3547_v34, 16  ;;  %v3168_v26 = vsel %vm6668_vm15, %v5116_v58, %v3167_v56 }
 0x22d   :  { %3683 = vst.msk [vmem:[#allocation4 + $0xb0] sm:$0xff] %vm2407_vm0, %v5152_v27  ;;  %v3605_v62 = vrot.slane %v3604_v33, 4  ;;  %v3550_v21 = vld [vmem:[#allocation3 + $0x84] sm:$0x1]  ;;  %v3615_v46 = vshll.u32 %v3547_v34, 16  ;;  %v3621_v48 = vshll.u32 %v3548_v29, 16  ;;  %v3172_v41 = vsel %vm6668_vm15, %v5117_v45, %v3171_v7 }
 0x22e   :  { %v3596_v59 = vsel %vm5814_vm2, %v3591_v61, %v3595_v24  ;;  %v3614_v37 = vrot.slane %v3612_v63, 4  ;;  %v3551_v47 = vld [vmem:[#allocation3 + $0x88] sm:$0xf]  ;;  %v3552_v2 = vld [vmem:[#allocation3 + $0x8c] sm:$0x1]  ;;  %v5124_v39 = vcombine.low %v3168_v26, %v3172_v41  ;;  %v3629_v4 = vshll.u32 %v3549_v42, 16 }
 0x22f   :  { %v4071_v9 = vld [vmem:[#allocation4 + $0x78] sm:$0xff]  ;;  %v3610_v51 = vsel %vm5814_vm2, %v3605_v62, %v3609_v30  ;;  %v3617_v20 = vrot.slane %v3615_v46, 5  ;;  %v3623_v38 = vrot.slane %v3621_v48, 5  ;;  %v3553_v11 = vld [vmem:[#allocation3 + $0x90] sm:$0xf]  ;;  %v3635_v18 = vshll.u32 %v3550_v21, 16 }
 0x230   :  { %4472 = vmatmul.mubr.bf16.gmra.mrb[44].mxu1 %v4071_v9  ;;  %v3554_v9 = vld [vmem:[#allocation3 + $0x94] sm:$0x1]  ;;  %v5153_v0 = vcombine.low %v3596_v59, %v3610_v51  ;;  %v3137_v6 = vld [vmem:[#allocation3 + $0x20] sm:$0xe]  ;;  %3213 = vst.msk [vmem:[#allocation4 + $0x20] sm:$0xff] %vm2407_vm0, %v5124_v39  ;;  %v3640_v28 = vshrl.u32 %v3551_v47, 16 }
 0x231   :  { %4479 = vmatprep.mubr.bf16.mxu1 %v4077_v25  ;;  %v3626_v25 = vshrl.u32 %v3549_v42, 16  ;;  %v3618_v8 = vor.u32 %v3617_v20, %v3614_v37  ;;  %v3643_v10 = vshll.u32 %v3551_v47, 16  ;;  %v3649_v22 = vshll.u32 %v3552_v2, 16  ;;  %v3138_v43 = vld [vmem:[#allocation3 + $0x24] sm:$0x1] }
 0x232   :  { %3684 = vst.msk [vmem:[#allocation4 + $0xd8] sm:$0xff] %vm2407_vm0, %v5153_v0  ;;  %v3631_v12 = vrot.slane %v3629_v4, 5  ;;  %v3637_v15 = vrot.slane %v3635_v18, 5  ;;  %v3657_v19 = vshll.u32 %v3553_v11, 16  ;;  %v3141_v44 = vld [vmem:[#allocation3 + $0x30] sm:$0xe] }
 0x233   :  { %v3120_v13 = vpop.permute.xlu0 %3119  ;;  %v4058_v32 = vld [vmem:[#allocation4 + $0x10] sm:$0xff]  ;;  %v3628_v1 = vrot.slane %v3626_v25, 4  ;;  %v3619_v60 = vrot.slane %v3618_v8, 4  ;;  %v3642_v3 = vrot.slane %v3640_v28, 4  ;;  %v3651_v24 = vrot.slane %v3649_v22, 5 }
 0x234   :  { %3130 = vst.msk [vmem:[#allocation4 + $0x40] sm:$0xff] %vm2564_vm1, %v3120_v13  ;;  %4545 = vmatmul.mubr.bf16.vlgmr.msra.gmra.mrb[32].mxu0 %v4058_v32  ;;  %v3654_v13 = vshrl.u32 %v3553_v11, 16  ;;  %v3645_v32 = vrot.slane %v3643_v10, 5  ;;  %v3659_v35 = vrot.slane %v3657_v19, 5  ;;  %v3663_v54 = vshll.u32 %v3554_v9, 16 }
 0x235   :  { %v3632_v30 = vor.u32 %v3631_v12, %v3628_v1  ;;  %v3142_v5 = vld [vmem:[#allocation3 + $0x34] sm:$0x1]  ;;  %v3624_v55 = vsel %vm5814_vm2, %v3619_v60, %v3623_v38  ;;  %v5118_v14 = vrot.slane %v3137_v6, 9  ;;  %v3143_v27 = vld [vmem:[#allocation3 + $0x38] sm:$0xe]  ;;  %v5120_v29 = vrot.slane %v3141_v44, 9 }
 0x236   :  { %v3395_v52 = vpop.permute.xlu1 %3394  ;;  %v3656_v53 = vrot.slane %v3654_v13, 4  ;;  %v3646_v23 = vor.u32 %v3645_v32, %v3642_v3  ;;  %v3144_v33 = vld [vmem:[#allocation3 + $0x3c] sm:$0x1]  ;;  %v3665_v34 = vrot.slane %v3663_v54, 5  ;;  %v3183_v42 = vrot.slane %v3142_v5, 5 }
 0x237   :  { %3406 = vst.msk [vmem:[#allocation4 + $0xa0] sm:$0xff] %vm2564_vm1, %v3395_v52  ;;  %v3526_v40 = vpop.permute.xlu0 %3525  ;;  %v3175_v52 = vrot.slane %v3138_v43, 5  ;;  %v3633_v58 = vrot.slane %v3632_v30, 4  ;;  %v5121_v63 = vrot.slane %v3143_v27, 9  ;;  %v3146_v62 = vld [vmem:[#allocation3 + $0x44] sm:$0x1] }
 0x238   :  { %3536 = vst.msk [vmem:[#allocation4 + $0xd0] sm:$0xff] %vm2564_vm1, %v3526_v40  ;;  %v3660_v56 = vor.u32 %v3659_v35, %v3656_v53  ;;  %v3145_v40 = vld [vmem:[#allocation3 + $0x40] sm:$0xe]  ;;  %v3647_v45 = vrot.slane %v3646_v23, 4  ;;  %v3187_v48 = vrot.slane %v3144_v33, 5  ;;  %v3184_v25 = vsel %vm6668_vm15, %v5120_v29, %v3183_v42 }
 0x239   :  { %v3176_v7 = vsel %vm6668_vm15, %v5118_v14, %v3175_v52  ;;  %v3638_v26 = vsel %vm5814_vm2, %v3633_v58, %v3637_v15  ;;  %v3147_v59 = vld [vmem:[#allocation3 + $0x48] sm:$0xe]  ;;  %v3148_v47 = vld [vmem:[#allocation3 + $0x4c] sm:$0x1]  ;;  %v5122_v2 = vrot.slane %v3145_v40, 9  ;;  %v3191_v20 = vrot.slane %v3146_v62, 5 }
 0x23a   :  { %v2927_v16 = vpop.permute.xlu1 %2926  ;;  %v3661_v21 = vrot.slane %v3660_v56, 4  ;;  %v5125_v46 = vcombine.low %v3176_v7, %v7157_v49  ;;  %v5154_v41 = vcombine.low %v3624_v55, %v3638_v26  ;;  %v3652_v37 = vsel %vm5814_vm2, %v3647_v45, %v3651_v24  ;;  %v3973_v11 = vld [vmem:[#allocation3 + $0x64] sm:$0x1]  ;;  %v3974_v9 = vld [vmem:[#allocation3 + $0x68] sm:$0xe] }
 0x23b   :  { %2937 = vst.msk [vmem:[#allocation4 + $0x38] sm:$0xff] %vm2564_vm1, %v2927_v16  ;;  %v4064_v57 = vld [vmem:[#allocation4 + $0x40] sm:$0xff]  ;;  %v3188_v49 = vsel %vm6668_vm15, %v5121_v63, %v3187_v48  ;;  %v5123_v38 = vrot.slane %v3147_v59, 9  ;;  %v3195_v1 = vrot.slane %v3148_v47, 5  ;;  %v3975_v4 = vld [vmem:[#allocation3 + $0x6c] sm:$0x1]  ;;  %v3192_v6 = vsel %vm6668_vm15, %v5122_v2, %v3191_v20 }
 0x23c   :  { %4552 = vmatprep.mubr.bf16.mxu0 %v4064_v57  ;;  %v3972_v16 = vld [vmem:[#allocation3 + $0x60] sm:$0xe]  ;;  %v3666_v39 = vsel %vm5814_vm2, %v3661_v21, %v3665_v34  ;;  %3214 = vst.msk [vmem:[#allocation4 + $0x48] sm:$0xff] %vm2407_vm0, %v5125_v46  ;;  %3685 = vst.msk [vmem:[#allocation4 + $0x100] sm:$0xff] %vm2407_vm0, %v5154_v41  ;;  %v5126_v0 = vcombine.low %v3184_v25, %v3188_v49  ;;  %v4006_v8 = vrot.slane %v3973_v11, 5  ;;  %v5177_v28 = vrot.slane %v3974_v9, 9 }
 0x23d   :  { %v5155_v57 = vcombine.low %v3652_v37, %v3666_v39  ;;  %v5176_v18 = vrot.slane %v3972_v16, 9  ;;  %v4010_v10 = vrot.slane %v3975_v4, 5  ;;  %v3977_v22 = vld [vmem:[#allocation3 + $0x74] sm:$0x1]  ;;  %v3196_v43 = vsel %vm6668_vm15, %v5123_v38, %v3195_v1  ;;  %v3978_v12 = vld [vmem:[#allocation3 + $0x78] sm:$0xe] }
 0x23e   :  { %v4076_v50 = vld [vmem:[#allocation4 + $0xa0] sm:$0xff]  ;;  %3215 = vst.msk [vmem:[#allocation4 + $0x70] sm:$0xff] %vm2407_vm0, %v5126_v0  ;;  %v3979_v15 = vld [vmem:[#allocation3 + $0x7c] sm:$0x1]  ;;  %v5178_v13 = vrot.slane %v3976_v31, 9  ;;  %v4014_v19 = vrot.slane %v3977_v22, 5 }
 0x23f   :  { %4480 = vmatmul.mubr.bf16.gmra.mrb[48].mxu1 %v4076_v50  ;;  %v4082_v36 = vld [vmem:[#allocation4 + $0xd0] sm:$0xff]  ;;  %3686 = vst.msk [vmem:[#allocation4 + $0x128] sm:$0xff] %vm2407_vm0, %v5155_v57  ;;  %v5127_v50 = vcombine.low %v3192_v6, %v3196_v43  ;;  %v4007_v60 = vsel %vm6668_vm15, %v5176_v18, %v4006_v8  ;;  %v4011_v3 = vsel %vm6668_vm15, %v5177_v28, %v4010_v10  ;;  %v5179_v32 = vrot.slane %v3978_v12, 9  ;;  %v3980_v24 = vld [vmem:[#allocation3 + $0x80] sm:$0xe] }
 0x240   :  { %4487 = vmatprep.mubr.bf16.mxu1 %v4082_v36  ;;  %v3981_v36 = vld [vmem:[#allocation3 + $0x84] sm:$0x1]  ;;  %v5184_v53 = vcombine.low %v4007_v60, %v4011_v3  ;;  %v4018_v35 = vrot.slane %v3979_v15, 5  ;;  %v3982_v54 = vld [vmem:[#allocation3 + $0x88] sm:$0xe]  ;;  %v5180_v55 = vrot.slane %v3980_v24, 9  ;;  %v4015_v33 = vsel %vm6668_vm15, %v5178_v13, %v4014_v19 }
 0x241   :  { %v3983_v5 = vld [vmem:[#allocation3 + $0x8c] sm:$0x1]  ;;  %3216 = vst.msk [vmem:[#allocation4 + $0x98] sm:$0xff] %vm2407_vm0, %v5127_v50  ;;  %v4022_v23 = vrot.slane %v3981_v36, 5  ;;  %v5181_v14 = vrot.slane %v3982_v54, 9  ;;  %v4060_v31 = vld [vmem:[#allocation4 + $0x20] sm:$0xff] }
 0x242   :  { %v4063_v61 = vld [vmem:[#allocation4 + $0x38] sm:$0xff]  ;;  %v4026_v52 = vrot.slane %v3983_v5, 5  ;;  %v3984_v27 = vld [vmem:[#allocation3 + $0x90] sm:$0xe]  ;;  %4052 = vst.msk [vmem:[#allocation4 + $0xc0] sm:$0xff] %vm2407_vm0, %v5184_v53  ;;  %v4019_v58 = vsel %vm6668_vm15, %v5179_v32, %v4018_v35 }
 0x243   :  { %4553 = vmatmul.mubr.bf16.gmra.mrb[36].mxu0 %v4063_v61  ;;  %v3985_v56 = vld [vmem:[#allocation3 + $0x94] sm:$0x1]  ;;  %v3986_v34 = vld [vmem:[#allocation3 + $0x98] sm:$0xe]  ;;  %v5182_v29 = vrot.slane %v3984_v27, 9  ;;  %v5185_v61 = vcombine.low %v4015_v33, %v4019_v58  ;;  %v4023_v45 = vsel %vm6668_vm15, %v5180_v55, %v4022_v23  ;;  %v4065_v43 = vld [vmem:[#allocation4 + $0x48] sm:$0xff] }
 0x244   :  { %v4027_v7 = vsel %vm6668_vm15, %v5181_v14, %v4026_v52  ;;  %v3987_v42 = vld [vmem:[#allocation3 + $0x9c] sm:$0x1]  ;;  %v4030_v63 = vrot.slane %v3985_v56, 5  ;;  %v5183_v21 = vrot.slane %v3986_v34, 9 }
 0x245   :  { %v3122_v51 = vpop.permute.xlu0 %3121  ;;  %v5186_v26 = vcombine.low %v4023_v45, %v4027_v7  ;;  %v4034_v46 = vrot.slane %v3987_v42, 5  ;;  %4053 = vst.msk [vmem:[#allocation4 + $0xe8] sm:$0xff] %vm2407_vm0, %v5185_v61  ;;  %v4070_v12 = vld [vmem:[#allocation4 + $0x70] sm:$0xff] }
 0x246   :  { %3131 = vst.msk [vmem:[#allocation4 + $0x68] sm:$0xff] %vm2564_vm1, %v3122_v51  ;;  %v4031_v59 = vsel %vm6668_vm15, %v5182_v29, %v4030_v63 }
 0x247   :  { %4054 = vst.msk [vmem:[#allocation4 + $0x110] sm:$0xff] %vm2407_vm0, %v5186_v26  ;;  %v4035_v41 = vsel %vm6668_vm15, %v5183_v21, %v4034_v46  ;;  %v7245_v21 = vld [vmem:[%s7389_s4] ss:$0 sm:$0xff] }
 0x248   :  { %v5187_v25 = vcombine.low %v4031_v59, %v4035_v41 }
 0x249   :  { %v3528_v44 = vpop.permute.xlu0 %3527  ;;  %v4080_v50 = vld [vmem:[#allocation4 + $0xc0] sm:$0xff] }
 0x24a   :  { %v3397_v30 = vpop.permute.xlu1 %3396  ;;  %3537 = vst.msk [vmem:[#allocation4 + $0xf8] sm:$0xff] %vm2564_vm1, %v3528_v44  ;;  %v4075_v44 = vld [vmem:[#allocation4 + $0x98] sm:$0xff] }
 0x24b   :  { %3407 = vst.msk [vmem:[#allocation4 + $0xc8] sm:$0xff] %vm2564_vm1, %v3397_v30 }
 0x24c   :  { %4055 = vst.msk [vmem:[#allocation4 + $0x138] sm:$0xff] %vm2407_vm0, %v5187_v25  ;;  %v4085_v32 = vld [vmem:[#allocation4 + $0xe8] sm:$0xff] }
 0x24d   :  { %v4069_v40 = vld [vmem:[#allocation4 + $0x68] sm:$0xff] }
 0x24e   :  { %v2929_v62 = vpop.permute.xlu1 %2928  ;;  %4560 = vmatprep.mubr.bf16.mxu0 %v4069_v40  ;;  %v4090_v24 = vld [vmem:[#allocation4 + $0x110] sm:$0xff] }
 0x24f   :  { %2938 = vst.msk [vmem:[#allocation4 + $0x60] sm:$0xff] %vm2564_vm1, %v2929_v62  ;;  %v3124_v48 = vpop.permute.xlu0 %3123 }
 0x250   :  { %3132 = vst.msk [vmem:[#allocation4 + $0x90] sm:$0xff] %vm2564_vm1, %v3124_v48 }
 0x251   :  { %v4087_v37 = vld [vmem:[#allocation4 + $0xf8] sm:$0xff] }
 0x252   :  { %v4081_v47 = vld [vmem:[#allocation4 + $0xc8] sm:$0xff] }
 0x253   :  { %4488 = vmatmul.mubr.bf16.gmra.mrb[52].mxu1 %v4081_v47  ;;  %v3530_v2 = vpop.permute.xlu0 %3529  ;;  %v4095_v30 = vld [vmem:[#allocation4 + $0x138] sm:$0xff] }
 0x254   :  { %v3399_v16 = vpop.permute.xlu1 %3398  ;;  %4495 = vmatprep.mubr.bf16.mxu1 %v4087_v37  ;;  %3538 = vst.msk [vmem:[#allocation4 + $0x120] sm:$0xff] %vm2564_vm1, %v3530_v2 }
 0x255   :  { %3408 = vst.msk [vmem:[#allocation4 + $0xf0] sm:$0xff] %vm2564_vm1, %v3399_v16 }
 0x256   :  { %v4068_v51 = vld [vmem:[#allocation4 + $0x60] sm:$0xff] }
 0x257   :  { %4561 = vmatmul.mubr.bf16.gmra.mrb[40].mxu0 %v4068_v51  ;;  %v4074_v39 = vld [vmem:[#allocation4 + $0x90] sm:$0xff] }
 0x258   :  { %v2931_v49 = vpop.permute.xlu1 %2930  ;;  %4568 = vmatprep.mubr.bf16.mxu0 %v4074_v39 }
 0x259   :  { %2939 = vst.msk [vmem:[#allocation4 + $0x88] sm:$0xff] %vm2564_vm1, %v2931_v49 }
 0x25b   :  { %v3957_v17 = vpop.permute.xlu0 %3956  ;;  %v4092_v20 = vld [vmem:[#allocation4 + $0x120] sm:$0xff] }
 0x25c   :  { %3968 = vst.msk [vmem:[#allocation4 + $0xb8] sm:$0xff] %vm2564_vm1, %v3957_v17  ;;  %v4086_v38 = vld [vmem:[#allocation4 + $0xf0] sm:$0xff] }
 0x25d   :  { %4496 = vmatmul.mubr.bf16.gmra.mrb[56].mxu1 %v4086_v38 }
 0x25e   :  { %4503 = vmatprep.mubr.bf16.mxu1 %v4092_v20 }
 0x25f   :  { %v3401_v11 = vpop.permute.xlu1 %3400 }
 0x260   :  { %3409 = vst.msk [vmem:[#allocation4 + $0x118] sm:$0xff] %vm2564_vm1, %v3401_v11  ;;  %v4073_v9 = vld [vmem:[#allocation4 + $0x88] sm:$0xff] }
 0x261   :  { %4569 = vmatmul.mubr.bf16.gmra.mrb[44].mxu0 %v4073_v9 }
 0x263   :  { %v3959_v57 = vpop.permute.xlu0 %3958  ;;  %v3764_v0 = vpop.permute.xlu1 %3763  ;;  %v4079_v1 = vld [vmem:[#allocation4 + $0xb8] sm:$0xff] }
 0x264   :  { %3969 = vst.msk [vmem:[#allocation4 + $0xe0] sm:$0xff] %vm2564_vm1, %v3959_v57  ;;  %3775 = vst.msk [vmem:[#allocation4 + $0xb0] sm:$0xff] %vm2564_vm1, %v3764_v0  ;;  %4576 = vmatprep.mubr.bf16.mxu0 %v4079_v1 }
 0x267   :  { %v4091_v4 = vld [vmem:[#allocation4 + $0x118] sm:$0xff] }
 0x268   :  { %v3766_v18 = vpop.permute.xlu1 %3765  ;;  %4504 = vmatmul.mubr.bf16.gmra.mrb[60].mxu1 %v4091_v4 }
 0x269   :  { %3776 = vst.msk [vmem:[#allocation4 + $0xd8] sm:$0xff] %vm2564_vm1, %v3766_v18  ;;  %5521 = vmatprep.mubr.msk.bf16.mxu1 %vm2407_vm0, %v4060_v31 }
 0x26a   :  { %v3961_v6 = vpop.permute.xlu0 %3960 }
 0x26b   :  { %3970 = vst.msk [vmem:[#allocation4 + $0x108] sm:$0xff] %vm2564_vm1, %v3961_v6  ;;  %v4078_v8 = vld [vmem:[#allocation4 + $0xb0] sm:$0xff]  ;;  %v4084_v28 = vld [vmem:[#allocation4 + $0xe0] sm:$0xff] }
 0x26c   :  { %4577 = vmatmul.mubr.bf16.gmra.mrb[48].mxu0 %v4078_v8 }
 0x26d   :  { %v3768_v10 = vpop.permute.xlu1 %3767  ;;  %4584 = vmatprep.mubr.bf16.mxu0 %v4084_v28 }
 0x26e   :  { %v3963_v22 = vpop.permute.xlu0 %3962  ;;  %3777 = vst.msk [vmem:[#allocation4 + $0x100] sm:$0xff] %vm2564_vm1, %v3768_v10 }
 0x26f   :  { %3971 = vst.msk [vmem:[#allocation4 + $0x130] sm:$0xff] %vm2564_vm1, %v3963_v22 }
 0x270   :  { %5522 = vmatmul.mubr.msk.bf16.vlgmr.msra.gmra.mrb[16].mxu1 %vm2407_vm0, %v4065_v43  ;;  %v4083_v13 = vld [vmem:[#allocation4 + $0xd8] sm:$0xff] }
 0x271   :  { %v3770_v15 = vpop.permute.xlu1 %3769  ;;  %5525 = vmatprep.mubr.msk.bf16.mxu1 %vm2407_vm0, %v4070_v12 }
 0x272   :  { %3778 = vst.msk [vmem:[#allocation4 + $0x128] sm:$0xff] %vm2564_vm1, %v3770_v15  ;;  %v4089_v19 = vld [vmem:[#allocation4 + $0x108] sm:$0xff] }
 0x274   :  { %4585 = vmatmul.mubr.bf16.gmra.mrb[52].mxu0 %v4083_v13 }
 0x275   :  { %4592 = vmatprep.mubr.bf16.mxu0 %v4089_v19  ;;  %v4088_v60 = vld [vmem:[#allocation4 + $0x100] sm:$0xff] }
 0x276   :  { %v4094_v3 = vld [vmem:[#allocation4 + $0x130] sm:$0xff] }
 0x278   :  { %5526 = vmatmul.mubr.msk.bf16.gmra.mrb[20].mxu1 %vm2407_vm0, %v4075_v44 }
 0x279   :  { %5529 = vmatprep.mubr.msk.bf16.mxu1 %vm2407_vm0, %v4080_v50  ;;  %v4093_v36 = vld [vmem:[#allocation4 + $0x128] sm:$0xff] }
 0x27c   :  { %4593 = vmatmul.mubr.bf16.gmra.mrb[56].mxu0 %v4088_v60 }
 0x27d   :  { %4600 = vmatprep.mubr.bf16.mxu0 %v4094_v3 }
 0x280   :  { %5530 = vmatmul.mubr.msk.bf16.gmra.mrb[24].mxu1 %vm2407_vm0, %v4085_v32 }
 0x281   :  { %5533 = vmatprep.mubr.msk.bf16.mxu1 %vm2407_vm0, %v4090_v24 }
 0x284   :  { %4601 = vmatmul.mubr.bf16.gmra.mrb[60].mxu0 %v4093_v36 }
 0x288   :  { %5534 = vmatmul.mubr.msk.bf16.gmra.mrb[28].mxu1 %vm2407_vm0, %v4095_v30 }
 0x2da   :  { %v5349_v53 = vpop.f32.mrb[32].mxu1 }
 0x2db   :  { %v5350_v35 = vpop.f32.mrb[33].mxu1 }
 0x2dc   :  { %v5351_v54 = vadd.f32 %v5350_v35, %v5349_v53  ;;  %v5352_v5 = vpop.f32.mrb[34].mxu1 }
 0x2dd   :  { %v5353_v55 = vpop.f32.mrb[35].mxu1 }
 0x2de   :  { %v5354_v23 = vadd.f32 %v5353_v55, %v5352_v5  ;;  %v4450_v37 = vadd.f32 %v5351_v54, %v7245_v21 }
 0x2e0   :  { %v4453_v16 = vadd.f32 %v5354_v23, %v7245_v21 }
 0x2e8   :  { %v5355_v14 = vpop.f32.mrb[36].mxu1 }
 0x2e9   :  { %v5356_v52 = vpop.f32.mrb[37].mxu1 }
 0x2ea   :  { %v5357_v27 = vadd.f32 %v5356_v52, %v5355_v14  ;;  %v5358_v33 = vpop.f32.mrb[38].mxu1 }
 0x2eb   :  { %v5359_v58 = vpop.f32.mrb[39].mxu1 }
 0x2ec   :  { %v5360_v56 = vadd.f32 %v5359_v58, %v5358_v33  ;;  %v4458_v4 = vadd.f32 %v5357_v27, %v7245_v21 }
 0x2ee   :  { %v4461_v8 = vadd.f32 %v5360_v56, %v7245_v21 }
 0x2f5   :  { %v5361_v34 = vpop.f32.mrb[40].mxu1 }
 0x2f6   :  { %v5362_v29 = vpop.f32.mrb[41].mxu1 }
 0x2f7   :  { %v5363_v40 = vadd.f32 %v5362_v29, %v5361_v34  ;;  %v5364_v61 = vpop.f32.mrb[42].mxu1 }
 0x2f8   :  { %v5365_v45 = vpop.f32.mrb[43].mxu1 }
 0x2f9   :  { %v5366_v7 = vadd.f32 %v5365_v45, %v5364_v61  ;;  %v4466_v3 = vadd.f32 %v5363_v40, %v7245_v21 }
 0x2fb   :  { %v4469_v30 = vadd.f32 %v5366_v7, %v7245_v21 }
 0x303   :  { %v5367_v42 = vpop.f32.mrb[44].mxu1 }
 0x304   :  { %v5368_v63 = vpop.f32.mrb[45].mxu1 }
 0x305   :  { %v5369_v62 = vadd.f32 %v5368_v63, %v5367_v42  ;;  %v5370_v26 = vpop.f32.mrb[46].mxu1 }
 0x306   :  { %v5371_v46 = vpop.f32.mrb[47].mxu1 }
 0x307   :  { %v5372_v48 = vadd.f32 %v5371_v46, %v5370_v26  ;;  %v5413_v59 = vpop.f32.mrb[32].mxu0  ;;  %v4474_v56 = vadd.f32 %v5369_v62, %v7245_v21  ;;  %v7278_v62 = vld [vmem:[%s7390_s6] ss:$0 sm:$0xff] }
 0x308   :  { %v5414_v41 = vpop.f32.mrb[33].mxu0 }
 0x309   :  { %v5415_v25 = vadd.f32 %v5414_v41, %v5413_v59  ;;  %v5416_v47 = vpop.f32.mrb[34].mxu0  ;;  %v4477_v61 = vadd.f32 %v5372_v48, %v7245_v21 }
 0x30a   :  { %v5417_v2 = vpop.f32.mrb[35].mxu0 }
 0x30b   :  { %v7249_v51 = vadd.f32 %v5415_v25, %v4450_v37  ;;  %v5418_v39 = vadd.f32 %v5417_v2, %v5416_v47 }
 0x30d   :  { %v7251_v49 = vadd.f32 %v5418_v39, %v4453_v16 }
 0x312   :  { %v5373_v17 = vpop.f32.mrb[48].mxu1 }
 0x313   :  { %v5374_v20 = vpop.f32.mrb[49].mxu1 }
 0x314   :  { %v5375_v38 = vadd.f32 %v5374_v20, %v5373_v17  ;;  %v5376_v11 = vpop.f32.mrb[50].mxu1 }
 0x315   :  { %v5377_v9 = vpop.f32.mrb[51].mxu1 }
 0x316   :  { %v5378_v57 = vadd.f32 %v5377_v9, %v5376_v11  ;;  %v5419_v0 = vpop.f32.mrb[36].mxu0  ;;  %v4482_v48 = vadd.f32 %v5375_v38, %v7245_v21 }
 0x317   :  { %v5420_v1 = vpop.f32.mrb[37].mxu0 }
 0x318   :  { %v5421_v18 = vadd.f32 %v5420_v1, %v5419_v0  ;;  %v5422_v31 = vpop.f32.mrb[38].mxu0  ;;  %v4485_v20 = vadd.f32 %v5378_v57, %v7245_v21  ;;  %v5539_v1 = vadd.f32 %v7278_v62, %v7249_v51 }
 0x319   :  { %v5423_v6 = vpop.f32.mrb[39].mxu0 }
 0x31a   :  { %v4555_v28 = vadd.f32 %v5421_v18, %v4458_v4  ;;  %v5424_v10 = vadd.f32 %v5423_v6, %v5422_v31 }
 0x31c   :  { %v4558_v22 = vadd.f32 %v5424_v10, %v4461_v8  ;;  %v5537_v17 = vadd.f32 %v7278_v62, %v4555_v28  ;;  %v5543_v28 = vadd.f32 %v7278_v62, %v7251_v49 }
 0x31e   :  { %v5541_v31 = vadd.f32 %v7278_v62, %v4558_v22 }
 0x326   :  { %v5379_v43 = vpop.f32.mrb[52].mxu1 }
 0x327   :  { %v5380_v12 = vpop.f32.mrb[53].mxu1 }
 0x328   :  { %v7255_v15 = vadd.f32 %v5380_v12, %v5379_v43  ;;  %v5382_v13 = vpop.f32.mrb[54].mxu1 }
 0x329   :  { %v5383_v19 = vpop.f32.mrb[55].mxu1 }
 0x32a   :  { %v7257_v44 = vadd.f32 %v5383_v19, %v5382_v13  ;;  %v5425_v50 = vpop.f32.mrb[40].mxu0 }
 0x32b   :  { %v5426_v60 = vpop.f32.mrb[41].mxu0 }
 0x32c   :  { %v5427_v32 = vadd.f32 %v5426_v60, %v5425_v50  ;;  %v5428_v24 = vpop.f32.mrb[42].mxu0 }
 0x32d   :  { %v5429_v36 = vpop.f32.mrb[43].mxu0 }
 0x32e   :  { %v7261_v53 = vadd.f32 %v5427_v32, %v4466_v3  ;;  %v5430_v35 = vadd.f32 %v5429_v36, %v5428_v24  ;;  %v4490_v3 = vadd.f32 %v7255_v15, %v7245_v21 }
 0x330   :  { %v7263_v54 = vadd.f32 %v5430_v35, %v4469_v30  ;;  %v5385_v5 = vpop.f32.mrb[56].mxu1  ;;  %v4493_v30 = vadd.f32 %v7257_v44, %v7245_v21  ;;  %v5547_v44 = vadd.f32 %v7278_v62, %v7261_v53 }
 0x331   :  { %v5386_v55 = vpop.f32.mrb[57].mxu1 }
 0x332   :  { %v7265_v23 = vadd.f32 %v5386_v55, %v5385_v5  ;;  %v5388_v14 = vpop.f32.mrb[58].mxu1  ;;  %v5551_v53 = vadd.f32 %v7278_v62, %v7263_v54 }
 0x333   :  { %v5389_v52 = vpop.f32.mrb[59].mxu1 }
 0x334   :  { %v7267_v27 = vadd.f32 %v5389_v52, %v5388_v14  ;;  %v5431_v33 = vpop.f32.mrb[44].mxu0 }
 0x335   :  { %v5432_v58 = vpop.f32.mrb[45].mxu0 }
 0x336   :  { %v5433_v34 = vadd.f32 %v5432_v58, %v5431_v33  ;;  %v5434_v29 = vpop.f32.mrb[46].mxu0 }
 0x337   :  { %v5435_v40 = vpop.f32.mrb[47].mxu0 }
 0x338   :  { %v4571_v45 = vadd.f32 %v5433_v34, %v4474_v56  ;;  %v5436_v7 = vadd.f32 %v5435_v40, %v5434_v29 }
 0x33a   :  { %v4574_v42 = vadd.f32 %v5436_v7, %v4477_v61  ;;  %v5545_v5 = vadd.f32 %v7278_v62, %v4571_v45 }
 0x33b   :  { %v5391_v63 = vpop.f32.mrb[60].mxu1 }
 0x33c   :  { %v5392_v26 = vpop.f32.mrb[61].mxu1  ;;  %v5549_v56 = vadd.f32 %v7278_v62, %v4574_v42 }
 0x33d   :  { %v7271_v46 = vadd.f32 %v5392_v26, %v5391_v63  ;;  %v5394_v59 = vpop.f32.mrb[62].mxu1 }
 0x33e   :  { %v5395_v41 = vpop.f32.mrb[63].mxu1 }
 0x33f   :  { %v7273_v37 = vadd.f32 %v5395_v41, %v5394_v59  ;;  %v5437_v25 = vpop.f32.mrb[48].mxu0 }
 0x340   :  { %v5438_v47 = vpop.f32.mrb[49].mxu0 }
 0x341   :  { %v5439_v2 = vadd.f32 %v5438_v47, %v5437_v25  ;;  %v5440_v16 = vpop.f32.mrb[50].mxu0  ;;  %v4498_v47 = vadd.f32 %v7265_v23, %v7245_v21 }
 0x342   :  { %v5441_v39 = vpop.f32.mrb[51].mxu0 }
 0x343   :  { %v7283_v11 = vadd.f32 %v5439_v2, %v4482_v48  ;;  %v5442_v9 = vadd.f32 %v5441_v39, %v5440_v16  ;;  %v5523_v0 = vpop.f32.mrb[16].mxu1 }
 0x344   :  { %v5538_v4 = vadd.f32 %v5537_v17, %v5523_v0  ;;  %v4643_v18 = vpop.f32.mrb[17].mxu1  ;;  %v4501_v17 = vadd.f32 %v7267_v27, %v7245_v21 }
 0x345   :  { %v7288_v6 = vadd.f32 %v5442_v9, %v4485_v20  ;;  %v5540_v38 = vadd.f32 %v5539_v1, %v4643_v18  ;;  %v5524_v8 = vpop.f32.mrb[18].mxu1  ;;  %v5555_v27 = vadd.f32 %v7278_v62, %v7283_v11 }
 0x346   :  { %v4724_v10 = vmax.f32 %v5538_v4, 0.0  ;;  %v5542_v57 = vadd.f32 %v5541_v31, %v5524_v8  ;;  %v4646_v43 = vpop.f32.mrb[19].mxu1 }
 0x347   :  { %v4722_v12 = vmax.f32 %v5540_v38, 0.0  ;;  %v5544_v13 = vadd.f32 %v5543_v28, %v4646_v43  ;;  %v5443_v19 = vpop.f32.mrb[52].mxu0  ;;  %v5559_v11 = vadd.f32 %v7278_v62, %v7288_v6 }
 0x348   :  { %v4740_v50 = vpack.c.bf16 %v4724_v10, %v4724_v10  ;;  %v4725_v60 = vmax.f32 %v5542_v57, 0.0  ;;  %v5444_v51 = vpop.f32.mrb[53].mxu0 }
 0x349   :  { %v4738_v22 = vpack.c.bf16 %v4722_v12, %v4722_v12  ;;  %v4723_v32 = vmax.f32 %v5544_v13, 0.0  ;;  %v5445_v24 = vadd.f32 %v5444_v51, %v5443_v19  ;;  %v5446_v36 = vpop.f32.mrb[54].mxu0 }
 0x34a   :  { %4756 = vst.msk [vmem:[%s7391_s7 + $0x8] sm:$0xf] %vm2022_vm7, %v4740_v50  ;;  %v4741_v49 = vpack.c.bf16 %v4725_v60, %v4725_v60  ;;  %v5447_v35 = vpop.f32.mrb[55].mxu0 }
 0x34b   :  { %4754 = vst.msk [vmem:[%s7391_s7] sm:$0xf] %vm2022_vm7, %v4738_v22  ;;  %v4739_v15 = vpack.c.bf16 %v4723_v32, %v4723_v32  ;;  %v4587_v55 = vadd.f32 %v5445_v24, %v4490_v3  ;;  %v5448_v14 = vadd.f32 %v5447_v35, %v5446_v36  ;;  %v5527_v52 = vpop.f32.mrb[20].mxu1  ;;  %v4506_v22 = vadd.f32 %v7271_v46, %v7245_v21 }
 0x34c   :  { %4757 = vst.msk [vmem:[%s7391_s7 + $0xc] sm:$0xf] %vm2022_vm7, %v4741_v49  ;;  %v5546_v33 = vadd.f32 %v5545_v5, %v5527_v52  ;;  %v4659_v58 = vpop.f32.mrb[21].mxu1  ;;  %v4509_v49 = vadd.f32 %v7273_v37, %v7245_v21 }
 0x34d   :  { %4755 = vst.msk [vmem:[%s7391_s7 + $0x4] sm:$0xf] %vm2022_vm7, %v4739_v15  ;;  %v4590_v34 = vadd.f32 %v5448_v14, %v4493_v30  ;;  %v5548_v29 = vadd.f32 %v5547_v44, %v4659_v58  ;;  %v5528_v40 = vpop.f32.mrb[22].mxu1  ;;  %v5553_v9 = vadd.f32 %v7278_v62, %v4587_v55 }
 0x34e   :  { %v4728_v61 = vmax.f32 %v5546_v33, 0.0  ;;  %v5550_v45 = vadd.f32 %v5549_v56, %v5528_v40  ;;  %v4662_v7 = vpop.f32.mrb[23].mxu1 }
 0x34f   :  { %v4726_v63 = vmax.f32 %v5548_v29, 0.0  ;;  %v5552_v26 = vadd.f32 %v5551_v53, %v4662_v7  ;;  %v5449_v59 = vpop.f32.mrb[56].mxu0  ;;  %v5557_v38 = vadd.f32 %v7278_v62, %v4590_v34 }
 0x350   :  { %v4744_v41 = vpack.c.bf16 %v4728_v61, %v4728_v61  ;;  %v4729_v25 = vmax.f32 %v5550_v45, 0.0  ;;  %v5450_v42 = vpop.f32.mrb[57].mxu0 }
 0x351   :  { %v4742_v48 = vpack.c.bf16 %v4726_v63, %v4726_v63  ;;  %v4727_v2 = vmax.f32 %v5552_v26, 0.0  ;;  %v5451_v16 = vadd.f32 %v5450_v42, %v5449_v59  ;;  %v5452_v39 = vpop.f32.mrb[58].mxu0 }
 0x352   :  { %4760 = vst.msk [vmem:[%s7391_s7 + $0x18] sm:$0xf] %vm2022_vm7, %v4744_v41  ;;  %v4745_v54 = vpack.c.bf16 %v4729_v25, %v4729_v25  ;;  %v5453_v20 = vpop.f32.mrb[59].mxu0 }
 0x353   :  { %4758 = vst.msk [vmem:[%s7391_s7 + $0x10] sm:$0xf] %vm2022_vm7, %v4742_v48  ;;  %v4743_v23 = vpack.c.bf16 %v4727_v2, %v4727_v2  ;;  %v4595_v0 = vadd.f32 %v5451_v16, %v4498_v47  ;;  %v5454_v1 = vadd.f32 %v5453_v20, %v5452_v39  ;;  %v5531_v4 = vpop.f32.mrb[24].mxu1 }
 0x354   :  { %4761 = vst.msk [vmem:[%s7391_s7 + $0x1c] sm:$0xf] %vm2022_vm7, %v4745_v54  ;;  %v5554_v18 = vadd.f32 %v5553_v9, %v5531_v4  ;;  %v4675_v31 = vpop.f32.mrb[25].mxu1 }
 0x355   :  { %4759 = vst.msk [vmem:[%s7391_s7 + $0x14] sm:$0xf] %vm2022_vm7, %v4743_v23  ;;  %v4598_v8 = vadd.f32 %v5454_v1, %v4501_v17  ;;  %v5556_v28 = vadd.f32 %v5555_v27, %v4675_v31  ;;  %v5532_v10 = vpop.f32.mrb[26].mxu1  ;;  %v5563_v14 = vadd.f32 %v7278_v62, %v4595_v0 }
 0x356   :  { %v4732_v57 = vmax.f32 %v5554_v18, 0.0  ;;  %v5558_v43 = vadd.f32 %v5557_v38, %v5532_v10  ;;  %v4678_v12 = vpop.f32.mrb[27].mxu1 }
 0x357   :  { %v4730_v13 = vmax.f32 %v5556_v28, 0.0  ;;  %v5560_v19 = vadd.f32 %v5559_v11, %v4678_v12  ;;  %v5455_v50 = vpop.f32.mrb[60].mxu0  ;;  %v5567_v58 = vadd.f32 %v7278_v62, %v4598_v8 }
 0x358   :  { %v4748_v60 = vpack.c.bf16 %v4732_v57, %v4732_v57  ;;  %v4733_v51 = vmax.f32 %v5558_v43, 0.0  ;;  %v5456_v3 = vpop.f32.mrb[61].mxu0 }
 0x359   :  { %v4746_v32 = vpack.c.bf16 %v4730_v13, %v4730_v13  ;;  %v4731_v24 = vmax.f32 %v5560_v19, 0.0  ;;  %v5457_v36 = vadd.f32 %v5456_v3, %v5455_v50  ;;  %v5458_v30 = vpop.f32.mrb[62].mxu0 }
 0x35a   :  { %4764 = vst.msk [vmem:[%s7391_s7 + $0x28] sm:$0xf] %vm2022_vm7, %v4748_v60  ;;  %v4749_v6 = vpack.c.bf16 %v4733_v51, %v4733_v51  ;;  %v5459_v35 = vpop.f32.mrb[63].mxu0 }
 0x35b   :  { %4762 = vst.msk [vmem:[%s7391_s7 + $0x20] sm:$0xf] %vm2022_vm7, %v4746_v32  ;;  %v4747_v46 = vpack.c.bf16 %v4731_v24, %v4731_v24  ;;  %v4603_v5 = vadd.f32 %v5457_v36, %v4506_v22  ;;  %v5460_v15 = vadd.f32 %v5459_v35, %v5458_v30  ;;  %v5535_v55 = vpop.f32.mrb[28].mxu1 }
 0x35c   :  { %4765 = vst.msk [vmem:[%s7391_s7 + $0x2c] sm:$0xf] %vm2022_vm7, %v4749_v6  ;;  %v4691_v21 = vpop.f32.mrb[29].mxu1 }
 0x35d   :  { %4763 = vst.msk [vmem:[%s7391_s7 + $0x24] sm:$0xf] %vm2022_vm7, %v4747_v46  ;;  %v4606_v37 = vadd.f32 %v5460_v15, %v4509_v49  ;;  %v5561_v52 = vadd.f32 %v7278_v62, %v4603_v5  ;;  %v5564_v44 = vadd.f32 %v5563_v14, %v4691_v21  ;;  %v5536_v33 = vpop.f32.mrb[30].mxu1 }
 0x35e   :  { %v4694_v56 = vpop.f32.mrb[31].mxu1 }
 0x35f   :  { %v5562_v34 = vadd.f32 %v5561_v52, %v5535_v55  ;;  %v4734_v29 = vmax.f32 %v5564_v44, 0.0  ;;  %v5565_v40 = vadd.f32 %v7278_v62, %v4606_v37  ;;  %v5568_v53 = vadd.f32 %v5567_v58, %v4694_v56 }
 0x361   :  { %v4736_v61 = vmax.f32 %v5562_v34, 0.0  ;;  %v4750_v45 = vpack.c.bf16 %v4734_v29, %v4734_v29  ;;  %v5566_v7 = vadd.f32 %v5565_v40, %v5536_v33  ;;  %v4735_v63 = vmax.f32 %v5568_v53, 0.0 }
 0x363   :  { %v4752_v26 = vpack.c.bf16 %v4736_v61, %v4736_v61  ;;  %4766 = vst.msk [vmem:[%s7391_s7 + $0x30] sm:$0xf] %vm2022_vm7, %v4750_v45  ;;  %v4737_v59 = vmax.f32 %v5566_v7, 0.0  ;;  %v4751_v41 = vpack.c.bf16 %v4735_v63, %v4735_v63 }
 0x365   :  { %4768 = vst.msk [vmem:[%s7391_s7 + $0x38] sm:$0xf] %vm2022_vm7, %v4752_v26  ;;  %v4753_v25 = vpack.c.bf16 %v4737_v59, %v4737_v59  ;;  %4767 = vst.msk [vmem:[%s7391_s7 + $0x34] sm:$0xf] %vm2022_vm7, %v4751_v41 }
 0x367   :  { %4769 = vst.msk [vmem:[%s7391_s7 + $0x3c] sm:$0xf] %vm2022_vm7, %v4753_v25 }

// kernel: two_blocks.3
= control target key start
LH: loop header
LB: loop body
LE: loop exit
PB: predicated region body
PF: predicated region fallthrough
CT: control target
= control target key end

     0   :  { %vm74_vm0 = vsmask.f32 3328  ;;  %vm75_vm1 = vsmask.f32 7440  ;;  %s6156_s22 = smov 64   ;;  %vm250_vm3 = vcmask 1042432   ;;  %s8103_s0 = inlined_call_operand.vmem [shape: bf16[2,1,10,10,64], index: 0, kind: input, shape index: {}]   ;;  %s8104_s1 = inlined_call_operand.vmem [shape: bf16[576,64], index: 1, kind: input, shape index: {}]   ;;  %s8105_s2 = inlined_call_operand.vmem [shape: f32[1,64], index: 2, kind: input, shape index: {}]   ;;  %s8106_s3 = inlined_call_operand.vmem [shape: bf16[576,64], index: 3, kind: input, shape index: {}]   ;;  %s8107_s4 = inlined_call_operand.vmem [shape: f32[1,64], index: 4, kind: input, shape index: {}]   ;;  %s8108_s5 = inlined_call_operand.vmem [shape: bf16[2,8,8,64], index: 5, kind: output, shape index: {}]  }
   0x1   :  { %v6035_v0 = vld [vmem:[%s8103_s0 + $0x8] ss:$8 sps:$4 sm:$0xff]   ;;  %v6036_v1 = vld [vmem:[%s8103_s0 + $0x18] ss:$8 sps:$4 sm:$0xff]   ;;  %v59_v3 = vld [vmem:[%s8103_s0 + $0x4] sm:$0x1] }
   0x2   :  { %334 = vrot.lane.b32.xlu0 %v6035_v0, %s6156_s22  ;;  %v58_v2 = vld [vmem:[%s8103_s0] sm:$0xf]  ;;  %v60_v4 = vld [vmem:[%s8103_s0 + $0x8] sm:$0xf]  ;;  %336 = vrot.lane.b32.xlu1 %v6036_v1, %s6156_s22  ;;  %v87_v8 = vshll.u32 %v59_v3, 16  ;;  %vm6225_vm2 = vmor %vm74_vm0, %vm75_vm1  ;;  %vm251_vm4 = vcmask 1046532  }
   0x3   :  { %v61_v5 = vld [vmem:[%s8103_s0 + $0xc] sm:$0x1]  ;;  %v78_v6 = vshrl.u32 %v58_v2, 16  ;;  %v81_v7 = vshll.u32 %v58_v2, 16  ;;  %v92_v9 = vshrl.u32 %v60_v4, 16  ;;  %v95_v10 = vshll.u32 %v60_v4, 16  ;;  %vm6436_vm5 = vmor %vm250_vm3, %vm251_vm4 }
   0x4   :  { %v101_v11 = vshll.u32 %v61_v5, 16  ;;  %v62_v12 = vld [vmem:[%s8103_s0 + $0x10] sm:$0xf]  ;;  %v63_v13 = vld [vmem:[%s8103_s0 + $0x14] sm:$0x1]  ;;  %v89_v16 = vrot.slane %v87_v8, 5 }
   0x5   :  { %v80_v14 = vrot.slane %v78_v6, 4  ;;  %v83_v15 = vrot.slane %v81_v7, 5  ;;  %v94_v17 = vrot.slane %v92_v9, 4  ;;  %v64_v18 = vld [vmem:[%s8103_s0 + $0x18] sm:$0xf]  ;;  %v97_v19 = vrot.slane %v95_v10, 5 }
   0x6   :  { %v103_v20 = vrot.slane %v101_v11, 5  ;;  %v65_v21 = vld [vmem:[%s8103_s0 + $0x1c] sm:$0x1]  ;;  %v106_v22 = vshrl.u32 %v62_v12, 16  ;;  %v109_v23 = vshll.u32 %v62_v12, 16  ;;  %v115_v25 = vshll.u32 %v63_v13, 16 }
   0x7   :  { %v84_v24 = vor.u32 %v83_v15, %v80_v14  ;;  %v120_v26 = vshrl.u32 %v64_v18, 16  ;;  %v123_v27 = vshll.u32 %v64_v18, 16  ;;  %v6043_v28 = vld [vmem:[%s8104_s1 + $0x40] sm:$0xff]   ;;  %v98_v30 = vor.u32 %v97_v19, %v94_v17  ;;  %v68_v46 = vld [vmem:[%s8103_s0 + $0x28] sm:$0xf]  ;;  %v6047_v0 = vld [vmem:[%s8104_s1 + $0x50] sm:$0xff]  }
   0x8   :  { %v108_v31 = vrot.slane %v106_v22, 4  ;;  %v111_v32 = vrot.slane %v109_v23, 5  ;;  %v129_v33 = vshll.u32 %v65_v21, 16  ;;  %v6044_v34 = vld [vmem:[%s8104_s1] sm:$0xff]   ;;  %v117_v36 = vrot.slane %v115_v25, 5  ;;  %5705 = vmatprep.subr.bf16.mxu0 %v6043_v28  ;;  %v6045_v54 = vld [vmem:[%s8104_s1 + $0x48] sm:$0xff]  }
   0x9   :  { %v85_v35 = vrot.slane %v84_v24, 4  ;;  %v122_v37 = vrot.slane %v120_v26, 4  ;;  %v125_v38 = vrot.slane %v123_v27, 5  ;;  %v99_v39 = vrot.slane %v98_v30, 4  ;;  %v66_v42 = vld [vmem:[%s8103_s0 + $0x20] sm:$0xf]  ;;  %5706 = vmatpush3.bf16.msra.mxu0 %v6044_v34 }
   0xa   :  { %v112_v40 = vor.u32 %v111_v32, %v108_v31  ;;  %v131_v41 = vrot.slane %v129_v33, 5  ;;  %v67_v43 = vld [vmem:[%s8103_s0 + $0x24] sm:$0x1]  ;;  %v69_v47 = vld [vmem:[%s8103_s0 + $0x2c] sm:$0x1]  ;;  %v134_v48 = vshrl.u32 %v66_v42, 16  ;;  %5707 = vmatprep.subr.bf16.mxu0 %v6045_v54 }
   0xb   :  { %v90_v44 = vsel %vm6225_vm2, %v85_v35, %v89_v16  ;;  %v126_v45 = vor.u32 %v125_v38, %v122_v37  ;;  %v137_v49 = vshll.u32 %v66_v42, 16  ;;  %v104_v50 = vsel %vm6225_vm2, %v99_v39, %v103_v20  ;;  %v6046_v59 = vld [vmem:[%s8104_s1 + $0x8] sm:$0xff]   ;;  %v70_v5 = vld [vmem:[%s8103_s0 + $0x30] sm:$0xf]  ;;  %v71_v6 = vld [vmem:[%s8103_s0 + $0x34] sm:$0x1] }
   0xc   :  { %v113_v51 = vrot.slane %v112_v40, 4  ;;  %v143_v52 = vshll.u32 %v67_v43, 16  ;;  %v148_v53 = vshrl.u32 %v68_v46, 16  ;;  %v5147_v55 = vcombine.low %v90_v44, %v104_v50  ;;  %v6037_v61 = vld [vmem:[%s8103_s0 + $0x28] ss:$8 sps:$4 sm:$0xff]   ;;  %v6049_v25 = vld [vmem:[%s8104_s1 + $0x58] sm:$0xff]  }
   0xd   :  { %v127_v56 = vrot.slane %v126_v45, 4  ;;  %v136_v57 = vrot.slane %v134_v48, 4  ;;  %v139_v58 = vrot.slane %v137_v49, 5  ;;  %v151_v63 = vshll.u32 %v68_v46, 16  ;;  %5708 = vmatpush3.bf16.msra.mxu0 %v6046_v59  ;;  %v72_v9 = vld [vmem:[%s8103_s0 + $0x38] sm:$0xf] }
   0xe   :  { %v118_v60 = vsel %vm6225_vm2, %v113_v51, %v117_v36  ;;  %v150_v62 = vrot.slane %v148_v53, 4  ;;  %201 = vrot.lane.b32.xlu0 %v5147_v55, %s6156_s22  ;;  %v145_v3 = vrot.slane %v143_v52, 5  ;;  %v157_v4 = vshll.u32 %v69_v47, 16  ;;  %v73_v10 = vld [vmem:[%s8103_s0 + $0x3c] sm:$0x1]  ;;  %5709 = vmatprep.subr.bf16.mxu0 %v6047_v0  ;;  %v6048_v20 = vld [vmem:[%s8104_s1 + $0x10] sm:$0xff]  }
   0xf   :  { %v132_v1 = vsel %vm6225_vm2, %v127_v56, %v131_v41  ;;  %v140_v2 = vor.u32 %v139_v58, %v136_v57  ;;  %v153_v8 = vrot.slane %v151_v63, 5  ;;  %v162_v11 = vshrl.u32 %v70_v5, 16  ;;  %v6038_v21 = vld [vmem:[%s8103_s0 + $0x38] ss:$8 sps:$4 sm:$0xff]   ;;  %v5295_v31 = vld [vmem:[%s8103_s0 + $0x50] sm:$0xf] }
  0x10   :  { %v5148_v7 = vcombine.low %v118_v60, %v132_v1  ;;  %v159_v13 = vrot.slane %v157_v4, 5  ;;  %v165_v14 = vshll.u32 %v70_v5, 16  ;;  %v171_v15 = vshll.u32 %v71_v6, 16  ;;  %v6050_v32 = vld [vmem:[%s8104_s1 + $0x18] sm:$0xff]   ;;  %v5296_v36 = vld [vmem:[%s8103_s0 + $0x54] sm:$0x1] }
  0x11   :  { %v141_v12 = vrot.slane %v140_v2, 4  ;;  %v154_v16 = vor.u32 %v153_v8, %v150_v62  ;;  %v164_v17 = vrot.slane %v162_v11, 4  ;;  %v176_v18 = vshrl.u32 %v72_v9, 16  ;;  %5710 = vmatpush3.bf16.msra.mxu0 %v6048_v20  ;;  %v6039_v35 = vld [vmem:[%s8103_s0 + $0x58] ss:$8 sps:$4 sm:$0xff]  }
  0x12   :  { %203 = vrot.lane.b32.xlu1 %v5148_v7, %s6156_s22  ;;  %v179_v19 = vshll.u32 %v72_v9, 16  ;;  %338 = vrot.lane.b32.xlu0 %v6037_v61, %s6156_s22  ;;  %v167_v22 = vrot.slane %v165_v14, 5  ;;  %v173_v23 = vrot.slane %v171_v15, 5  ;;  %v185_v24 = vshll.u32 %v73_v10, 16  ;;  %v5297_v37 = vld [vmem:[%s8103_s0 + $0x58] sm:$0xf] }
  0x13   :  { %v146_v26 = vsel %vm6225_vm2, %v141_v12, %v145_v3  ;;  %v155_v27 = vrot.slane %v154_v16, 4  ;;  %v178_v28 = vrot.slane %v176_v18, 4  ;;  %v921_v38 = vshrl.u32 %v5295_v31, 16  ;;  %5711 = vmatprep.subr.bf16.mxu0 %v6049_v25  ;;  %v5298_v41 = vld [vmem:[%s8103_s0 + $0x5c] sm:$0x1]  ;;  %v6051_v48 = vld [vmem:[%s8104_s1 + $0x60] sm:$0xff]  }
  0x14   :  { %v181_v30 = vrot.slane %v179_v19, 5  ;;  %v168_v33 = vor.u32 %v167_v22, %v164_v17  ;;  %v187_v34 = vrot.slane %v185_v24, 5  ;;  %v924_v42 = vshll.u32 %v5295_v31, 16  ;;  %v6040_v56 = vld [vmem:[%s8103_s0 + $0x68] ss:$8 sps:$4 sm:$0xff]   ;;  %v6052_v5 = vld [vmem:[%s8104_s1 + $0x20] sm:$0xff]  }
  0x15   :  { %v160_v39 = vsel %vm6225_vm2, %v155_v27, %v159_v13  ;;  %v930_v43 = vshll.u32 %v5296_v36, 16  ;;  %v923_v46 = vrot.slane %v921_v38, 4  ;;  %v935_v47 = vshrl.u32 %v5297_v37, 16  ;;  %5712 = vmatpush3.bf16.msra.mxu0 %v6050_v32  ;;  %v5299_v57 = vld [vmem:[%s8103_s0 + $0x60] sm:$0xf]  ;;  %v6053_v10 = vld [vmem:[%s8104_s1 + $0x68] sm:$0xff]  }
  0x16   :  { %v182_v40 = vor.u32 %v181_v30, %v178_v28  ;;  %v5149_v44 = vcombine.low %v146_v26, %v160_v39  ;;  %340 = vrot.lane.b32.xlu0 %v6038_v21, %s6156_s22  ;;  %v169_v45 = vrot.slane %v168_v33, 4  ;;  %v926_v50 = vrot.slane %v924_v42, 5  ;;  %v5300_v58 = vld [vmem:[%s8103_s0 + $0x64] sm:$0x1]  ;;  %5713 = vmatprep.subr.bf16.mxu0 %v6051_v48  ;;  %v5301_v62 = vld [vmem:[%s8103_s0 + $0x68] sm:$0xf] }
  0x17   :  { %v932_v51 = vrot.slane %v930_v43, 5  ;;  %v938_v52 = vshll.u32 %v5297_v37, 16  ;;  %v937_v54 = vrot.slane %v935_v47, 4  ;;  %v944_v55 = vshll.u32 %v5298_v41, 16  ;;  %v5302_v63 = vld [vmem:[%s8103_s0 + $0x6c] sm:$0x1] }
  0x18   :  { %v183_v49 = vrot.slane %v182_v40, 4  ;;  %205 = vrot.lane.b32.xlu1 %v5149_v44, %s6156_s22  ;;  %v174_v53 = vsel %vm6225_vm2, %v169_v45, %v173_v23  ;;  %v927_v60 = vor.u32 %v926_v50, %v923_v46  ;;  %v949_v0 = vshrl.u32 %v5299_v57, 16  ;;  %v6041_v15 = vld [vmem:[%s8103_s0 + $0x78] ss:$8 sps:$4 sm:$0xff]   ;;  %v5303_v19 = vld [vmem:[%s8103_s0 + $0x70] sm:$0xf] }
  0x19   :  { %v940_v61 = vrot.slane %v938_v52, 5  ;;  %v946_v2 = vrot.slane %v944_v55, 5  ;;  %v952_v3 = vshll.u32 %v5299_v57, 16  ;;  %v958_v4 = vshll.u32 %v5300_v58, 16  ;;  %5714 = vmatpush3.bf16.msra.mxu0 %v6052_v5  ;;  %v5304_v20 = vld [vmem:[%s8103_s0 + $0x74] sm:$0x1] }
  0x1a   :  { %v188_v59 = vsel %vm6225_vm2, %v183_v49, %v187_v34  ;;  %1173 = vrot.lane.b32.xlu0 %v6039_v35, %s6156_s22  ;;  %v928_v6 = vrot.slane %v927_v60, 4  ;;  %v951_v8 = vrot.slane %v949_v0, 4  ;;  %v963_v9 = vshrl.u32 %v5301_v62, 16  ;;  %5715 = vmatprep.subr.bf16.mxu0 %v6053_v10  ;;  %v5305_v24 = vld [vmem:[%s8103_s0 + $0x78] sm:$0xf]  ;;  %v6054_v31 = vld [vmem:[%s8104_s1 + $0x28] sm:$0xff]  }
  0x1b   :  { %v5150_v1 = vcombine.low %v174_v53, %v188_v59  ;;  %v941_v7 = vor.u32 %v940_v61, %v937_v54  ;;  %v954_v11 = vrot.slane %v952_v3, 5  ;;  %v960_v12 = vrot.slane %v958_v4, 5  ;;  %v5306_v25 = vld [vmem:[%s8103_s0 + $0x7c] sm:$0x1]  ;;  %v6042_v36 = vld [vmem:[%s8103_s0 + $0x88] ss:$8 sps:$4 sm:$0xff]  }
  0x1c   :  { %v966_v13 = vshll.u32 %v5301_v62, 16  ;;  %v972_v14 = vshll.u32 %v5302_v63, 16  ;;  %v933_v16 = vsel %vm6225_vm2, %v928_v6, %v932_v51  ;;  %v965_v18 = vrot.slane %v963_v9, 4  ;;  %v5307_v41 = vld [vmem:[%s8103_s0 + $0x80] sm:$0xf]  ;;  %v6055_v47 = vld [vmem:[%s8104_s1 + $0x70] sm:$0xff]  }
  0x1d   :  { %207 = vrot.lane.b32.xlu1 %v5150_v1, %s6156_s22  ;;  %v942_v17 = vrot.slane %v941_v7, 4  ;;  %v955_v21 = vor.u32 %v954_v11, %v951_v8  ;;  %v977_v27 = vshrl.u32 %v5303_v19, 16  ;;  %v980_v28 = vshll.u32 %v5303_v19, 16  ;;  %5716 = vmatpush3.bf16.msra.mxu0 %v6054_v31  ;;  %v5308_v46 = vld [vmem:[%s8103_s0 + $0x84] sm:$0x1]  ;;  %v6057_v58 = vld [vmem:[%s8104_s1 + $0x30] sm:$0xff]  }
  0x1e   :  { %1175 = vrot.lane.b32.xlu0 %v6040_v56, %s6156_s22  ;;  %v968_v22 = vrot.slane %v966_v13, 5  ;;  %v974_v23 = vrot.slane %v972_v14, 5  ;;  %v986_v30 = vshll.u32 %v5304_v20, 16  ;;  %v991_v35 = vshrl.u32 %v5305_v24, 16  ;;  %v5309_v50 = vld [vmem:[%s8103_s0 + $0x88] sm:$0xf]  ;;  %5717 = vmatprep.subr.bf16.mxu0 %v6055_v47 }
  0x1f   :  { %v947_v26 = vsel %vm6225_vm2, %v942_v17, %v946_v2  ;;  %v956_v33 = vrot.slane %v955_v21, 4  ;;  %v979_v37 = vrot.slane %v977_v27, 4  ;;  %v982_v38 = vrot.slane %v980_v28, 5  ;;  %v5310_v51 = vld [vmem:[%s8103_s0 + $0x8c] sm:$0x1]  ;;  %v6059_v9 = vld [vmem:[%s8104_s1 + $0x78] sm:$0xff]  }
  0x20   :  { %v5311_v32 = vcombine.low %v933_v16, %v947_v26  ;;  %v969_v34 = vor.u32 %v968_v22, %v965_v18  ;;  %v988_v39 = vrot.slane %v986_v30, 5  ;;  %v994_v40 = vshll.u32 %v5305_v24, 16  ;;  %v5235_v57 = vld [vmem:[%s8103_s0 + $0x10] sm:$0xf]  ;;  %v5236_v3 = vld [vmem:[%s8103_s0 + $0x14] sm:$0x1] }
  0x21   :  { %v961_v42 = vsel %vm6225_vm2, %v956_v33, %v960_v12  ;;  %v993_v44 = vrot.slane %v991_v35, 4  ;;  %v1000_v45 = vshll.u32 %v5306_v25, 16  ;;  %v983_v48 = vor.u32 %v982_v38, %v979_v37  ;;  %5718 = vmatpush3.bf16.msra.mxu0 %v6057_v58  ;;  %v5237_v7 = vld [vmem:[%s8103_s0 + $0x18] sm:$0xf]  ;;  %v5238_v13 = vld [vmem:[%s8103_s0 + $0x1c] sm:$0x1] }
  0x22   :  { %1044 = vrot.lane.b32.xlu1 %v5311_v32, %s6156_s22  ;;  %v970_v43 = vrot.slane %v969_v34, 4  ;;  %1177 = vrot.lane.b32.xlu0 %v6041_v15, %s6156_s22  ;;  %v996_v49 = vrot.slane %v994_v40, 5  ;;  %v1005_v52 = vshrl.u32 %v5307_v41, 16  ;;  %v1008_v55 = vshll.u32 %v5307_v41, 16  ;;  %v6060_v15 = vld [vmem:[%s8104_s1 + $0x38] sm:$0xff]   ;;  %v6062_v21 = vld [vmem:[%s8104_s1 + $0xc0] sm:$0xff]  }
  0x23   :  { %v1002_v54 = vrot.slane %v1000_v45, 5  ;;  %v1014_v56 = vshll.u32 %v5308_v46, 16  ;;  %v984_v60 = vrot.slane %v983_v48, 4  ;;  %v1019_v1 = vshrl.u32 %v5309_v50, 16  ;;  %v5195_v20 = vld [vmem:[%s8103_s0 + $0x8] sm:$0xe]  ;;  %5719 = vmatprep.subr.bf16.mxu0 %v6059_v9  ;;  %5769 = vmatprep.subr.bf16.mxu1 %v6062_v21 }
  0x24   :  { %v975_v53 = vsel %vm6225_vm2, %v970_v43, %v974_v23  ;;  %v997_v61 = vor.u32 %v996_v49, %v993_v44  ;;  %v1007_v62 = vrot.slane %v1005_v52, 4  ;;  %v1010_v63 = vrot.slane %v1008_v55, 5  ;;  %v5196_v26 = vld [vmem:[%s8103_s0 + $0xc] sm:$0x1]  ;;  %v5197_v27 = vld [vmem:[%s8103_s0 + $0x10] sm:$0xe] }
  0x25   :  { %v5312_v59 = vcombine.low %v961_v42, %v975_v53  ;;  %v1016_v0 = vrot.slane %v1014_v56, 5  ;;  %v1022_v2 = vshll.u32 %v5309_v50, 16  ;;  %v989_v4 = vsel %vm6225_vm2, %v984_v60, %v988_v39  ;;  %5720 = vmatpush3.bf16.msra.mxu0 %v6060_v15  ;;  %v5198_v33 = vld [vmem:[%s8103_s0 + $0x14] sm:$0x1]  ;;  %v5239_v39 = vld [vmem:[%s8103_s0 + $0x20] sm:$0xf] }
  0x26   :  { %1179 = vrot.lane.b32.xlu0 %v6042_v36, %s6156_s22  ;;  %v998_v5 = vrot.slane %v997_v61, 4  ;;  %v1028_v6 = vshll.u32 %v5310_v51, 16  ;;  %v644_v8 = vshrl.u32 %v5235_v57, 16  ;;  %v1011_v10 = vor.u32 %v1010_v63, %v1007_v62  ;;  %v5240_v44 = vld [vmem:[%s8103_s0 + $0x24] sm:$0x1] }
  0x27   :  { %1046 = vrot.lane.b32.xlu1 %v5312_v59, %s6156_s22  ;;  %v1021_v11 = vrot.slane %v1019_v1, 4  ;;  %v1024_v12 = vrot.slane %v1022_v2, 5  ;;  %v647_v14 = vshll.u32 %v5235_v57, 16  ;;  %v653_v19 = vshll.u32 %v5236_v3, 16  ;;  %v5241_v49 = vld [vmem:[%s8103_s0 + $0x28] sm:$0xf] }
  0x28   :  { %v1003_v16 = vsel %vm6225_vm2, %v998_v5, %v1002_v54  ;;  %v1030_v17 = vrot.slane %v1028_v6, 5  ;;  %v646_v18 = vrot.slane %v644_v8, 4  ;;  %v1012_v23 = vrot.slane %v1011_v10, 4  ;;  %v6063_v50 = vld [vmem:[%s8104_s1 + $0x80] sm:$0xff]   ;;  %v5242_v54 = vld [vmem:[%s8103_s0 + $0x2c] sm:$0x1] }
  0x29   :  { %v5313_v22 = vcombine.low %v989_v4, %v1003_v16  ;;  %v1025_v24 = vor.u32 %v1024_v12, %v1021_v11  ;;  %v649_v25 = vrot.slane %v647_v14, 5  ;;  %v655_v28 = vrot.slane %v653_v19, 5  ;;  %v5199_v56 = vld [vmem:[%s8103_s0 + $0x18] sm:$0xe]  ;;  %v6465_v57 = vld [vmem:[%s8104_s1 + $0x100] sm:$0xff]   ;;  %5770 = vmatpush3.bf16.msra.mxu1 %v6063_v50  ;;  %v6066_v5 = vld [vmem:[%s8104_s1 + $0xc8] sm:$0xff]  }
  0x2a   :  { %v658_v30 = vshrl.u32 %v5237_v7, 16  ;;  %v661_v31 = vshll.u32 %v5237_v7, 16  ;;  %v667_v32 = vshll.u32 %v5238_v13, 16  ;;  %v1017_v34 = vsel %vm6225_vm2, %v1012_v23, %v1016_v0  ;;  %v5200_v62 = vld [vmem:[%s8103_s0 + $0x1c] sm:$0x1]  ;;  %5985 = vmatprep.subr.bf16.mxu0 %v6465_v57  ;;  %5771 = vmatprep.subr.bf16.mxu1 %v6066_v5  ;;  %v6067_v16 = vld [vmem:[%s8104_s1 + $0x88] sm:$0xff]  }
  0x2b   :  { %1048 = vrot.lane.b32.xlu1 %v5313_v22, %s6156_s22  ;;  %v1026_v35 = vrot.slane %v1025_v24, 4  ;;  %v650_v36 = vor.u32 %v649_v25, %v646_v18  ;;  %v5211_v38 = vrot.slane %v5195_v20, 9  ;;  %v532_v43 = vrot.slane %v5196_v26, 5  ;;  %v5201_v63 = vld [vmem:[%s8103_s0 + $0x20] sm:$0xe]  ;;  %v6073_v5 = vld [vmem:[%s8104_s1 + $0x98] sm:$0xff]  }
  0x2c   :  { %v660_v40 = vrot.slane %v658_v30, 4  ;;  %v663_v41 = vrot.slane %v661_v31, 5  ;;  %v669_v42 = vrot.slane %v667_v32, 5  ;;  %v5212_v47 = vrot.slane %v5197_v27, 9  ;;  %v5202_v4 = vld [vmem:[%s8103_s0 + $0x24] sm:$0x1] }
  0x2d   :  { %v1031_v45 = vsel %vm6225_vm2, %v1026_v35, %v1030_v17  ;;  %v651_v46 = vrot.slane %v650_v36, 4  ;;  %v536_v48 = vrot.slane %v5198_v33, 5  ;;  %v533_v53 = vsel %vm6436_vm5, %v5211_v38, %v532_v43  ;;  %v5243_v10 = vld [vmem:[%s8103_s0 + $0x30] sm:$0xf]  ;;  %v5244_v15 = vld [vmem:[%s8103_s0 + $0x34] sm:$0x1]  ;;  %5772 = vmatpush3.bf16.msra.mxu1 %v6067_v16 }
  0x2e   :  { %v5314_v51 = vcombine.low %v1017_v34, %v1031_v45  ;;  %v664_v52 = vor.u32 %v663_v41, %v660_v40  ;;  %v672_v55 = vshrl.u32 %v5239_v39, 16  ;;  %v675_v60 = vshll.u32 %v5239_v39, 16  ;;  %v5245_v21 = vld [vmem:[%s8103_s0 + $0x38] sm:$0xf]  ;;  %v5246_v25 = vld [vmem:[%s8103_s0 + $0x3c] sm:$0x1] }
  0x2f   :  { %v656_v58 = vsel %vm6225_vm2, %v651_v46, %v655_v28  ;;  %v537_v59 = vsel %vm6436_vm5, %v5212_v47, %v536_v48  ;;  %v681_v61 = vshll.u32 %v5240_v44, 16  ;;  %v686_v3 = vshrl.u32 %v5241_v49, 16  ;;  %v6069_v27 = vld [vmem:[%s8104_s1 + $0xd0] sm:$0xff]   ;;  %v5203_v33 = vld [vmem:[%s8103_s0 + $0x28] sm:$0xe]  ;;  %v6072_v41 = vld [vmem:[%s8104_s1 + $0xd8] sm:$0xff]  }
  0x30   :  { %1050 = vrot.lane.b32.xlu1 %v5314_v51, %s6156_s22  ;;  %v665_v0 = vrot.slane %v664_v52, 4  ;;  %v5219_v1 = vcombine.low %v533_v53, %v537_v59  ;;  %v674_v2 = vrot.slane %v672_v55, 4  ;;  %v677_v6 = vrot.slane %v675_v60, 5  ;;  %v6070_v34 = vld [vmem:[%s8104_s1 + $0x90] sm:$0xff]   ;;  %v5204_v40 = vld [vmem:[%s8103_s0 + $0x2c] sm:$0x1]  ;;  %5773 = vmatprep.subr.bf16.mxu1 %v6069_v27 }
  0x31   :  { %v683_v7 = vrot.slane %v681_v61, 5  ;;  %v689_v8 = vshll.u32 %v5241_v49, 16  ;;  %v695_v9 = vshll.u32 %v5242_v54, 16  ;;  %v688_v12 = vrot.slane %v686_v3, 4  ;;  %v5205_v46 = vld [vmem:[%s8103_s0 + $0x30] sm:$0xe]  ;;  %5774 = vmatpush3.bf16.msra.mxu1 %v6070_v34 }
  0x32   :  { %v670_v11 = vsel %vm6225_vm2, %v665_v0, %v669_v42  ;;  %v5213_v13 = vrot.slane %v5199_v56, 9  ;;  %v540_v14 = vrot.slane %v5200_v62, 5  ;;  %v678_v18 = vor.u32 %v677_v6, %v674_v2  ;;  %v5206_v47 = vld [vmem:[%s8103_s0 + $0x34] sm:$0x1]  ;;  %v5247_v52 = vld [vmem:[%s8103_s0 + $0x40] sm:$0xf]  ;;  %5775 = vmatprep.subr.bf16.mxu1 %v6072_v41 }
  0x33   :  { %v5251_v17 = vcombine.low %v656_v58, %v670_v11  ;;  %v691_v19 = vrot.slane %v689_v8, 5  ;;  %v697_v20 = vrot.slane %v695_v9, 5  ;;  %v5214_v23 = vrot.slane %v5201_v63, 9  ;;  %v5248_v58 = vld [vmem:[%s8103_s0 + $0x44] sm:$0x1] }
  0x34   :  { %574 = vrot.lane.b32.xlu1 %v5219_v1, %s6156_s22  ;;  %v541_v22 = vsel %vm6436_vm5, %v5213_v13, %v540_v14  ;;  %v544_v24 = vrot.slane %v5202_v4, 5  ;;  %v700_v26 = vshrl.u32 %v5243_v10, 16  ;;  %v679_v28 = vrot.slane %v678_v18, 4  ;;  %v5249_v59 = vld [vmem:[%s8103_s0 + $0x48] sm:$0xf] }
  0x35   :  { %767 = vrot.lane.b32.xlu0 %v5251_v17, %s6156_s22  ;;  %v692_v30 = vor.u32 %v691_v19, %v688_v12  ;;  %v703_v31 = vshll.u32 %v5243_v10, 16  ;;  %v709_v32 = vshll.u32 %v5244_v15, 16  ;;  %v714_v38 = vshrl.u32 %v5245_v21, 16  ;;  %v5250_v3 = vld [vmem:[%s8103_s0 + $0x4c] sm:$0x1]  ;;  %5776 = vmatpush3.bf16.msra.mxu1 %v6073_v5 }
  0x36   :  { %v545_v35 = vsel %vm6436_vm5, %v5214_v23, %v544_v24  ;;  %v702_v36 = vrot.slane %v700_v26, 4  ;;  %v717_v39 = vshll.u32 %v5245_v21, 16  ;;  %v684_v42 = vsel %vm6225_vm2, %v679_v28, %v683_v7  ;;  %v5207_v10 = vld [vmem:[%s8103_s0 + $0x38] sm:$0xe]  ;;  %v5208_v15 = vld [vmem:[%s8103_s0 + $0x3c] sm:$0x1] }
  0x37   :  { %v693_v43 = vrot.slane %v692_v30, 4  ;;  %v5220_v44 = vcombine.low %v541_v22, %v545_v35  ;;  %v705_v45 = vrot.slane %v703_v31, 5  ;;  %v711_v48 = vrot.slane %v709_v32, 5  ;;  %v5209_v16 = vld [vmem:[%s8103_s0 + $0x40] sm:$0xe] }
  0x38   :  { %v716_v49 = vrot.slane %v714_v38, 4  ;;  %v719_v50 = vrot.slane %v717_v39, 5  ;;  %v723_v51 = vshll.u32 %v5246_v25, 16  ;;  %v5215_v55 = vrot.slane %v5203_v33, 9  ;;  %v5210_v21 = vld [vmem:[%s8103_s0 + $0x44] sm:$0x1] }
  0x39   :  { %v698_v53 = vsel %vm6225_vm2, %v693_v43, %v697_v20  ;;  %576 = vrot.lane.b32.xlu1 %v5220_v44, %s6156_s22  ;;  %v706_v54 = vor.u32 %v705_v45, %v702_v36  ;;  %v548_v56 = vrot.slane %v5204_v40, 5  ;;  %v5216_v63 = vrot.slane %v5205_v46, 9  ;;  %v5415_v22 = vld [vmem:[%s8103_s0 + $0x60] sm:$0xf]  ;;  %v5416_v27 = vld [vmem:[%s8103_s0 + $0x64] sm:$0x1] }
  0x3a   :  { %v5252_v60 = vcombine.low %v684_v42, %v698_v53  ;;  %v720_v61 = vor.u32 %v719_v50, %v716_v49  ;;  %v725_v62 = vrot.slane %v723_v51, 5  ;;  %v552_v2 = vrot.slane %v5206_v47, 5  ;;  %v6075_v28 = vld [vmem:[%s8104_s1 + $0xe0] sm:$0xff]   ;;  %v5417_v34 = vld [vmem:[%s8103_s0 + $0x68] sm:$0xf] }
  0x3b   :  { %v707_v0 = vrot.slane %v706_v54, 4  ;;  %v549_v1 = vsel %vm6436_vm5, %v5215_v55, %v548_v56  ;;  %v728_v4 = vshrl.u32 %v5247_v52, 16  ;;  %v731_v7 = vshll.u32 %v5247_v52, 16  ;;  %v6076_v35 = vld [vmem:[%s8104_s1 + $0xa0] sm:$0xff]   ;;  %v5418_v40 = vld [vmem:[%s8103_s0 + $0x6c] sm:$0x1]  ;;  %5777 = vmatprep.subr.bf16.mxu1 %v6075_v28 }
  0x3c   :  { %769 = vrot.lane.b32.xlu0 %v5252_v60, %s6156_s22  ;;  %v721_v6 = vrot.slane %v720_v61, 4  ;;  %v737_v8 = vshll.u32 %v5248_v58, 16  ;;  %v742_v9 = vshrl.u32 %v5249_v59, 16  ;;  %v553_v12 = vsel %vm6436_vm5, %v5216_v63, %v552_v2  ;;  %v5375_v46 = vld [vmem:[%s8103_s0 + $0x58] sm:$0xe]  ;;  %5778 = vmatpush3.bf16.msra.mxu1 %v6076_v35  ;;  %v6079_v47 = vld [vmem:[%s8104_s1 + $0xe8] sm:$0xff]  }
  0x3d   :  { %v712_v11 = vsel %vm6225_vm2, %v707_v0, %v711_v48  ;;  %v730_v13 = vrot.slane %v728_v4, 4  ;;  %v745_v14 = vshll.u32 %v5249_v59, 16  ;;  %v5221_v18 = vcombine.low %v549_v1, %v553_v12  ;;  %v5376_v52 = vld [vmem:[%s8103_s0 + $0x5c] sm:$0x1]  ;;  %v6080_v53 = vld [vmem:[%s8104_s1 + $0xa8] sm:$0xff]   ;;  %5779 = vmatprep.subr.bf16.mxu1 %v6079_v47  ;;  %v6082_v2 = vld [vmem:[%s8104_s1 + $0xf0] sm:$0xff]  }
  0x3e   :  { %v726_v17 = vsel %vm6225_vm2, %v721_v6, %v725_v62  ;;  %v733_v19 = vrot.slane %v731_v7, 5  ;;  %v739_v20 = vrot.slane %v737_v8, 5  ;;  %v744_v24 = vrot.slane %v742_v9, 4  ;;  %v5377_v59 = vld [vmem:[%s8103_s0 + $0x60] sm:$0xe] }
  0x3f   :  { %v5253_v23 = vcombine.low %v712_v11, %v726_v17  ;;  %v747_v25 = vrot.slane %v745_v14, 5  ;;  %v751_v26 = vshll.u32 %v5250_v3, 16  ;;  %578 = vrot.lane.b32.xlu1 %v5221_v18, %s6156_s22  ;;  %v5217_v31 = vrot.slane %v5207_v10, 9  ;;  %v5378_v60 = vld [vmem:[%s8103_s0 + $0x64] sm:$0x1]  ;;  %v6083_v18 = vld [vmem:[%s8104_s1 + $0xb0] sm:$0xff]  }
  0x40   :  { %v734_v30 = vor.u32 %v733_v19, %v730_v13  ;;  %v556_v32 = vrot.slane %v5208_v15, 5  ;;  %v5218_v33 = vrot.slane %v5209_v16, 9  ;;  %v560_v39 = vrot.slane %v5210_v21, 5  ;;  %v5419_v1 = vld [vmem:[%s8103_s0 + $0x70] sm:$0xf]  ;;  %5780 = vmatpush3.bf16.msra.mxu1 %v6080_v53 }
  0x41   :  { %771 = vrot.lane.b32.xlu0 %v5253_v23, %s6156_s22  ;;  %v748_v36 = vor.u32 %v747_v25, %v744_v24  ;;  %v753_v38 = vrot.slane %v751_v26, 5  ;;  %v1483_v41 = vshrl.u32 %v5415_v22, 16  ;;  %v1486_v44 = vshll.u32 %v5415_v22, 16  ;;  %v5420_v7 = vld [vmem:[%s8103_s0 + $0x74] sm:$0x1]  ;;  %5781 = vmatprep.subr.bf16.mxu1 %v6082_v2 }
  0x42   :  { %v735_v42 = vrot.slane %v734_v30, 4  ;;  %v557_v43 = vsel %vm6436_vm5, %v5217_v31, %v556_v32  ;;  %v1492_v45 = vshll.u32 %v5416_v27, 16  ;;  %v561_v49 = vsel %vm6436_vm5, %v5218_v33, %v560_v39  ;;  %v5421_v8 = vld [vmem:[%s8103_s0 + $0x78] sm:$0xf]  ;;  %v5422_v15 = vld [vmem:[%s8103_s0 + $0x7c] sm:$0x1] }
  0x43   :  { %v749_v48 = vrot.slane %v748_v36, 4  ;;  %v1485_v50 = vrot.slane %v1483_v41, 4  ;;  %v1497_v51 = vshrl.u32 %v5417_v34, 16  ;;  %v5222_v55 = vcombine.low %v557_v43, %v561_v49  ;;  %v5379_v23 = vld [vmem:[%s8103_s0 + $0x68] sm:$0xe]  ;;  %v6084_v43 = vld [vmem:[%s8104_s1 + $0xf8] sm:$0xff]  }
  0x44   :  { %v740_v54 = vsel %vm6225_vm2, %v735_v42, %v739_v20  ;;  %v1488_v56 = vrot.slane %v1486_v44, 5  ;;  %v1494_v58 = vrot.slane %v1492_v45, 5  ;;  %v1500_v63 = vshll.u32 %v5417_v34, 16  ;;  %v5380_v24 = vld [vmem:[%s8103_s0 + $0x6c] sm:$0x1]  ;;  %5782 = vmatpush3.bf16.msra.mxu1 %v6083_v18  ;;  %v6085_v49 = vld [vmem:[%s8104_s1 + $0xb8] sm:$0xff]  }
  0x45   :  { %v754_v61 = vsel %vm6225_vm2, %v749_v48, %v753_v38  ;;  %v1499_v62 = vrot.slane %v1497_v51, 4  ;;  %v1506_v0 = vshll.u32 %v5418_v40, 16  ;;  %580 = vrot.lane.b32.xlu1 %v5222_v55, %s6156_s22  ;;  %v5391_v5 = vrot.slane %v5375_v46, 9  ;;  %v5381_v30 = vld [vmem:[%s8103_s0 + $0x70] sm:$0xe]  ;;  %5783 = vmatprep.subr.bf16.mxu1 %v6084_v43 }
  0x46   :  { %v5254_v3 = vcombine.low %v740_v54, %v754_v61  ;;  %v1489_v4 = vor.u32 %v1488_v56, %v1485_v50  ;;  %v1371_v6 = vrot.slane %v5376_v52, 5  ;;  %v1502_v9 = vrot.slane %v1500_v63, 5  ;;  %v5382_v31 = vld [vmem:[%s8103_s0 + $0x74] sm:$0x1]  ;;  %v5423_v36 = vld [vmem:[%s8103_s0 + $0x80] sm:$0xf] }
  0x47   :  { %v1508_v10 = vrot.slane %v1506_v0, 5  ;;  %v5392_v11 = vrot.slane %v5377_v59, 9  ;;  %v1375_v12 = vrot.slane %v5378_v60, 5  ;;  %v1511_v16 = vshrl.u32 %v5419_v1, 16  ;;  %v5424_v42 = vld [vmem:[%s8103_s0 + $0x84] sm:$0x1] }
  0x48   :  { %773 = vrot.lane.b32.xlu0 %v5254_v3, %s6156_s22  ;;  %v1490_v13 = vrot.slane %v1489_v4, 4  ;;  %v1372_v14 = vsel %vm6436_vm5, %v5391_v5, %v1371_v6  ;;  %v1514_v17 = vshll.u32 %v5419_v1, 16  ;;  %v1503_v19 = vor.u32 %v1502_v9, %v1499_v62  ;;  %v5425_v48 = vld [vmem:[%s8103_s0 + $0x88] sm:$0xf]  ;;  %v5426_v54 = vld [vmem:[%s8103_s0 + $0x8c] sm:$0x1]  ;;  %5784 = vmatpush3.bf16.msra.mxu1 %v6085_v49 }
  0x49   :  { %v1376_v20 = vsel %vm6436_vm5, %v5392_v11, %v1375_v12  ;;  %v1520_v21 = vshll.u32 %v5420_v7, 16  ;;  %v1525_v22 = vshrl.u32 %v5421_v8, 16  ;;  %v1513_v27 = vrot.slane %v1511_v16, 4  ;;  %v5383_v55 = vld [vmem:[%s8103_s0 + $0x78] sm:$0xe] }
  0x4a   :  { %v1495_v25 = vsel %vm6225_vm2, %v1490_v13, %v1494_v58  ;;  %v5399_v26 = vcombine.low %v1372_v14, %v1376_v20  ;;  %v1516_v28 = vrot.slane %v1514_v17, 5  ;;  %v1504_v32 = vrot.slane %v1503_v19, 4  ;;  %v5384_v61 = vld [vmem:[%s8103_s0 + $0x7c] sm:$0x1]  ;;  %v5385_v62 = vld [vmem:[%s8103_s0 + $0x80] sm:$0xe] }
  0x4b   :  { %v1522_v33 = vrot.slane %v1520_v21, 5  ;;  %v1527_v34 = vrot.slane %v1525_v22, 4  ;;  %v1528_v35 = vshll.u32 %v5421_v8, 16  ;;  %v1534_v39 = vshll.u32 %v5422_v15, 16  ;;  %v5386_v3 = vld [vmem:[%s8103_s0 + $0x84] sm:$0x1] }
  0x4c   :  { %1413 = vrot.lane.b32.xlu1 %v5399_v26, %s6156_s22  ;;  %v1517_v38 = vor.u32 %v1516_v28, %v1513_v27  ;;  %v5393_v40 = vrot.slane %v5379_v23, 9  ;;  %v1379_v41 = vrot.slane %v5380_v24, 5  ;;  %v1509_v44 = vsel %vm6225_vm2, %v1504_v32, %v1508_v10  ;;  %v5427_v4 = vld [vmem:[%s8103_s0 + $0x90] sm:$0xf]  ;;  %v5428_v9 = vld [vmem:[%s8103_s0 + $0x94] sm:$0x1] }
  0x4d   :  { %v1530_v45 = vrot.slane %v1528_v35, 5  ;;  %v5394_v46 = vrot.slane %v5381_v30, 9  ;;  %v1383_v47 = vrot.slane %v5382_v31, 5  ;;  %v5431_v50 = vcombine.low %v1495_v25, %v1509_v44  ;;  %v5429_v10 = vld [vmem:[%s8103_s0 + $0x98] sm:$0xf] }
  0x4e   :  { %v1518_v51 = vrot.slane %v1517_v38, 4  ;;  %v1536_v52 = vrot.slane %v1534_v39, 5  ;;  %v1380_v53 = vsel %vm6436_vm5, %v5393_v40, %v1379_v41  ;;  %v1539_v59 = vshrl.u32 %v5423_v36, 16  ;;  %v5430_v23 = vld [vmem:[%s8103_s0 + $0x9c] sm:$0x1] }
  0x4f   :  { %v1531_v56 = vor.u32 %v1530_v45, %v1527_v34  ;;  %v1384_v58 = vsel %vm6436_vm5, %v5394_v46, %v1383_v47  ;;  %v1542_v60 = vshll.u32 %v5423_v36, 16  ;;  %1606 = vrot.lane.b32.xlu0 %v5431_v50, %s6156_s22  ;;  %v1548_v1 = vshll.u32 %v5424_v42, 16  ;;  %v5387_v24 = vld [vmem:[%s8103_s0 + $0x88] sm:$0xe]  ;;  %v5388_v25 = vld [vmem:[%s8103_s0 + $0x8c] sm:$0x1] }
  0x50   :  { %v1523_v63 = vsel %vm6225_vm2, %v1518_v51, %v1522_v33  ;;  %v5400_v0 = vcombine.low %v1380_v53, %v1384_v58  ;;  %v1553_v2 = vshrl.u32 %v5425_v48, 16  ;;  %v1541_v6 = vrot.slane %v1539_v59, 4  ;;  %v5389_v31 = vld [vmem:[%s8103_s0 + $0x90] sm:$0xe]  ;;  %v5390_v36 = vld [vmem:[%s8103_s0 + $0x94] sm:$0x1] }
  0x51   :  { %v1532_v5 = vrot.slane %v1531_v56, 4  ;;  %v1544_v7 = vrot.slane %v1542_v60, 5  ;;  %v1556_v8 = vshll.u32 %v5425_v48, 16  ;;  %v1550_v11 = vrot.slane %v1548_v1, 5  ;;  %v219_v1 = vld [vmem:[%s8103_s0 + $0x4] sm:$0x1] }
  0x52   :  { %1415 = vrot.lane.b32.xlu1 %v5400_v0, %s6156_s22  ;;  %v1555_v12 = vrot.slane %v1553_v2, 4  ;;  %v1562_v13 = vshll.u32 %v5426_v54, 16  ;;  %v5395_v14 = vrot.slane %v5383_v55, 9  ;;  %v1387_v18 = vrot.slane %v5384_v61, 5  ;;  %v218_v0 = vld [vmem:[%s8103_s0] sm:$0xe] }
  0x53   :  { %v1537_v15 = vsel %vm6225_vm2, %v1532_v5, %v1536_v52  ;;  %v1545_v16 = vor.u32 %v1544_v7, %v1541_v6  ;;  %v1558_v17 = vrot.slane %v1556_v8, 5  ;;  %v5396_v21 = vrot.slane %v5385_v62, 9  ;;  %v220_v2 = vld [vmem:[%s8103_s0 + $0x8] sm:$0xe] }
  0x54   :  { %v5432_v19 = vcombine.low %v1523_v63, %v1537_v15  ;;  %v1564_v20 = vrot.slane %v1562_v13, 5  ;;  %v1391_v22 = vrot.slane %v5386_v3, 5  ;;  %v1388_v28 = vsel %vm6436_vm5, %v5395_v14, %v1387_v18  ;;  %v221_v3 = vld [vmem:[%s8103_s0 + $0xc] sm:$0x1]  ;;  %v224_v13 = vld [vmem:[%s8103_s0 + $0x18] sm:$0xe] }
  0x55   :  { %v1546_v26 = vrot.slane %v1545_v16, 4  ;;  %v1559_v27 = vor.u32 %v1558_v17, %v1555_v12  ;;  %v1567_v30 = vshrl.u32 %v5427_v4, 16  ;;  %v1570_v33 = vshll.u32 %v5427_v4, 16  ;;  %v223_v12 = vld [vmem:[%s8103_s0 + $0x14] sm:$0x1] }
  0x56   :  { %1608 = vrot.lane.b32.xlu0 %v5432_v19, %s6156_s22  ;;  %v1392_v32 = vsel %vm6436_vm5, %v5396_v21, %v1391_v22  ;;  %v1576_v34 = vshll.u32 %v5428_v9, 16  ;;  %v1581_v35 = vshrl.u32 %v5429_v10, 16  ;;  %v1584_v45 = vshll.u32 %v5429_v10, 16  ;;  %v222_v10 = vld [vmem:[%s8103_s0 + $0x10] sm:$0xe] }
  0x57   :  { %v1551_v38 = vsel %vm6225_vm2, %v1546_v26, %v1550_v11  ;;  %v1560_v39 = vrot.slane %v1559_v27, 4  ;;  %v5401_v40 = vcombine.low %v1388_v28, %v1392_v32  ;;  %v1569_v41 = vrot.slane %v1567_v30, 4  ;;  %v225_v14 = vld [vmem:[%s8103_s0 + $0x1c] sm:$0x1]  ;;  %v6056_v22 = vld [vmem:[%s8103_s0] ss:$8 sps:$4 sm:$0xff]  }
  0x58   :  { %v1572_v42 = vrot.slane %v1570_v33, 5  ;;  %v1578_v43 = vrot.slane %v1576_v34, 5  ;;  %v1583_v44 = vrot.slane %v1581_v35, 4  ;;  %v1590_v47 = vshll.u32 %v5430_v23, 16  ;;  %v226_v26 = vld [vmem:[%s8103_s0 + $0x20] sm:$0xe] }
  0x59   :  { %v1565_v46 = vsel %vm6225_vm2, %v1560_v39, %v1564_v20  ;;  %1417 = vrot.lane.b32.xlu1 %v5401_v40, %s6156_s22  ;;  %v5397_v48 = vrot.slane %v5387_v24, 9  ;;  %v1395_v49 = vrot.slane %v5388_v25, 5  ;;  %v1586_v52 = vrot.slane %v1584_v45, 5  ;;  %v6058_v25 = vld [vmem:[%s8103_s0 + $0x10] ss:$8 sps:$4 sm:$0xff]  }
  0x5a   :  { %v5433_v50 = vcombine.low %v1551_v38, %v1565_v46  ;;  %v1573_v51 = vor.u32 %v1572_v42, %v1569_v41  ;;  %v5398_v53 = vrot.slane %v5389_v31, 9  ;;  %v1399_v55 = vrot.slane %v5390_v36, 5  ;;  %v227_v27 = vld [vmem:[%s8103_s0 + $0x24] sm:$0x1]  ;;  %v228_v28 = vld [vmem:[%s8103_s0 + $0x28] sm:$0xe] }
  0x5b   :  { %v1396_v54 = vsel %vm6436_vm5, %v5397_v48, %v1395_v49  ;;  %v1587_v58 = vor.u32 %v1586_v52, %v1583_v44  ;;  %v1592_v59 = vrot.slane %v1590_v47, 5  ;;  %v5151_v5 = vrot.slane %v218_v0, 9  ;;  %v229_v30 = vld [vmem:[%s8103_s0 + $0x2c] sm:$0x1]  ;;  %v6061_v36 = vld [vmem:[%s8103_s0 + $0x20] ss:$8 sps:$4 sm:$0xff]  }
  0x5c   :  { %1610 = vrot.lane.b32.xlu0 %v5433_v50, %s6156_s22  ;;  %v1574_v56 = vrot.slane %v1573_v51, 4  ;;  %v1400_v60 = vsel %vm6436_vm5, %v5398_v53, %v1399_v55  ;;  %v255_v6 = vrot.slane %v219_v1, 5  ;;  %v5152_v7 = vrot.slane %v220_v2, 9  ;;  %v230_v40 = vld [vmem:[%s8103_s0 + $0x30] sm:$0xe] }
  0x5d   :  { %v1588_v62 = vrot.slane %v1587_v58, 4  ;;  %v5402_v63 = vcombine.low %v1396_v54, %v1400_v60  ;;  %vm53_vm6 = vcmask 523264   ;;  %v259_v9 = vrot.slane %v221_v3, 5  ;;  %v231_v41 = vld [vmem:[%s8103_s0 + $0x34] sm:$0x1] }
  0x5e   :  { %v1579_v61 = vsel %vm6225_vm2, %v1574_v56, %v1578_v43  ;;  %v256_v11 = vsel %vm6436_vm5, %v5151_v5, %v255_v6  ;;  %v5153_v16 = vrot.slane %v222_v10, 9  ;;  %v263_v17 = vrot.slane %v223_v12, 5  ;;  %54 = vst.msk [vmem:[#allocation2] sm:$0xff] %vm53_vm6, %v6056_v22  ;;  %55 = vst.msk [vmem:[#allocation2 + $0x28] sm:$0xff] %vm53_vm6, %v6058_v25  ;;  %v232_v42 = vld [vmem:[%s8103_s0 + $0x38] sm:$0xe] }
  0x5f   :  { %v1593_v4 = vsel %vm6225_vm2, %v1588_v62, %v1592_v59  ;;  %1419 = vrot.lane.b32.xlu1 %v5402_v63, %s6156_s22  ;;  %v260_v15 = vsel %vm6436_vm5, %v5152_v7, %v259_v9  ;;  %v5154_v18 = vrot.slane %v224_v13, 9  ;;  %v267_v20 = vrot.slane %v225_v14, 5  ;;  %56 = vst.msk [vmem:[#allocation2 + $0x50] sm:$0xff] %vm53_vm6, %v6061_v36  ;;  %v233_v43 = vld [vmem:[%s8103_s0 + $0x3c] sm:$0x1] }
  0x60   :  { %v5434_v8 = vcombine.low %v1579_v61, %v1593_v4  ;;  %v5159_v19 = vcombine.low %v256_v11, %v260_v15  ;;  %v264_v21 = vsel %vm6436_vm5, %v5153_v16, %v263_v17  ;;  %v5155_v31 = vrot.slane %v226_v26, 9  ;;  %v6065_v49 = vld [vmem:[%s8103_s0 + $0x30] ss:$8 sps:$4 sm:$0xff]   ;;  %v5316_v55 = vld [vmem:[%s8103_s0 + $0x54] sm:$0x1] }
  0x61   :  { %v268_v23 = vsel %vm6436_vm5, %v5154_v18, %v267_v20  ;;  %v271_v32 = vrot.slane %v227_v27, 5  ;;  %v5156_v33 = vrot.slane %v228_v28, 9  ;;  %v275_v34 = vrot.slane %v229_v30, 5  ;;  %v5315_v52 = vld [vmem:[%s8103_s0 + $0x50] sm:$0xe]  ;;  %57 = vst.msk [vmem:[#allocation2 + $0x78] sm:$0xff] %vm53_vm6, %v6065_v49 }
  0x62   :  { %1612 = vrot.lane.b32.xlu0 %v5434_v8, %s6156_s22  ;;  %301 = vst.msk [vmem:[#allocation2 + $0x8] sm:$0xff] %vm53_vm6, %v5159_v19  ;;  %v5160_v24 = vcombine.low %v264_v21, %v268_v23  ;;  %v5157_v44 = vrot.slane %v230_v40, 9  ;;  %v279_v45 = vrot.slane %v231_v41, 5  ;;  %v5158_v46 = vrot.slane %v232_v42, 9  ;;  %v5317_v56 = vld [vmem:[%s8103_s0 + $0x58] sm:$0xe] }
  0x63   :  { %v272_v35 = vsel %vm6436_vm5, %v5155_v31, %v271_v32  ;;  %v276_v38 = vsel %vm6436_vm5, %v5156_v33, %v275_v34  ;;  %vm213_vm7 = vcmask 1048064   ;;  %v283_v47 = vrot.slane %v233_v43, 5  ;;  %v5318_v58 = vld [vmem:[%s8103_s0 + $0x5c] sm:$0x1]  ;;  %v6068_v63 = vld [vmem:[%s8103_s0 + $0x50] ss:$8 sps:$4 sm:$0xff]  }
  0x64   :  { %302 = vst.msk [vmem:[#allocation2 + $0x30] sm:$0xff] %vm53_vm6, %v5160_v24  ;;  %v5161_v39 = vcombine.low %v272_v35, %v276_v38  ;;  %v280_v48 = vsel %vm6436_vm5, %v5157_v44, %v279_v45  ;;  %v5331_v59 = vrot.slane %v5315_v52, 9  ;;  %v1094_v60 = vrot.slane %v5316_v55, 5  ;;  %900 = vst.msk [vmem:[#allocation2 + $0xa0] sm:$0xff] %vm53_vm6, %v6068_v63  ;;  %v5319_v3 = vld [vmem:[%s8103_s0 + $0x60] sm:$0xe] }
  0x65   :  { %v284_v51 = vsel %vm6436_vm5, %v5158_v46, %v283_v47  ;;  %v5332_v61 = vrot.slane %v5317_v56, 9  ;;  %v1098_v62 = vrot.slane %v5318_v58, 5  ;;  %v5320_v4 = vld [vmem:[%s8103_s0 + $0x64] sm:$0x1]  ;;  %v5321_v5 = vld [vmem:[%s8103_s0 + $0x68] sm:$0xe] }
  0x66   :  { %303 = vst.msk [vmem:[#allocation2 + $0x58] sm:$0xff] %vm53_vm6, %v5161_v39  ;;  %v5162_v54 = vcombine.low %v280_v48, %v284_v51  ;;  %v1095_v0 = vsel %vm6436_vm5, %v5331_v59, %v1094_v60  ;;  %v5322_v6 = vld [vmem:[%s8103_s0 + $0x6c] sm:$0x1]  ;;  %v5333_v7 = vrot.slane %v5319_v3, 9  ;;  %v1102_v8 = vrot.slane %v5320_v4, 5 }
  0x67   :  { %v1099_v1 = vsel %vm6436_vm5, %v5332_v61, %v1098_v62  ;;  %v5334_v9 = vrot.slane %v5321_v5, 9  ;;  %v1106_v10 = vrot.slane %v5322_v6, 5  ;;  %v6071_v13 = vld [vmem:[%s8103_s0 + $0x60] ss:$8 sps:$4 sm:$0xff]   ;;  %v5323_v16 = vld [vmem:[%s8103_s0 + $0x70] sm:$0xe] }
  0x68   :  { %304 = vst.msk [vmem:[#allocation2 + $0x80] sm:$0xff] %vm53_vm6, %v5162_v54  ;;  %v5339_v2 = vcombine.low %v1095_v0, %v1099_v1  ;;  %v1103_v12 = vsel %vm6436_vm5, %v5333_v7, %v1102_v8  ;;  %901 = vst.msk [vmem:[#allocation2 + $0xc8] sm:$0xff] %vm53_vm6, %v6071_v13  ;;  %v5324_v17 = vld [vmem:[%s8103_s0 + $0x74] sm:$0x1]  ;;  %v5325_v18 = vld [vmem:[%s8103_s0 + $0x78] sm:$0xe] }
  0x69   :  { %v1107_v14 = vsel %vm6436_vm5, %v5334_v9, %v1106_v10  ;;  %v5326_v19 = vld [vmem:[%s8103_s0 + $0x7c] sm:$0x1]  ;;  %v5335_v20 = vrot.slane %v5323_v16, 9  ;;  %v1110_v21 = vrot.slane %v5324_v17, 5  ;;  %v5336_v22 = vrot.slane %v5325_v18, 9  ;;  %v6077_v44 = vld [vmem:[%s8104_s1 + $0x108] sm:$0xff]  }
  0x6a   :  { %1140 = vst.msk [vmem:[#allocation2 + $0xa8] sm:$0xff] %vm53_vm6, %v5339_v2  ;;  %v5340_v15 = vcombine.low %v1103_v12, %v1107_v14  ;;  %v1114_v23 = vrot.slane %v5326_v19, 5  ;;  %v6074_v26 = vld [vmem:[%s8103_s0 + $0x70] ss:$8 sps:$4 sm:$0xff]   ;;  %v5327_v28 = vld [vmem:[%s8103_s0 + $0x80] sm:$0xe] }
  0x6b   :  { %v1111_v25 = vsel %vm6436_vm5, %v5335_v20, %v1110_v21  ;;  %902 = vst.msk [vmem:[#allocation2 + $0xf0] sm:$0xff] %vm53_vm6, %v6074_v26  ;;  %v5328_v31 = vld [vmem:[%s8103_s0 + $0x84] sm:$0x1]  ;;  %v5329_v32 = vld [vmem:[%s8103_s0 + $0x88] sm:$0xe]  ;;  %v5337_v35 = vrot.slane %v5327_v28, 9 }
  0x6c   :  { %1141 = vst.msk [vmem:[#allocation2 + $0xd0] sm:$0xff] %vm53_vm6, %v5340_v15  ;;  %v1115_v27 = vsel %vm6436_vm5, %v5336_v22, %v1114_v23  ;;  %v5330_v33 = vld [vmem:[%s8103_s0 + $0x8c] sm:$0x1]  ;;  %v1118_v36 = vrot.slane %v5328_v31, 5  ;;  %v5338_v38 = vrot.slane %v5329_v32, 9  ;;  %v6087_v2 = vld [vmem:[%s8104_s1 + $0x110] sm:$0xff]  }
  0x6d   :  { %v5341_v30 = vcombine.low %v1111_v25, %v1115_v27  ;;  %v1122_v39 = vrot.slane %v5330_v33, 5  ;;  %v6078_v45 = vld [vmem:[%s8103_s0 + $0x80] ss:$8 sps:$4 sm:$0xff]   ;;  %v6081_v47 = vld [vmem:[%s8103_s0 + $0x10] ss:$8 sps:$4 sm:$0xff]   ;;  %vm2396_vm8 = vcmask 519168  }
  0x6e   :  { %v1119_v42 = vsel %vm6436_vm5, %v5337_v35, %v1118_v36  ;;  %903 = vst.msk [vmem:[#allocation2 + $0x118] sm:$0xff] %vm53_vm6, %v6078_v45  ;;  %v5175_v48 = vld [vmem:[%s8103_s0 + $0x8] sm:$0xf]  ;;  %v5176_v51 = vld [vmem:[%s8103_s0 + $0xc] sm:$0x1]  ;;  %623 = vst.msk [vmem:[#allocation2 + $0x18] sm:$0xff] %vm53_vm6, %v6081_v47 }
  0x6f   :  { %1142 = vst.msk [vmem:[#allocation2 + $0xf8] sm:$0xff] %vm53_vm6, %v5341_v30  ;;  %v1123_v43 = vsel %vm6436_vm5, %v5338_v38, %v1122_v39  ;;  %v5177_v52 = vld [vmem:[%s8103_s0 + $0x10] sm:$0xf]  ;;  %v5178_v54 = vld [vmem:[%s8103_s0 + $0x14] sm:$0x1]  ;;  %v370_v55 = vshll.u32 %v5175_v48, 16 }
  0x70   :  { %v5342_v46 = vcombine.low %v1119_v42, %v1123_v43  ;;  %v376_v56 = vshll.u32 %v5176_v51, 16  ;;  %v381_v58 = vshrl.u32 %v5177_v52, 16  ;;  %v384_v59 = vshll.u32 %v5177_v52, 16  ;;  %v6090_v9 = vld [vmem:[%s8104_s1 + $0x118] sm:$0xff]   ;;  %v6086_v13 = vld [vmem:[%s8103_s0 + $0x20] ss:$8 sps:$4 sm:$0xff]  }
  0x71   :  { %v390_v62 = vshll.u32 %v5178_v54, 16  ;;  %v372_v63 = vrot.slane %v370_v55, 5  ;;  %v5179_v14 = vld [vmem:[%s8103_s0 + $0x18] sm:$0xf]  ;;  %v5180_v16 = vld [vmem:[%s8103_s0 + $0x1c] sm:$0x1] }
  0x72   :  { %1143 = vst.msk [vmem:[#allocation2 + $0x120] sm:$0xff] %vm53_vm6, %v5342_v46  ;;  %v383_v0 = vrot.slane %v381_v58, 4  ;;  %v386_v1 = vrot.slane %v384_v59, 5  ;;  %v378_v5 = vrot.slane %v376_v56, 5  ;;  %v5181_v17 = vld [vmem:[%s8103_s0 + $0x20] sm:$0xf] }
  0x73   :  { %v392_v6 = vrot.slane %v390_v62, 5  ;;  %v395_v18 = vshrl.u32 %v5179_v14, 16  ;;  %624 = vst.msk [vmem:[#allocation2 + $0x40] sm:$0xff] %vm53_vm6, %v6086_v13  ;;  %v5182_v21 = vld [vmem:[%s8103_s0 + $0x24] sm:$0x1]  ;;  %v398_v22 = vshll.u32 %v5179_v14, 16 }
  0x74   :  { %v335_v50 = vpop.permute.xlu0 %334  ;;  %v337_v53 = vpop.permute.xlu1 %336  ;;  %v387_v8 = vor.u32 %v386_v1, %v383_v0  ;;  %v404_v23 = vshll.u32 %v5180_v16, 16  ;;  %v409_v26 = vshrl.u32 %v5181_v17, 16  ;;  %v412_v27 = vshll.u32 %v5181_v17, 16  ;;  %v5185_v45 = vld [vmem:[%s8103_s0 + $0x30] sm:$0xf] }
  0x75   :  { %346 = vst.msk [vmem:[#allocation2 + $0x8] sm:$0xff] %vm213_vm7, %v335_v50  ;;  %347 = vst.msk [vmem:[#allocation2 + $0x30] sm:$0xff] %vm213_vm7, %v337_v53  ;;  %v367_v53 = vshrl.u32 %v5175_v48, 16  ;;  %v397_v25 = vrot.slane %v395_v18, 4  ;;  %v400_v28 = vrot.slane %v398_v22, 5  ;;  %v418_v30 = vshll.u32 %v5182_v21, 16 }
  0x76   :  { %v388_v12 = vrot.slane %v387_v8, 4  ;;  %v411_v33 = vrot.slane %v409_v26, 4  ;;  %v406_v39 = vrot.slane %v404_v23, 5  ;;  %v5186_v48 = vld [vmem:[%s8103_s0 + $0x34] sm:$0x1]  ;;  %v437_v51 = vshrl.u32 %v5185_v45, 16 }
  0x77   :  { %v369_v61 = vrot.slane %v367_v53, 4  ;;  %v401_v38 = vor.u32 %v400_v28, %v397_v25  ;;  %v420_v43 = vrot.slane %v418_v30, 5  ;;  %v440_v55 = vshll.u32 %v5185_v45, 16  ;;  %v5190_v8 = vld [vmem:[%s8103_s0 + $0x44] sm:$0x1] }
  0x78   :  { %v393_v20 = vsel %vm6225_vm2, %v388_v12, %v392_v6  ;;  %v446_v56 = vshll.u32 %v5186_v48, 16  ;;  %v439_v62 = vrot.slane %v437_v51, 4  ;;  %v5188_v6 = vld [vmem:[%s8103_s0 + $0x3c] sm:$0x1]  ;;  %v6091_v28 = vld [vmem:[%s8103_s0 + $0x60] ss:$8 sps:$4 sm:$0xff]  }
  0x79   :  { %v373_v7 = vor.u32 %v372_v63, %v369_v61  ;;  %v402_v47 = vrot.slane %v401_v38, 4  ;;  %v442_v0 = vrot.slane %v440_v55, 5  ;;  %1462 = vst.msk [vmem:[#allocation2 + $0xb8] sm:$0xff] %vm53_vm6, %v6091_v28  ;;  %v5358_v38 = vld [vmem:[%s8103_s0 + $0x64] sm:$0x1]  ;;  %vm2398_vm9 = vcmask 516096  }
  0x7a   :  { %v448_v1 = vrot.slane %v446_v56, 5  ;;  %v1229_v48 = vshll.u32 %v5358_v38, 16  ;;  %vm2648_vm10 = vsmask.f32 7938  ;;  %vm2654_vm11 = vsmask.f32 256 }
  0x7b   :  { %v407_v59 = vsel %vm6225_vm2, %v402_v47, %v406_v39  ;;  %vm7422_vm12 = vmand %vm2396_vm8, %vm2648_vm10 }
  0x7c   :  { %v1707_v11 = vld [vmem:[#allocation2 + $0x8] sm:$0xff]  ;;  %v1712_v41 = vld [vmem:[#allocation2 + $0x30] sm:$0xff]  ;;  %vm7431_vm13 = vmand %vm2398_vm9, %vm2654_vm11 }
  0x7d   :  { %2097 = vmatprep.mubr.bf16.mxu0 %v1707_v11  ;;  %v374_v11 = vrot.slane %v373_v7, 4  ;;  %v443_v7 = vor.u32 %v442_v0, %v439_v62  ;;  %v5359_v62 = vld [vmem:[%s8103_s0 + $0x68] sm:$0xf]  ;;  %v5361_v0 = vld [vmem:[%s8103_s0 + $0x70] sm:$0xf] }
  0x7f   :  { %v379_v19 = vsel %vm6225_vm2, %v374_v11, %v378_v5  ;;  %v5187_v5 = vld [vmem:[%s8103_s0 + $0x38] sm:$0xf]  ;;  %v460_v11 = vshll.u32 %v5188_v6, 16  ;;  %v444_v18 = vrot.slane %v443_v7, 4  ;;  %v1248_v7 = vshrl.u32 %v5361_v0, 16 }
  0x80   :  { %v202_v24 = vpop.permute.xlu0 %201 }
  0x81   :  { %214 = vst.msk [vmem:[#allocation2] sm:$0xff] %vm213_vm7, %v202_v24  ;;  %v5191_v24 = vcombine.low %v379_v19, %v393_v20  ;;  %v462_v23 = vrot.slane %v460_v11, 5  ;;  %v449_v26 = vsel %vm6225_vm2, %v444_v18, %v448_v1 }
  0x83   :  { %494 = vst.msk [vmem:[#allocation2 + $0x10] sm:$0xff] %vm53_vm6, %v5191_v24 }
  0x84   :  { %v204_v34 = vpop.permute.xlu1 %203  ;;  %v339_v40 = vpop.permute.xlu0 %338 }
  0x85   :  { %215 = vst.msk [vmem:[#allocation2 + $0x28] sm:$0xff] %vm213_vm7, %v204_v34  ;;  %348 = vst.msk [vmem:[#allocation2 + $0x58] sm:$0xff] %vm213_vm7, %v339_v40  ;;  %v414_v34 = vrot.slane %v412_v27, 5  ;;  %v6088_v40 = vld [vmem:[%s8103_s0 + $0x30] ss:$8 sps:$4 sm:$0xff]  }
  0x86   :  { %625 = vst.msk [vmem:[#allocation2 + $0x68] sm:$0xff] %vm53_vm6, %v6088_v40 }
  0x87   :  { %v415_v42 = vor.u32 %v414_v34, %v411_v33  ;;  %v5355_v33 = vld [vmem:[%s8103_s0 + $0x58] sm:$0xf]  ;;  %v5356_v34 = vld [vmem:[%s8103_s0 + $0x5c] sm:$0x1] }
  0x88   :  { %v341_v49 = vpop.permute.xlu0 %340  ;;  %v1706_v50 = vld [vmem:[#allocation2] sm:$0xff]  ;;  %v1206_v39 = vshrl.u32 %v5355_v33, 16 }
  0x89   :  { %349 = vst.msk [vmem:[#allocation2 + $0x80] sm:$0xff] %vm213_vm7, %v341_v49  ;;  %2098 = vmatmul.mubr.bf16.vlgmr.msra.gmra.mrb[0].mxu0 %v1706_v50  ;;  %v416_v53 = vrot.slane %v415_v42, 4  ;;  %v1209_v42 = vshll.u32 %v5355_v33, 16 }
  0x8a   :  { %v206_v60 = vpop.permute.xlu1 %205  ;;  %5986 = vmatpush3.bf16.msra.mxu0 %v6465_v57  ;;  %2105 = vmatprep.mubr.bf16.mxu0 %v1712_v41  ;;  %v5183_v41 = vld [vmem:[%s8103_s0 + $0x28] sm:$0xf] }
  0x8b   :  { %216 = vst.msk [vmem:[#allocation2 + $0x50] sm:$0xff] %vm213_vm7, %v206_v60  ;;  %5987 = vmatprep.subr.bf16.mxu0 %v6077_v44  ;;  %v423_v46 = vshrl.u32 %v5183_v41, 16  ;;  %v426_v49 = vshll.u32 %v5183_v41, 16  ;;  %v421_v63 = vsel %vm6225_vm2, %v416_v53, %v420_v43  ;;  %v1215_v43 = vshll.u32 %v5356_v34, 16  ;;  %v5260_v34 = vld [vmem:[%s8103_s0 + $0x24] sm:$0x1] }
  0x8c   :  { %v1174_v3 = vpop.permute.xlu0 %1173  ;;  %v1711_v4 = vld [vmem:[#allocation2 + $0x28] sm:$0xff]  ;;  %v1717_v57 = vld [vmem:[#allocation2 + $0x58] sm:$0xff]  ;;  %v1211_v51 = vrot.slane %v1209_v42, 5  ;;  %v825_v42 = vrot.slane %v5260_v34, 5 }
  0x8d   :  { %1185 = vst.msk [vmem:[#allocation2 + $0xa8] sm:$0xff] %vm213_vm7, %v1174_v3  ;;  %v425_v54 = vrot.slane %v423_v46, 4  ;;  %v428_v60 = vrot.slane %v426_v49, 5  ;;  %v5192_v3 = vcombine.low %v407_v59, %v421_v63  ;;  %v1208_v46 = vrot.slane %v1206_v39, 4  ;;  %v6092_v59 = vld [vmem:[%s8103_s0 + $0x70] ss:$8 sps:$4 sm:$0xff]  }
  0x8e   :  { %5988 = vmatpush3.bf16.msra.mxu0 %v6077_v44  ;;  %v5184_v44 = vld [vmem:[%s8103_s0 + $0x2c] sm:$0x1]  ;;  %v1217_v55 = vrot.slane %v1215_v43, 5  ;;  %1463 = vst.msk [vmem:[#allocation2 + $0xe0] sm:$0xff] %vm53_vm6, %v6092_v59  ;;  %v5365_v59 = vld [vmem:[%s8103_s0 + $0x80] sm:$0xf] }
  0x8f   :  { %v208_v10 = vpop.permute.xlu1 %207  ;;  %5989 = vmatprep.subr.bf16.mxu0 %v6087_v2  ;;  %v432_v50 = vshll.u32 %v5184_v44, 16  ;;  %495 = vst.msk [vmem:[#allocation2 + $0x38] sm:$0xff] %vm53_vm6, %v5192_v3  ;;  %v5360_v63 = vld [vmem:[%s8103_s0 + $0x6c] sm:$0x1]  ;;  %v5362_v3 = vld [vmem:[%s8103_s0 + $0x74] sm:$0x1] }
  0x90   :  { %217 = vst.msk [vmem:[#allocation2 + $0x78] sm:$0xff] %vm213_vm7, %v208_v10  ;;  %v1176_v15 = vpop.permute.xlu0 %1175  ;;  %v1722_v36 = vld [vmem:[#allocation2 + $0x80] sm:$0xff]  ;;  %v454_v10 = vshll.u32 %v5187_v5, 16  ;;  %v1243_v6 = vshll.u32 %v5360_v63, 16  ;;  %v5270_v34 = vld [vmem:[%s8103_s0 + $0x4c] sm:$0x1] }
  0x91   :  { %1186 = vst.msk [vmem:[#allocation2 + $0xd0] sm:$0xff] %vm213_vm7, %v1176_v15  ;;  %2106 = vmatmul.mubr.bf16.gmra.mrb[4].mxu0 %v1711_v4  ;;  %v434_v61 = vrot.slane %v432_v50, 5  ;;  %v429_v4 = vor.u32 %v428_v60, %v425_v54  ;;  %v474_v15 = vshll.u32 %v5190_v8, 16  ;;  %v1251_v8 = vshll.u32 %v5361_v0, 16 }
  0x92   :  { %2113 = vmatprep.mubr.bf16.mxu0 %v1717_v57  ;;  %5990 = vmatpush3.bf16.msra.mxu0 %v6087_v2  ;;  %v1716_v35 = vld [vmem:[#allocation2 + $0x50] sm:$0xff]  ;;  %v6089_v2 = vld [vmem:[%s8103_s0 + $0x40] ss:$8 sps:$4 sm:$0xff]   ;;  %v456_v20 = vrot.slane %v454_v10, 5 }
  0x93   :  { %5991 = vmatprep.subr.bf16.mxu0 %v6090_v9  ;;  %v5189_v57 = vld [vmem:[%s8103_s0 + $0x40] sm:$0xf]  ;;  %626 = vst.msk [vmem:[#allocation2 + $0x90] sm:$0xff] %vm53_vm6, %v6089_v2  ;;  %v430_v12 = vrot.slane %v429_v4, 4  ;;  %v1234_v4 = vshrl.u32 %v5359_v62, 16  ;;  %v1253_v18 = vrot.slane %v1251_v8, 5 }
  0x94   :  { %v1045_v31 = vpop.permute.xlu1 %1044  ;;  %v1178_v32 = vpop.permute.xlu0 %1177  ;;  %v465_v13 = vshrl.u32 %v5189_v57, 16  ;;  %v468_v14 = vshll.u32 %v5189_v57, 16  ;;  %v1727_v21 = vld [vmem:[#allocation2 + $0xa8] sm:$0xff]  ;;  %v5255_v10 = vld [vmem:[%s8103_s0 + $0x10] sm:$0xe] }
  0x95   :  { %1056 = vst.msk [vmem:[#allocation2 + $0xa0] sm:$0xff] %vm213_vm7, %v1045_v31  ;;  %1187 = vst.msk [vmem:[#allocation2 + $0xf8] sm:$0xff] %vm213_vm7, %v1178_v32  ;;  %v435_v22 = vsel %vm6225_vm2, %v430_v12, %v434_v61  ;;  %v476_v32 = vrot.slane %v474_v15, 5  ;;  %v1212_v61 = vor.u32 %v1211_v51, %v1208_v46  ;;  %v1236_v12 = vrot.slane %v1234_v4, 4  ;;  %v5256_v15 = vld [vmem:[%s8103_s0 + $0x14] sm:$0x1] }
  0x96   :  { %5992 = vmatpush3.bf16.msra.mxu0 %v6090_v9  ;;  %v451_v9 = vshrl.u32 %v5187_v5, 16  ;;  %v467_v24 = vrot.slane %v465_v13, 4  ;;  %v470_v25 = vrot.slane %v468_v14, 5  ;;  %v5193_v30 = vcombine.low %v435_v22, %v449_v26 }
  0x97   :  { %v1721_v17 = vld [vmem:[#allocation2 + $0x78] sm:$0xff]  ;;  %v1237_v5 = vshll.u32 %v5359_v62, 16  ;;  %v1213_v57 = vrot.slane %v1212_v61, 4  ;;  %v1245_v14 = vrot.slane %v1243_v6, 5  ;;  %v817_v26 = vrot.slane %v5256_v15, 5 }
  0x98   :  { %v1180_v52 = vpop.permute.xlu0 %1179  ;;  %v453_v19 = vrot.slane %v451_v9, 4  ;;  %v471_v31 = vor.u32 %v470_v25, %v467_v24  ;;  %496 = vst.msk [vmem:[#allocation2 + $0x60] sm:$0xff] %vm53_vm6, %v5193_v30  ;;  %v1732_v49 = vld [vmem:[#allocation2 + $0xd0] sm:$0xff]  ;;  %v1257_v9 = vshll.u32 %v5362_v3, 16  ;;  %v5258_v24 = vld [vmem:[%s8103_s0 + $0x1c] sm:$0x1] }
  0x99   :  { %v1047_v58 = vpop.permute.xlu1 %1046  ;;  %1188 = vst.msk [vmem:[#allocation2 + $0x120] sm:$0xff] %vm213_vm7, %v1180_v52  ;;  %2114 = vmatmul.mubr.bf16.gmra.mrb[8].mxu0 %v1716_v35  ;;  %v1239_v13 = vrot.slane %v1237_v5, 5  ;;  %v5271_v25 = vrot.slane %v5255_v10, 9  ;;  %v821_v33 = vrot.slane %v5258_v24, 5  ;;  %v5366_v62 = vld [vmem:[%s8103_s0 + $0x84] sm:$0x1] }
  0x9a   :  { %1057 = vst.msk [vmem:[#allocation2 + $0xc8] sm:$0xff] %vm213_vm7, %v1047_v58  ;;  %2121 = vmatprep.mubr.bf16.mxu0 %v1722_v36  ;;  %v457_v27 = vor.u32 %v456_v20, %v453_v19  ;;  %v5357_v36 = vld [vmem:[%s8103_s0 + $0x60] sm:$0xf]  ;;  %v472_v41 = vrot.slane %v471_v31, 4  ;;  %v1231_v58 = vrot.slane %v1229_v48, 5  ;;  %v1259_v19 = vrot.slane %v1257_v9, 5 }
  0x9b   :  { %v1220_v44 = vshrl.u32 %v5357_v36, 16  ;;  %v1223_v47 = vshll.u32 %v5357_v36, 16  ;;  %v5257_v20 = vld [vmem:[%s8103_s0 + $0x18] sm:$0xe]  ;;  %v818_v39 = vsel %vm6436_vm5, %v5271_v25, %v817_v26  ;;  %v1276_v4 = vshrl.u32 %v5365_v59, 16 }
  0x9c   :  { %v458_v35 = vrot.slane %v457_v27, 4  ;;  %v477_v50 = vsel %vm6225_vm2, %v472_v41, %v476_v32  ;;  %v1726_v53 = vld [vmem:[#allocation2 + $0xa0] sm:$0xff]  ;;  %v1737_v28 = vld [vmem:[#allocation2 + $0xf8] sm:$0xff]  ;;  %v5272_v32 = vrot.slane %v5257_v20, 9  ;;  %v1279_v5 = vshll.u32 %v5365_v59, 16 }
  0x9d   :  { %v1049_v16 = vpop.permute.xlu1 %1048  ;;  %v1222_v52 = vrot.slane %v1220_v44, 4  ;;  %v1225_v56 = vrot.slane %v1223_v47, 5  ;;  %v5259_v27 = vld [vmem:[%s8103_s0 + $0x20] sm:$0xe]  ;;  %v1285_v6 = vshll.u32 %v5366_v62, 16  ;;  %v1278_v15 = vrot.slane %v1276_v4, 4 }
  0x9e   :  { %1058 = vst.msk [vmem:[#allocation2 + $0xf0] sm:$0xff] %vm213_vm7, %v1049_v16  ;;  %v463_v45 = vsel %vm6225_vm2, %v458_v35, %v462_v23  ;;  %v1218_v16 = vsel %vm6225_vm2, %v1213_v57, %v1217_v55  ;;  %v1240_v23 = vor.u32 %v1239_v13, %v1236_v12  ;;  %v5261_v35 = vld [vmem:[%s8103_s0 + $0x28] sm:$0xe]  ;;  %v5273_v41 = vrot.slane %v5259_v27, 9  ;;  %v5264_v57 = vld [vmem:[%s8103_s0 + $0x34] sm:$0x1] }
  0x9f   :  { %v5194_v54 = vcombine.low %v463_v45, %v477_v50  ;;  %v1226_v2 = vor.u32 %v1225_v56, %v1222_v52  ;;  %v822_v46 = vsel %vm6436_vm5, %v5272_v32, %v821_v33  ;;  %v5274_v47 = vrot.slane %v5261_v35, 9  ;;  %v5363_v56 = vld [vmem:[%s8103_s0 + $0x78] sm:$0xf]  ;;  %v5267_v24 = vld [vmem:[%s8103_s0 + $0x40] sm:$0xe] }
  0xa0   :  { %v1241_v38 = vrot.slane %v1240_v23, 4  ;;  %v5279_v51 = vcombine.low %v818_v39, %v822_v46  ;;  %v826_v52 = vsel %vm6436_vm5, %v5273_v41, %v825_v42  ;;  %v1262_v63 = vshrl.u32 %v5363_v56, 16  ;;  %v1742_v13 = vld [vmem:[#allocation2 + $0x120] sm:$0xff]  ;;  %v5368_v46 = vld [vmem:[%s8103_s0 + $0x8c] sm:$0x1] }
  0xa1   :  { %2122 = vmatmul.mubr.bf16.gmra.mrb[12].mxu0 %v1721_v17  ;;  %497 = vst.msk [vmem:[#allocation2 + $0x88] sm:$0xff] %vm53_vm6, %v5194_v54  ;;  %v1227_v11 = vrot.slane %v1226_v2, 4  ;;  %v1250_v17 = vrot.slane %v1248_v7, 4  ;;  %v1731_v36 = vld [vmem:[#allocation2 + $0xc8] sm:$0xff]  ;;  %v1265_v0 = vshll.u32 %v5363_v56, 16  ;;  %v845_v41 = vrot.slane %v5270_v34, 5 }
  0xa2   :  { %2129 = vmatprep.mubr.bf16.mxu0 %v1727_v21  ;;  %v1051_v40 = vpop.permute.xlu1 %1050  ;;  %v1246_v50 = vsel %vm6225_vm2, %v1241_v38, %v1245_v14  ;;  %863 = vst.msk [vmem:[#allocation2 + $0x20] sm:$0xff] %vm53_vm6, %v5279_v51  ;;  %v1264_v9 = vrot.slane %v1262_v63, 4  ;;  %v5268_v27 = vld [vmem:[%s8103_s0 + $0x44] sm:$0x1]  ;;  %v1299_v59 = vshll.u32 %v5368_v46, 16 }
  0xa3   :  { %1059 = vst.msk [vmem:[#allocation2 + $0x118] sm:$0xff] %vm213_vm7, %v1051_v40  ;;  %v1232_v22 = vsel %vm6225_vm2, %v1227_v11, %v1231_v58  ;;  %v1254_v31 = vor.u32 %v1253_v18, %v1250_v17  ;;  %v5262_v40 = vld [vmem:[%s8103_s0 + $0x2c] sm:$0x1]  ;;  %v5364_v58 = vld [vmem:[%s8103_s0 + $0x7c] sm:$0x1]  ;;  %v1267_v10 = vrot.slane %v1265_v0, 5 }
  0xa4   :  { %v5371_v30 = vcombine.low %v1218_v16, %v1232_v22  ;;  %v829_v48 = vrot.slane %v5262_v40, 5  ;;  %v1271_v3 = vshll.u32 %v5364_v58, 16  ;;  %v5265_v11 = vld [vmem:[%s8103_s0 + $0x38] sm:$0xe]  ;;  %v1281_v16 = vrot.slane %v1279_v5, 5 }
  0xa5   :  { %v1255_v45 = vrot.slane %v1254_v31, 4  ;;  %v1736_v8 = vld [vmem:[#allocation2 + $0xf0] sm:$0xff]  ;;  %v1287_v17 = vrot.slane %v1285_v6, 5  ;;  %v5266_v18 = vld [vmem:[%s8103_s0 + $0x3c] sm:$0x1]  ;;  %v1268_v20 = vor.u32 %v1267_v10, %v1264_v9  ;;  %v5276_v22 = vrot.slane %v5265_v11, 9 }
  0xa6   :  { %v575_v60 = vpop.permute.xlu1 %574  ;;  %1333 = vst.msk [vmem:[#allocation2 + $0xb0] sm:$0xff] %vm53_vm6, %v5371_v30  ;;  %v830_v55 = vsel %vm6436_vm5, %v5274_v47, %v829_v48  ;;  %v1273_v14 = vrot.slane %v1271_v3, 5  ;;  %v837_v23 = vrot.slane %v5266_v18, 5  ;;  %v1282_v26 = vor.u32 %v1281_v16, %v1278_v15  ;;  %v5370_v58 = vld [vmem:[%s8103_s0 + $0x94] sm:$0x1] }
  0xa7   :  { %v768_v1 = vpop.permute.xlu0 %767  ;;  %586 = vst.msk [vmem:[#allocation2 + $0x10] sm:$0xff] %vm213_vm7, %v575_v60  ;;  %v1260_v54 = vsel %vm6225_vm2, %v1255_v45, %v1259_v19  ;;  %v5280_v61 = vcombine.low %v826_v52, %v830_v55  ;;  %v5277_v30 = vrot.slane %v5267_v24, 9  ;;  %v1269_v31 = vrot.slane %v1268_v20, 4  ;;  %v5367_v45 = vld [vmem:[%s8103_s0 + $0x88] sm:$0xf] }
  0xa8   :  { %779 = vst.msk [vmem:[#allocation2 + $0x18] sm:$0xff] %vm213_vm7, %v768_v1  ;;  %v5372_v60 = vcombine.low %v1246_v50, %v1260_v54  ;;  %v5263_v1 = vld [vmem:[%s8103_s0 + $0x30] sm:$0xe]  ;;  %v838_v33 = vsel %vm6436_vm5, %v5276_v22, %v837_v23  ;;  %v841_v35 = vrot.slane %v5268_v27, 5  ;;  %v1283_v38 = vrot.slane %v1282_v26, 4 }
  0xa9   :  { %2130 = vmatmul.mubr.bf16.gmra.mrb[16].mxu0 %v1726_v53  ;;  %v6093_v53 = vld [vmem:[%s8103_s0 + $0x80] ss:$8 sps:$4 sm:$0xff]   ;;  %864 = vst.msk [vmem:[#allocation2 + $0x48] sm:$0xff] %vm53_vm6, %v5280_v61  ;;  %v5275_v12 = vrot.slane %v5263_v1, 9  ;;  %v1274_v42 = vsel %vm6225_vm2, %v1269_v31, %v1273_v14  ;;  %v5369_v50 = vld [vmem:[%s8103_s0 + $0x90] sm:$0xf] }
  0xaa   :  { %2137 = vmatprep.mubr.bf16.mxu0 %v1732_v49  ;;  %1464 = vst.msk [vmem:[#allocation2 + $0x108] sm:$0xff] %vm53_vm6, %v6093_v53  ;;  %1334 = vst.msk [vmem:[#allocation2 + $0xd8] sm:$0xff] %vm53_vm6, %v5372_v60  ;;  %v1288_v48 = vsel %vm6225_vm2, %v1283_v38, %v1287_v17  ;;  %v1290_v51 = vshrl.u32 %v5367_v45, 16  ;;  %v1293_v52 = vshll.u32 %v5367_v45, 16  ;;  %v1741_v54 = vld [vmem:[#allocation2 + $0x118] sm:$0xff]  ;;  %v1304_v60 = vshrl.u32 %v5369_v50, 16 }
  0xab   :  { %v577_v21 = vpop.permute.xlu1 %576  ;;  %v5373_v55 = vcombine.low %v1274_v42, %v1288_v48  ;;  %v1307_v63 = vshll.u32 %v5369_v50, 16  ;;  %v1313_v0 = vshll.u32 %v5370_v58, 16  ;;  %v5435_v1 = vld [vmem:[%s8103_s0 + $0x60] sm:$0xe]  ;;  %v5436_v4 = vld [vmem:[%s8103_s0 + $0x64] sm:$0x1] }
  0xac   :  { %587 = vst.msk [vmem:[#allocation2 + $0x38] sm:$0xff] %vm213_vm7, %v577_v21  ;;  %v833_v21 = vrot.slane %v5264_v57, 5  ;;  %v1292_v61 = vrot.slane %v1290_v51, 4  ;;  %v1295_v62 = vrot.slane %v1293_v52, 5  ;;  %v1306_v3 = vrot.slane %v1304_v60, 4 }
  0xad   :  { %1335 = vst.msk [vmem:[#allocation2 + $0x100] sm:$0xff] %vm53_vm6, %v5373_v55  ;;  %v5437_v5 = vld [vmem:[%s8103_s0 + $0x68] sm:$0xe]  ;;  %v1309_v9 = vrot.slane %v1307_v63, 5  ;;  %v5438_v10 = vld [vmem:[%s8103_s0 + $0x6c] sm:$0x1] }
  0xae   :  { %v770_v43 = vpop.permute.xlu0 %769  ;;  %v1708_v44 = vld [vmem:[#allocation2 + $0x10] sm:$0xff]  ;;  %v834_v32 = vsel %vm6436_vm5, %v5275_v12, %v833_v21  ;;  %v5451_v11 = vrot.slane %v5435_v1, 9  ;;  %v1656_v12 = vrot.slane %v5436_v4, 5  ;;  %v1660_v14 = vrot.slane %v5438_v10, 5  ;;  %v5441_v20 = vld [vmem:[%s8103_s0 + $0x78] sm:$0xe] }
  0xaf   :  { %780 = vst.msk [vmem:[#allocation2 + $0x40] sm:$0xff] %vm213_vm7, %v770_v43  ;;  %v1709_v49 = vld [vmem:[#allocation2 + $0x18] sm:$0xff]  ;;  %v5281_v39 = vcombine.low %v834_v32, %v838_v33  ;;  %v842_v43 = vsel %vm6436_vm5, %v5277_v30, %v841_v35  ;;  %v5439_v15 = vld [vmem:[%s8103_s0 + $0x70] sm:$0xe]  ;;  %v1310_v17 = vor.u32 %v1309_v9, %v1306_v3  ;;  %v1315_v18 = vrot.slane %v1313_v0, 5 }
  0xb0   :  { %2194 = vmatprep.mubr.bf16.mxu1 %v1709_v49  ;;  %v1657_v21 = vsel %vm6436_vm5, %v5451_v11, %v1656_v12  ;;  %v5442_v23 = vld [vmem:[%s8103_s0 + $0x7c] sm:$0x1]  ;;  %v5453_v24 = vrot.slane %v5439_v15, 9  ;;  %v5454_v32 = vrot.slane %v5441_v20, 9  ;;  %v5443_v33 = vld [vmem:[%s8103_s0 + $0x80] sm:$0xe] }
  0xb1   :  { %2138 = vmatmul.mubr.bf16.gmra.mrb[20].mxu0 %v1731_v36  ;;  %2195 = vmatmul.mubr.bf16.vlgmr.msra.gmra.mrb[0].mxu1 %v1708_v44  ;;  %v579_v2 = vpop.permute.xlu1 %578  ;;  %v6094_v44 = vld [vmem:[%s8103_s0 + $0x90] ss:$8 sps:$4 sm:$0xff]   ;;  %865 = vst.msk [vmem:[#allocation2 + $0x70] sm:$0xff] %vm53_vm6, %v5281_v39  ;;  %v1311_v30 = vrot.slane %v1310_v17, 4  ;;  %v1668_v35 = vrot.slane %v5442_v23, 5  ;;  %v5455_v39 = vrot.slane %v5443_v33, 9 }
  0xb2   :  { %2145 = vmatprep.mubr.bf16.mxu0 %v1737_v28  ;;  %588 = vst.msk [vmem:[#allocation2 + $0x60] sm:$0xff] %vm213_vm7, %v579_v2  ;;  %v5269_v28 = vld [vmem:[%s8103_s0 + $0x48] sm:$0xe]  ;;  %v1710_v2 = vld [vmem:[#allocation2 + $0x20] sm:$0xff]  ;;  %v5447_v50 = vld [vmem:[%s8103_s0 + $0x90] sm:$0xe] }
  0xb3   :  { %v772_v7 = vpop.permute.xlu0 %771  ;;  %v1713_v19 = vld [vmem:[#allocation2 + $0x38] sm:$0xff]  ;;  %v5278_v40 = vrot.slane %v5269_v28, 9  ;;  %1465 = vst.msk [vmem:[#allocation2 + $0x130] sm:$0xff] %vm53_vm6, %v6094_v44  ;;  %v5445_v38 = vld [vmem:[%s8103_s0 + $0x88] sm:$0xe]  ;;  %v1316_v42 = vsel %vm6225_vm2, %v1311_v30, %v1315_v18  ;;  %v1669_v48 = vsel %vm6436_vm5, %v5454_v32, %v1668_v35  ;;  %v5457_v58 = vrot.slane %v5447_v50, 9 }
  0xb4   :  { %781 = vst.msk [vmem:[#allocation2 + $0x68] sm:$0xff] %vm213_vm7, %v772_v7  ;;  %v1296_v7 = vor.u32 %v1295_v62, %v1292_v61  ;;  %v5456_v45 = vrot.slane %v5445_v38, 9  ;;  %v5448_v51 = vld [vmem:[%s8103_s0 + $0x94] sm:$0x1]  ;;  %v5449_v55 = vld [vmem:[%s8103_s0 + $0x98] sm:$0xe] }
  0xb5   :  { %v846_v49 = vsel %vm6436_vm5, %v5278_v40, %v845_v41  ;;  %v1715_v41 = vld [vmem:[#allocation2 + $0x48] sm:$0xff]  ;;  %v1680_v60 = vrot.slane %v5448_v51, 5  ;;  %v5458_v61 = vrot.slane %v5449_v55, 9  ;;  %v6157_v20 = vmov 0  }
  0xb6   :  { %v1714_v25 = vld [vmem:[#allocation2 + $0x40] sm:$0xff]  ;;  %v5282_v56 = vcombine.low %v842_v43, %v846_v49  ;;  %v1297_v16 = vrot.slane %v1296_v7, 4  ;;  %v5446_v43 = vld [vmem:[%s8103_s0 + $0x8c] sm:$0x1]  ;;  %2404 = vst.msk [vmem:[#allocation3 + $0x18] sm:$0xf] %vm2396_vm8, %v6157_v20 }
  0xb7   :  { %2202 = vmatprep.mubr.bf16.mxu1 %v1714_v25  ;;  %v581_v36 = vpop.permute.xlu1 %580  ;;  %v1676_v49 = vrot.slane %v5446_v43, 5  ;;  %v1681_v1 = vsel %vm6436_vm5, %v5457_v58, %v1680_v60  ;;  %2405 = vst.msk [vmem:[#allocation3 + $0x1c] sm:$0x1] %vm2398_vm9, %v6157_v20  ;;  %2399 = vst.msk [vmem:[#allocation3 + $0x4] sm:$0x1] %vm2398_vm9, %v6157_v20 }
  0xb8   :  { %589 = vst.msk [vmem:[#allocation2 + $0x88] sm:$0xff] %vm213_vm7, %v581_v36  ;;  %v5444_v36 = vld [vmem:[%s8103_s0 + $0x84] sm:$0x1]  ;;  %v1720_v52 = vld [vmem:[#allocation2 + $0x70] sm:$0xff] }
  0xb9   :  { %2146 = vmatmul.mubr.bf16.gmra.mrb[24].mxu0 %v1736_v8  ;;  %2203 = vmatmul.mubr.bf16.gmra.mrb[4].mxu1 %v1713_v19  ;;  %866 = vst.msk [vmem:[#allocation2 + $0x98] sm:$0xff] %vm53_vm6, %v5282_v56  ;;  %v1718_v6 = vld [vmem:[#allocation2 + $0x60] sm:$0xff]  ;;  %v1301_v8 = vrot.slane %v1299_v59, 5  ;;  %v5440_v19 = vld [vmem:[%s8103_s0 + $0x74] sm:$0x1]  ;;  %v1672_v44 = vrot.slane %v5444_v36, 5  ;;  %v1677_v59 = vsel %vm6436_vm5, %v5456_v45, %v1676_v49 }
  0xba   :  { %2153 = vmatprep.mubr.bf16.mxu0 %v1742_v13  ;;  %v774_v47 = vpop.permute.xlu0 %773  ;;  %v5452_v13 = vrot.slane %v5437_v5, 9  ;;  %v1664_v25 = vrot.slane %v5440_v19, 5  ;;  %v5450_v56 = vld [vmem:[%s8103_s0 + $0x9c] sm:$0x1]  ;;  %2397 = vst.msk [vmem:[#allocation3] sm:$0xf] %vm2396_vm8, %v6157_v20 }
  0xbb   :  { %782 = vst.msk [vmem:[#allocation2 + $0x90] sm:$0xff] %vm213_vm7, %v774_v47  ;;  %v1719_v53 = vld [vmem:[#allocation2 + $0x68] sm:$0xff]  ;;  %v1302_v28 = vsel %vm6225_vm2, %v1297_v16, %v1301_v8  ;;  %v1684_v62 = vrot.slane %v5450_v56, 5 }
  0xbc   :  { %2210 = vmatprep.mubr.bf16.mxu1 %v1719_v53  ;;  %v1661_v22 = vsel %vm6436_vm5, %v5452_v13, %v1660_v14  ;;  %v1665_v34 = vsel %vm6436_vm5, %v5453_v24, %v1664_v25  ;;  %v5374_v47 = vcombine.low %v1302_v28, %v1316_v42  ;;  %2400 = vst.msk [vmem:[#allocation3 + $0x8] sm:$0xf] %vm2396_vm8, %v6157_v20  ;;  %2402 = vst.msk [vmem:[#allocation3 + $0x10] sm:$0xf] %vm2396_vm8, %v6157_v20 }
  0xbd   :  { %v5459_v31 = vcombine.low %v1657_v21, %v1661_v22  ;;  %v5460_v53 = vcombine.low %v1665_v34, %v1669_v48  ;;  %2401 = vst.msk [vmem:[#allocation3 + $0xc] sm:$0x1] %vm2398_vm9, %v6157_v20  ;;  %2403 = vst.msk [vmem:[#allocation3 + $0x14] sm:$0x1] %vm2398_vm9, %v6157_v20 }
  0xbe   :  { %v1414_v57 = vpop.permute.xlu1 %1413  ;;  %1336 = vst.msk [vmem:[#allocation2 + $0x128] sm:$0xff] %vm53_vm6, %v5374_v47 }
  0xbf   :  { %1425 = vst.msk [vmem:[#allocation2 + $0xb0] sm:$0xff] %vm213_vm7, %v1414_v57  ;;  %v1723_v46 = vld [vmem:[#allocation2 + $0x88] sm:$0xff] }
  0xc0   :  { %1702 = vst.msk [vmem:[#allocation2 + $0xc0] sm:$0xff] %vm53_vm6, %v5459_v31  ;;  %1703 = vst.msk [vmem:[#allocation2 + $0xe8] sm:$0xff] %vm53_vm6, %v5460_v53  ;;  %v7321_v53 = vld [vmem:[%s8105_s2] ss:$0 sm:$0xff] }
  0xc1   :  { %2154 = vmatmul.mubr.bf16.gmra.mrb[28].mxu0 %v1741_v54  ;;  %2211 = vmatmul.mubr.bf16.gmra.mrb[8].mxu1 %v1718_v6  ;;  %v1607_v26 = vpop.permute.xlu0 %1606  ;;  %v1673_v54 = vsel %vm6436_vm5, %v5455_v39, %v1672_v44  ;;  %v1725_v6 = vld [vmem:[#allocation2 + $0x98] sm:$0xff]  ;;  %2406 = vst.msk [vmem:[#allocation3 + $0x20] sm:$0xf] %vm2396_vm8, %v6157_v20  ;;  %2408 = vst.msk [vmem:[#allocation3 + $0x28] sm:$0xf] %vm2396_vm8, %v6157_v20 }
  0xc2   :  { %5993 = vmatprep.mubr.msk.bf16.mxu0 %vm53_vm6, %v1710_v2  ;;  %v1724_v27 = vld [vmem:[#allocation2 + $0x90] sm:$0xff]  ;;  %1618 = vst.msk [vmem:[#allocation2 + $0xb8] sm:$0xff] %vm213_vm7, %v1607_v26  ;;  %v5461_v0 = vcombine.low %v1673_v54, %v1677_v59  ;;  %v1685_v2 = vsel %vm6436_vm5, %v5458_v61, %v1684_v62  ;;  %v2785_v58 = vld [vmem:[#allocation3] sm:$0xf] }
  0xc3   :  { %2218 = vmatprep.mubr.bf16.mxu1 %v1724_v27  ;;  %v5462_v4 = vcombine.low %v1681_v1, %v1685_v2  ;;  %2407 = vst.msk [vmem:[#allocation3 + $0x24] sm:$0x1] %vm2398_vm9, %v6157_v20  ;;  %2409 = vst.msk [vmem:[#allocation3 + $0x2c] sm:$0x1] %vm2398_vm9, %v6157_v20 }
  0xc4   :  { %v1416_v40 = vpop.permute.xlu1 %1415  ;;  %1704 = vst.msk [vmem:[#allocation2 + $0x110] sm:$0xff] %vm53_vm6, %v5461_v0 }
  0xc5   :  { %1426 = vst.msk [vmem:[#allocation2 + $0xd8] sm:$0xff] %vm213_vm7, %v1416_v40 }
  0xc6   :  { %1705 = vst.msk [vmem:[#allocation2 + $0x138] sm:$0xff] %vm53_vm6, %v5462_v4  ;;  %v1728_v57 = vld [vmem:[#allocation2 + $0xb0] sm:$0xff]  ;;  %v2802_v4 = vshrl.u32 %v2785_v58, 16 }
  0xc7   :  { %v1730_v8 = vld [vmem:[#allocation2 + $0xc0] sm:$0xff]  ;;  %v1735_v12 = vld [vmem:[#allocation2 + $0xe8] sm:$0xff]  ;;  %2410 = vst.msk [vmem:[#allocation3 + $0x30] sm:$0xf] %vm2396_vm8, %v6157_v20  ;;  %2412 = vst.msk [vmem:[#allocation3 + $0x38] sm:$0xf] %vm2396_vm8, %v6157_v20 }
  0xc8   :  { %v1609_v63 = vpop.permute.xlu0 %1608  ;;  %2411 = vst.msk [vmem:[#allocation3 + $0x34] sm:$0x1] %vm2398_vm9, %v6157_v20  ;;  %2413 = vst.msk [vmem:[#allocation3 + $0x3c] sm:$0x1] %vm2398_vm9, %v6157_v20 }
  0xc9   :  { %5994 = vmatmul.mubr.msk.bf16.vlgmr.msra.gmra.mrb[32].mxu0 %vm53_vm6, %v1715_v41  ;;  %2219 = vmatmul.mubr.bf16.gmra.mrb[12].mxu1 %v1723_v46  ;;  %1619 = vst.msk [vmem:[#allocation2 + $0xe0] sm:$0xff] %vm213_vm7, %v1609_v63  ;;  %v1729_v3 = vld [vmem:[#allocation2 + $0xb8] sm:$0xff] }
  0xca   :  { %5997 = vmatprep.mubr.msk.bf16.mxu0 %vm53_vm6, %v1720_v52  ;;  %2226 = vmatprep.mubr.bf16.mxu1 %v1729_v3  ;;  %2414 = vst.msk [vmem:[#allocation3 + $0x40] sm:$0xf] %vm2396_vm8, %v6157_v20  ;;  %2416 = vst.msk [vmem:[#allocation3 + $0x48] sm:$0xf] %vm2396_vm8, %v6157_v20 }
  0xcb   :  { %v1418_v5 = vpop.permute.xlu1 %1417  ;;  %v1740_v14 = vld [vmem:[#allocation2 + $0x110] sm:$0xff]  ;;  %2415 = vst.msk [vmem:[#allocation3 + $0x44] sm:$0x1] %vm2398_vm9, %v6157_v20  ;;  %2417 = vst.msk [vmem:[#allocation3 + $0x4c] sm:$0x1] %vm2398_vm9, %v6157_v20 }
  0xcc   :  { %1427 = vst.msk [vmem:[#allocation2 + $0x100] sm:$0xff] %vm213_vm7, %v1418_v5  ;;  %v1733_v13 = vld [vmem:[#allocation2 + $0xd8] sm:$0xff] }
  0xcd   :  { %v1745_v16 = vld [vmem:[#allocation2 + $0x138] sm:$0xff]  ;;  %2418 = vst.msk [vmem:[#allocation3 + $0x50] sm:$0xf] %vm2396_vm8, %v6157_v20  ;;  %2420 = vst.msk [vmem:[#allocation3 + $0x58] sm:$0xf] %vm2396_vm8, %v6157_v20 }
  0xce   :  { %v1611_v7 = vpop.permute.xlu0 %1610  ;;  %2419 = vst.msk [vmem:[#allocation3 + $0x54] sm:$0x1] %vm2398_vm9, %v6157_v20  ;;  %2421 = vst.msk [vmem:[#allocation3 + $0x5c] sm:$0x1] %vm2398_vm9, %v6157_v20 }
  0xcf   :  { %1620 = vst.msk [vmem:[#allocation2 + $0x108] sm:$0xff] %vm213_vm7, %v1611_v7 }
  0xd0   :  { %v1734_v9 = vld [vmem:[#allocation2 + $0xe0] sm:$0xff]  ;;  %2422 = vst.msk [vmem:[#allocation3 + $0x60] sm:$0xf] %vm2396_vm8, %v6157_v20  ;;  %2424 = vst.msk [vmem:[#allocation3 + $0x68] sm:$0xf] %vm2396_vm8, %v6157_v20 }
  0xd1   :  { %5998 = vmatmul.mubr.msk.bf16.gmra.mrb[36].mxu0 %vm53_vm6, %v1725_v6  ;;  %2227 = vmatmul.mubr.bf16.gmra.mrb[16].mxu1 %v1728_v57  ;;  %v1420_v10 = vpop.permute.xlu1 %1419  ;;  %2423 = vst.msk [vmem:[#allocation3 + $0x64] sm:$0x1] %vm2398_vm9, %v6157_v20  ;;  %2425 = vst.msk [vmem:[#allocation3 + $0x6c] sm:$0x1] %vm2398_vm9, %v6157_v20 }
  0xd2   :  { %6001 = vmatprep.mubr.msk.bf16.mxu0 %vm53_vm6, %v1730_v8  ;;  %2234 = vmatprep.mubr.bf16.mxu1 %v1734_v9  ;;  %1428 = vst.msk [vmem:[#allocation2 + $0x128] sm:$0xff] %vm213_vm7, %v1420_v10  ;;  %v2805_v8 = vshll.u32 %v2785_v58, 16  ;;  %v3360_v9 = vld [vmem:[#allocation3 + $0x48] sm:$0xf] }
  0xd3   :  { %v1738_v17 = vld [vmem:[#allocation2 + $0x100] sm:$0xff]  ;;  %2426 = vst.msk [vmem:[#allocation3 + $0x70] sm:$0xf] %vm2396_vm8, %v6157_v20  ;;  %2428 = vst.msk [vmem:[#allocation3 + $0x78] sm:$0xf] %vm2396_vm8, %v6157_v20 }
  0xd4   :  { %v1613_v11 = vpop.permute.xlu0 %1612  ;;  %2427 = vst.msk [vmem:[#allocation3 + $0x74] sm:$0x1] %vm2398_vm9, %v6157_v20  ;;  %2429 = vst.msk [vmem:[#allocation3 + $0x7c] sm:$0x1] %vm2398_vm9, %v6157_v20  ;;  %v3623_v5 = vld [vmem:[#allocation3 + $0x50] sm:$0xf] }
  0xd5   :  { %1621 = vst.msk [vmem:[#allocation2 + $0x130] sm:$0xff] %vm213_vm7, %v1613_v11  ;;  %v3640_v11 = vshrl.u32 %v3623_v5, 16 }
  0xd6   :  { %v1739_v15 = vld [vmem:[#allocation2 + $0x108] sm:$0xff]  ;;  %2430 = vst.msk [vmem:[#allocation3 + $0x80] sm:$0xf] %vm2396_vm8, %v6157_v20  ;;  %2432 = vst.msk [vmem:[#allocation3 + $0x88] sm:$0xf] %vm2396_vm8, %v6157_v20 }
  0xd7   :  { %2431 = vst.msk [vmem:[#allocation3 + $0x84] sm:$0x1] %vm2398_vm9, %v6157_v20  ;;  %2433 = vst.msk [vmem:[#allocation3 + $0x8c] sm:$0x1] %vm2398_vm9, %v6157_v20 }
  0xd8   :  { %2434 = vst.msk [vmem:[#allocation3 + $0x90] sm:$0xf] %vm2396_vm8, %v6157_v20  ;;  %2436 = vst.msk [vmem:[#allocation3 + $0x98] sm:$0xf] %vm2396_vm8, %v6157_v20 }
  0xd9   :  { %6002 = vmatmul.mubr.msk.bf16.gmra.mrb[40].mxu0 %vm53_vm6, %v1735_v12  ;;  %2235 = vmatmul.mubr.bf16.gmra.mrb[20].mxu1 %v1733_v13  ;;  %v1743_v19 = vld [vmem:[#allocation2 + $0x128] sm:$0xff]  ;;  %2435 = vst.msk [vmem:[#allocation3 + $0x94] sm:$0x1] %vm2398_vm9, %v6157_v20  ;;  %2437 = vst.msk [vmem:[#allocation3 + $0x9c] sm:$0x1] %vm2398_vm9, %v6157_v20  ;;  %v3643_v12 = vshll.u32 %v3623_v5, 16 }
  0xda   :  { %6005 = vmatprep.mubr.msk.bf16.mxu0 %vm53_vm6, %v1740_v14  ;;  %2242 = vmatprep.mubr.bf16.mxu1 %v1739_v15  ;;  %v3461_v14 = vshrl.u32 %v3360_v9, 16  ;;  %v3464_v15 = vshll.u32 %v3360_v9, 16  ;;  %v2807_v20 = vrot.slane %v2805_v8, 5 }
  0xdc   :  { %v1744_v18 = vld [vmem:[#allocation2 + $0x130] sm:$0xff] }
  0xe1   :  { %6006 = vmatmul.mubr.msk.bf16.gmra.mrb[44].mxu0 %vm53_vm6, %v1745_v16  ;;  %2243 = vmatmul.mubr.bf16.gmra.mrb[24].mxu1 %v1738_v17 }
  0xe2   :  { %2250 = vmatprep.mubr.bf16.mxu1 %v1744_v18  ;;  %v2786_v18 = vld [vmem:[#allocation3 + $0x4] sm:$0x1] }
  0xe9   :  { %2251 = vmatmul.mubr.bf16.gmra.mrb[28].mxu1 %v1743_v19  ;;  %v2804_v19 = vrot.slane %v2802_v4, 4 }
 0x15c   :  { %v5721_v21 = vpop.f32.mrb[0].mxu0 }
 0x15d   :  { %v5722_v22 = vpop.f32.mrb[1].mxu0 }
 0x15e   :  { %v5723_v23 = vadd.f32 %v5722_v22, %v5721_v21  ;;  %v5724_v24 = vpop.f32.mrb[2].mxu0 }
 0x15f   :  { %v5725_v25 = vpop.f32.mrb[3].mxu0 }
 0x160   :  { %v5726_v26 = vadd.f32 %v5725_v25, %v5724_v24  ;;  %v2100_v62 = vadd.f32 %v5723_v23, %v7321_v53 }
 0x162   :  { %v2103_v6 = vadd.f32 %v5726_v26, %v7321_v53 }
 0x164   :  { %v5727_v27 = vpop.f32.mrb[4].mxu0 }
 0x165   :  { %v5728_v28 = vpop.f32.mrb[5].mxu0 }
 0x166   :  { %v5729_v30 = vadd.f32 %v5728_v28, %v5727_v27  ;;  %v5730_v31 = vpop.f32.mrb[6].mxu0  ;;  %v3642_v28 = vrot.slane %v3640_v11, 4 }
 0x167   :  { %v5731_v32 = vpop.f32.mrb[7].mxu0 }
 0x168   :  { %v7304_v33 = vadd.f32 %v5731_v32, %v5730_v31  ;;  %v2108_v24 = vadd.f32 %v5729_v30, %v7321_v53  ;;  %v3645_v31 = vrot.slane %v3643_v12, 5 }
 0x16a   :  { %v3646_v30 = vor.u32 %v3645_v31, %v3642_v28 }
 0x16c   :  { %v5733_v34 = vpop.f32.mrb[8].mxu0  ;;  %v7342_v8 = vrot.slane %v3646_v30, 4 }
 0x16d   :  { %v5734_v35 = vpop.f32.mrb[9].mxu0 }
 0x16e   :  { %v7306_v36 = vadd.f32 %v5734_v35, %v5733_v34  ;;  %v5736_v38 = vpop.f32.mrb[10].mxu0  ;;  %v2811_v35 = vshll.u32 %v2786_v18, 16 }
 0x16f   :  { %v5737_v39 = vpop.f32.mrb[11].mxu0 }
 0x170   :  { %v7308_v40 = vadd.f32 %v5737_v39, %v5736_v38  ;;  %v3624_v38 = vld [vmem:[#allocation3 + $0x54] sm:$0x1]  ;;  %v3463_v39 = vrot.slane %v3461_v14, 4  ;;  %v2116_v4 = vadd.f32 %v7306_v36, %v7321_v53 }
 0x172   :  { %v2119_v11 = vadd.f32 %v7308_v40, %v7321_v53 }
 0x174   :  { %v5739_v41 = vpop.f32.mrb[12].mxu0 }
 0x175   :  { %v5740_v42 = vpop.f32.mrb[13].mxu0 }
 0x176   :  { %v7310_v43 = vadd.f32 %v5740_v42, %v5739_v41  ;;  %v5742_v44 = vpop.f32.mrb[14].mxu0  ;;  %v3466_v41 = vrot.slane %v3464_v15, 5  ;;  %v2111_v42 = vadd.f32 %v7304_v33, %v7321_v53  ;;  %v2941_v33 = vld [vmem:[#allocation3] sm:$0xe] }
 0x177   :  { %v5743_v45 = vpop.f32.mrb[15].mxu0  ;;  %v5532_v36 = vrot.slane %v2941_v33, 9 }
 0x178   :  { %v7312_v46 = vadd.f32 %v5743_v45, %v5742_v44  ;;  %v2124_v40 = vadd.f32 %v7310_v43, %v7321_v53 }
 0x17c   :  { %v5745_v47 = vpop.f32.mrb[16].mxu0 }
 0x17d   :  { %v5746_v48 = vpop.f32.mrb[17].mxu0 }
 0x17e   :  { %v7314_v49 = vadd.f32 %v5746_v48, %v5745_v47  ;;  %v5748_v50 = vpop.f32.mrb[18].mxu0  ;;  %v2808_v47 = vor.u32 %v2807_v20, %v2804_v19  ;;  %v3361_v48 = vld [vmem:[#allocation3 + $0x4c] sm:$0x1]  ;;  %v2127_v20 = vadd.f32 %v7312_v46, %v7321_v53 }
 0x17f   :  { %v5749_v51 = vpop.f32.mrb[19].mxu0 }
 0x180   :  { %v7316_v52 = vadd.f32 %v5749_v51, %v5748_v50  ;;  %v3649_v51 = vshll.u32 %v3624_v38, 16 }
 0x182   :  { %v7344_v9 = vrot.slane %v3649_v51, 5 }
 0x184   :  { %v5751_v54 = vpop.f32.mrb[20].mxu0  ;;  %v5785_v55 = vpop.f32.mrb[0].mxu1 }
 0x185   :  { %v5752_v56 = vpop.f32.mrb[21].mxu0  ;;  %v5786_v59 = vpop.f32.mrb[1].mxu1 }
 0x186   :  { %v7323_v60 = vadd.f32 %v5752_v56, %v5751_v54  ;;  %v5754_v61 = vpop.f32.mrb[22].mxu0  ;;  %v5787_v63 = vadd.f32 %v5786_v59, %v5785_v55  ;;  %v5788_v0 = vpop.f32.mrb[2].mxu1  ;;  %v3467_v55 = vor.u32 %v3466_v41, %v3463_v39  ;;  %v3470_v56 = vshll.u32 %v3361_v48, 16  ;;  %v4199_v41 = vld [vmem:[#allocation3 + $0x98] sm:$0xf] }
 0x187   :  { %v5755_v1 = vpop.f32.mrb[23].mxu0  ;;  %v5789_v2 = vpop.f32.mrb[3].mxu1 }
 0x188   :  { %v7326_v3 = vadd.f32 %v5755_v1, %v5754_v61  ;;  %v5790_v57 = vadd.f32 %v5789_v2, %v5788_v0  ;;  %v7329_v7 = vadd.f32 %v5787_v63, %v2100_v62  ;;  %v7336_v61 = vrot.slane %v2808_v47, 4  ;;  %v2942_v2 = vld [vmem:[#allocation3 + $0x4] sm:$0x1] }
 0x189   :  { %v7338_v62 = vrot.slane %v2811_v35, 5  ;;  %v7348_v14 = vrot.slane %v3467_v55, 4  ;;  %v7350_v15 = vrot.slane %v3470_v56, 5  ;;  %v2975_v18 = vrot.slane %v2942_v2, 5 }
 0x18a   :  { %v7331_v10 = vadd.f32 %v5790_v57, %v2103_v6  ;;  %v7378_v43 = vadd.f32 %v7323_v60, %v7321_v53  ;;  %v4303_v56 = vshll.u32 %v4199_v41, 16 }
 0x18b   :  { %v2814_v19 = vsel %vm6225_vm2, %v7336_v61, %v7338_v62  ;;  %v7393_v60 = vsel %vm6436_vm5, %v5532_v36, %v2975_v18  ;;  %v6103_v18 = vld [vmem:[%s8106_s3 + $0x40] sm:$0xff]  }
 0x18c   :  { %v5757_v13 = vpop.f32.mrb[24].mxu0  ;;  %v5791_v16 = vpop.f32.mrb[4].mxu1  ;;  %v7411_v2 = vrot.slane %v4303_v56, 5  ;;  %5845 = vmatprep.subr.bf16.mxu1 %v6103_v18 }
 0x18d   :  { %v5758_v17 = vpop.f32.mrb[25].mxu0  ;;  %v5792_v21 = vpop.f32.mrb[5].mxu1 }
 0x18e   :  { %v5759_v22 = vadd.f32 %v5758_v17, %v5757_v13  ;;  %v5760_v23 = vpop.f32.mrb[26].mxu0  ;;  %v5793_v25 = vadd.f32 %v5792_v21, %v5791_v16  ;;  %v5794_v26 = vpop.f32.mrb[6].mxu1 }
 0x18f   :  { %v5761_v27 = vpop.f32.mrb[27].mxu0  ;;  %v5795_v32 = vpop.f32.mrb[7].mxu1 }
 0x190   :  { %v5762_v34 = vadd.f32 %v5761_v27, %v5760_v23  ;;  %v5796_v44 = vadd.f32 %v5795_v32, %v5794_v26  ;;  %v2205_v45 = vadd.f32 %v5793_v25, %v2108_v24  ;;  %v3652_v23 = vsel %vm6225_vm2, %v7342_v8, %v7344_v9 }
 0x191   :  { %v7370_v24 = vadd.f32 %v7314_v49, %v7321_v53  ;;  %v7374_v25 = vadd.f32 %v7316_v52, %v7321_v53  ;;  %v3473_v26 = vsel %vm6225_vm2, %v7348_v14, %v7350_v15  ;;  %v7386_v27 = vadd.f32 %v7326_v3, %v7321_v53 }
 0x192   :  { %v2208_v50 = vadd.f32 %v5796_v44, %v2111_v42  ;;  %v7389_v49 = vadd.f32 %v5759_v22, %v7321_v53  ;;  %v7396_v32 = vadd.f32 %v5762_v34, %v7321_v53  ;;  %v7405_v42 = vld [vmem:[#allocation3 + $0x9c] sm:$0x1]  ;;  %v4300_v34 = vshrl.u32 %v4199_v41, 16  ;;  %v6104_v41 = vld [vmem:[%s8106_s3] sm:$0xff]  }
 0x193   :  { %5846 = vmatpush3.bf16.msra.mxu1 %v6104_v41 }
 0x194   :  { %v5763_v54 = vpop.f32.mrb[28].mxu0  ;;  %v5797_v58 = vpop.f32.mrb[8].mxu1  ;;  %v7409_v33 = vrot.slane %v4300_v34, 4 }
 0x195   :  { %v5764_v59 = vpop.f32.mrb[29].mxu0  ;;  %v5798_v63 = vpop.f32.mrb[9].mxu1 }
 0x196   :  { %v5765_v0 = vadd.f32 %v5764_v59, %v5763_v54  ;;  %v5766_v1 = vpop.f32.mrb[30].mxu0  ;;  %v5799_v5 = vadd.f32 %v5798_v63, %v5797_v58  ;;  %v5800_v6 = vpop.f32.mrb[10].mxu1  ;;  %v4306_v36 = vor.u32 %v7411_v2, %v7409_v33 }
 0x197   :  { %v5767_v57 = vpop.f32.mrb[31].mxu0  ;;  %v5801_v12 = vpop.f32.mrb[11].mxu1 }
 0x198   :  { %v5768_v13 = vadd.f32 %v5767_v57, %v5766_v1  ;;  %v5802_v16 = vadd.f32 %v5801_v12, %v5800_v6  ;;  %v7352_v17 = vadd.f32 %v5799_v5, %v2116_v4  ;;  %v7399_v38 = vadd.f32 %v5765_v0, %v7321_v53  ;;  %v2665_v57 = vld [vmem:[#allocation3 + $0x18] sm:$0xf] }
 0x19a   :  { %v7362_v21 = vadd.f32 %v5802_v16, %v2119_v11  ;;  %v7402_v3 = vadd.f32 %v5768_v13, %v7321_v53 }
 0x19c   :  { %v5995_v46 = vpop.f32.mrb[32].mxu0  ;;  %v5803_v28 = vpop.f32.mrb[12].mxu1 }
 0x19d   :  { %v2302_v52 = vadd.f32 %v5995_v46, %v2205_v45  ;;  %v2293_v31 = vpop.f32.mrb[33].mxu0  ;;  %v5804_v35 = vpop.f32.mrb[13].mxu1 }
 0x19e   :  { %v2294_v22 = vadd.f32 %v2293_v31, %v7329_v7  ;;  %v5996_v39 = vpop.f32.mrb[34].mxu0  ;;  %v5805_v44 = vadd.f32 %v5804_v35, %v5803_v28  ;;  %v5806_v45 = vpop.f32.mrb[14].mxu1  ;;  %v2650_v28 = vld [vmem:[#allocation3 + $0x8] sm:$0xf] }
 0x19f   :  { %v2358_v47 = vmax.f32 %v2302_v52, 0.0  ;;  %v2305_v48 = vadd.f32 %v5996_v39, %v2208_v50  ;;  %v2296_v30 = vpop.f32.mrb[35].mxu0  ;;  %v5807_v51 = vpop.f32.mrb[15].mxu1  ;;  %v2656_v52 = vld [vmem:[#allocation3 + $0xc] sm:$0x1] }
 0x1a0   :  { %v2356_v54 = vmax.f32 %v2294_v22, 0.0  ;;  %v2297_v55 = vadd.f32 %v2296_v30, %v7331_v10  ;;  %v5808_v58 = vadd.f32 %v5807_v51, %v5806_v45  ;;  %v2221_v63 = vadd.f32 %v5805_v44, %v2124_v40  ;;  %v2668_v10 = vld [vmem:[#allocation3 + $0x1c] sm:$0x1] }
 0x1a1   :  { %v5691_v59 = vpack.c.bf16 %v2358_v47, %v2358_v47  ;;  %v2359_v7 = vmax.f32 %v2305_v48, 0.0  ;;  %v2671_v48 = vld [vmem:[#allocation3 + $0x20] sm:$0xf] }
 0x1a2   :  { %v5689_v0 = vpack.c.bf16 %v2356_v54, %v2356_v54  ;;  %v2357_v1 = vmax.f32 %v2297_v55, 0.0  ;;  %v7413_v6 = vadd.f32 %v5808_v58, %v2127_v20  ;;  %v6105_v55 = vld [vmem:[%s8106_s3 + $0x48] sm:$0xff]   ;;  %v6127_v20 = vld [vmem:[%s8106_s3 + $0xd8] sm:$0xff]  }
 0x1a3   :  { %v2503_v50 = vshrl.u32 %v5691_v59, 16  ;;  %v2506_v4 = vshll.u32 %v5691_v59, 16  ;;  %v5692_v5 = vpack.c.bf16 %v2359_v7, %v2359_v7  ;;  %5847 = vmatprep.subr.bf16.mxu1 %v6105_v55 }
 0x1a4   :  { %v2487_v11 = vshrl.u32 %v5689_v0, 16  ;;  %v2490_v12 = vshll.u32 %v5689_v0, 16  ;;  %v5690_v13 = vpack.c.bf16 %v2357_v1, %v2357_v1  ;;  %v5999_v16 = vpop.f32.mrb[36].mxu0  ;;  %v5809_v40 = vpop.f32.mrb[16].mxu1  ;;  %v2674_v0 = vld [vmem:[#allocation3 + $0x24] sm:$0x1] }
 0x1a5   :  { %v2505_v46 = vrot.slane %v2503_v50, 7  ;;  %v2511_v31 = vshrl.u32 %v5692_v5, 16  ;;  %v2514_v35 = vshll.u32 %v5692_v5, 16  ;;  %v2318_v22 = vadd.f32 %v5999_v16, %v2221_v63  ;;  %v2309_v39 = vpop.f32.mrb[37].mxu0  ;;  %v5810_v44 = vpop.f32.mrb[17].mxu1 }
 0x1a6   :  { %v2489_v47 = vrot.slane %v2487_v11, 7  ;;  %v2495_v30 = vshrl.u32 %v5690_v13, 16  ;;  %v2498_v34 = vshll.u32 %v5690_v13, 16  ;;  %v2310_v51 = vadd.f32 %v2309_v39, %v7352_v17  ;;  %v6000_v54 = vpop.f32.mrb[38].mxu0  ;;  %v5812_v58 = vpop.f32.mrb[18].mxu1 }
 0x1a7   :  { %v5811_v56 = vadd.f32 %v5810_v44, %v5809_v40  ;;  %v2508_v59 = vor.u32 %v2506_v4, %v2505_v46  ;;  %v2509_v7 = vrot.slane %v2505_v46, 4  ;;  %v2513_v63 = vrot.slane %v2511_v31, 7  ;;  %v2659_v1 = vld [vmem:[#allocation3 + $0x10] sm:$0xf]  ;;  %v2312_v50 = vpop.f32.mrb[39].mxu0  ;;  %v5813_v5 = vpop.f32.mrb[19].mxu1 }
 0x1a8   :  { %v2492_v11 = vor.u32 %v2490_v12, %v2489_v47  ;;  %v2493_v13 = vrot.slane %v2489_v47, 4  ;;  %v2497_v16 = vrot.slane %v2495_v30, 7  ;;  %v2662_v17 = vld [vmem:[#allocation3 + $0x14] sm:$0x1]  ;;  %v2362_v39 = vmax.f32 %v2318_v22, 0.0  ;;  %v6106_v22 = vld [vmem:[%s8106_s3 + $0x8] sm:$0xff]  }
 0x1a9   :  { %v5814_v18 = vadd.f32 %v5813_v5, %v5812_v58  ;;  %v2666_v53 = vsel %vm7422_vm12, %v2508_v59, %v2665_v57  ;;  %v2669_v4 = vsel %vm7431_vm13, %v2509_v7, %v2668_v10  ;;  %v2516_v40 = vor.u32 %v2514_v35, %v2513_v63  ;;  %5848 = vmatpush3.bf16.msra.mxu1 %v6106_v22 }
 0x1aa   :  { %2667 = vst [vmem:[#allocation3 + $0x18] sm:$0xf] %v2666_v53  ;;  %2670 = vst [vmem:[#allocation3 + $0x1c] sm:$0x1] %v2669_v4  ;;  %v2651_v46 = vsel %vm7422_vm12, %v2492_v11, %v2650_v28  ;;  %v2657_v12 = vsel %vm7431_vm13, %v2493_v13, %v2656_v52  ;;  %v2517_v31 = vrot.slane %v2513_v63, 4  ;;  %v2500_v41 = vor.u32 %v2498_v34, %v2497_v16  ;;  %v6107_v28 = vld [vmem:[%s8106_s3 + $0x50] sm:$0xff]  }
 0x1ab   :  { %2652 = vst [vmem:[#allocation3 + $0x8] sm:$0xf] %v2651_v46  ;;  %2658 = vst [vmem:[#allocation3 + $0xc] sm:$0x1] %v2657_v12  ;;  %v2672_v57 = vsel %vm7422_vm12, %v2516_v40, %v2671_v48  ;;  %v2501_v10 = vrot.slane %v2497_v16, 4  ;;  %v5695_v53 = vpack.c.bf16 %v2362_v39, %v2362_v39  ;;  %v2360_v35 = vmax.f32 %v2310_v51, 0.0  ;;  %5849 = vmatprep.subr.bf16.mxu1 %v6107_v28 }
 0x1ac   :  { %v6108_v52 = vld [vmem:[%s8106_s3 + $0x10] sm:$0xff]   ;;  %2673 = vst [vmem:[#allocation3 + $0x20] sm:$0xf] %v2672_v57  ;;  %v2675_v44 = vsel %vm7431_vm13, %v2517_v31, %v2674_v0  ;;  %v2660_v47 = vsel %vm7422_vm12, %v2500_v41, %v2659_v1  ;;  %v2321_v48 = vadd.f32 %v6000_v54, %v7413_v6  ;;  %v2313_v30 = vadd.f32 %v2312_v50, %v7362_v21  ;;  %v7464_v34 = vpop.f32.mrb[40].mxu0  ;;  %v6109_v51 = vld [vmem:[%s8106_s3 + $0x58] sm:$0xff]   ;;  %v5815_v58 = vpop.f32.mrb[20].mxu1 }
 0x1ad   :  { %2676 = vst [vmem:[#allocation3 + $0x24] sm:$0x1] %v2675_v44  ;;  %2661 = vst [vmem:[#allocation3 + $0x10] sm:$0xf] %v2660_v47  ;;  %v2663_v55 = vsel %vm7431_vm13, %v2501_v10, %v2662_v17  ;;  %v2535_v59 = vshrl.u32 %v5695_v53, 16  ;;  %v2538_v7 = vshll.u32 %v5695_v53, 16  ;;  %v5693_v63 = vpack.c.bf16 %v2360_v35, %v2360_v35  ;;  %5850 = vmatpush3.bf16.msra.mxu1 %v6108_v52 }
 0x1ae   :  { %v2325_v0 = vpop.f32.mrb[41].mxu0  ;;  %2664 = vst [vmem:[#allocation3 + $0x14] sm:$0x1] %v2663_v55  ;;  %v5816_v21 = vpop.f32.mrb[21].mxu1  ;;  %v2689_v6 = vld [vmem:[#allocation3 + $0x38] sm:$0xf]  ;;  %v2229_v5 = vadd.f32 %v5811_v56, %v7370_v24  ;;  %v2232_v13 = vadd.f32 %v5814_v18, %v7374_v25  ;;  %5851 = vmatprep.subr.bf16.mxu1 %v6109_v51 }
 0x1af   :  { %v2692_v54 = vld [vmem:[#allocation3 + $0x3c] sm:$0x1]  ;;  %v2363_v1 = vmax.f32 %v2321_v48, 0.0  ;;  %v2361_v50 = vmax.f32 %v2313_v30, 0.0  ;;  %v7472_v11 = vpop.f32.mrb[42].mxu0  ;;  %v5817_v16 = vadd.f32 %v5816_v21, %v5815_v58  ;;  %v5818_v17 = vpop.f32.mrb[22].mxu1 }
 0x1b0   :  { %v2537_v39 = vrot.slane %v2535_v59, 7  ;;  %v2519_v4 = vshrl.u32 %v5693_v63, 16  ;;  %v2522_v40 = vshll.u32 %v5693_v63, 16  ;;  %v2328_v46 = vpop.f32.mrb[43].mxu0  ;;  %v5819_v12 = vpop.f32.mrb[23].mxu1  ;;  %v2326_v10 = vadd.f32 %v2325_v0, %v2229_v5  ;;  %v6110_v24 = vld [vmem:[%s8106_s3 + $0x18] sm:$0xff]  }
 0x1b1   :  { %v2677_v31 = vld [vmem:[#allocation3 + $0x28] sm:$0xf]  ;;  %v2680_v41 = vld [vmem:[#allocation3 + $0x2c] sm:$0x1]  ;;  %v5696_v22 = vpack.c.bf16 %v2363_v1, %v2363_v1  ;;  %v5694_v57 = vpack.c.bf16 %v2361_v50, %v2361_v50  ;;  %v7475_v53 = vadd.f32 %v2328_v46, %v2232_v13  ;;  %v5820_v25 = vadd.f32 %v5819_v12, %v5818_v17  ;;  %v6111_v28 = vld [vmem:[%s8106_s3 + $0x60] sm:$0xff]   ;;  %5852 = vmatpush3.bf16.msra.mxu1 %v6110_v24 }
 0x1b2   :  { %v2540_v56 = vor.u32 %v2538_v7, %v2537_v39  ;;  %v2541_v18 = vrot.slane %v2537_v39, 4  ;;  %v2521_v35 = vrot.slane %v2519_v4, 7  ;;  %v2695_v63 = vld [vmem:[#allocation3 + $0x40] sm:$0xf]  ;;  %v2698_v51 = vld [vmem:[#allocation3 + $0x44] sm:$0x1]  ;;  %5853 = vmatprep.subr.bf16.mxu1 %v6111_v28 }
 0x1b3   :  { %v2543_v44 = vshrl.u32 %v5696_v22, 16  ;;  %v2546_v47 = vshll.u32 %v5696_v22, 16  ;;  %v2527_v48 = vshrl.u32 %v5694_v57, 16  ;;  %v2530_v30 = vshll.u32 %v5694_v57, 16  ;;  %v7483_v55 = vld [vmem:[#allocation3 + $0x20] sm:$0xe] }
 0x1b4   :  { %v2690_v52 = vsel %vm7422_vm12, %v2540_v56, %v2689_v6  ;;  %v2693_v58 = vsel %vm7431_vm13, %v2541_v18, %v2692_v54  ;;  %v2524_v59 = vor.u32 %v2522_v40, %v2521_v35  ;;  %v2525_v7 = vrot.slane %v2521_v35, 4  ;;  %v2683_v0 = vld [vmem:[#allocation3 + $0x30] sm:$0xf]  ;;  %v2686_v21 = vld [vmem:[#allocation3 + $0x34] sm:$0x1]  ;;  %v6112_v1 = vld [vmem:[%s8106_s3 + $0x20] sm:$0xff]  }
 0x1b5   :  { %v7492_v50 = vld [vmem:[#allocation3 + $0x24] sm:$0x1]  ;;  %v5574_v5 = vrot.slane %v7483_v55, 9  ;;  %2691 = vst [vmem:[#allocation3 + $0x38] sm:$0xf] %v2690_v52  ;;  %v2545_v6 = vrot.slane %v2543_v44, 7  ;;  %v2237_v54 = vadd.f32 %v5817_v16, %v7378_v43  ;;  %5854 = vmatpush3.bf16.msra.mxu1 %v6112_v1 }
 0x1b6   :  { %2694 = vst [vmem:[#allocation3 + $0x3c] sm:$0x1] %v2693_v58  ;;  %v2529_v13 = vrot.slane %v2527_v48, 7  ;;  %v7496_v17 = vpop.f32.mrb[44].mxu0  ;;  %v3544_v39 = vrot.slane %v7492_v50, 5  ;;  %v2678_v4 = vsel %vm7422_vm12, %v2524_v59, %v2677_v31  ;;  %v2681_v40 = vsel %vm7431_vm13, %v2525_v7, %v2680_v41  ;;  %v5821_v46 = vpop.f32.mrb[24].mxu1 }
 0x1b7   :  { %v2364_v12 = vmax.f32 %v2326_v10, 0.0  ;;  %v2341_v22 = vpop.f32.mrb[45].mxu0  ;;  %2679 = vst [vmem:[#allocation3 + $0x28] sm:$0xf] %v2678_v4  ;;  %2682 = vst [vmem:[#allocation3 + $0x2c] sm:$0x1] %v2681_v40  ;;  %v2548_v57 = vor.u32 %v2546_v47, %v2545_v6  ;;  %v2334_v31 = vadd.f32 %v7464_v34, %v2237_v54  ;;  %v2240_v41 = vadd.f32 %v5820_v25, %v7386_v27 }
 0x1b8   :  { %v2549_v56 = vrot.slane %v2545_v6, 4  ;;  %v2532_v43 = vor.u32 %v2530_v30, %v2529_v13  ;;  %v2533_v16 = vrot.slane %v2529_v13, 4  ;;  %v5822_v18 = vpop.f32.mrb[25].mxu1  ;;  %v7503_v24 = vpop.f32.mrb[46].mxu0  ;;  %v6095_v35 = vld [vmem:[#allocation3 + $0x8] ss:$8 sps:$4 sm:$0xff]  }
 0x1b9   :  { %v5823_v44 = vadd.f32 %v5822_v18, %v5821_v46  ;;  %v5824_v48 = vpop.f32.mrb[26].mxu1  ;;  %v5697_v52 = vpack.c.bf16 %v2364_v12, %v2364_v12  ;;  %v2344_v10 = vpop.f32.mrb[47].mxu0  ;;  %v7507_v58 = vld [vmem:[#allocation3 + $0x8] sm:$0xf]  ;;  %v2696_v28 = vsel %vm7422_vm12, %v2548_v57, %v2695_v63  ;;  %3053 = vrot.lane.b32.xlu0 %v6095_v35, %s6156_s22  ;;  %v2366_v25 = vmax.f32 %v2334_v31, 0.0 }
 0x1ba   :  { %v2699_v47 = vsel %vm7431_vm13, %v2549_v56, %v2698_v51  ;;  %v2684_v30 = vsel %vm7422_vm12, %v2532_v43, %v2683_v0  ;;  %v2687_v59 = vsel %vm7431_vm13, %v2533_v16, %v2686_v21  ;;  %v5825_v7 = vpop.f32.mrb[27].mxu1  ;;  %v6113_v27 = vld [vmem:[%s8106_s3 + $0x68] sm:$0xff]   ;;  %2697 = vst [vmem:[#allocation3 + $0x40] sm:$0xf] %v2696_v28  ;;  %v2337_v21 = vadd.f32 %v7472_v11, %v2240_v41  ;;  %v6096_v54 = vld [vmem:[#allocation3 + $0x18] ss:$8 sps:$4 sm:$0xff]  }
 0x1bb   :  { %2700 = vst [vmem:[#allocation3 + $0x44] sm:$0x1] %v2699_v47  ;;  %2685 = vst [vmem:[#allocation3 + $0x30] sm:$0xf] %v2684_v30  ;;  %v5826_v34 = vadd.f32 %v5825_v7, %v5824_v48  ;;  %v2551_v63 = vshrl.u32 %v5697_v52, 16  ;;  %v2554_v51 = vshll.u32 %v5697_v52, 16  ;;  %v2245_v13 = vadd.f32 %v5823_v44, %v7389_v49  ;;  %5855 = vmatprep.subr.bf16.mxu1 %v6113_v27 }
 0x1bc   :  { %2688 = vst [vmem:[#allocation3 + $0x34] sm:$0x1] %v2687_v59  ;;  %v6114_v0 = vld [vmem:[%s8106_s3 + $0x28] sm:$0xff]   ;;  %v2365_v6 = vmax.f32 %v7475_v53, 0.0  ;;  %v2816_v4 = vshrl.u32 %v7507_v58, 16  ;;  %v5699_v40 = vpack.c.bf16 %v2366_v25, %v2366_v25  ;;  %v2819_v1 = vshll.u32 %v7507_v58, 16 }
 0x1bd   :  { %v2553_v46 = vrot.slane %v2551_v63, 7  ;;  %v2248_v12 = vadd.f32 %v5826_v34, %v7396_v32  ;;  %v2701_v57 = vld [vmem:[#allocation3 + $0x58] sm:$0xf]  ;;  %v2704_v56 = vld [vmem:[#allocation3 + $0x5c] sm:$0x1]  ;;  %v2367_v43 = vmax.f32 %v2337_v21, 0.0  ;;  %v2342_v18 = vadd.f32 %v2341_v22, %v2245_v13  ;;  %3055 = vrot.lane.b32.xlu0 %v6096_v54, %s6156_s22  ;;  %5856 = vmatpush3.bf16.msra.mxu1 %v6114_v0 }
 0x1be   :  { %v5698_v16 = vpack.c.bf16 %v2365_v6, %v2365_v6  ;;  %v7531_v11 = vrot.slane %v2816_v4, 4  ;;  %v7533_v49 = vld [vmem:[#allocation3 + $0x28] sm:$0xe]  ;;  %v7535_v53 = vld [vmem:[#allocation3 + $0x2c] sm:$0x1]  ;;  %v2567_v35 = vshrl.u32 %v5699_v40, 16 }
 0x1bf   :  { %v2570_v44 = vshll.u32 %v5699_v40, 16  ;;  %v2556_v48 = vor.u32 %v2554_v51, %v2553_v46  ;;  %v2345_v31 = vadd.f32 %v2344_v10, %v2248_v12  ;;  %v5575_v32 = vrot.slane %v7533_v49, 9  ;;  %v2713_v41 = vld [vmem:[#allocation3 + $0x68] sm:$0xf]  ;;  %v5827_v47 = vpop.f32.mrb[28].mxu1  ;;  %v6115_v13 = vld [vmem:[%s8106_s3 + $0x70] sm:$0xff]  }
 0x1c0   :  { %v3548_v52 = vrot.slane %v7535_v53, 5  ;;  %v2557_v28 = vrot.slane %v2553_v46, 4  ;;  %v5700_v22 = vpack.c.bf16 %v2367_v43, %v2367_v43  ;;  %v2569_v30 = vrot.slane %v2567_v35, 7  ;;  %v2716_v59 = vld [vmem:[#allocation3 + $0x6c] sm:$0x1]  ;;  %v5828_v25 = vpop.f32.mrb[29].mxu1  ;;  %5857 = vmatprep.subr.bf16.mxu1 %v6115_v13 }
 0x1c1   :  { %v2702_v7 = vsel %vm7422_vm12, %v2556_v48, %v2701_v57  ;;  %v2559_v27 = vshrl.u32 %v5698_v16, 16  ;;  %v2562_v34 = vshll.u32 %v5698_v16, 16  ;;  %v2707_v0 = vld [vmem:[#allocation3 + $0x60] sm:$0xf]  ;;  %v5829_v21 = vadd.f32 %v5828_v25, %v5827_v47  ;;  %v5830_v6 = vpop.f32.mrb[30].mxu1  ;;  %v6120_v58 = vld [vmem:[%s8106_s3 + $0x88] sm:$0xff]  }
 0x1c2   :  { %2703 = vst [vmem:[#allocation3 + $0x58] sm:$0xf] %v2702_v7  ;;  %v2705_v10 = vsel %vm7431_vm13, %v2557_v28, %v2704_v56  ;;  %v2575_v63 = vshrl.u32 %v5700_v22, 16  ;;  %v2578_v51 = vshll.u32 %v5700_v22, 16  ;;  %v2572_v54 = vor.u32 %v2570_v44, %v2569_v30  ;;  %v5831_v46 = vpop.f32.mrb[31].mxu1 }
 0x1c3   :  { %v2573_v4 = vrot.slane %v2569_v30, 4  ;;  %2706 = vst [vmem:[#allocation3 + $0x5c] sm:$0x1] %v2705_v10  ;;  %v2561_v40 = vrot.slane %v2559_v27, 7  ;;  %v2368_v12 = vmax.f32 %v2342_v18, 0.0  ;;  %v5832_v35 = vadd.f32 %v5831_v46, %v5830_v6  ;;  %v6116_v18 = vld [vmem:[%s8106_s3 + $0x30] sm:$0xff]  }
 0x1c4   :  { %v6097_v57 = vld [vmem:[#allocation3 + $0x28] ss:$8 sps:$4 sm:$0xff]   ;;  %v2577_v43 = vrot.slane %v2575_v63, 7  ;;  %v2710_v16 = vld [vmem:[#allocation3 + $0x64] sm:$0x1]  ;;  %v2253_v56 = vadd.f32 %v5829_v21, %v7399_v38  ;;  %v2369_v48 = vmax.f32 %v2345_v31, 0.0  ;;  %v2714_v28 = vsel %vm7422_vm12, %v2572_v54, %v2713_v41  ;;  %5858 = vmatpush3.bf16.msra.mxu1 %v6116_v18 }
 0x1c5   :  { %v2717_v22 = vsel %vm7431_vm13, %v2573_v4, %v2716_v59  ;;  %v2719_v44 = vld [vmem:[#allocation3 + $0x70] sm:$0xf]  ;;  %v2722_v47 = vld [vmem:[#allocation3 + $0x74] sm:$0x1]  ;;  %v2564_v30 = vor.u32 %v2562_v34, %v2561_v40  ;;  %v2565_v7 = vrot.slane %v2561_v40, 4  ;;  %3057 = vrot.lane.b32.xlu0 %v6097_v57, %s6156_s22  ;;  %v5701_v41 = vpack.c.bf16 %v2368_v12, %v2368_v12  ;;  %v6117_v59 = vld [vmem:[%s8106_s3 + $0xc0] sm:$0xff]  }
 0x1c6   :  { %2715 = vst [vmem:[#allocation3 + $0x68] sm:$0xf] %v2714_v28  ;;  %2718 = vst [vmem:[#allocation3 + $0x6c] sm:$0x1] %v2717_v22  ;;  %v2580_v38 = vor.u32 %v2578_v51, %v2577_v43  ;;  %v2581_v31 = vrot.slane %v2577_v43, 4  ;;  %v2350_v27 = vadd.f32 %v7496_v17, %v2253_v56  ;;  %v2256_v10 = vadd.f32 %v5832_v35, %v7402_v3  ;;  %v6118_v57 = vld [vmem:[%s8106_s3 + $0x80] sm:$0xff]  }
 0x1c7   :  { %v2708_v34 = vsel %vm7422_vm12, %v2564_v30, %v2707_v0  ;;  %v2711_v25 = vsel %vm7431_vm13, %v2565_v7, %v2710_v16  ;;  %v5702_v63 = vpack.c.bf16 %v2369_v48, %v2369_v48  ;;  %v2788_v21 = vld [vmem:[#allocation3 + $0xc] sm:$0x1]  ;;  %v6098_v6 = vld [vmem:[#allocation3 + $0x38] ss:$8 sps:$4 sm:$0xff]   ;;  %v2583_v54 = vshrl.u32 %v5701_v41, 16  ;;  %5909 = vmatprep.subr.bf16.mxu0 %v6117_v59 }
 0x1c8   :  { %v2720_v17 = vsel %vm7422_vm12, %v2580_v38, %v2719_v44  ;;  %v2723_v51 = vsel %vm7431_vm13, %v2581_v31, %v2722_v47  ;;  %2709 = vst [vmem:[#allocation3 + $0x60] sm:$0xf] %v2708_v34  ;;  %2712 = vst [vmem:[#allocation3 + $0x64] sm:$0x1] %v2711_v25  ;;  %v2370_v13 = vmax.f32 %v2350_v27, 0.0  ;;  %v2586_v4 = vshll.u32 %v5701_v41, 16  ;;  %5910 = vmatpush3.bf16.msra.mxu0 %v6118_v57 }
 0x1c9   :  { %v2789_v0 = vld [vmem:[#allocation3 + $0x10] sm:$0xf]  ;;  %2721 = vst [vmem:[#allocation3 + $0x70] sm:$0xf] %v2720_v17  ;;  %2724 = vst [vmem:[#allocation3 + $0x74] sm:$0x1] %v2723_v51  ;;  %v2353_v40 = vadd.f32 %v7503_v24, %v2256_v10  ;;  %3059 = vrot.lane.b32.xlu0 %v6098_v6, %s6156_s22 }
 0x1ca   :  { %v2725_v3 = vld [vmem:[#allocation3 + $0x78] sm:$0xf]  ;;  %v2591_v46 = vshrl.u32 %v5702_v63, 16  ;;  %v2594_v12 = vshll.u32 %v5702_v63, 16  ;;  %v5703_v43 = vpack.c.bf16 %v2370_v13, %v2370_v13  ;;  %v2585_v16 = vrot.slane %v2583_v54, 7  ;;  %v6119_v28 = vld [vmem:[%s8106_s3 + $0xc8] sm:$0xff]  }
 0x1cb   :  { %v2728_v35 = vld [vmem:[#allocation3 + $0x7c] sm:$0x1]  ;;  %v2821_v56 = vrot.slane %v2819_v1, 5  ;;  %v2825_v48 = vshll.u32 %v2788_v21, 16  ;;  %v2371_v24 = vmax.f32 %v2353_v40, 0.0  ;;  %v2830_v47 = vshrl.u32 %v2789_v0, 16  ;;  %5911 = vmatprep.subr.bf16.mxu0 %v6119_v28 }
 0x1cc   :  { %v2593_v22 = vrot.slane %v2591_v46, 7  ;;  %v2731_v44 = vld [vmem:[#allocation3 + $0x80] sm:$0xf]  ;;  %v2833_v30 = vshll.u32 %v2789_v0, 16  ;;  %v2599_v7 = vshrl.u32 %v5703_v43, 16  ;;  %v2602_v18 = vshll.u32 %v5703_v43, 16  ;;  %5912 = vmatpush3.bf16.msra.mxu0 %v6120_v58 }
 0x1cd   :  { %v2588_v38 = vor.u32 %v2586_v4, %v2585_v16  ;;  %v2589_v31 = vrot.slane %v2585_v16, 4  ;;  %v2734_v27 = vld [vmem:[#allocation3 + $0x84] sm:$0x1]  ;;  %v2737_v1 = vld [vmem:[#allocation3 + $0x88] sm:$0xf]  ;;  %v5704_v41 = vpack.c.bf16 %v2371_v24, %v2371_v24  ;;  %v2822_v25 = vor.u32 %v2821_v56, %v7531_v11  ;;  %v6121_v10 = vld [vmem:[%s8106_s3 + $0x78] sm:$0xff]  }
 0x1ce   :  { %v2596_v59 = vor.u32 %v2594_v12, %v2593_v22  ;;  %v2597_v34 = vrot.slane %v2593_v22, 4  ;;  %v2601_v63 = vrot.slane %v2599_v7, 7  ;;  %v2827_v17 = vrot.slane %v2825_v48, 5  ;;  %v2790_v51 = vld [vmem:[#allocation3 + $0x14] sm:$0x1]  ;;  %5859 = vmatprep.subr.bf16.mxu1 %v6121_v10  ;;  %v6123_v56 = vld [vmem:[%s8106_s3 + $0x38] sm:$0xff]  }
 0x1cf   :  { %v2726_v21 = vsel %vm7422_vm12, %v2588_v38, %v2725_v3  ;;  %v2729_v6 = vsel %vm7431_vm13, %v2589_v31, %v2728_v35  ;;  %v2791_v13 = vld [vmem:[#allocation3 + $0x18] sm:$0xf]  ;;  %v2740_v54 = vld [vmem:[#allocation3 + $0x8c] sm:$0x1]  ;;  %v2607_v0 = vshrl.u32 %v5704_v41, 16  ;;  %v2610_v4 = vshll.u32 %v5704_v41, 16  ;;  %5860 = vmatpush3.bf16.msra.mxu1 %v6123_v56 }
 0x1d0   :  { %2727 = vst [vmem:[#allocation3 + $0x78] sm:$0xf] %v2726_v21  ;;  %2730 = vst [vmem:[#allocation3 + $0x7c] sm:$0x1] %v2729_v6  ;;  %v2732_v11 = vsel %vm7422_vm12, %v2596_v59, %v2731_v44  ;;  %v2735_v40 = vsel %vm7431_vm13, %v2597_v34, %v2734_v27  ;;  %v2604_v3 = vor.u32 %v2602_v18, %v2601_v63  ;;  %v2605_v46 = vrot.slane %v2601_v63, 4  ;;  %v6125_v59 = vld [vmem:[%s8106_s3 + $0x90] sm:$0xff]  }
 0x1d1   :  { %v2743_v12 = vld [vmem:[#allocation3 + $0x90] sm:$0xf]  ;;  %v2746_v57 = vld [vmem:[#allocation3 + $0x94] sm:$0x1]  ;;  %2733 = vst [vmem:[#allocation3 + $0x80] sm:$0xf] %v2732_v11 }
 0x1d2   :  { %2736 = vst [vmem:[#allocation3 + $0x84] sm:$0x1] %v2735_v40  ;;  %v2823_v43 = vrot.slane %v2822_v25, 4  ;;  %v2792_v16 = vld [vmem:[#allocation3 + $0x1c] sm:$0x1]  ;;  %v2832_v35 = vrot.slane %v2830_v47, 4  ;;  %v2738_v44 = vsel %vm7422_vm12, %v2604_v3, %v2737_v1  ;;  %v2741_v7 = vsel %vm7431_vm13, %v2605_v46, %v2740_v54 }
 0x1d3   :  { %v2609_v48 = vrot.slane %v2607_v0, 7  ;;  %v2835_v28 = vrot.slane %v2833_v30, 5  ;;  %v2839_v24 = vshll.u32 %v2790_v51, 16  ;;  %v2844_v22 = vshrl.u32 %v2791_v13, 16  ;;  %v2793_v31 = vld [vmem:[#allocation3 + $0x20] sm:$0xf] }
 0x1d4   :  { %v2828_v18 = vsel %vm6225_vm2, %v2823_v43, %v2827_v17  ;;  %v2847_v38 = vshll.u32 %v2791_v13, 16  ;;  %v6124_v47 = vld [vmem:[%s8106_s3 + $0xd0] sm:$0xff]   ;;  %2739 = vst [vmem:[#allocation3 + $0x88] sm:$0xf] %v2738_v44  ;;  %2742 = vst [vmem:[#allocation3 + $0x8c] sm:$0x1] %v2741_v7 }
 0x1d5   :  { %v2612_v30 = vor.u32 %v2610_v4, %v2609_v48  ;;  %v2613_v27 = vrot.slane %v2609_v48, 4  ;;  %v5528_v58 = vcombine.low %v2814_v19, %v2828_v18  ;;  %v2836_v1 = vor.u32 %v2835_v28, %v2832_v35  ;;  %v2794_v41 = vld [vmem:[#allocation3 + $0x24] sm:$0x1]  ;;  %v2795_v21 = vld [vmem:[#allocation3 + $0x28] sm:$0xf]  ;;  %5913 = vmatprep.subr.bf16.mxu0 %v6124_v47 }
 0x1d6   :  { %v2841_v34 = vrot.slane %v2839_v24, 5  ;;  %v2846_v25 = vrot.slane %v2844_v22, 4  ;;  %v2849_v10 = vrot.slane %v2847_v38, 5  ;;  %v2853_v63 = vshll.u32 %v2792_v16, 16  ;;  %v2796_v62 = vld [vmem:[#allocation3 + $0x2c] sm:$0x1]  ;;  %5914 = vmatpush3.bf16.msra.mxu0 %v6125_v59 }
 0x1d7   :  { %v2744_v6 = vsel %vm7422_vm12, %v2612_v30, %v2743_v12  ;;  %v2747_v17 = vsel %vm7431_vm13, %v2613_v27, %v2746_v57  ;;  %2925 = vrot.lane.b32.xlu1 %v5528_v58, %s6156_s22  ;;  %v2837_v61 = vrot.slane %v2836_v1, 4  ;;  %v2858_v19 = vshrl.u32 %v2793_v31, 16  ;;  %v3346_v4 = vld [vmem:[#allocation3 + $0x10] sm:$0xf]  ;;  %v3347_v46 = vld [vmem:[#allocation3 + $0x14] sm:$0x1]  ;;  %5915 = vmatprep.subr.bf16.mxu0 %v6127_v20 }
 0x1d8   :  { %2745 = vst [vmem:[#allocation3 + $0x90] sm:$0xf] %v2744_v6  ;;  %2748 = vst [vmem:[#allocation3 + $0x94] sm:$0x1] %v2747_v17  ;;  %v2850_v51 = vor.u32 %v2849_v10, %v2846_v25  ;;  %v2855_v13 = vrot.slane %v2853_v63, 5  ;;  %v2861_v54 = vshll.u32 %v2793_v31, 16 }
 0x1d9   :  { %v2867_v0 = vshll.u32 %v2794_v41, 16  ;;  %v2842_v45 = vsel %vm6225_vm2, %v2837_v61, %v2841_v34  ;;  %v2860_v11 = vrot.slane %v2858_v19, 4  ;;  %v2872_v40 = vshrl.u32 %v2795_v21, 16  ;;  %v6128_v12 = vld [vmem:[%s8106_s3 + $0x98] sm:$0xff]   ;;  %v2797_v47 = vld [vmem:[#allocation3 + $0x30] sm:$0xf] }
 0x1da   :  { %v2875_v3 = vshll.u32 %v2795_v21, 16  ;;  %v2851_v57 = vrot.slane %v2850_v51, 4  ;;  %v2863_v43 = vrot.slane %v2861_v54, 5  ;;  %v2881_v35 = vshll.u32 %v2796_v62, 16  ;;  %v3348_v28 = vld [vmem:[#allocation3 + $0x18] sm:$0xf]  ;;  %5916 = vmatpush3.bf16.msra.mxu0 %v6128_v12 }
 0x1db   :  { %v2869_v16 = vrot.slane %v2867_v0, 5  ;;  %v2874_v56 = vrot.slane %v2872_v40, 4  ;;  %v3363_v24 = vshrl.u32 %v3346_v4, 16  ;;  %v3366_v22 = vshll.u32 %v3346_v4, 16  ;;  %v3349_v38 = vld [vmem:[#allocation3 + $0x1c] sm:$0x1] }
 0x1dc   :  { %v2877_v48 = vrot.slane %v2875_v3, 5  ;;  %v2856_v44 = vsel %vm6225_vm2, %v2851_v57, %v2855_v13  ;;  %v2864_v7 = vor.u32 %v2863_v43, %v2860_v11  ;;  %v2883_v18 = vrot.slane %v2881_v35, 5  ;;  %v2798_v41 = vld [vmem:[#allocation3 + $0x34] sm:$0x1]  ;;  %v2799_v17 = vld [vmem:[#allocation3 + $0x38] sm:$0xf] }
 0x1dd   :  { %v3372_v31 = vshll.u32 %v3347_v46, 16  ;;  %v5529_v30 = vcombine.low %v2842_v45, %v2856_v44  ;;  %v3365_v58 = vrot.slane %v3363_v24, 4  ;;  %v3368_v1 = vrot.slane %v3366_v22, 5  ;;  %v6129_v62 = vld [vmem:[%s8106_s3 + $0x100] sm:$0xff]   ;;  %v2800_v54 = vld [vmem:[#allocation3 + $0x3c] sm:$0x1] }
 0x1de   :  { %v2878_v27 = vor.u32 %v2877_v48, %v2874_v56  ;;  %v2865_v59 = vrot.slane %v2864_v7, 4  ;;  %v3377_v25 = vshrl.u32 %v3348_v28, 16  ;;  %v3380_v10 = vshll.u32 %v3348_v28, 16  ;;  %v6131_v4 = vld [vmem:[%s8106_s3 + $0xe0] sm:$0xff]   ;;  %v3217_v3 = vld [vmem:[#allocation3 + $0x8] sm:$0xe]  ;;  %6009 = vmatprep.subr.bf16.mxu1 %v6129_v62 }
 0x1df   :  { %v3374_v34 = vrot.slane %v3372_v31, 5  ;;  %2927 = vrot.lane.b32.xlu1 %v5529_v30, %s6156_s22  ;;  %v3369_v21 = vor.u32 %v3368_v1, %v3365_v58  ;;  %v3386_v6 = vshll.u32 %v3349_v38, 16  ;;  %v2886_v61 = vshrl.u32 %v2797_v47, 16  ;;  %v6133_v46 = vld [vmem:[%s8106_s3 + $0xa0] sm:$0xff]   ;;  %v3218_v35 = vld [vmem:[#allocation3 + $0xc] sm:$0x1]  ;;  %5917 = vmatprep.subr.bf16.mxu0 %v6131_v4 }
 0x1e0   :  { %v2879_v63 = vrot.slane %v2878_v27, 4  ;;  %v2870_v19 = vsel %vm6225_vm2, %v2865_v59, %v2869_v16  ;;  %v3379_v51 = vrot.slane %v3377_v25, 4  ;;  %v3382_v13 = vrot.slane %v3380_v10, 5  ;;  %v3219_v56 = vld [vmem:[#allocation3 + $0x10] sm:$0xe]  ;;  %5918 = vmatpush3.bf16.msra.mxu0 %v6133_v46  ;;  %v6135_v7 = vld [vmem:[%s8106_s3 + $0xe8] sm:$0xff]  }
 0x1e1   :  { %v2889_v0 = vshll.u32 %v2797_v47, 16  ;;  %v3370_v45 = vrot.slane %v3369_v21, 4  ;;  %v3388_v11 = vrot.slane %v3386_v6, 5  ;;  %v2888_v40 = vrot.slane %v2886_v61, 4  ;;  %v3220_v44 = vld [vmem:[#allocation3 + $0x14] sm:$0x1]  ;;  %5919 = vmatprep.subr.bf16.mxu0 %v6135_v7 }
 0x1e2   :  { %v2884_v20 = vsel %vm6225_vm2, %v2879_v63, %v2883_v18  ;;  %v3383_v57 = vor.u32 %v3382_v13, %v3379_v51  ;;  %v2895_v16 = vshll.u32 %v2798_v41, 16  ;;  %v2900_v28 = vshrl.u32 %v2799_v17, 16  ;;  %v3350_v30 = vld [vmem:[#allocation3 + $0x20] sm:$0xf]  ;;  %v6136_v27 = vld [vmem:[%s8106_s3 + $0xa8] sm:$0xff]  }
 0x1e3   :  { %v5530_v12 = vcombine.low %v2870_v19, %v2884_v20  ;;  %v2891_v43 = vrot.slane %v2889_v0, 5  ;;  %v3375_v48 = vsel %vm6225_vm2, %v3370_v45, %v3374_v34  ;;  %v2903_v24 = vshll.u32 %v2799_v17, 16  ;;  %v3351_v34 = vld [vmem:[#allocation3 + $0x24] sm:$0x1]  ;;  %v3352_v6 = vld [vmem:[#allocation3 + $0x28] sm:$0xf] }
 0x1e4   :  { %v2909_v22 = vshll.u32 %v2800_v54, 16  ;;  %v3384_v18 = vrot.slane %v3383_v57, 4  ;;  %v2897_v31 = vrot.slane %v2895_v16, 5  ;;  %v5552_v47 = vrot.slane %v3217_v3, 9  ;;  %v6137_v17 = vld [vmem:[%s8106_s3 + $0xf0] sm:$0xff]   ;;  %5920 = vmatpush3.bf16.msra.mxu0 %v6136_v27 }
 0x1e5   :  { %2929 = vrot.lane.b32.xlu1 %v5530_v12, %s6156_s22  ;;  %v2892_v38 = vor.u32 %v2891_v43, %v2888_v40  ;;  %v2902_v58 = vrot.slane %v2900_v28, 4  ;;  %v2905_v1 = vrot.slane %v2903_v24, 5  ;;  %v3251_v59 = vrot.slane %v3218_v35, 5  ;;  %v3353_v51 = vld [vmem:[#allocation3 + $0x2c] sm:$0x1]  ;;  %5921 = vmatprep.subr.bf16.mxu0 %v6137_v17  ;;  %v6139_v16 = vld [vmem:[%s8106_s3 + $0xb0] sm:$0xff]  }
 0x1e6   :  { %v2911_v41 = vrot.slane %v2909_v22, 5  ;;  %v3389_v25 = vsel %vm6225_vm2, %v3384_v18, %v3388_v11  ;;  %v5553_v63 = vrot.slane %v3219_v56, 9  ;;  %v3255_v21 = vrot.slane %v3220_v44, 5  ;;  %v3625_v54 = vld [vmem:[#allocation3 + $0x58] sm:$0xf] }
 0x1e7   :  { %v2893_v10 = vrot.slane %v2892_v38, 4  ;;  %v5568_v61 = vcombine.low %v3375_v48, %v3389_v25  ;;  %v2906_v62 = vor.u32 %v2905_v1, %v2902_v58  ;;  %v7658_v19 = vsel %vm6436_vm5, %v5552_v47, %v3251_v59  ;;  %v3626_v11 = vld [vmem:[#allocation3 + $0x5c] sm:$0x1]  ;;  %v6099_v3 = vld [vmem:[#allocation3 + $0x58] ss:$8 sps:$4 sm:$0xff]  }
 0x1e8   :  { %v3391_v13 = vshrl.u32 %v3350_v30, 16  ;;  %v3256_v4 = vsel %vm6436_vm5, %v5553_v63, %v3255_v21  ;;  %v3394_v20 = vshll.u32 %v3350_v30, 16  ;;  %v3400_v45 = vshll.u32 %v3351_v34, 16  ;;  %v3221_v43 = vld [vmem:[#allocation3 + $0x18] sm:$0xe]  ;;  %5922 = vmatpush3.bf16.msra.mxu0 %v6139_v16 }
 0x1e9   :  { %v2898_v0 = vsel %vm6225_vm2, %v2893_v10, %v2897_v31  ;;  %3486 = vrot.lane.b32.xlu0 %v5568_v61, %s6156_s22  ;;  %v2907_v40 = vrot.slane %v2906_v62, 4  ;;  %v5560_v46 = vcombine.low %v7658_v19, %v3256_v4  ;;  %v3405_v57 = vshrl.u32 %v3352_v6, 16  ;;  %v3222_v24 = vld [vmem:[#allocation3 + $0x1c] sm:$0x1]  ;;  %v3223_v38 = vld [vmem:[#allocation3 + $0x20] sm:$0xe] }
 0x1ea   :  { %v3393_v12 = vrot.slane %v3391_v13, 4  ;;  %v3396_v35 = vrot.slane %v3394_v20, 5  ;;  %v3402_v56 = vrot.slane %v3400_v45, 5  ;;  %v3408_v48 = vshll.u32 %v3352_v6, 16  ;;  %v6141_v31 = vld [vmem:[%s8106_s3 + $0xf8] sm:$0xff]  }
 0x1eb   :  { %v3414_v28 = vshll.u32 %v3353_v51, 16  ;;  %v2912_v22 = vsel %vm6225_vm2, %v2907_v40, %v2911_v41  ;;  %v3407_v44 = vrot.slane %v3405_v57, 4  ;;  %v3654_v7 = vshrl.u32 %v3625_v54, 16  ;;  %v3224_v1 = vld [vmem:[#allocation3 + $0x24] sm:$0x1]  ;;  %5923 = vmatprep.subr.bf16.mxu0 %v6141_v31  ;;  %v6142_v62 = vld [vmem:[%s8106_s3 + $0xb8] sm:$0xff]  }
 0x1ec   :  { %v3657_v18 = vshll.u32 %v3625_v54, 16  ;;  %v5531_v47 = vcombine.low %v2898_v0, %v2912_v22  ;;  %v3397_v30 = vor.u32 %v3396_v35, %v3393_v12  ;;  %v3410_v27 = vrot.slane %v3408_v48, 5  ;;  %v3354_v59 = vld [vmem:[#allocation3 + $0x30] sm:$0xf]  ;;  %v3355_v61 = vld [vmem:[#allocation3 + $0x34] sm:$0x1]  ;;  %5924 = vmatpush3.bf16.msra.mxu0 %v6142_v62 }
 0x1ed   :  { %v3416_v58 = vrot.slane %v3414_v28, 5  ;;  %3892 = vrot.lane.b32.xlu0 %v6099_v3, %s6156_s22  ;;  %v3656_v34 = vrot.slane %v3654_v7, 4  ;;  %v3663_v41 = vshll.u32 %v3626_v11, 16  ;;  %v5554_v10 = vrot.slane %v3221_v43, 9  ;;  %v3356_v54 = vld [vmem:[#allocation3 + $0x38] sm:$0xf] }
 0x1ee   :  { %v3659_v25 = vrot.slane %v3657_v18, 5  ;;  %2931 = vrot.lane.b32.xlu1 %v5531_v47, %s6156_s22  ;;  %v3398_v63 = vrot.slane %v3397_v30, 4  ;;  %v3411_v21 = vor.u32 %v3410_v27, %v3407_v44  ;;  %v3259_v6 = vrot.slane %v3222_v24, 5  ;;  %v3357_v12 = vld [vmem:[#allocation3 + $0x3c] sm:$0x1] }
 0x1ef   :  { %v5555_v17 = vrot.slane %v3223_v38, 9  ;;  %v3665_v51 = vrot.slane %v3663_v41, 5  ;;  %v3263_v13 = vrot.slane %v3224_v1, 5  ;;  %v3419_v0 = vshrl.u32 %v3354_v59, 16  ;;  %v3627_v28 = vld [vmem:[#allocation3 + $0x60] sm:$0xf] }
 0x1f0   :  { %v3660_v19 = vor.u32 %v3659_v25, %v3656_v34  ;;  %v3403_v4 = vsel %vm6225_vm2, %v3398_v63, %v3402_v56  ;;  %v3412_v20 = vrot.slane %v3411_v21, 4  ;;  %v3260_v45 = vsel %vm6436_vm5, %v5554_v10, %v3259_v6  ;;  %v3628_v24 = vld [vmem:[#allocation3 + $0x64] sm:$0x1]  ;;  %v3629_v38 = vld [vmem:[#allocation3 + $0x68] sm:$0xf] }
 0x1f1   :  { %v3422_v11 = vshll.u32 %v3354_v59, 16  ;;  %v3264_v3 = vsel %vm6436_vm5, %v5555_v17, %v3263_v13  ;;  %v3421_v57 = vrot.slane %v3419_v0, 4  ;;  %v3428_v43 = vshll.u32 %v3355_v61, 16  ;;  %v3630_v27 = vld [vmem:[#allocation3 + $0x6c] sm:$0x1] }
 0x1f2   :  { %v3661_v40 = vrot.slane %v3660_v19, 4  ;;  %3293 = vrot.lane.b32.xlu1 %v5560_v46, %s6156_s22  ;;  %v3417_v16 = vsel %vm6225_vm2, %v3412_v20, %v3416_v58  ;;  %v5561_v35 = vcombine.low %v3260_v45, %v3264_v3  ;;  %v3433_v48 = vshrl.u32 %v3356_v54, 16  ;;  %v3225_v58 = vld [vmem:[#allocation3 + $0x28] sm:$0xe]  ;;  %v3226_v10 = vld [vmem:[#allocation3 + $0x2c] sm:$0x1] }
 0x1f3   :  { %v3424_v56 = vrot.slane %v3422_v11, 5  ;;  %v5569_v22 = vcombine.low %v3403_v4, %v3417_v16  ;;  %v3430_v7 = vrot.slane %v3428_v43, 5  ;;  %v3436_v18 = vshll.u32 %v3356_v54, 16  ;;  %v6100_v1 = vld [vmem:[#allocation3 + $0x68] ss:$8 sps:$4 sm:$0xff]  }
 0x1f4   :  { %v3666_v44 = vsel %vm6225_vm2, %v3661_v40, %v3665_v51  ;;  %v3435_v47 = vrot.slane %v3433_v48, 4  ;;  %v3442_v30 = vshll.u32 %v3357_v12, 16  ;;  %v3668_v34 = vshrl.u32 %v3627_v28, 16  ;;  %v3227_v9 = vld [vmem:[#allocation3 + $0x30] sm:$0xe] }
 0x1f5   :  { %v5588_v46 = vcombine.low %v3652_v23, %v3666_v44  ;;  %v3425_v31 = vor.u32 %v3424_v56, %v3421_v57  ;;  %3488 = vrot.lane.b32.xlu0 %v5569_v22, %s6156_s22  ;;  %v3438_v59 = vrot.slane %v3436_v18, 5  ;;  %v3671_v25 = vshll.u32 %v3627_v28, 16  ;;  %v3228_v19 = vld [vmem:[#allocation3 + $0x34] sm:$0x1]  ;;  %v3358_v4 = vld [vmem:[#allocation3 + $0x40] sm:$0xf] }
 0x1f6   :  { %v3677_v41 = vshll.u32 %v3628_v24, 16  ;;  %v3444_v21 = vrot.slane %v3442_v30, 5  ;;  %v3682_v6 = vshrl.u32 %v3629_v38, 16  ;;  %v3685_v8 = vshll.u32 %v3629_v38, 16  ;;  %v3359_v16 = vld [vmem:[#allocation3 + $0x44] sm:$0x1] }
 0x1f7   :  { %3763 = vrot.lane.b32.xlu1 %v5588_v46, %s6156_s22  ;;  %v3426_v63 = vrot.slane %v3425_v31, 4  ;;  %v3439_v23 = vor.u32 %v3438_v59, %v3435_v47  ;;  %v3670_v17 = vrot.slane %v3668_v34, 4  ;;  %v3673_v61 = vrot.slane %v3671_v25, 5  ;;  %v3631_v22 = vld [vmem:[#allocation3 + $0x70] sm:$0xf] }
 0x1f8   :  { %v3679_v62 = vrot.slane %v3677_v41, 5  ;;  %v3684_v13 = vrot.slane %v3682_v6, 4  ;;  %v3687_v54 = vrot.slane %v3685_v8, 5  ;;  %v3691_v0 = vshll.u32 %v3630_v27, 16  ;;  %v3632_v44 = vld [vmem:[#allocation3 + $0x74] sm:$0x1] }
 0x1f9   :  { %v3431_v51 = vsel %vm6225_vm2, %v3426_v63, %v3430_v7  ;;  %3894 = vrot.lane.b32.xlu0 %v6100_v1, %s6156_s22  ;;  %v3440_v20 = vrot.slane %v3439_v23, 4  ;;  %v3674_v45 = vor.u32 %v3673_v61, %v3670_v17  ;;  %v5556_v11 = vrot.slane %v3225_v58, 9  ;;  %v3633_v46 = vld [vmem:[#allocation3 + $0x78] sm:$0xf]  ;;  %v3634_v31 = vld [vmem:[#allocation3 + $0x7c] sm:$0x1] }
 0x1fa   :  { %v3267_v40 = vrot.slane %v3226_v10, 5  ;;  %v3688_v3 = vor.u32 %v3687_v54, %v3684_v13  ;;  %v3693_v12 = vrot.slane %v3691_v0, 5  ;;  %v5557_v57 = vrot.slane %v3227_v9, 9  ;;  %v3229_v1 = vld [vmem:[#allocation3 + $0x38] sm:$0xe] }
 0x1fb   :  { %3295 = vrot.lane.b32.xlu1 %v5561_v35, %s6156_s22  ;;  %v3271_v43 = vrot.slane %v3228_v19, 5  ;;  %v3445_v56 = vsel %vm6225_vm2, %v3440_v20, %v3444_v21  ;;  %v3675_v48 = vrot.slane %v3674_v45, 4  ;;  %v3447_v24 = vshrl.u32 %v3358_v4, 16  ;;  %v3230_v59 = vld [vmem:[#allocation3 + $0x3c] sm:$0x1] }
 0x1fc   :  { %v3268_v28 = vsel %vm6436_vm5, %v5556_v11, %v3267_v40  ;;  %v5570_v7 = vcombine.low %v3431_v51, %v3445_v56  ;;  %v3689_v18 = vrot.slane %v3688_v3, 4  ;;  %v3450_v38 = vshll.u32 %v3358_v4, 16  ;;  %v6101_v25 = vld [vmem:[#allocation3 + $0x78] ss:$8 sps:$4 sm:$0xff]   ;;  %v3232_v17 = vld [vmem:[#allocation3 + $0x44] sm:$0x1] }
 0x1fd   :  { %v3272_v35 = vsel %vm6436_vm5, %v5557_v57, %v3271_v43  ;;  %v3680_v47 = vsel %vm6225_vm2, %v3675_v48, %v3679_v62  ;;  %v3449_v27 = vrot.slane %v3447_v24, 4  ;;  %v3456_v58 = vshll.u32 %v3359_v16, 16  ;;  %v3231_v21 = vld [vmem:[#allocation3 + $0x40] sm:$0xe]  ;;  %v4186_v16 = vld [vmem:[#allocation3 + $0x64] sm:$0x1] }
 0x1fe   :  { %v5562_v30 = vcombine.low %v3268_v28, %v3272_v35  ;;  %3490 = vrot.lane.b32.xlu0 %v5570_v7, %s6156_s22  ;;  %v3694_v34 = vsel %vm6225_vm2, %v3689_v18, %v3693_v12  ;;  %v3452_v41 = vrot.slane %v3450_v38, 5  ;;  %v3696_v10 = vshrl.u32 %v3631_v22, 16  ;;  %v4185_v13 = vld [vmem:[#allocation3 + $0x60] sm:$0xf]  ;;  %v4188_v7 = vld [vmem:[#allocation3 + $0x6c] sm:$0x1] }
 0x1ff   :  { %v3699_v63 = vshll.u32 %v3631_v22, 16  ;;  %v5589_v6 = vcombine.low %v3680_v47, %v3694_v34  ;;  %v3458_v8 = vrot.slane %v3456_v58, 5  ;;  %v3705_v9 = vshll.u32 %v3632_v44, 16  ;;  %v4187_v44 = vld [vmem:[#allocation3 + $0x68] sm:$0xf] }
 0x200   :  { %v3710_v23 = vshrl.u32 %v3633_v46, 16  ;;  %v3453_v61 = vor.u32 %v3452_v41, %v3449_v27  ;;  %v3698_v62 = vrot.slane %v3696_v10, 4  ;;  %v3713_v51 = vshll.u32 %v3633_v46, 16  ;;  %v3636_v47 = vld [vmem:[#allocation3 + $0x84] sm:$0x1] }
 0x201   :  { %v3701_v19 = vrot.slane %v3699_v63, 5  ;;  %3765 = vrot.lane.b32.xlu1 %v5589_v6, %s6156_s22  ;;  %v3707_v54 = vrot.slane %v3705_v9, 5  ;;  %v3719_v4 = vshll.u32 %v3634_v31, 16  ;;  %v5558_v20 = vrot.slane %v3229_v1, 9  ;;  %v3635_v31 = vld [vmem:[#allocation3 + $0x80] sm:$0xf] }
 0x202   :  { %v3712_v0 = vrot.slane %v3710_v23, 4  ;;  %3896 = vrot.lane.b32.xlu0 %v6101_v25, %s6156_s22  ;;  %v3454_v45 = vrot.slane %v3453_v61, 4  ;;  %v3715_v40 = vrot.slane %v3713_v51, 5  ;;  %v3275_v3 = vrot.slane %v3230_v59, 5  ;;  %v6102_v34 = vld [vmem:[#allocation3 + $0x88] ss:$8 sps:$4 sm:$0xff]  }
 0x203   :  { %v3702_v11 = vor.u32 %v3701_v19, %v3698_v62  ;;  %v3721_v12 = vrot.slane %v3719_v4, 5  ;;  %v5559_v57 = vrot.slane %v3231_v21, 9  ;;  %v3279_v43 = vrot.slane %v3232_v17, 5  ;;  %v3638_v41 = vld [vmem:[#allocation3 + $0x8c] sm:$0x1] }
 0x204   :  { %v4202_v56 = vshrl.u32 %v4185_v13, 16  ;;  %v3459_v48 = vsel %vm6225_vm2, %v3454_v45, %v3458_v8  ;;  %v3716_v24 = vor.u32 %v3715_v40, %v3712_v0  ;;  %v3276_v22 = vsel %vm6436_vm5, %v5558_v20, %v3275_v3  ;;  %v4189_v10 = vld [vmem:[#allocation3 + $0x70] sm:$0xf]  ;;  %v4191_v0 = vld [vmem:[#allocation3 + $0x78] sm:$0xf] }
 0x205   :  { %v3703_v28 = vrot.slane %v3702_v11, 4  ;;  %3297 = vrot.lane.b32.xlu1 %v5562_v30, %s6156_s22  ;;  %v5571_v18 = vcombine.low %v3459_v48, %v3473_v26  ;;  %v3280_v35 = vsel %vm6436_vm5, %v5559_v57, %v3279_v43  ;;  %v4205_v46 = vshll.u32 %v4185_v13, 16  ;;  %v3637_v30 = vld [vmem:[#allocation3 + $0x88] sm:$0xf]  ;;  %v4192_v57 = vld [vmem:[#allocation3 + $0x7c] sm:$0x1] }
 0x206   :  { %v4204_v38 = vrot.slane %v4202_v56, 4  ;;  %v3717_v58 = vrot.slane %v3716_v24, 4  ;;  %v5563_v1 = vcombine.low %v3276_v22, %v3280_v35  ;;  %v4211_v59 = vshll.u32 %v4186_v16, 16  ;;  %v4056_v24 = vld [vmem:[#allocation3 + $0x58] sm:$0xe] }
 0x207   :  { %v3708_v27 = vsel %vm6225_vm2, %v3703_v28, %v3707_v54  ;;  %3492 = vrot.lane.b32.xlu0 %v5571_v18, %s6156_s22  ;;  %v4207_v25 = vrot.slane %v4205_v46, 5  ;;  %v4216_v14 = vshrl.u32 %v4187_v44, 16  ;;  %v4219_v15 = vshll.u32 %v4187_v44, 16  ;;  %v4190_v54 = vld [vmem:[#allocation3 + $0x74] sm:$0x1] }
 0x208   :  { %v4225_v26 = vshll.u32 %v4188_v7, 16  ;;  %v3722_v63 = vsel %vm6225_vm2, %v3717_v58, %v3721_v12  ;;  %v4213_v21 = vrot.slane %v4211_v59, 5  ;;  %v3724_v6 = vshrl.u32 %v3635_v31, 16  ;;  %v4057_v22 = vld [vmem:[#allocation3 + $0x5c] sm:$0x1] }
 0x209   :  { %v3727_v8 = vshll.u32 %v3635_v31, 16  ;;  %v5590_v9 = vcombine.low %v3708_v27, %v3722_v63  ;;  %v4208_v23 = vor.u32 %v4207_v25, %v4204_v38  ;;  %v4218_v17 = vrot.slane %v4216_v14, 4  ;;  %v4058_v38 = vld [vmem:[#allocation3 + $0x60] sm:$0xe]  ;;  %v4059_v46 = vld [vmem:[#allocation3 + $0x64] sm:$0x1] }
 0x20a   :  { %v4221_v61 = vrot.slane %v4219_v15, 5  ;;  %v4227_v62 = vrot.slane %v4225_v26, 5  ;;  %v3726_v19 = vrot.slane %v3724_v6, 4  ;;  %v3733_v13 = vshll.u32 %v3636_v47, 16  ;;  %v4193_v14 = vld [vmem:[#allocation3 + $0x80] sm:$0xf] }
 0x20b   :  { %v3729_v51 = vrot.slane %v3727_v8, 5  ;;  %3767 = vrot.lane.b32.xlu1 %v5590_v9, %s6156_s22  ;;  %3898 = vrot.lane.b32.xlu0 %v6102_v34, %s6156_s22  ;;  %v4209_v4 = vrot.slane %v4208_v23, 4  ;;  %v3738_v45 = vshrl.u32 %v3637_v30, 16  ;;  %v3741_v11 = vshll.u32 %v3637_v30, 16  ;;  %v4194_v15 = vld [vmem:[#allocation3 + $0x84] sm:$0x1] }
 0x20c   :  { %v4222_v20 = vor.u32 %v4221_v61, %v4218_v17  ;;  %v3735_v3 = vrot.slane %v3733_v13, 5  ;;  %v3747_v12 = vshll.u32 %v3638_v41, 16  ;;  %v4230_v43 = vshrl.u32 %v4189_v10, 16  ;;  %v2945_v2 = vld [vmem:[#allocation3 + $0x10] sm:$0xe] }
 0x20d   :  { %v3730_v40 = vor.u32 %v3729_v51, %v3726_v19  ;;  %v4214_v16 = vsel %vm6225_vm2, %v4209_v4, %v4213_v21  ;;  %v3740_v48 = vrot.slane %v3738_v45, 4  ;;  %v3743_v28 = vrot.slane %v3741_v11, 5  ;;  %v4195_v21 = vld [vmem:[#allocation3 + $0x88] sm:$0xf]  ;;  %v4196_v19 = vld [vmem:[#allocation3 + $0x8c] sm:$0x1] }
 0x20e   :  { %v4223_v56 = vrot.slane %v4222_v20, 4  ;;  %v3749_v7 = vrot.slane %v3747_v12, 5  ;;  %v4232_v18 = vrot.slane %v4230_v43, 4  ;;  %v4233_v35 = vshll.u32 %v4189_v10, 16  ;;  %v4060_v51 = vld [vmem:[#allocation3 + $0x68] sm:$0xe] }
 0x20f   :  { %v3731_v44 = vrot.slane %v3730_v40, 4  ;;  %3299 = vrot.lane.b32.xlu1 %v5563_v1, %s6156_s22  ;;  %v3744_v47 = vor.u32 %v3743_v28, %v3740_v48  ;;  %v4239_v27 = vshll.u32 %v4190_v54, 16  ;;  %v4244_v58 = vshrl.u32 %v4191_v0, 16  ;;  %v4061_v20 = vld [vmem:[#allocation3 + $0x6c] sm:$0x1] }
 0x210   :  { %v4228_v31 = vsel %vm6225_vm2, %v4223_v56, %v4227_v62  ;;  %v4235_v34 = vrot.slane %v4233_v35, 5  ;;  %v4247_v25 = vshll.u32 %v4191_v0, 16  ;;  %v4253_v63 = vshll.u32 %v4192_v57, 16  ;;  %v4062_v12 = vld [vmem:[#allocation3 + $0x70] sm:$0xe] }
 0x211   :  { %v5628_v59 = vcombine.low %v4214_v16, %v4228_v31  ;;  %v3736_v30 = vsel %vm6225_vm2, %v3731_v44, %v3735_v3  ;;  %v3745_v26 = vrot.slane %v3744_v47, 4  ;;  %v4241_v41 = vrot.slane %v4239_v27, 5  ;;  %v4063_v48 = vld [vmem:[#allocation3 + $0x74] sm:$0x1]  ;;  %v4197_v28 = vld [vmem:[#allocation3 + $0x90] sm:$0xf] }
 0x212   :  { %v4246_v10 = vrot.slane %v4244_v58, 4  ;;  %v4236_v1 = vor.u32 %v4235_v34, %v4232_v18  ;;  %v4249_v6 = vrot.slane %v4247_v25, 5  ;;  %v5612_v8 = vrot.slane %v4056_v24, 9  ;;  %v4198_v18 = vld [vmem:[#allocation3 + $0x94] sm:$0x1] }
 0x213   :  { %4325 = vrot.lane.b32.xlu0 %v5628_v59, %s6156_s22  ;;  %v4090_v9 = vrot.slane %v4057_v22, 5  ;;  %v3750_v23 = vsel %vm6225_vm2, %v3745_v26, %v3749_v7  ;;  %v4255_v17 = vrot.slane %v4253_v63, 5  ;;  %v5613_v61 = vrot.slane %v4058_v38, 9  ;;  %v4065_v34 = vld [vmem:[#allocation3 + $0x7c] sm:$0x1] }
 0x214   :  { %v4094_v62 = vrot.slane %v4059_v46, 5  ;;  %v5591_v13 = vcombine.low %v3736_v30, %v3750_v23  ;;  %v4237_v54 = vrot.slane %v4236_v1, 4  ;;  %v4250_v0 = vor.u32 %v4249_v6, %v4246_v10  ;;  %v4064_v30 = vld [vmem:[#allocation3 + $0x78] sm:$0xe]  ;;  %v4067_v10 = vld [vmem:[#allocation3 + $0x84] sm:$0x1] }
 0x215   :  { %v4091_v4 = vsel %vm6436_vm5, %v5612_v8, %v4090_v9  ;;  %v4258_v11 = vshrl.u32 %v4193_v14, 16  ;;  %v4261_v40 = vshll.u32 %v4193_v14, 16  ;;  %v4267_v3 = vshll.u32 %v4194_v15, 16  ;;  %v4068_v8 = vld [vmem:[#allocation3 + $0x88] sm:$0xe] }
 0x216   :  { %v4095_v45 = vsel %vm6436_vm5, %v5613_v61, %v4094_v62  ;;  %3769 = vrot.lane.b32.xlu1 %v5591_v13, %s6156_s22  ;;  %v4242_v57 = vsel %vm6225_vm2, %v4237_v54, %v4241_v41  ;;  %v4251_v43 = vrot.slane %v4250_v0, 4  ;;  %v4272_v56 = vshrl.u32 %v4195_v21, 16  ;;  %v4066_v41 = vld [vmem:[#allocation3 + $0x80] sm:$0xe]  ;;  %v6132_v50 = vld [vmem:[#allocation3 + $0x10] ss:$8 sps:$4 sm:$0xff]  }
 0x217   :  { %v5620_v16 = vcombine.low %v4091_v4, %v4095_v45  ;;  %v4260_v24 = vrot.slane %v4258_v11, 4  ;;  %v4263_v22 = vrot.slane %v4261_v40, 5  ;;  %v4269_v44 = vrot.slane %v4267_v3, 5  ;;  %v6122_v9 = vld [vmem:[#allocation3] ss:$8 sps:$4 sm:$0xff]   ;;  %3342 = vst.msk [vmem:[#allocation4 + $0x18] sm:$0xff] %vm53_vm6, %v6132_v50 }
 0x218   :  { %v4275_v7 = vshll.u32 %v4195_v21, 16  ;;  %v4256_v35 = vsel %vm6225_vm2, %v4251_v43, %v4255_v17  ;;  %v4274_v38 = vrot.slane %v4272_v56, 4  ;;  %v4281_v46 = vshll.u32 %v4196_v19, 16  ;;  %v4069_v19 = vld [vmem:[#allocation3 + $0x8c] sm:$0x1]  ;;  %2781 = vst.msk [vmem:[#allocation4] sm:$0xff] %vm53_vm6, %v6122_v9 }
 0x219   :  { %v5614_v31 = vrot.slane %v4060_v51, 9  ;;  %v5629_v47 = vcombine.low %v4242_v57, %v4256_v35  ;;  %v4264_v27 = vor.u32 %v4263_v22, %v4260_v24  ;;  %v4098_v59 = vrot.slane %v4061_v20, 5  ;;  %v4070_v51 = vld [vmem:[#allocation3 + $0x90] sm:$0xe]  ;;  %v4071_v20 = vld [vmem:[#allocation3 + $0x94] sm:$0x1] }
 0x21a   :  { %v4277_v58 = vrot.slane %v4275_v7, 5  ;;  %4132 = vrot.lane.b32.xlu1 %v5620_v16, %s6156_s22  ;;  %v4283_v25 = vrot.slane %v4281_v46, 5  ;;  %v5615_v14 = vrot.slane %v4062_v12, 9  ;;  %v4102_v15 = vrot.slane %v4063_v48, 5  ;;  %v2944_v45 = vld [vmem:[#allocation3 + $0xc] sm:$0x1] }
 0x21b   :  { %v4286_v26 = vshrl.u32 %v4197_v28, 16  ;;  %4327 = vrot.lane.b32.xlu0 %v5629_v47, %s6156_s22  ;;  %v4265_v63 = vrot.slane %v4264_v27, 4  ;;  %v4099_v1 = vsel %vm6436_vm5, %v5614_v31, %v4098_v59  ;;  %v4289_v6 = vshll.u32 %v4197_v28, 16  ;;  %v2943_v11 = vld [vmem:[#allocation3 + $0x8] sm:$0xe] }
 0x21c   :  { %v4278_v21 = vor.u32 %v4277_v58, %v4274_v38  ;;  %v4103_v23 = vsel %vm6436_vm5, %v5615_v14, %v4102_v15  ;;  %v4295_v61 = vshll.u32 %v4198_v18, 16  ;;  %v4307_v62 = vrot.slane %v4306_v36, 4  ;;  %v2946_v48 = vld [vmem:[#allocation3 + $0x14] sm:$0x1]  ;;  %v2947_v28 = vld [vmem:[#allocation3 + $0x18] sm:$0xe] }
 0x21d   :  { %v4288_v17 = vrot.slane %v4286_v26, 4  ;;  %v4270_v13 = vsel %vm6225_vm2, %v4265_v63, %v4269_v44  ;;  %v5621_v0 = vcombine.low %v4099_v1, %v4103_v23  ;;  %v4291_v4 = vrot.slane %v4289_v6, 5  ;;  %v2948_v7 = vld [vmem:[#allocation3 + $0x1c] sm:$0x1]  ;;  %v2949_v31 = vld [vmem:[#allocation3 + $0x20] sm:$0xe] }
 0x21e   :  { %v4279_v54 = vrot.slane %v4278_v21, 4  ;;  %v4297_v40 = vrot.slane %v4295_v61, 5  ;;  %v8117_v3 = vshll.u32 %v7405_v42, 16  ;;  %v5616_v57 = vrot.slane %v4064_v30, 9  ;;  %v2950_v47 = vld [vmem:[#allocation3 + $0x24] sm:$0x1] }
 0x21f   :  { %v4106_v33 = vrot.slane %v4065_v34, 5  ;;  %4134 = vrot.lane.b32.xlu1 %v5621_v0, %s6156_s22  ;;  %v4292_v43 = vor.u32 %v4291_v4, %v4288_v17  ;;  %v5617_v16 = vrot.slane %v4066_v41, 9  ;;  %v4110_v56 = vrot.slane %v4067_v10, 5  ;;  %v2951_v27 = vld [vmem:[#allocation3 + $0x28] sm:$0xe] }
 0x220   :  { %v4311_v12 = vrot.slane %v8117_v3, 5  ;;  %v4284_v36 = vsel %vm6225_vm2, %v4279_v54, %v4283_v25  ;;  %v5618_v44 = vrot.slane %v4068_v8, 9  ;;  %v4114_v38 = vrot.slane %v4069_v19, 5  ;;  %v2952_v58 = vld [vmem:[#allocation3 + $0x2c] sm:$0x1] }
 0x221   :  { %v5630_v24 = vcombine.low %v4270_v13, %v4284_v36  ;;  %v4107_v42 = vsel %vm6436_vm5, %v5616_v57, %v4106_v33  ;;  %v4293_v18 = vrot.slane %v4292_v43, 4  ;;  %v4111_v35 = vsel %vm6436_vm5, %v5617_v16, %v4110_v56  ;;  %v6126_v10 = vld [vmem:[#allocation3 + $0x10] ss:$8 sps:$4 sm:$0xff]   ;;  %v2956_v4 = vld [vmem:[#allocation3 + $0x3c] sm:$0x1] }
 0x222   :  { %v4312_v22 = vsel %vm6225_vm2, %v4307_v62, %v4311_v12  ;;  %v5619_v46 = vrot.slane %v4070_v51, 9  ;;  %v5622_v59 = vcombine.low %v4107_v42, %v4111_v35  ;;  %v4118_v30 = vrot.slane %v4071_v20, 5  ;;  %2782 = vst.msk [vmem:[#allocation4 + $0x28] sm:$0xff] %vm53_vm6, %v6126_v10  ;;  %v2953_v61 = vld [vmem:[#allocation3 + $0x30] sm:$0xe] }
 0x223   :  { %4329 = vrot.lane.b32.xlu0 %v5630_v24, %s6156_s22  ;;  %v2979_v34 = vrot.slane %v2944_v45, 5  ;;  %v5533_v25 = vrot.slane %v2943_v11, 9  ;;  %v4298_v14 = vsel %vm6225_vm2, %v4293_v18, %v4297_v40  ;;  %v4115_v15 = vsel %vm6436_vm5, %v5618_v44, %v4114_v38  ;;  %v2954_v62 = vld [vmem:[#allocation3 + $0x34] sm:$0x1]  ;;  %v2955_v0 = vld [vmem:[#allocation3 + $0x38] sm:$0xe] }
 0x224   :  { %v5534_v26 = vrot.slane %v2945_v2, 9  ;;  %v2983_v41 = vrot.slane %v2946_v48, 5  ;;  %v5631_v63 = vcombine.low %v4298_v14, %v4312_v22  ;;  %4136 = vrot.lane.b32.xlu1 %v5622_v59, %s6156_s22  ;;  %v4119_v21 = vsel %vm6436_vm5, %v5619_v46, %v4118_v30  ;;  %v6130_v56 = vld [vmem:[#allocation3 + $0x20] ss:$8 sps:$4 sm:$0xff]   ;;  %v3779_v49 = vld [vmem:[#allocation3 + $0x50] sm:$0xe] }
 0x225   :  { %v2980_v1 = vsel %vm6436_vm5, %v5533_v25, %v2979_v34  ;;  %v5535_v6 = vrot.slane %v2947_v28, 9  ;;  %v5623_v8 = vcombine.low %v4115_v15, %v4119_v21  ;;  %v2987_v17 = vrot.slane %v2948_v7, 5  ;;  %2783 = vst.msk [vmem:[#allocation4 + $0x50] sm:$0xff] %vm53_vm6, %v6130_v56  ;;  %v3780_v53 = vld [vmem:[#allocation3 + $0x54] sm:$0x1] }
 0x226   :  { %v5540_v9 = vcombine.low %v7393_v60, %v2980_v1  ;;  %v2984_v23 = vsel %vm6436_vm5, %v5534_v26, %v2983_v41  ;;  %v5536_v19 = vrot.slane %v2949_v31, 9  ;;  %v2991_v51 = vrot.slane %v2950_v47, 5  ;;  %v3069_v44 = vld [vmem:[#allocation3 + $0x8] sm:$0xf]  ;;  %v3070_v7 = vld [vmem:[#allocation3 + $0xc] sm:$0x1] }
 0x227   :  { %4331 = vrot.lane.b32.xlu0 %v5631_v63, %s6156_s22  ;;  %v5537_v13 = vrot.slane %v2951_v27, 9  ;;  %v2995_v54 = vrot.slane %v2952_v58, 5  ;;  %v2988_v60 = vsel %vm6436_vm5, %v5535_v6, %v2987_v17  ;;  %v5538_v20 = vrot.slane %v2953_v61, 9  ;;  %v3071_v46 = vld [vmem:[#allocation3 + $0x10] sm:$0xf] }
 0x228   :  { %3021 = vst.msk [vmem:[#allocation4 + $0x8] sm:$0xff] %vm53_vm6, %v5540_v9  ;;  %v2999_v45 = vrot.slane %v2954_v62, 5  ;;  %v5539_v11 = vrot.slane %v2955_v0, 9  ;;  %4138 = vrot.lane.b32.xlu1 %v5623_v8, %s6156_s22  ;;  %v5541_v40 = vcombine.low %v2984_v23, %v2988_v60  ;;  %v2992_v3 = vsel %vm6436_vm5, %v5536_v19, %v2991_v51  ;;  %v3072_v31 = vld [vmem:[#allocation3 + $0x14] sm:$0x1] }
 0x229   :  { %v2996_v12 = vsel %vm6436_vm5, %v5537_v13, %v2995_v54  ;;  %v3003_v57 = vrot.slane %v2956_v4, 5  ;;  %v3545_v36 = vsel %vm6436_vm5, %v5574_v5, %v3544_v39  ;;  %v3549_v43 = vsel %vm6436_vm5, %v5575_v32, %v3548_v52  ;;  %v6134_v5 = vld [vmem:[#allocation3 + $0x30] ss:$8 sps:$4 sm:$0xff]   ;;  %v3782_v52 = vld [vmem:[#allocation3 + $0x5c] sm:$0x1] }
 0x22a   :  { %v5542_v33 = vcombine.low %v2992_v3, %v2996_v12  ;;  %v3000_v2 = vsel %vm6436_vm5, %v5538_v20, %v2999_v45  ;;  %3022 = vst.msk [vmem:[#allocation4 + $0x30] sm:$0xff] %vm53_vm6, %v5541_v40  ;;  %v5581_v48 = vcombine.low %v3545_v36, %v3549_v43  ;;  %2784 = vst.msk [vmem:[#allocation4 + $0x78] sm:$0xff] %vm53_vm6, %v6134_v5  ;;  %v3781_v32 = vld [vmem:[#allocation3 + $0x58] sm:$0xe]  ;;  %v5592_v28 = vrot.slane %v3779_v49, 9 }
 0x22b   :  { %v3004_v16 = vsel %vm6436_vm5, %v5539_v11, %v3003_v57  ;;  %v3054_v39 = vpop.permute.xlu0 %3053  ;;  %v3813_v24 = vrot.slane %v3780_v53, 5  ;;  %v5593_v22 = vrot.slane %v3781_v32, 9  ;;  %v3817_v42 = vrot.slane %v3782_v52, 5  ;;  %v6138_v21 = vld [vmem:[#allocation3 + $0x20] ss:$8 sps:$4 sm:$0xff]  }
 0x22c   :  { %3023 = vst.msk [vmem:[#allocation4 + $0x58] sm:$0xff] %vm53_vm6, %v5542_v33  ;;  %v5543_v55 = vcombine.low %v3000_v2, %v3004_v16  ;;  %3583 = vst.msk [vmem:[#allocation4 + $0x48] sm:$0xff] %vm53_vm6, %v5581_v48  ;;  %v3086_v47 = vshrl.u32 %v3069_v44, 16  ;;  %v3089_v27 = vshll.u32 %v3069_v44, 16  ;;  %v3100_v59 = vshrl.u32 %v3071_v46, 16 }
 0x22d   :  { %3065 = vst.msk [vmem:[#allocation4 + $0x8] sm:$0xff] %vm213_vm7, %v3054_v39  ;;  %v3814_v35 = vsel %vm6436_vm5, %v5592_v28, %v3813_v24  ;;  %v3818_v38 = vsel %vm6436_vm5, %v5593_v22, %v3817_v42  ;;  %v3103_v30 = vshll.u32 %v3071_v46, 16  ;;  %v3095_v14 = vshll.u32 %v3070_v7, 16  ;;  %v6140_v9 = vld [vmem:[#allocation3 + $0x50] ss:$8 sps:$4 sm:$0xff]  }
 0x22e   :  { %3024 = vst.msk [vmem:[#allocation4 + $0x80] sm:$0xff] %vm53_vm6, %v5543_v55  ;;  %v5600_v58 = vcombine.low %v3814_v35, %v3818_v38  ;;  %v3088_v34 = vrot.slane %v3086_v47, 4  ;;  %v3091_v25 = vrot.slane %v3089_v27, 5  ;;  %v3102_v15 = vrot.slane %v3100_v59, 4  ;;  %3343 = vst.msk [vmem:[#allocation4 + $0x40] sm:$0xff] %vm53_vm6, %v6138_v21 }
 0x22f   :  { %v3056_v18 = vpop.permute.xlu0 %3055  ;;  %v3105_v26 = vrot.slane %v3103_v30, 5  ;;  %v3109_v41 = vshll.u32 %v3072_v31, 16  ;;  %v3097_v8 = vrot.slane %v3095_v14, 5  ;;  %v3783_v62 = vld [vmem:[#allocation3 + $0x60] sm:$0xe]  ;;  %3619 = vst.msk [vmem:[#allocation4 + $0xa0] sm:$0xff] %vm53_vm6, %v6140_v9 }
 0x230   :  { %3066 = vst.msk [vmem:[#allocation4 + $0x30] sm:$0xff] %vm213_vm7, %v3056_v18  ;;  %v3092_v63 = vor.u32 %v3091_v25, %v3088_v34  ;;  %v3784_v19 = vld [vmem:[#allocation3 + $0x64] sm:$0x1]  ;;  %v3785_v51 = vld [vmem:[#allocation3 + $0x68] sm:$0xe]  ;;  %v5594_v13 = vrot.slane %v3783_v62, 9 }
 0x231   :  { %3859 = vst.msk [vmem:[#allocation4 + $0xa8] sm:$0xff] %vm53_vm6, %v5600_v58  ;;  %v3106_v1 = vor.u32 %v3105_v26, %v3102_v15  ;;  %v3111_v61 = vrot.slane %v3109_v41, 5  ;;  %v3786_v60 = vld [vmem:[#allocation3 + $0x6c] sm:$0x1]  ;;  %v3821_v4 = vrot.slane %v3784_v19, 5  ;;  %v5595_v20 = vrot.slane %v3785_v51, 9 }
 0x232   :  { %v3093_v6 = vrot.slane %v3092_v63, 4  ;;  %v3825_v11 = vrot.slane %v3786_v60, 5  ;;  %v3073_v40 = vld [vmem:[#allocation3 + $0x18] sm:$0xf]  ;;  %v3074_v57 = vld [vmem:[#allocation3 + $0x1c] sm:$0x1] }
 0x233   :  { %v3107_v17 = vrot.slane %v3106_v1, 4  ;;  %v3822_v12 = vsel %vm6436_vm5, %v5594_v13, %v3821_v4  ;;  %v3075_v33 = vld [vmem:[#allocation3 + $0x20] sm:$0xf]  ;;  %v3076_v2 = vld [vmem:[#allocation3 + $0x24] sm:$0x1]  ;;  %v3114_v43 = vshrl.u32 %v3073_v40, 16 }
 0x234   :  { %v4426_v10 = vld [vmem:[#allocation4 + $0x8] sm:$0xff]  ;;  %v3098_v54 = vsel %vm6225_vm2, %v3093_v6, %v3097_v8  ;;  %v3826_v36 = vsel %vm6436_vm5, %v5595_v20, %v3825_v11  ;;  %v3117_v16 = vshll.u32 %v3073_v40, 16  ;;  %v3123_v56 = vshll.u32 %v3074_v57, 16  ;;  %v6144_v22 = vld [vmem:[#allocation3 + $0x30] ss:$8 sps:$4 sm:$0xff]  }
 0x235   :  { %4816 = vmatprep.mubr.bf16.mxu1 %v4426_v10  ;;  %v3112_v0 = vsel %vm6225_vm2, %v3107_v17, %v3111_v61  ;;  %v5601_v48 = vcombine.low %v3822_v12, %v3826_v36  ;;  %v3128_v55 = vshrl.u32 %v3075_v33, 16  ;;  %v3131_v50 = vshll.u32 %v3075_v33, 16  ;;  %v6145_v44 = vld [vmem:[#allocation3 + $0x60] ss:$8 sps:$4 sm:$0xff]   ;;  %v3787_v7 = vld [vmem:[#allocation3 + $0x70] sm:$0xe] }
 0x236   :  { %v5548_v45 = vcombine.low %v3098_v54, %v3112_v0  ;;  %v3137_v5 = vshll.u32 %v3076_v2, 16  ;;  %v3116_v39 = vrot.slane %v3114_v43, 4  ;;  %v3119_v49 = vrot.slane %v3117_v16, 5  ;;  %v3788_v18 = vld [vmem:[#allocation3 + $0x74] sm:$0x1]  ;;  %3344 = vst.msk [vmem:[#allocation4 + $0x68] sm:$0xff] %vm53_vm6, %v6144_v22 }
 0x237   :  { %v3058_v23 = vpop.permute.xlu0 %3057  ;;  %3860 = vst.msk [vmem:[#allocation4 + $0xd0] sm:$0xff] %vm53_vm6, %v5601_v48  ;;  %v3125_v53 = vrot.slane %v3123_v56, 5  ;;  %v3130_v32 = vrot.slane %v3128_v55, 4  ;;  %v3133_v52 = vrot.slane %v3131_v50, 5  ;;  %v3789_v38 = vld [vmem:[#allocation3 + $0x78] sm:$0xe] }
 0x238   :  { %3067 = vst.msk [vmem:[#allocation4 + $0x58] sm:$0xff] %vm213_vm7, %v3058_v23  ;;  %v3139_v28 = vrot.slane %v3137_v5, 5  ;;  %v3120_v24 = vor.u32 %v3119_v49, %v3116_v39  ;;  %v3790_v46 = vld [vmem:[#allocation3 + $0x7c] sm:$0x1]  ;;  %v5596_v31 = vrot.slane %v3787_v7, 9  ;;  %v3829_v27 = vrot.slane %v3788_v18, 5 }
 0x239   :  { %3213 = vst.msk [vmem:[#allocation4 + $0x10] sm:$0xff] %vm53_vm6, %v5548_v45  ;;  %v3134_v42 = vor.u32 %v3133_v52, %v3130_v32  ;;  %3620 = vst.msk [vmem:[#allocation4 + $0xc8] sm:$0xff] %vm53_vm6, %v6145_v44  ;;  %v5597_v58 = vrot.slane %v3789_v38, 9  ;;  %v3833_v59 = vrot.slane %v3790_v46, 5  ;;  %v3077_v34 = vld [vmem:[#allocation3 + $0x28] sm:$0xf] }
 0x23a   :  { %v3121_v35 = vrot.slane %v3120_v24, 4  ;;  %v3078_v25 = vld [vmem:[#allocation3 + $0x2c] sm:$0x1]  ;;  %v3079_v14 = vld [vmem:[#allocation3 + $0x30] sm:$0xf]  ;;  %v3830_v26 = vsel %vm6436_vm5, %v5596_v31, %v3829_v27  ;;  %v3142_v63 = vshrl.u32 %v3077_v34, 16 }
 0x23b   :  { %v3060_v3 = vpop.permute.xlu0 %3059  ;;  %v3135_v47 = vrot.slane %v3134_v42, 4  ;;  %v3834_v41 = vsel %vm6436_vm5, %v5597_v58, %v3833_v59  ;;  %v3080_v10 = vld [vmem:[#allocation3 + $0x34] sm:$0x1]  ;;  %v3145_v6 = vshll.u32 %v3077_v34, 16  ;;  %v3151_v8 = vshll.u32 %v3078_v25, 16  ;;  %v6143_v39 = vld [vmem:[%s8106_s3 + $0x108] sm:$0xff]  }
 0x23c   :  { %3068 = vst.msk [vmem:[#allocation4 + $0x80] sm:$0xff] %vm213_vm7, %v3060_v3  ;;  %v3126_v30 = vsel %vm6225_vm2, %v3121_v35, %v3125_v53  ;;  %v5602_v1 = vcombine.low %v3830_v26, %v3834_v41  ;;  %v6146_v9 = vld [vmem:[#allocation3 + $0x40] ss:$8 sps:$4 sm:$0xff]   ;;  %v3144_v17 = vrot.slane %v3142_v63, 4  ;;  %v3156_v61 = vshrl.u32 %v3079_v14, 16  ;;  %v4431_v46 = vld [vmem:[#allocation4 + $0x30] sm:$0xff] }
 0x23d   :  { %v3140_v15 = vsel %vm6225_vm2, %v3135_v47, %v3139_v28  ;;  %v3159_v62 = vshll.u32 %v3079_v14, 16  ;;  %v3165_v19 = vshll.u32 %v3080_v10, 16  ;;  %v3147_v51 = vrot.slane %v3145_v6, 5  ;;  %3345 = vst.msk [vmem:[#allocation4 + $0x90] sm:$0xff] %vm53_vm6, %v6146_v9  ;;  %v6147_v13 = vld [vmem:[#allocation3 + $0x70] ss:$8 sps:$4 sm:$0xff]  }
 0x23e   :  { %v5549_v21 = vcombine.low %v3126_v30, %v3140_v15  ;;  %3861 = vst.msk [vmem:[#allocation4 + $0xf8] sm:$0xff] %vm53_vm6, %v5602_v1  ;;  %v3791_v54 = vld [vmem:[#allocation3 + $0x80] sm:$0xe]  ;;  %v3153_v0 = vrot.slane %v3151_v8, 5  ;;  %v3158_v60 = vrot.slane %v3156_v61, 4  ;;  %3621 = vst.msk [vmem:[#allocation4 + $0xf0] sm:$0xff] %vm53_vm6, %v6147_v13 }
 0x23f   :  { %v3161_v4 = vrot.slane %v3159_v62, 5  ;;  %v3792_v20 = vld [vmem:[#allocation3 + $0x84] sm:$0x1]  ;;  %v5598_v45 = vrot.slane %v3791_v54, 9  ;;  %v3148_v11 = vor.u32 %v3147_v51, %v3144_v17  ;;  %v3167_v40 = vrot.slane %v3165_v19, 5  ;;  %v6148_v14 = vld [vmem:[%s8106_s3 + $0x110] sm:$0xff]  }
 0x240   :  { %3214 = vst.msk [vmem:[#allocation4 + $0x38] sm:$0xff] %vm53_vm6, %v5549_v21  ;;  %v3793_v3 = vld [vmem:[#allocation3 + $0x88] sm:$0xe]  ;;  %v3794_v12 = vld [vmem:[#allocation3 + $0x8c] sm:$0x1]  ;;  %v3837_v57 = vrot.slane %v3792_v20, 5 }
 0x241   :  { %v3162_v33 = vor.u32 %v3161_v4, %v3158_v60  ;;  %v5599_v2 = vrot.slane %v3793_v3, 9  ;;  %v3841_v36 = vrot.slane %v3794_v12, 5  ;;  %v3081_v43 = vld [vmem:[#allocation3 + $0x38] sm:$0xf]  ;;  %v3082_v16 = vld [vmem:[#allocation3 + $0x3c] sm:$0x1] }
 0x242   :  { %v3149_v56 = vrot.slane %v3148_v11, 4  ;;  %v3838_v48 = vsel %vm6436_vm5, %v5598_v45, %v3837_v57  ;;  %v3083_v55 = vld [vmem:[#allocation3 + $0x40] sm:$0xf]  ;;  %v3084_v50 = vld [vmem:[#allocation3 + $0x44] sm:$0x1]  ;;  %v3170_v5 = vshrl.u32 %v3081_v43, 16 }
 0x243   :  { %v3163_v49 = vrot.slane %v3162_v33, 4  ;;  %v3842_v53 = vsel %vm6436_vm5, %v5599_v2, %v3841_v36  ;;  %v3173_v32 = vshll.u32 %v3081_v43, 16  ;;  %v3179_v52 = vshll.u32 %v3082_v16, 16  ;;  %v6149_v27 = vld [vmem:[#allocation3 + $0x60] ss:$8 sps:$4 sm:$0xff]   ;;  %v6154_v9 = vld [vmem:[%s8106_s3 + $0x118] sm:$0xff]  }
 0x244   :  { %v5603_v28 = vcombine.low %v3838_v48, %v3842_v53  ;;  %v3172_v24 = vrot.slane %v3170_v5, 4  ;;  %v3184_v22 = vshrl.u32 %v3083_v55, 16  ;;  %v3154_v7 = vsel %vm6225_vm2, %v3149_v56, %v3153_v0  ;;  %v6155_v58 = vld [vmem:[%s8106_s3 + $0x100] sm:$0xff]   ;;  %4181 = vst.msk [vmem:[#allocation4 + $0xb8] sm:$0xff] %vm53_vm6, %v6149_v27  ;;  %v6151_v10 = vld [vmem:[#allocation3 + $0x70] ss:$8 sps:$4 sm:$0xff]  }
 0x245   :  { %v3168_v18 = vsel %vm6225_vm2, %v3163_v49, %v3167_v40  ;;  %v3175_v35 = vrot.slane %v3173_v32, 5  ;;  %v3187_v38 = vshll.u32 %v3083_v55, 16  ;;  %v3193_v34 = vshll.u32 %v3084_v50, 16  ;;  %v6150_v25 = vld [vmem:[#allocation3 + $0x80] ss:$8 sps:$4 sm:$0xff]   ;;  %4182 = vst.msk [vmem:[#allocation4 + $0xe0] sm:$0xff] %vm53_vm6, %v6151_v10 }
 0x246   :  { %v5550_v31 = vcombine.low %v3154_v7, %v3168_v18  ;;  %3862 = vst.msk [vmem:[#allocation4 + $0x120] sm:$0xff] %vm53_vm6, %v5603_v28  ;;  %v3186_v47 = vrot.slane %v3184_v22, 4  ;;  %v3181_v26 = vrot.slane %v3179_v52, 5  ;;  %3622 = vst.msk [vmem:[#allocation4 + $0x118] sm:$0xff] %vm53_vm6, %v6150_v25  ;;  %v3908_v63 = vld [vmem:[#allocation3 + $0x58] sm:$0xf] }
 0x247   :  { %v3176_v59 = vor.u32 %v3175_v35, %v3172_v24  ;;  %v3189_v30 = vrot.slane %v3187_v38, 5  ;;  %v3909_v1 = vld [vmem:[#allocation3 + $0x5c] sm:$0x1]  ;;  %v3910_v6 = vld [vmem:[#allocation3 + $0x60] sm:$0xf]  ;;  %v3195_v17 = vrot.slane %v3193_v34, 5 }
 0x248   :  { %3215 = vst.msk [vmem:[#allocation4 + $0x60] sm:$0xff] %vm53_vm6, %v5550_v31  ;;  %v3911_v8 = vld [vmem:[#allocation3 + $0x64] sm:$0x1]  ;;  %v3925_v61 = vshrl.u32 %v3908_v63, 16  ;;  %v3928_v62 = vshll.u32 %v3908_v63, 16  ;;  %v3934_v19 = vshll.u32 %v3909_v1, 16 }
 0x249   :  { %v2926_v23 = vpop.permute.xlu1 %2925  ;;  %v3177_v15 = vrot.slane %v3176_v59, 4  ;;  %v3190_v41 = vor.u32 %v3189_v30, %v3186_v47  ;;  %v3939_v51 = vshrl.u32 %v3910_v6, 16  ;;  %v3942_v13 = vshll.u32 %v3910_v6, 16  ;;  %v6152_v11 = vld [vmem:[#allocation3 + $0x80] ss:$8 sps:$4 sm:$0xff]   ;;  %v4436_v40 = vld [vmem:[#allocation4 + $0x58] sm:$0xff] }
 0x24a   :  { %2937 = vst.msk [vmem:[#allocation4] sm:$0xff] %vm213_vm7, %v2926_v23  ;;  %v3948_v54 = vshll.u32 %v3911_v8, 16  ;;  %v3927_v20 = vrot.slane %v3925_v61, 4  ;;  %v3930_v45 = vrot.slane %v3928_v62, 5  ;;  %v3936_v12 = vrot.slane %v3934_v19, 5 }
 0x24b   :  { %v3191_v23 = vrot.slane %v3190_v41, 4  ;;  %v3182_v60 = vsel %vm6225_vm2, %v3177_v15, %v3181_v26  ;;  %v3941_v57 = vrot.slane %v3939_v51, 4  ;;  %v3944_v33 = vrot.slane %v3942_v13, 5  ;;  %v3912_v2 = vld [vmem:[#allocation3 + $0x68] sm:$0xf]  ;;  %4183 = vst.msk [vmem:[#allocation4 + $0x108] sm:$0xff] %vm53_vm6, %v6152_v11 }
 0x24c   :  { %v3931_v43 = vor.u32 %v3930_v45, %v3927_v20  ;;  %v3950_v16 = vrot.slane %v3948_v54, 5  ;;  %v3913_v56 = vld [vmem:[#allocation3 + $0x6c] sm:$0x1]  ;;  %v3914_v48 = vld [vmem:[#allocation3 + $0x70] sm:$0xf]  ;;  %v3953_v55 = vshrl.u32 %v3912_v2, 16 }
 0x24d   :  { %v3196_v4 = vsel %vm6225_vm2, %v3191_v23, %v3195_v17  ;;  %v3945_v50 = vor.u32 %v3944_v33, %v3941_v57  ;;  %v3915_v5 = vld [vmem:[#allocation3 + $0x74] sm:$0x1]  ;;  %v3962_v49 = vshll.u32 %v3913_v56, 16  ;;  %v3967_v53 = vshrl.u32 %v3914_v48, 16  ;;  %v6153_v31 = vld [vmem:[#allocation3 + $0x90] ss:$8 sps:$4 sm:$0xff]  }
 0x24e   :  { %v5551_v3 = vcombine.low %v3182_v60, %v3196_v4  ;;  %v3932_v32 = vrot.slane %v3931_v43, 4  ;;  %v3955_v52 = vrot.slane %v3953_v55, 4  ;;  %v3970_v28 = vshll.u32 %v3914_v48, 16  ;;  %v3916_v47 = vld [vmem:[#allocation3 + $0x78] sm:$0xf]  ;;  %4184 = vst.msk [vmem:[#allocation4 + $0x130] sm:$0xff] %vm53_vm6, %v6153_v31 }
 0x24f   :  { %v3976_v24 = vshll.u32 %v3915_v5, 16  ;;  %v3946_v22 = vrot.slane %v3945_v50, 4  ;;  %v3969_v7 = vrot.slane %v3967_v53, 4  ;;  %v3917_v25 = vld [vmem:[#allocation3 + $0x7c] sm:$0x1]  ;;  %v3981_v10 = vshrl.u32 %v3916_v47, 16 }
 0x250   :  { %3216 = vst.msk [vmem:[#allocation4 + $0x88] sm:$0xff] %vm53_vm6, %v5551_v3  ;;  %v3972_v38 = vrot.slane %v3970_v28, 5  ;;  %v3937_v59 = vsel %vm6225_vm2, %v3932_v32, %v3936_v12  ;;  %v3919_v15 = vld [vmem:[#allocation3 + $0x84] sm:$0x1]  ;;  %v3984_v63 = vshll.u32 %v3916_v47, 16  ;;  %v3990_v1 = vshll.u32 %v3917_v25, 16 }
 0x251   :  { %v2928_v42 = vpop.permute.xlu1 %2927  ;;  %v4425_v44 = vld [vmem:[#allocation4] sm:$0xff]  ;;  %v3951_v30 = vsel %vm6225_vm2, %v3946_v22, %v3950_v16  ;;  %v3983_v61 = vrot.slane %v3981_v10, 4  ;;  %v4004_v19 = vshll.u32 %v3919_v15, 16  ;;  %v3921_v4 = vld [vmem:[#allocation3 + $0x8c] sm:$0x1] }
 0x252   :  { %2938 = vst.msk [vmem:[#allocation4 + $0x28] sm:$0xff] %vm213_vm7, %v2928_v42  ;;  %4817 = vmatmul.mubr.bf16.vlgmr.msra.gmra.mrb[32].mxu1 %v4425_v44  ;;  %v3964_v44 = vrot.slane %v3962_v49, 5  ;;  %v5608_v26 = vcombine.low %v3937_v59, %v3951_v30  ;;  %v3973_v41 = vor.u32 %v3972_v38, %v3969_v7  ;;  %v3986_v62 = vrot.slane %v3984_v63, 5  ;;  %v3923_v3 = vld [vmem:[#allocation3 + $0x94] sm:$0x1] }
 0x253   :  { %6010 = vmatpush3.bf16.msra.mxu1 %v6155_v58  ;;  %4824 = vmatprep.mubr.bf16.mxu1 %v4431_v46  ;;  %v3978_v46 = vrot.slane %v3976_v24, 5  ;;  %v4441_v58 = vld [vmem:[#allocation4 + $0x80] sm:$0xff]  ;;  %v3992_v54 = vrot.slane %v3990_v1, 5  ;;  %v4006_v11 = vrot.slane %v4004_v19, 5  ;;  %v3502_v43 = vld [vmem:[#allocation3 + $0x10] sm:$0xe] }
 0x254   :  { %6011 = vmatprep.subr.bf16.mxu1 %v6143_v39  ;;  %4052 = vst.msk [vmem:[#allocation4 + $0xb0] sm:$0xff] %vm53_vm6, %v5608_v26  ;;  %v3974_v17 = vrot.slane %v3973_v41, 4  ;;  %v3987_v45 = vor.u32 %v3986_v62, %v3983_v61  ;;  %v3503_v5 = vld [vmem:[#allocation3 + $0x14] sm:$0x1]  ;;  %v4032_v24 = vshll.u32 %v3923_v3, 16  ;;  %v5572_v31 = vrot.slane %v3502_v43, 9 }
 0x255   :  { %v3504_v7 = vld [vmem:[#allocation3 + $0x18] sm:$0xe]  ;;  %v3510_v47 = vld [vmem:[#allocation3 + $0x30] sm:$0xe]  ;;  %v3513_v15 = vld [vmem:[#allocation3 + $0x3c] sm:$0x1] }
 0x256   :  { %v3979_v20 = vsel %vm6225_vm2, %v3974_v17, %v3978_v46  ;;  %v3988_v56 = vrot.slane %v3987_v45, 4  ;;  %v4034_v46 = vrot.slane %v4032_v24, 5  ;;  %v5573_v25 = vrot.slane %v3504_v7, 9  ;;  %v3514_v17 = vld [vmem:[#allocation3 + $0x40] sm:$0xe] }
 0x257   :  { %v2930_v21 = vpop.permute.xlu1 %2929  ;;  %6012 = vmatpush3.bf16.msra.mxu1 %v6143_v39  ;;  %v3956_v39 = vshll.u32 %v3912_v2, 16  ;;  %v5578_v45 = vrot.slane %v3514_v17, 9  ;;  %v4343_v43 = vld [vmem:[#allocation3 + $0x68] sm:$0xe]  ;;  %v4347_v24 = vld [vmem:[#allocation3 + $0x78] sm:$0xe] }
 0x258   :  { %2939 = vst.msk [vmem:[#allocation4 + $0x50] sm:$0xff] %vm213_vm7, %v2930_v21  ;;  %6013 = vmatprep.subr.bf16.mxu1 %v6148_v14  ;;  %v3993_v22 = vsel %vm6225_vm2, %v3988_v56, %v3992_v54  ;;  %v3517_v54 = vld [vmem:[#allocation3 + $0x4c] sm:$0x1]  ;;  %v4356_v17 = vld [vmem:[#allocation3 + $0x9c] sm:$0x1] }
 0x259   :  { %v4430_v0 = vld [vmem:[#allocation4 + $0x28] sm:$0xff]  ;;  %v3958_v42 = vrot.slane %v3956_v39, 5  ;;  %v3564_v29 = vrot.slane %v3517_v54, 5 }
 0x25a   :  { %4825 = vmatmul.mubr.bf16.gmra.mrb[36].mxu1 %v4430_v0 }
 0x25b   :  { %v3487_v36 = vpop.permute.xlu0 %3486  ;;  %4832 = vmatprep.mubr.bf16.mxu1 %v4436_v40  ;;  %6014 = vmatpush3.bf16.msra.mxu1 %v6148_v14  ;;  %v3959_v34 = vor.u32 %v3958_v42, %v3955_v52  ;;  %v3918_v14 = vld [vmem:[#allocation3 + $0x80] sm:$0xf]  ;;  %v3922_v40 = vld [vmem:[#allocation3 + $0x90] sm:$0xf] }
 0x25c   :  { %3498 = vst.msk [vmem:[#allocation4 + $0x18] sm:$0xff] %vm213_vm7, %v3487_v36  ;;  %6015 = vmatprep.subr.bf16.mxu1 %v6154_v9  ;;  %v3995_v6 = vshrl.u32 %v3918_v14, 16  ;;  %v3998_v8 = vshll.u32 %v3918_v14, 16  ;;  %v4018_v36 = vshll.u32 %v3921_v4, 16  ;;  %v4023_v55 = vshrl.u32 %v3922_v40, 16 }
 0x25d   :  { %v3960_v21 = vrot.slane %v3959_v34, 4  ;;  %v4026_v50 = vshll.u32 %v3922_v40, 16  ;;  %v3536_v34 = vrot.slane %v3503_v5, 5  ;;  %v3512_v14 = vld [vmem:[#allocation3 + $0x38] sm:$0xe] }
 0x25e   :  { %v3997_v0 = vrot.slane %v3995_v6, 4  ;;  %v4000_v60 = vrot.slane %v3998_v8, 5  ;;  %v4020_v28 = vrot.slane %v4018_v36, 5  ;;  %v4025_v42 = vrot.slane %v4023_v55, 4  ;;  %v4342_v40 = vld [vmem:[#allocation3 + $0x64] sm:$0x1] }
 0x25f   :  { %v3893_v18 = vpop.permute.xlu0 %3892  ;;  %v4435_v35 = vld [vmem:[#allocation4 + $0x50] sm:$0xff]  ;;  %6016 = vmatpush3.bf16.msra.mxu1 %v6154_v9  ;;  %v3920_v9 = vld [vmem:[#allocation3 + $0x88] sm:$0xf]  ;;  %v3965_v13 = vsel %vm6225_vm2, %v3960_v21, %v3964_v44  ;;  %v4028_v44 = vrot.slane %v4026_v50, 5  ;;  %v5576_v21 = vrot.slane %v3510_v47, 9  ;;  %v3537_v8 = vsel %vm6436_vm5, %v5572_v31, %v3536_v34 }
 0x260   :  { %v2932_v27 = vpop.permute.xlu1 %2931  ;;  %3904 = vst.msk [vmem:[#allocation4 + $0xa8] sm:$0xff] %vm213_vm7, %v3893_v18  ;;  %v4009_v12 = vshrl.u32 %v3920_v9, 16  ;;  %v5609_v57 = vcombine.low %v3965_v13, %v3979_v20  ;;  %v4001_v33 = vor.u32 %v4000_v60, %v3997_v0  ;;  %v4012_v2 = vshll.u32 %v3920_v9, 16  ;;  %v3505_v18 = vld [vmem:[#allocation3 + $0x1c] sm:$0x1] }
 0x261   :  { %2940 = vst.msk [vmem:[#allocation4 + $0x78] sm:$0xff] %vm213_vm7, %v2932_v27  ;;  %v3511_v27 = vld [vmem:[#allocation3 + $0x34] sm:$0x1]  ;;  %v4029_v30 = vor.u32 %v4028_v44, %v4025_v42  ;;  %v3540_v63 = vrot.slane %v3505_v18, 5  ;;  %v5577_v9 = vrot.slane %v3512_v14, 9  ;;  %v5633_v55 = vrot.slane %v4343_v43, 9 }
 0x262   :  { %4833 = vmatmul.mubr.bf16.gmra.mrb[40].mxu1 %v4435_v35  ;;  %v4011_v48 = vrot.slane %v4009_v12, 4  ;;  %4053 = vst.msk [vmem:[#allocation4 + $0xd8] sm:$0xff] %vm53_vm6, %v5609_v57  ;;  %v4002_v32 = vrot.slane %v4001_v33, 4  ;;  %v4014_v52 = vrot.slane %v4012_v2, 5  ;;  %v3552_v1 = vrot.slane %v3511_v27, 5 }
 0x263   :  { %v4428_v23 = vld [vmem:[#allocation4 + $0x18] sm:$0xff]  ;;  %4840 = vmatprep.mubr.bf16.mxu1 %v4441_v58  ;;  %v4030_v6 = vrot.slane %v4029_v30, 4  ;;  %v3541_v62 = vsel %vm6436_vm5, %v5573_v25, %v3540_v63  ;;  %v3516_v13 = vld [vmem:[#allocation3 + $0x48] sm:$0xe]  ;;  %v4349_v31 = vld [vmem:[#allocation3 + $0x80] sm:$0xe] }
 0x264   :  { %v3294_v51 = vpop.permute.xlu1 %3293  ;;  %4913 = vmatprep.mubr.bf16.mxu0 %v4428_v23  ;;  %v4007_v35 = vsel %vm6225_vm2, %v4002_v32, %v4006_v11  ;;  %v4015_v38 = vor.u32 %v4014_v52, %v4011_v48  ;;  %v3556_v23 = vrot.slane %v3513_v15, 5  ;;  %v3553_v19 = vsel %vm6436_vm5, %v5576_v21, %v3552_v1  ;;  %v4341_v11 = vld [vmem:[#allocation3 + $0x60] sm:$0xe]  ;;  %v4352_v34 = vld [vmem:[#allocation3 + $0x8c] sm:$0x1] }
 0x265   :  { %3305 = vst.msk [vmem:[#allocation4 + $0x10] sm:$0xff] %vm213_vm7, %v3294_v51  ;;  %v5610_v59 = vcombine.low %v3993_v22, %v4007_v35  ;;  %v3515_v51 = vld [vmem:[#allocation3 + $0x44] sm:$0x1]  ;;  %v4035_v60 = vsel %vm6225_vm2, %v4030_v6, %v4034_v46  ;;  %v5580_v4 = vcombine.low %v3537_v8, %v3541_v62  ;;  %v5579_v36 = vrot.slane %v3516_v13, 9  ;;  %v4348_v22 = vld [vmem:[#allocation3 + $0x7c] sm:$0x1] }
 0x266   :  { %v4016_v10 = vrot.slane %v4015_v38, 4  ;;  %v3557_v20 = vsel %vm6436_vm5, %v5577_v9, %v3556_v23  ;;  %v3560_v2 = vrot.slane %v3515_v51, 5  ;;  %v5632_v56 = vrot.slane %v4341_v11, 9  ;;  %v4353_v15 = vld [vmem:[#allocation3 + $0x90] sm:$0xe] }
 0x267   :  { %v3489_v16 = vpop.permute.xlu0 %3488  ;;  %v4446_v53 = vld [vmem:[#allocation4 + $0xa8] sm:$0xff]  ;;  %4054 = vst.msk [vmem:[#allocation4 + $0x100] sm:$0xff] %vm53_vm6, %v5610_v59  ;;  %v5582_v33 = vcombine.low %v3553_v19, %v3557_v20  ;;  %3582 = vst.msk [vmem:[#allocation4 + $0x20] sm:$0xff] %vm53_vm6, %v5580_v4  ;;  %v4375_v48 = vrot.slane %v4342_v40, 5  ;;  %v3565_v52 = vsel %vm6436_vm5, %v5579_v36, %v3564_v29  ;;  %v5635_v46 = vrot.slane %v4347_v24, 9 }
 0x268   :  { %3499 = vst.msk [vmem:[#allocation4 + $0x40] sm:$0xff] %vm213_vm7, %v3489_v16  ;;  %v4440_v49 = vld [vmem:[#allocation4 + $0x78] sm:$0xff]  ;;  %v4021_v61 = vsel %vm6225_vm2, %v4016_v10, %v4020_v28  ;;  %v4344_v16 = vld [vmem:[#allocation3 + $0x6c] sm:$0x1]  ;;  %v3561_v50 = vsel %vm6436_vm5, %v5578_v45, %v3560_v2  ;;  %v4387_v27 = vrot.slane %v4348_v22, 5  ;;  %v5636_v30 = vrot.slane %v4349_v31, 9 }
 0x269   :  { %v3764_v39 = vpop.permute.xlu1 %3763  ;;  %v5611_v57 = vcombine.low %v4021_v61, %v4035_v60  ;;  %3584 = vst.msk [vmem:[#allocation4 + $0x70] sm:$0xff] %vm53_vm6, %v5582_v33  ;;  %v4379_v5 = vrot.slane %v4344_v16, 5  ;;  %v4376_v28 = vsel %vm6436_vm5, %v5632_v56, %v4375_v48  ;;  %v5583_v18 = vcombine.low %v3561_v50, %v3565_v52  ;;  %v4351_v59 = vld [vmem:[#allocation3 + $0x88] sm:$0xe]  ;;  %v4354_v21 = vld [vmem:[#allocation3 + $0x94] sm:$0x1] }
 0x26a   :  { %3775 = vst.msk [vmem:[#allocation4 + $0xa0] sm:$0xff] %vm213_vm7, %v3764_v39  ;;  %4841 = vmatmul.mubr.bf16.gmra.mrb[44].mxu1 %v4440_v49  ;;  %v4345_v39 = vld [vmem:[#allocation3 + $0x70] sm:$0xe]  ;;  %v4346_v49 = vld [vmem:[#allocation3 + $0x74] sm:$0x1]  ;;  %v5637_v14 = vrot.slane %v4351_v59, 9  ;;  %v4388_v10 = vsel %vm6436_vm5, %v5635_v46, %v4387_v27 }
 0x26b   :  { %v3895_v58 = vpop.permute.xlu0 %3894  ;;  %4848 = vmatprep.mubr.bf16.mxu1 %v4446_v53  ;;  %4055 = vst.msk [vmem:[#allocation4 + $0x128] sm:$0xff] %vm53_vm6, %v5611_v57  ;;  %v5634_v42 = vrot.slane %v4345_v39, 9  ;;  %v4380_v35 = vsel %vm6436_vm5, %v5633_v55, %v4379_v5  ;;  %v4383_v38 = vrot.slane %v4346_v49, 5  ;;  %3585 = vst.msk [vmem:[#allocation4 + $0x98] sm:$0xff] %vm53_vm6, %v5583_v18  ;;  %v4395_v63 = vrot.slane %v4352_v34, 5  ;;  %v4434_v52 = vld [vmem:[#allocation4 + $0x48] sm:$0xff] }
 0x26c   :  { %3905 = vst.msk [vmem:[#allocation4 + $0xd0] sm:$0xff] %vm213_vm7, %v3895_v58  ;;  %v4427_v41 = vld [vmem:[#allocation4 + $0x10] sm:$0xff]  ;;  %v5640_v47 = vcombine.low %v4376_v28, %v4380_v35  ;;  %v4350_v58 = vld [vmem:[#allocation3 + $0x84] sm:$0x1]  ;;  %v4355_v1 = vld [vmem:[#allocation3 + $0x98] sm:$0xe] }
 0x26d   :  { %v3296_v26 = vpop.permute.xlu1 %3295  ;;  %4914 = vmatmul.mubr.bf16.vlgmr.msra.gmra.mrb[48].mxu0 %v4427_v41  ;;  %v4391_v25 = vrot.slane %v4350_v58, 5  ;;  %v4384_v41 = vsel %vm6436_vm5, %v5634_v42, %v4383_v38  ;;  %v5638_v6 = vrot.slane %v4353_v15, 9  ;;  %v4399_v61 = vrot.slane %v4354_v21, 5 }
 0x26e   :  { %3306 = vst.msk [vmem:[#allocation4 + $0x38] sm:$0xff] %vm213_vm7, %v3296_v26  ;;  %v5641_v9 = vcombine.low %v4384_v41, %v4388_v10  ;;  %v5639_v62 = vrot.slane %v4355_v1, 9  ;;  %v4396_v51 = vsel %vm6436_vm5, %v5637_v14, %v4395_v63  ;;  %v4403_v13 = vrot.slane %v4356_v17, 5  ;;  %v4429_v50 = vld [vmem:[#allocation4 + $0x20] sm:$0xff] }
 0x26f   :  { %v4433_v0 = vld [vmem:[#allocation4 + $0x40] sm:$0xff]  ;;  %4421 = vst.msk [vmem:[#allocation4 + $0xc0] sm:$0xff] %vm53_vm6, %v5640_v47  ;;  %v4392_v23 = vsel %vm6436_vm5, %v5636_v30, %v4391_v25 }
 0x270   :  { %v3491_v3 = vpop.permute.xlu0 %3490  ;;  %4921 = vmatprep.mubr.bf16.mxu0 %v4433_v0  ;;  %4422 = vst.msk [vmem:[#allocation4 + $0xe8] sm:$0xff] %vm53_vm6, %v5641_v9  ;;  %v5642_v54 = vcombine.low %v4392_v23, %v4396_v51  ;;  %v4400_v0 = vsel %vm6436_vm5, %v5638_v6, %v4399_v61  ;;  %v4404_v4 = vsel %vm6436_vm5, %v5639_v62, %v4403_v13  ;;  %v4439_v28 = vld [vmem:[#allocation4 + $0x70] sm:$0xff]  ;;  %v7982_v62 = vld [vmem:[%s8107_s4] ss:$0 sm:$0xff] }
 0x271   :  { %v4445_v12 = vld [vmem:[#allocation4 + $0xa0] sm:$0xff]  ;;  %3500 = vst.msk [vmem:[#allocation4 + $0x68] sm:$0xff] %vm213_vm7, %v3491_v3  ;;  %v5643_v45 = vcombine.low %v4400_v0, %v4404_v4 }
 0x272   :  { %4849 = vmatmul.mubr.bf16.gmra.mrb[48].mxu1 %v4445_v12  ;;  %4423 = vst.msk [vmem:[#allocation4 + $0x110] sm:$0xff] %vm53_vm6, %v5642_v54 }
 0x273   :  { %v3766_v53 = vpop.permute.xlu1 %3765  ;;  %v4451_v32 = vld [vmem:[#allocation4 + $0xd0] sm:$0xff]  ;;  %4424 = vst.msk [vmem:[#allocation4 + $0x138] sm:$0xff] %vm53_vm6, %v5643_v45 }
 0x274   :  { %3776 = vst.msk [vmem:[#allocation4 + $0xc8] sm:$0xff] %vm213_vm7, %v3766_v53  ;;  %v3897_v44 = vpop.permute.xlu0 %3896  ;;  %4856 = vmatprep.mubr.bf16.mxu1 %v4451_v32 }
 0x275   :  { %v4432_v7 = vld [vmem:[#allocation4 + $0x38] sm:$0xff]  ;;  %3906 = vst.msk [vmem:[#allocation4 + $0xf8] sm:$0xff] %vm213_vm7, %v3897_v44 }
 0x276   :  { %4922 = vmatmul.mubr.bf16.gmra.mrb[52].mxu0 %v4432_v7  ;;  %v4444_v44 = vld [vmem:[#allocation4 + $0x98] sm:$0xff]  ;;  %v4449_v7 = vld [vmem:[#allocation4 + $0xc0] sm:$0xff] }
 0x277   :  { %v3298_v26 = vpop.permute.xlu1 %3297  ;;  %v4454_v38 = vld [vmem:[#allocation4 + $0xe8] sm:$0xff] }
 0x278   :  { %3307 = vst.msk [vmem:[#allocation4 + $0x60] sm:$0xff] %vm213_vm7, %v3298_v26  ;;  %v4438_v8 = vld [vmem:[#allocation4 + $0x68] sm:$0xff] }
 0x279   :  { %v3493_v19 = vpop.permute.xlu0 %3492  ;;  %4929 = vmatprep.mubr.bf16.mxu0 %v4438_v8  ;;  %v4459_v46 = vld [vmem:[#allocation4 + $0x110] sm:$0xff] }
 0x27a   :  { %3501 = vst.msk [vmem:[#allocation4 + $0x90] sm:$0xff] %vm213_vm7, %v3493_v19  ;;  %v4464_v47 = vld [vmem:[#allocation4 + $0x138] sm:$0xff] }
 0x27b   :  { %v4450_v60 = vld [vmem:[#allocation4 + $0xc8] sm:$0xff] }
 0x27c   :  { %4857 = vmatmul.mubr.bf16.gmra.mrb[52].mxu1 %v4450_v60  ;;  %v4456_v20 = vld [vmem:[#allocation4 + $0xf8] sm:$0xff] }
 0x27d   :  { %v3768_v11 = vpop.permute.xlu1 %3767  ;;  %v3899_v40 = vpop.permute.xlu0 %3898  ;;  %4864 = vmatprep.mubr.bf16.mxu1 %v4456_v20 }
 0x27e   :  { %3777 = vst.msk [vmem:[#allocation4 + $0xf0] sm:$0xff] %vm213_vm7, %v3768_v11  ;;  %3907 = vst.msk [vmem:[#allocation4 + $0x120] sm:$0xff] %vm213_vm7, %v3899_v40 }
 0x27f   :  { %v4437_v3 = vld [vmem:[#allocation4 + $0x60] sm:$0xff] }
 0x280   :  { %4930 = vmatmul.mubr.bf16.gmra.mrb[56].mxu0 %v4437_v3 }
 0x281   :  { %v3300_v12 = vpop.permute.xlu1 %3299  ;;  %v4443_v57 = vld [vmem:[#allocation4 + $0x90] sm:$0xff] }
 0x282   :  { %3308 = vst.msk [vmem:[#allocation4 + $0x88] sm:$0xff] %vm213_vm7, %v3300_v12  ;;  %4937 = vmatprep.mubr.bf16.mxu0 %v4443_v57 }
 0x285   :  { %v4326_v37 = vpop.permute.xlu0 %4325  ;;  %v4455_v33 = vld [vmem:[#allocation4 + $0xf0] sm:$0xff]  ;;  %v4461_v2 = vld [vmem:[#allocation4 + $0x120] sm:$0xff] }
 0x286   :  { %4337 = vst.msk [vmem:[#allocation4 + $0xb8] sm:$0xff] %vm213_vm7, %v4326_v37  ;;  %4865 = vmatmul.mubr.bf16.gmra.mrb[56].mxu1 %v4455_v33 }
 0x287   :  { %4872 = vmatprep.mubr.bf16.mxu1 %v4461_v2 }
 0x288   :  { %v3770_v36 = vpop.permute.xlu1 %3769 }
 0x289   :  { %3778 = vst.msk [vmem:[#allocation4 + $0x118] sm:$0xff] %vm213_vm7, %v3770_v36  ;;  %v4442_v43 = vld [vmem:[#allocation4 + $0x88] sm:$0xff] }
 0x28a   :  { %4938 = vmatmul.mubr.bf16.gmra.mrb[60].mxu0 %v4442_v43 }
 0x28c   :  { %v4133_v29 = vpop.permute.xlu1 %4132 }
 0x28d   :  { %v4448_v16 = vld [vmem:[#allocation4 + $0xb8] sm:$0xff]  ;;  %v4328_v56 = vpop.permute.xlu0 %4327  ;;  %4144 = vst.msk [vmem:[#allocation4 + $0xb0] sm:$0xff] %vm213_vm7, %v4133_v29 }
 0x28e   :  { %4945 = vmatprep.mubr.bf16.mxu0 %v4448_v16  ;;  %4338 = vst.msk [vmem:[#allocation4 + $0xe0] sm:$0xff] %vm213_vm7, %v4328_v56 }
 0x290   :  { %v4460_v48 = vld [vmem:[#allocation4 + $0x118] sm:$0xff] }
 0x291   :  { %v4135_v55 = vpop.permute.xlu1 %4134  ;;  %4873 = vmatmul.mubr.bf16.gmra.mrb[60].mxu1 %v4460_v48 }
 0x292   :  { %4145 = vst.msk [vmem:[#allocation4 + $0xd8] sm:$0xff] %vm213_vm7, %v4135_v55  ;;  %6017 = vmatprep.mubr.msk.bf16.mxu1 %vm53_vm6, %v4429_v50 }
 0x294   :  { %v4447_v39 = vld [vmem:[#allocation4 + $0xb0] sm:$0xff] }
 0x295   :  { %v4330_v5 = vpop.permute.xlu0 %4329  ;;  %4946 = vmatmul.mubr.bf16.gmra.mrb[64].mxu0 %v4447_v39  ;;  %v4453_v49 = vld [vmem:[#allocation4 + $0xe0] sm:$0xff] }
 0x296   :  { %4339 = vst.msk [vmem:[#allocation4 + $0x108] sm:$0xff] %vm213_vm7, %v4330_v5  ;;  %v4137_v53 = vpop.permute.xlu1 %4136  ;;  %4953 = vmatprep.mubr.bf16.mxu0 %v4453_v49 }
 0x297   :  { %4146 = vst.msk [vmem:[#allocation4 + $0x100] sm:$0xff] %vm213_vm7, %v4137_v53 }
 0x299   :  { %v4332_v32 = vpop.permute.xlu0 %4331  ;;  %6018 = vmatmul.mubr.msk.bf16.vlgmr.msra.gmra.mrb[64].mxu1 %vm53_vm6, %v4434_v52  ;;  %v4452_v22 = vld [vmem:[#allocation4 + $0xd8] sm:$0xff] }
 0x29a   :  { %4340 = vst.msk [vmem:[#allocation4 + $0x130] sm:$0xff] %vm213_vm7, %v4332_v32  ;;  %v4139_v24 = vpop.permute.xlu1 %4138  ;;  %6021 = vmatprep.mubr.msk.bf16.mxu1 %vm53_vm6, %v4439_v28 }
 0x29b   :  { %4147 = vst.msk [vmem:[#allocation4 + $0x128] sm:$0xff] %vm213_vm7, %v4139_v24 }
 0x29d   :  { %4954 = vmatmul.mubr.bf16.gmra.mrb[68].mxu0 %v4452_v22  ;;  %v4458_v42 = vld [vmem:[#allocation4 + $0x108] sm:$0xff] }
 0x29e   :  { %4961 = vmatprep.mubr.bf16.mxu0 %v4458_v42  ;;  %v4457_v18 = vld [vmem:[#allocation4 + $0x100] sm:$0xff] }
 0x2a1   :  { %6022 = vmatmul.mubr.msk.bf16.gmra.mrb[68].mxu1 %vm53_vm6, %v4444_v44  ;;  %v4463_v35 = vld [vmem:[#allocation4 + $0x130] sm:$0xff] }
 0x2a2   :  { %6025 = vmatprep.mubr.msk.bf16.mxu1 %vm53_vm6, %v4449_v7  ;;  %v4462_v31 = vld [vmem:[#allocation4 + $0x128] sm:$0xff] }
 0x2a5   :  { %4962 = vmatmul.mubr.bf16.gmra.mrb[72].mxu0 %v4457_v18 }
 0x2a6   :  { %4969 = vmatprep.mubr.bf16.mxu0 %v4463_v35 }
 0x2a9   :  { %6026 = vmatmul.mubr.msk.bf16.gmra.mrb[72].mxu1 %vm53_vm6, %v4454_v38 }
 0x2aa   :  { %6029 = vmatprep.mubr.msk.bf16.mxu1 %vm53_vm6, %v4459_v46 }
 0x2ad   :  { %4970 = vmatmul.mubr.bf16.gmra.mrb[76].mxu0 %v4462_v31 }
 0x2b1   :  { %6030 = vmatmul.mubr.msk.bf16.gmra.mrb[76].mxu1 %vm53_vm6, %v4464_v47 }
 0x325   :  { %v5861_v27 = vpop.f32.mrb[32].mxu1 }
 0x326   :  { %v5862_v58 = vpop.f32.mrb[33].mxu1 }
 0x327   :  { %v5863_v59 = vadd.f32 %v5862_v58, %v5861_v27  ;;  %v5864_v30 = vpop.f32.mrb[34].mxu1 }
 0x328   :  { %v5865_v34 = vpop.f32.mrb[35].mxu1 }
 0x329   :  { %v5866_v25 = vadd.f32 %v5865_v34, %v5864_v30  ;;  %v4819_v4 = vadd.f32 %v5863_v59, %v7982_v62 }
 0x32b   :  { %v4822_v40 = vadd.f32 %v5866_v25, %v7982_v62 }
 0x32d   :  { %v5867_v14 = vpop.f32.mrb[36].mxu1 }
 0x32e   :  { %v5868_v15 = vpop.f32.mrb[37].mxu1 }
 0x32f   :  { %v5869_v26 = vadd.f32 %v5868_v15, %v5867_v14  ;;  %v5870_v41 = vpop.f32.mrb[38].mxu1 }
 0x330   :  { %v5871_v10 = vpop.f32.mrb[39].mxu1 }
 0x331   :  { %v5872_v63 = vadd.f32 %v5871_v10, %v5870_v41  ;;  %v4827_v48 = vadd.f32 %v5869_v26, %v7982_v62 }
 0x333   :  { %v4830_v39 = vadd.f32 %v5872_v63, %v7982_v62 }
 0x335   :  { %v5873_v21 = vpop.f32.mrb[40].mxu1 }
 0x336   :  { %v5874_v1 = vpop.f32.mrb[41].mxu1 }
 0x337   :  { %v5875_v6 = vadd.f32 %v5874_v1, %v5873_v21  ;;  %v5876_v8 = vpop.f32.mrb[42].mxu1 }
 0x338   :  { %v5877_v9 = vpop.f32.mrb[43].mxu1 }
 0x339   :  { %v5878_v23 = vadd.f32 %v5877_v9, %v5876_v8  ;;  %v4835_v35 = vadd.f32 %v5875_v6, %v7982_v62 }
 0x33b   :  { %v4838_v47 = vadd.f32 %v5878_v23, %v7982_v62 }
 0x33d   :  { %v5879_v17 = vpop.f32.mrb[44].mxu1 }
 0x33e   :  { %v5880_v61 = vpop.f32.mrb[45].mxu1 }
 0x33f   :  { %v5881_v19 = vadd.f32 %v5880_v61, %v5879_v17  ;;  %v5882_v51 = vpop.f32.mrb[46].mxu1 }
 0x340   :  { %v5925_v13 = vpop.f32.mrb[48].mxu0  ;;  %v5883_v54 = vpop.f32.mrb[47].mxu1 }
 0x341   :  { %v5926_v0 = vpop.f32.mrb[49].mxu0  ;;  %v5884_v60 = vadd.f32 %v5883_v54, %v5882_v51  ;;  %v4843_v63 = vadd.f32 %v5881_v19, %v7982_v62 }
 0x342   :  { %v5927_v20 = vadd.f32 %v5926_v0, %v5925_v13  ;;  %v5928_v45 = vpop.f32.mrb[50].mxu0 }
 0x343   :  { %v5929_v11 = vpop.f32.mrb[51].mxu0  ;;  %v4846_v8 = vadd.f32 %v5884_v60, %v7982_v62 }
 0x344   :  { %v5930_v3 = vadd.f32 %v5929_v11, %v5928_v45  ;;  %v7986_v12 = vadd.f32 %v5927_v20, %v4819_v4 }
 0x345   :  { %v5885_v57 = vpop.f32.mrb[48].mxu1 }
 0x346   :  { %v5886_v37 = vpop.f32.mrb[49].mxu1  ;;  %v7988_v33 = vadd.f32 %v5930_v3, %v4822_v40  ;;  %v2373_v3 = vld [vmem:[#allocation2 + $0x38] sm:$0xff] }
 0x347   :  { %v5887_v2 = vadd.f32 %v5886_v37, %v5885_v57  ;;  %v5888_v36 = vpop.f32.mrb[50].mxu1  ;;  %v2372_v57 = vld [vmem:[#allocation2 + $0x10] sm:$0xff] }
 0x348   :  { %v5889_v29 = vpop.f32.mrb[51].mxu1 }
 0x349   :  { %v5931_v43 = vpop.f32.mrb[52].mxu0  ;;  %v5890_v56 = vadd.f32 %v5889_v29, %v5888_v36  ;;  %v4851_v19 = vadd.f32 %v5887_v2, %v7982_v62 }
 0x34a   :  { %v5932_v16 = vpop.f32.mrb[53].mxu0 }
 0x34b   :  { %v5933_v55 = vadd.f32 %v5932_v16, %v5931_v43  ;;  %v5934_v50 = vpop.f32.mrb[54].mxu0  ;;  %v4854_v37 = vadd.f32 %v5890_v56, %v7982_v62  ;;  %v2382_v16 = vunpack.c.l.bf16 %v2373_v3  ;;  %v2381_v56 = vunpack.c.h.bf16 %v2372_v57 }
 0x34c   :  { %v5935_v5 = vpop.f32.mrb[55].mxu0 }
 0x34d   :  { %v5936_v49 = vadd.f32 %v5935_v5, %v5934_v50  ;;  %v4924_v53 = vadd.f32 %v5933_v55, %v4827_v48  ;;  %v2380_v50 = vunpack.c.l.bf16 %v2372_v57 }
 0x34f   :  { %v4927_v32 = vadd.f32 %v5936_v49, %v4830_v39  ;;  %v5891_v52 = vpop.f32.mrb[52].mxu1 }
 0x350   :  { %v5892_v28 = vpop.f32.mrb[53].mxu1 }
 0x351   :  { %v7992_v24 = vadd.f32 %v5892_v28, %v5891_v52  ;;  %v5894_v22 = vpop.f32.mrb[54].mxu1  ;;  %v2383_v52 = vunpack.c.h.bf16 %v2373_v3 }
 0x352   :  { %v5895_v42 = vpop.f32.mrb[55].mxu1 }
 0x353   :  { %v5937_v44 = vpop.f32.mrb[56].mxu0  ;;  %v7994_v7 = vadd.f32 %v5895_v42, %v5894_v22 }
 0x354   :  { %v5938_v18 = vpop.f32.mrb[57].mxu0 }
 0x355   :  { %v5939_v38 = vadd.f32 %v5938_v18, %v5937_v44  ;;  %v5940_v46 = vpop.f32.mrb[58].mxu0 }
 0x356   :  { %v5941_v31 = vpop.f32.mrb[59].mxu0 }
 0x357   :  { %v5942_v27 = vadd.f32 %v5941_v31, %v5940_v46  ;;  %v7998_v58 = vadd.f32 %v5939_v38, %v4835_v35 }
 0x359   :  { %v5897_v59 = vpop.f32.mrb[56].mxu1  ;;  %v8000_v30 = vadd.f32 %v5942_v27, %v4838_v47 }
 0x35a   :  { %v5898_v34 = vpop.f32.mrb[57].mxu1 }
 0x35b   :  { %v8002_v25 = vadd.f32 %v5898_v34, %v5897_v59  ;;  %v5900_v14 = vpop.f32.mrb[58].mxu1  ;;  %v2375_v59 = vld [vmem:[#allocation2 + $0x88] sm:$0xff] }
 0x35c   :  { %v5901_v15 = vpop.f32.mrb[59].mxu1 }
 0x35d   :  { %v5943_v26 = vpop.f32.mrb[60].mxu0  ;;  %v8004_v41 = vadd.f32 %v5901_v15, %v5900_v14 }
 0x35e   :  { %v5944_v10 = vpop.f32.mrb[61].mxu0 }
 0x35f   :  { %v5945_v21 = vadd.f32 %v5944_v10, %v5943_v26  ;;  %v5946_v1 = vpop.f32.mrb[62].mxu0  ;;  %v2374_v26 = vld [vmem:[#allocation2 + $0x60] sm:$0xff] }
 0x360   :  { %v5947_v6 = vpop.f32.mrb[63].mxu0 }
 0x361   :  { %v5948_v9 = vadd.f32 %v5947_v6, %v5946_v1  ;;  %v4940_v23 = vadd.f32 %v5945_v21, %v4843_v63  ;;  %v2386_v6 = vunpack.c.l.bf16 %v2375_v59 }
 0x363   :  { %v8008_v17 = vadd.f32 %v5948_v9, %v4846_v8 }
 0x364   :  { %v5903_v61 = vpop.f32.mrb[60].mxu1 }
 0x365   :  { %v5904_v51 = vpop.f32.mrb[61].mxu1 }
 0x366   :  { %v8010_v13 = vadd.f32 %v5904_v51, %v5903_v61  ;;  %v5906_v54 = vpop.f32.mrb[62].mxu1  ;;  %v2384_v61 = vunpack.c.l.bf16 %v2374_v26 }
 0x367   :  { %v5907_v0 = vpop.f32.mrb[63].mxu1 }
 0x368   :  { %v5949_v4 = vpop.f32.mrb[64].mxu0  ;;  %v8012_v20 = vadd.f32 %v5907_v0, %v5906_v54 }
 0x369   :  { %v5950_v45 = vpop.f32.mrb[65].mxu0 }
 0x36a   :  { %v5951_v11 = vadd.f32 %v5950_v45, %v5949_v4  ;;  %v5952_v40 = vpop.f32.mrb[66].mxu0  ;;  %v2387_v45 = vunpack.c.h.bf16 %v2375_v59 }
 0x36b   :  { %v5953_v60 = vpop.f32.mrb[67].mxu0 }
 0x36c   :  { %v5954_v36 = vadd.f32 %v5953_v60, %v5952_v40  ;;  %v6019_v43 = vpop.f32.mrb[64].mxu1  ;;  %v8016_v29 = vadd.f32 %v5951_v11, %v4851_v19 }
 0x36d   :  { %v5021_v48 = vadd.f32 %v6019_v43, %v4924_v53  ;;  %v5012_v55 = vpop.f32.mrb[65].mxu1  ;;  %v4859_v53 = vadd.f32 %v7992_v24, %v7982_v62 }
 0x36e   :  { %v5013_v5 = vadd.f32 %v5012_v55, %v7986_v12  ;;  %v6020_v39 = vpop.f32.mrb[66].mxu1  ;;  %v8019_v49 = vadd.f32 %v5954_v36, %v4854_v37  ;;  %v4867_v36 = vadd.f32 %v8002_v25, %v7982_v62  ;;  %v2377_v55 = vld [vmem:[#allocation2 + $0xd8] sm:$0xff] }
 0x36f   :  { %v5077_v2 = vadd.f32 %v5021_v48, %v2382_v16  ;;  %v5024_v28 = vadd.f32 %v6020_v39, %v4927_v32  ;;  %v5015_v22 = vpop.f32.mrb[67].mxu1  ;;  %v4862_v32 = vadd.f32 %v7994_v7, %v7982_v62 }
 0x370   :  { %v5955_v42 = vpop.f32.mrb[68].mxu0  ;;  %v5075_v44 = vadd.f32 %v5013_v5, %v2380_v50  ;;  %v5016_v18 = vadd.f32 %v5015_v22, %v7988_v33  ;;  %v4870_v50 = vadd.f32 %v8004_v41, %v7982_v62 }
 0x371   :  { %v5956_v35 = vpop.f32.mrb[69].mxu0  ;;  %v5093_v38 = vmax.f32 %v5077_v2, 0.0  ;;  %v5078_v46 = vadd.f32 %v5024_v28, %v2383_v52  ;;  %v2376_v52 = vld [vmem:[#allocation2 + $0xb0] sm:$0xff] }
 0x372   :  { %v5957_v31 = vadd.f32 %v5956_v35, %v5955_v42  ;;  %v5958_v12 = vpop.f32.mrb[70].mxu0  ;;  %v5091_v47 = vmax.f32 %v5075_v44, 0.0  ;;  %v5076_v27 = vadd.f32 %v5016_v18, %v2381_v56  ;;  %v2390_v56 = vunpack.c.l.bf16 %v2377_v55 }
 0x373   :  { %v5959_v34 = vpop.f32.mrb[71].mxu0  ;;  %v5109_v14 = vpack.c.bf16 %v5093_v38, %v5093_v38  ;;  %v5094_v15 = vmax.f32 %v5078_v46, 0.0  ;;  %v2388_v38 = vunpack.c.l.bf16 %v2376_v52 }
 0x374   :  { %v5960_v10 = vadd.f32 %v5959_v34, %v5958_v12  ;;  %v5107_v33 = vpack.c.bf16 %v5091_v47, %v5091_v47  ;;  %v5092_v63 = vmax.f32 %v5076_v27, 0.0  ;;  %v6023_v21 = vpop.f32.mrb[68].mxu1  ;;  %v4956_v1 = vadd.f32 %v5957_v31, %v4859_v53 }
 0x375   :  { %5125 = vst.msk [vmem:[%s8108_s5 + $0x8] sm:$0xf] %vm2396_vm8, %v5109_v14  ;;  %v5110_v24 = vpack.c.bf16 %v5094_v15, %v5094_v15  ;;  %v5037_v8 = vadd.f32 %v6023_v21, %v4940_v23  ;;  %v5028_v9 = vpop.f32.mrb[69].mxu1  ;;  %v2391_v47 = vunpack.c.h.bf16 %v2377_v55  ;;  %v2389_v14 = vunpack.c.h.bf16 %v2376_v52 }
 0x376   :  { %5123 = vst.msk [vmem:[%s8108_s5] sm:$0xf] %vm2396_vm8, %v5107_v33  ;;  %v5108_v7 = vpack.c.bf16 %v5092_v63, %v5092_v63  ;;  %v5029_v51 = vadd.f32 %v5028_v9, %v7998_v58  ;;  %v6024_v54 = vpop.f32.mrb[70].mxu1  ;;  %v4959_v0 = vadd.f32 %v5960_v10, %v4862_v32  ;;  %v2385_v58 = vunpack.c.h.bf16 %v2374_v26 }
 0x377   :  { %5126 = vst.msk [vmem:[%s8108_s5 + $0xc] sm:$0xf] %vm2396_vm8, %v5110_v24  ;;  %v5081_v4 = vadd.f32 %v5037_v8, %v2386_v6  ;;  %v5040_v23 = vadd.f32 %v6024_v54, %v8008_v17  ;;  %v5031_v19 = vpop.f32.mrb[71].mxu1  ;;  %v4875_v33 = vadd.f32 %v8010_v13, %v7982_v62  ;;  %v2379_v6 = vld [vmem:[#allocation2 + $0x128] sm:$0xff]  ;;  %v2378_v8 = vld [vmem:[#allocation2 + $0x100] sm:$0xff]  ;;  %v4878_v9 = vadd.f32 %v8012_v20, %v7982_v62 }
 0x378   :  { %v5961_v11 = vpop.f32.mrb[72].mxu0  ;;  %5124 = vst.msk [vmem:[%s8108_s5 + $0x4] sm:$0xf] %vm2396_vm8, %v5108_v7  ;;  %v5079_v40 = vadd.f32 %v5029_v51, %v2384_v61  ;;  %v5032_v3 = vadd.f32 %v5031_v19, %v8000_v30  ;;  %v2392_v19 = vunpack.c.l.bf16 %v2378_v8 }
 0x379   :  { %v5962_v60 = vpop.f32.mrb[73].mxu0  ;;  %v5097_v57 = vmax.f32 %v5081_v4, 0.0  ;;  %v5082_v37 = vadd.f32 %v5040_v23, %v2387_v45  ;;  %v2394_v23 = vunpack.c.l.bf16 %v2379_v6 }
 0x37a   :  { %v5963_v43 = vadd.f32 %v5962_v60, %v5961_v11  ;;  %v5964_v16 = vpop.f32.mrb[74].mxu0  ;;  %v5095_v17 = vmax.f32 %v5079_v40, 0.0  ;;  %v5080_v48 = vadd.f32 %v5032_v3, %v2385_v58  ;;  %v2395_v60 = vunpack.c.h.bf16 %v2379_v6 }
 0x37b   :  { %v5965_v5 = vpop.f32.mrb[75].mxu0  ;;  %v5113_v39 = vpack.c.bf16 %v5097_v57, %v5097_v57  ;;  %v5098_v2 = vmax.f32 %v5082_v37, 0.0  ;;  %v2393_v57 = vunpack.c.h.bf16 %v2378_v8 }
 0x37c   :  { %v5966_v28 = vadd.f32 %v5965_v5, %v5964_v16  ;;  %v5111_v30 = vpack.c.bf16 %v5095_v17, %v5095_v17  ;;  %v5096_v22 = vmax.f32 %v5080_v48, 0.0  ;;  %v6027_v42 = vpop.f32.mrb[72].mxu1  ;;  %v4964_v44 = vadd.f32 %v5963_v43, %v4867_v36 }
 0x37d   :  { %5129 = vst.msk [vmem:[%s8108_s5 + $0x18] sm:$0xf] %vm2396_vm8, %v5113_v39  ;;  %v5114_v25 = vpack.c.bf16 %v5098_v2, %v5098_v2  ;;  %v5053_v18 = vadd.f32 %v6027_v42, %v4956_v1  ;;  %v5044_v35 = vpop.f32.mrb[73].mxu1 }
 0x37e   :  { %5127 = vst.msk [vmem:[%s8108_s5 + $0x10] sm:$0xf] %vm2396_vm8, %v5111_v30  ;;  %v5112_v41 = vpack.c.bf16 %v5096_v22, %v5096_v22  ;;  %v5045_v46 = vadd.f32 %v5044_v35, %v8016_v29  ;;  %v6028_v53 = vpop.f32.mrb[74].mxu1  ;;  %v4967_v31 = vadd.f32 %v5966_v28, %v4870_v50 }
 0x37f   :  { %5130 = vst.msk [vmem:[%s8108_s5 + $0x1c] sm:$0xf] %vm2396_vm8, %v5114_v25  ;;  %v5085_v12 = vadd.f32 %v5053_v18, %v2390_v56  ;;  %v5056_v27 = vadd.f32 %v6028_v53, %v4959_v0  ;;  %v5047_v59 = vpop.f32.mrb[75].mxu1 }
 0x380   :  { %v5967_v32 = vpop.f32.mrb[76].mxu0  ;;  %5128 = vst.msk [vmem:[%s8108_s5 + $0x14] sm:$0xf] %vm2396_vm8, %v5112_v41  ;;  %v5083_v34 = vadd.f32 %v5045_v46, %v2388_v38  ;;  %v5048_v29 = vadd.f32 %v5047_v59, %v8019_v49 }
 0x381   :  { %v5968_v15 = vpop.f32.mrb[77].mxu0  ;;  %v5101_v26 = vmax.f32 %v5085_v12, 0.0  ;;  %v5086_v10 = vadd.f32 %v5056_v27, %v2391_v47 }
 0x382   :  { %v5969_v63 = vadd.f32 %v5968_v15, %v5967_v32  ;;  %v5970_v21 = vpop.f32.mrb[78].mxu0  ;;  %v5099_v1 = vmax.f32 %v5083_v34, 0.0  ;;  %v5084_v24 = vadd.f32 %v5048_v29, %v2389_v14 }
 0x383   :  { %v5971_v7 = vpop.f32.mrb[79].mxu0  ;;  %v5117_v61 = vpack.c.bf16 %v5101_v26, %v5101_v26  ;;  %v5102_v51 = vmax.f32 %v5086_v10, 0.0 }
 0x384   :  { %v5972_v54 = vadd.f32 %v5971_v7, %v5970_v21  ;;  %v5115_v49 = vpack.c.bf16 %v5099_v1, %v5099_v1  ;;  %v5100_v0 = vmax.f32 %v5084_v24, 0.0  ;;  %v4972_v4 = vadd.f32 %v5969_v63, %v4875_v33  ;;  %v6031_v45 = vpop.f32.mrb[76].mxu1 }
 0x385   :  { %5133 = vst.msk [vmem:[%s8108_s5 + $0x28] sm:$0xf] %vm2396_vm8, %v5117_v61  ;;  %v5118_v13 = vpack.c.bf16 %v5102_v51, %v5102_v51  ;;  %v5060_v11 = vpop.f32.mrb[77].mxu1 }
 0x386   :  { %5131 = vst.msk [vmem:[%s8108_s5 + $0x20] sm:$0xf] %vm2396_vm8, %v5115_v49  ;;  %v5116_v62 = vpack.c.bf16 %v5100_v0, %v5100_v0  ;;  %v5069_v20 = vadd.f32 %v6031_v45, %v4972_v4  ;;  %v5061_v40 = vadd.f32 %v5060_v11, %v4964_v44  ;;  %v4975_v58 = vadd.f32 %v5972_v54, %v4878_v9  ;;  %v6032_v3 = vpop.f32.mrb[78].mxu1 }
 0x387   :  { %5134 = vst.msk [vmem:[%s8108_s5 + $0x2c] sm:$0xf] %vm2396_vm8, %v5118_v13  ;;  %v5063_v37 = vpop.f32.mrb[79].mxu1 }
 0x388   :  { %5132 = vst.msk [vmem:[%s8108_s5 + $0x24] sm:$0xf] %vm2396_vm8, %v5116_v62  ;;  %v5089_v36 = vadd.f32 %v5069_v20, %v2394_v23  ;;  %v5087_v43 = vadd.f32 %v5061_v40, %v2392_v19  ;;  %v5072_v16 = vadd.f32 %v6032_v3, %v4975_v58  ;;  %v5064_v17 = vadd.f32 %v5063_v37, %v4967_v31 }
 0x38a   :  { %v5105_v48 = vmax.f32 %v5089_v36, 0.0  ;;  %v5103_v55 = vmax.f32 %v5087_v43, 0.0  ;;  %v5090_v50 = vadd.f32 %v5072_v16, %v2395_v60  ;;  %v5088_v5 = vadd.f32 %v5064_v17, %v2393_v57 }
 0x38c   :  { %v5121_v39 = vpack.c.bf16 %v5105_v48, %v5105_v48  ;;  %v5119_v2 = vpack.c.bf16 %v5103_v55, %v5103_v55  ;;  %v5106_v52 = vmax.f32 %v5090_v50, 0.0  ;;  %v5104_v28 = vmax.f32 %v5088_v5, 0.0 }
 0x38e   :  { %5137 = vst.msk [vmem:[%s8108_s5 + $0x38] sm:$0xf] %vm2396_vm8, %v5121_v39  ;;  %5135 = vst.msk [vmem:[%s8108_s5 + $0x30] sm:$0xf] %vm2396_vm8, %v5119_v2  ;;  %v5122_v30 = vpack.c.bf16 %v5106_v52, %v5106_v52  ;;  %v5120_v22 = vpack.c.bf16 %v5104_v28, %v5104_v28 }
 0x390   :  { %5138 = vst.msk [vmem:[%s8108_s5 + $0x3c] sm:$0xf] %vm2396_vm8, %v5122_v30  ;;  %5136 = vst.msk [vmem:[%s8108_s5 + $0x34] sm:$0xf] %vm2396_vm8, %v5120_v22 }

</bundles_post_ra>
